<compile_context>
chip_gen: v7x
topology: tpu7x:2x2x1
jax: 0.10.0
libtpu: 0.0.40
codegen_flags: <defaults>
</compile_context>

<pallas_src>
import functools

import numpy as np

import jax
import jax.numpy as jnp
from jax.experimental import pallas as pl
from jax.experimental.pallas import tpu as pltpu


# ----------------------------------------------------------------------------
# mobilenet_v3_small.features[1:9] configuration
#   (cin, kernel, expanded, cout, use_se, activation, stride, se_squeeze)
# ----------------------------------------------------------------------------
BLOCK_CFG = [
    (16, 3, 16, 16, True, "relu", 2, 8),
    (16, 3, 72, 24, False, "relu", 2, 0),
    (24, 3, 88, 24, False, "relu", 1, 0),
    (24, 5, 96, 40, True, "hardswish", 2, 24),
    (40, 5, 240, 40, True, "hardswish", 1, 64),
    (40, 5, 240, 40, True, "hardswish", 1, 64),
    (40, 5, 120, 48, True, "hardswish", 1, 32),
    (48, 5, 144, 48, True, "hardswish", 1, 40),
]


def _activate(y, act):
    if act == "linear":
        return y
    if act == "relu":
        return jnp.maximum(y, 0.0)
    if act == "hardswish":
        return y * jnp.clip(y + 3.0, 0.0, 6.0) * (1.0 / 6.0)
    if act == "hardsigmoid":
        return jnp.clip(y + 3.0, 0.0, 6.0) * (1.0 / 6.0)
    if act == "sigmoid":
        return jax.nn.sigmoid(y)
    raise ValueError(f"unknown activation {act}")


# ----------------------------------------------------------------------------
# static depthwise tap-selection matrices (numpy, built once at prepare time)
#   sel = vstack over NON-ZERO taps t of S_t, where S_t[r*Wo+c, hi*W+wi] = 1 if
#   output (r,c) reads input (hi,wi) at tap t; rows hitting 'same' padding are 0.
# ----------------------------------------------------------------------------
def _make_sel_stacked(h, w, k, stride):
    p = (k - 1) // 2
    ho = (h + 2 * p - k) // stride + 1
    wo = (w + 2 * p - k) // stride + 1
    mats, taps = [], []
    for dy in range(k):
        for dx in range(k):
            m = np.zeros((ho * wo, h * w), np.float32)
            nz = False
            for r in range(ho):
                hi = stride * r + dy - p
                if hi < 0 or hi >= h:
                    continue
                for c in range(wo):
                    wi = stride * c + dx - p
                    if wi < 0 or wi >= w:
                        continue
                    m[r * wo + c, hi * w + wi] = 1.0
                    nz = True
            if nz:                      # prune padding-only taps at trace time
                mats.append(m)
                taps.append(dy * k + dx)
    return np.concatenate(mats, axis=0), taps, ho, wo


# ----------------------------------------------------------------------------
# parameter / selector packing into two slabs (one bf16, one f32)
# ----------------------------------------------------------------------------
class _Slab:
    def __init__(self):
        self.parts = []
        self.rows = 0

    def add(self, arr):
        arr = np.asarray(arr, np.float32)
        if arr.ndim == 1:
            arr = arr[None, :]
        off = self.rows
        self.parts.append(arr)
        self.rows += arr.shape[0]
        return off

    def build(self, dtype):
        width = max(p.shape[1] for p in self.parts)
        width = ((width + 127) // 128) * 128
        rows = ((self.rows + 7) // 8) * 8
        slab = np.zeros((rows, width), np.float32)
        r = 0
        for p in self.parts:
            slab[r:r + p.shape[0], :p.shape[1]] = p
            r += p.shape[0]
        return jnp.asarray(slab, dtype)


def prepare(params, h, w):
    """Pack all weights/selectors into two slabs; return (wslab_bf16, fslab_f32, plan)."""
    wsl, fsl = _Slab(), _Slab()
    plan = {}

    # stem: Conv2d(3,16,3,stride=2,pad=1) + folded BN + hardswish
    ho = (h + 2 - 3) // 2 + 1
    wo = (w + 2 - 3) // 2 + 1
    sp = params["stem"]
    plan["stem"] = {
        "w": wsl.add(sp["w"]),
        "aff": fsl.add(np.stack([np.asarray(sp["scale"]), np.asarray(sp["bias"])])),
        "kkc": 27, "cout": 16,
    }
    cur_h, cur_w = ho, wo
    plan["stem_hw"] = ho * wo

    blocks = []
    for cfg, bp in zip(BLOCK_CFG, params["blocks"]):
        cin, k, exp, cout, use_se, act, stride, sq = cfg
        sel, taps, oh, ow = _make_sel_stacked(cur_h, cur_w, k, stride)
        e = dict(cin=cin, exp=exp, cout=cout, sq=sq, act=act,
                 has_expand=(exp != cin), has_se=use_se,
                 has_res=(stride == 1 and cin == cout),
                 T=len(taps), hw_in=cur_h * cur_w, hw_out=oh * ow)
        e["sel"] = wsl.add(sel)
        if e["has_expand"]:
            e["expand_w"] = wsl.add(bp["expand_w"])
            e["expand_aff"] = fsl.add(np.stack([np.asarray(bp["expand_s"]),
                                                np.asarray(bp["expand_b"])]))
        e["dw_w"] = fsl.add(np.asarray(bp["dw_w"])[taps])        # pruned tap weights
        e["dw_aff"] = fsl.add(np.stack([np.asarray(bp["dw_s"]),
                                        np.asarray(bp["dw_b"])]))
        if use_se:
            e["se1_w"] = wsl.add(bp["se1_w"])
            e["se1_b"] = fsl.add(bp["se1_b"])
            e["se2_w"] = wsl.add(bp["se2_w"])
            e["se2_b"] = fsl.add(bp["se2_b"])
        e["proj_w"] = wsl.add(bp["proj_w"])
        e["proj_aff"] = fsl.add(np.stack([np.asarray(bp["proj_s"]),
                                          np.asarray(bp["proj_b"])]))
        blocks.append(e)
        cur_h, cur_w = oh, ow

    plan["blocks"] = blocks
    plan["head"] = fsl.add(np.asarray(params["head_w"]).reshape(1, -1))
    plan["cout_last"] = BLOCK_CFG[-1][3]
    plan["out_h"], plan["out_w"] = cur_h, cur_w
    return wsl.build(jnp.bfloat16), fsl.build(jnp.float32), plan


# ----------------------------------------------------------------------------
# the single fused Pallas kernel (one batch element per grid step)
# ----------------------------------------------------------------------------
def _network_kernel(x_ref, w_ref, f_ref, o_ref, *, plan):
    # x_ref: (1, HW0, 27) bf16 stem patches      w_ref: (Rb, L) bf16 weight slab
    # f_ref: (Rf, L) f32 affine slab             o_ref: (1, HWout, 1) f32
    def wl(off, r, c):
        return w_ref[off:off + r, :c]

    def fl(off, r, c):
        return f_ref[off:off + r, :c]

    # --- stem: patches @ W + folded BN + hardswish (MXU) ---------------------
    st = plan["stem"]
    y = jnp.dot(x_ref[0], wl(st["w"], st["kkc"], st["cout"]),
                preferred_element_type=jnp.float32)
    aff = fl(st["aff"], 2, st["cout"])
    y = _activate(y * aff[0:1] + aff[1:2], "hardswish")

    # --- 8 inverted-residual blocks, fully VMEM-resident ----------------------
    for b in plan["blocks"]:
        exp, cout, act = b["exp"], b["cout"], b["act"]
        x_in = y

        # expand 1x1 + folded BN + act
        if b["has_expand"]:
            ea = fl(b["expand_aff"], 2, exp)
            y = jnp.dot(y.astype(jnp.bfloat16), wl(b["expand_w"], b["cin"], exp),
                        preferred_element_type=jnp.float32)
            y = _activate(y * ea[0:1] + ea[1:2], act)

        # depthwise KxK (stride + 'same' padding folded into stacked 0/1 selectors):
        #   ONE matmul  G = [S_t stacked] @ y, then per-tap VPU scale + add.
        T, hw_in, hw_out = b["T"], b["hw_in"], b["hw_out"]
        sel = wl(b["sel"], T * hw_out, hw_in)                         # bf16 0/1
        g = jnp.dot(sel, y.astype(jnp.bfloat16),
                    preferred_element_type=jnp.float32)               # (T*HWo, E) f32
        dww = fl(b["dw_w"], T, exp)                                   # (T, E) f32
        dw = g[0:hw_out] * dww[0:1]
        for t in range(1, T):
            dw = dw + g[t * hw_out:(t + 1) * hw_out] * dww[t:t + 1]
        da = fl(b["dw_aff"], 2, exp)
        dw = _activate(dw * da[0:1] + da[1:2], act)                   # (HWo, E)

        # squeeze & excite
        if b["has_se"]:
            sq = b["sq"]
            pooled = jnp.sum(dw, axis=0, keepdims=True) * (1.0 / hw_out)   # (1, E)
            hid = jnp.dot(pooled.astype(jnp.bfloat16), wl(b["se1_w"], exp, sq),
                          preferred_element_type=jnp.float32) + fl(b["se1_b"], 1, sq)
            hid = jnp.maximum(hid, 0.0)
            gate = jnp.dot(hid.astype(jnp.bfloat16), wl(b["se2_w"], sq, exp),
                           preferred_element_type=jnp.float32) + fl(b["se2_b"], 1, exp)
            gate = jnp.clip(gate + 3.0, 0.0, 6.0) * (1.0 / 6.0)            # hardsigmoid
            dw = dw * gate

        # project 1x1 + folded BN (linear) + residual
        pa = fl(b["proj_aff"], 2, cout)
        out = jnp.dot(dw.astype(jnp.bfloat16), wl(b["proj_w"], exp, cout),
                      preferred_element_type=jnp.float32)
        out = out * pa[0:1] + pa[1:2]
        if b["has_res"]:
            out = out + x_in
        y = out

    # --- head: 1x1 conv (48 -> 1, no bias) + sigmoid as VPU lane reduction ----
    hwv = fl(plan["head"], 1, plan["cout_last"])
    logit = jnp.sum(y * hwv, axis=-1, keepdims=True)                  # (HWo, 1)
    o_ref[0] = jax.nn.sigmoid(logit)


# ----------------------------------------------------------------------------
# wrapper
# ----------------------------------------------------------------------------
def mobilenet_v3_with_conv(x_nchw, wslab, fslab, *, plan):
    x = jnp.transpose(x_nchw, (0, 2, 3, 1)).astype(jnp.float32)       # NCHW -> NHWC
    n, h, w, cin = x.shape

    # stem im2col (pad + 9 strided slices + concat) — one small fused XLA op.
    k, s, pad = 3, 2, 1
    ho = (h + 2 * pad - k) // s + 1
    wo = (w + 2 * pad - k) // s + 1
    xp = jnp.pad(x, ((0, 0), (pad, pad), (pad, pad), (0, 0)))
    pats = []
    for dy in range(k):
        for dx in range(k):
            pats.append(xp[:, dy:dy + s * (ho - 1) + 1:s,
                           dx:dx + s * (wo - 1) + 1:s, :])
    patches = jnp.concatenate(pats, axis=-1).reshape(n, ho * wo, k * k * cin)
    patches = patches.astype(jnp.bfloat16)

    hw0 = ho * wo
    out_hw = plan["out_h"] * plan["out_w"]
    kernel = functools.partial(_network_kernel, plan=plan)
    out = pl.pallas_call(
        kernel,
        grid=(n,),
        in_specs=[
            pl.BlockSpec((1, hw0, k * k * cin), lambda i: (i, 0, 0)),
            pl.BlockSpec(wslab.shape, lambda i: (0, 0)),
            pl.BlockSpec(fslab.shape, lambda i: (0, 0)),
        ],
        out_specs=pl.BlockSpec((1, out_hw, 1), lambda i: (i, 0, 0)),
        out_shape=jax.ShapeDtypeStruct((n, out_hw, 1), jnp.float32),
        compiler_params=pltpu.CompilerParams(dimension_semantics=("parallel",)),
    )(patches, wslab, fslab)
    out = out.reshape(n, plan["out_h"], plan["out_w"], 1)
    return jnp.transpose(out, (0, 3, 1, 2))                           # NHWC -> NCHW


# ----------------------------------------------------------------------------
# deterministic synthetic parameters (shapes match the torchvision module;
# inference BatchNorm pre-folded into per-channel scale/bias)
# ----------------------------------------------------------------------------
class ParamGen:
    def __init__(self, key):
        self._key = key

    def take(self, shape, scale=1.0):
        self._key, sub = jax.random.split(self._key)
        return scale * jax.random.normal(sub, shape, jnp.float32)


def init_params(key):
    g = ParamGen(key)
    params = {
        "stem": {
            "w": g.take((27, 16), 27 ** -0.5),      # (k*k*cin, cout)
            "scale": 1.0 + 0.1 * g.take((16,)),
            "bias": 0.05 * g.take((16,)),
        }
    }
    blocks = []
    for (cin, k, exp, cout, use_se, act, stride, sq) in BLOCK_CFG:
        bp = {}
        if exp != cin:
            bp["expand_w"] = g.take((cin, exp), cin ** -0.5)
            bp["expand_s"] = 1.0 + 0.1 * g.take((exp,))
            bp["expand_b"] = 0.05 * g.take((exp,))
        bp["dw_w"] = g.take((k * k, exp), (k * k) ** -0.5)
        bp["dw_s"] = 1.0 + 0.1 * g.take((exp,))
        bp["dw_b"] = 0.05 * g.take((exp,))
        if use_se:
            bp["se1_w"] = g.take((exp, sq), exp ** -0.5)
            bp["se1_b"] = 0.05 * g.take((sq,))
            bp["se2_w"] = g.take((sq, exp), sq ** -0.5)
            bp["se2_b"] = 0.05 * g.take((exp,))
        bp["proj_w"] = g.take((exp, cout), exp ** -0.5)
        bp["proj_s"] = 1.0 + 0.1 * g.take((cout,))
        bp["proj_b"] = 0.05 * g.take((cout,))
        blocks.append(bp)
    params["blocks"] = blocks
    params["head_w"] = g.take((48, 1), 48 ** -0.5)
    return params


# ----------------------------------------------------------------------------
if __name__ == "__main__":
    key = jax.random.PRNGKey(0)
    pkey, xkey = jax.random.split(key)
    params = init_params(pkey)

    # NCHW input like PyTorch; 32x32 -> /16 downsampling -> 2x2 spatial output
    x = jax.random.normal(xkey, (2, 3, 32, 32), jnp.float32)

    wslab, fslab, plan = prepare(params, 32, 32)       # pack once, outside jit
    fwd = jax.jit(functools.partial(mobilenet_v3_with_conv, plan=plan))
    out = jax.block_until_ready(fwd(x, wslab, fslab))

    assert out.shape == (2, 1, 2, 2), out.shape
    assert bool(jnp.all(jnp.isfinite(out)))
    assert bool(jnp.all((out >= 0.0) & (out <= 1.0)))  # sigmoid output
    print("KERNEL_OK")
</pallas_src>

<mosaic_0001>
module attributes {stable_mosaic.version = 11 : i64} {
  func.func @_network_kernel(%arg0: i32, %arg1: memref<1x256x27xbf16, #tpu.memory_space<vmem>>, %arg2: memref<3472x256xbf16, #tpu.memory_space<vmem>>, %arg3: memref<152x256xf32, #tpu.memory_space<vmem>>, %arg4: memref<1x4x1xf32, #tpu.memory_space<vmem>>) attributes {dimension_semantics = [#tpu.dimension_semantics<parallel>], iteration_bounds = array<i64: 2>, scalar_prefetch = 0 : i64, scratch_operands = 0 : i64, tpu.core_type = #tpu.core_type<tc>, window_params = [{transform_indices = @transform_0, window_bounds = array<i64: 1, 256, 27>}, {pipeline_mode = #tpu.pipeline_mode<synchronous>, transform_indices = @transform_1, window_bounds = array<i64: 3472, 256>}, {pipeline_mode = #tpu.pipeline_mode<synchronous>, transform_indices = @transform_2, window_bounds = array<i64: 152, 256>}, {transform_indices = @transform_3, window_bounds = array<i64: 1, 4, 1>}]} {
    %c0 = arith.constant 0 : index
    %c0_0 = arith.constant 0 : index
    %c0_1 = arith.constant 0 : index
    %0 = vector.load %arg1[%c0, %c0_0, %c0_1] : memref<1x256x27xbf16, #tpu.memory_space<vmem>>, vector<1x256x27xbf16>
    %1 = vector.shape_cast %0 : vector<1x256x27xbf16> to vector<256x27xbf16>
    %c0_2 = arith.constant 0 : index
    %c0_3 = arith.constant 0 : index
    %2 = vector.load %arg2[%c0_2, %c0_3] : memref<3472x256xbf16, #tpu.memory_space<vmem>>, vector<27x16xbf16>
    %cst = arith.constant dense<0.000000e+00> : vector<256x16xf32>
    %3 = tpu.matmul %1, %2, %cst {dimension_numbers = #tpu.dot_dimension_numbers<[1], [0], [0], [1], [0, 0, 1, 1], [], []>} : vector<256x27xbf16>, vector<27x16xbf16>, vector<256x16xf32> -> vector<256x16xf32>
    %c0_4 = arith.constant 0 : index
    %c0_5 = arith.constant 0 : index
    %4 = vector.load %arg3[%c0_4, %c0_5] : memref<152x256xf32, #tpu.memory_space<vmem>>, vector<2x16xf32>
    %5 = vector.extract_strided_slice %4 {offsets = [0, 0], sizes = [1, 16], strides = [1, 1]} : vector<2x16xf32> to vector<1x16xf32>
    %6 = vector.broadcast %5 : vector<1x16xf32> to vector<256x16xf32>
    %7 = arith.mulf %3, %6 : vector<256x16xf32>
    %8 = vector.extract_strided_slice %4 {offsets = [1, 0], sizes = [1, 16], strides = [1, 1]} : vector<2x16xf32> to vector<1x16xf32>
    %9 = vector.broadcast %8 : vector<1x16xf32> to vector<256x16xf32>
    %10 = arith.addf %7, %9 : vector<256x16xf32>
    %cst_6 = arith.constant 3.000000e+00 : f32
    %11 = vector.broadcast %cst_6 : f32 to vector<256x16xf32>
    %12 = arith.addf %10, %11 : vector<256x16xf32>
    %cst_7 = arith.constant 0.000000e+00 : f32
    %cst_8 = arith.constant 6.000000e+00 : f32
    %13 = vector.broadcast %cst_7 : f32 to vector<256x16xf32>
    %14 = arith.maximumf %13, %12 : vector<256x16xf32>
    %15 = vector.broadcast %cst_8 : f32 to vector<256x16xf32>
    %16 = arith.minimumf %15, %14 : vector<256x16xf32>
    %17 = arith.mulf %10, %16 : vector<256x16xf32>
    %cst_9 = arith.constant 0.166666672 : f32
    %18 = vector.broadcast %cst_9 : f32 to vector<256x16xf32>
    %19 = arith.mulf %17, %18 : vector<256x16xf32>
    %c27 = arith.constant 27 : index
    %c0_10 = arith.constant 0 : index
    %20 = vector.load %arg2[%c27, %c0_10] : memref<3472x256xbf16, #tpu.memory_space<vmem>>, vector<576x256xbf16>
    %21 = arith.truncf %19 : vector<256x16xf32> to vector<256x16xbf16>
    %cst_11 = arith.constant dense<0.000000e+00> : vector<576x16xf32>
    %22 = tpu.matmul %20, %21, %cst_11 {dimension_numbers = #tpu.dot_dimension_numbers<[1], [0], [0], [1], [0, 0, 1, 1], [], []>} : vector<576x256xbf16>, vector<256x16xbf16>, vector<576x16xf32> -> vector<576x16xf32>
    %c2 = arith.constant 2 : index
    %c0_12 = arith.constant 0 : index
    %23 = vector.load %arg3[%c2, %c0_12] : memref<152x256xf32, #tpu.memory_space<vmem>>, vector<9x16xf32>
    %24 = vector.extract_strided_slice %22 {offsets = [0, 0], sizes = [64, 16], strides = [1, 1]} : vector<576x16xf32> to vector<64x16xf32>
    %25 = vector.extract_strided_slice %23 {offsets = [0, 0], sizes = [1, 16], strides = [1, 1]} : vector<9x16xf32> to vector<1x16xf32>
    %26 = vector.broadcast %25 : vector<1x16xf32> to vector<64x16xf32>
    %27 = arith.mulf %24, %26 : vector<64x16xf32>
    %28 = vector.extract_strided_slice %22 {offsets = [64, 0], sizes = [64, 16], strides = [1, 1]} : vector<576x16xf32> to vector<64x16xf32>
    %29 = vector.extract_strided_slice %23 {offsets = [1, 0], sizes = [1, 16], strides = [1, 1]} : vector<9x16xf32> to vector<1x16xf32>
    %30 = vector.broadcast %29 : vector<1x16xf32> to vector<64x16xf32>
    %31 = arith.mulf %28, %30 : vector<64x16xf32>
    %32 = arith.addf %27, %31 : vector<64x16xf32>
    %33 = vector.extract_strided_slice %22 {offsets = [128, 0], sizes = [64, 16], strides = [1, 1]} : vector<576x16xf32> to vector<64x16xf32>
    %34 = vector.extract_strided_slice %23 {offsets = [2, 0], sizes = [1, 16], strides = [1, 1]} : vector<9x16xf32> to vector<1x16xf32>
    %35 = vector.broadcast %34 : vector<1x16xf32> to vector<64x16xf32>
    %36 = arith.mulf %33, %35 : vector<64x16xf32>
    %37 = arith.addf %32, %36 : vector<64x16xf32>
    %38 = vector.extract_strided_slice %22 {offsets = [192, 0], sizes = [64, 16], strides = [1, 1]} : vector<576x16xf32> to vector<64x16xf32>
    %39 = vector.extract_strided_slice %23 {offsets = [3, 0], sizes = [1, 16], strides = [1, 1]} : vector<9x16xf32> to vector<1x16xf32>
    %40 = vector.broadcast %39 : vector<1x16xf32> to vector<64x16xf32>
    %41 = arith.mulf %38, %40 : vector<64x16xf32>
    %42 = arith.addf %37, %41 : vector<64x16xf32>
    %43 = vector.extract_strided_slice %22 {offsets = [256, 0], sizes = [64, 16], strides = [1, 1]} : vector<576x16xf32> to vector<64x16xf32>
    %44 = vector.extract_strided_slice %23 {offsets = [4, 0], sizes = [1, 16], strides = [1, 1]} : vector<9x16xf32> to vector<1x16xf32>
    %45 = vector.broadcast %44 : vector<1x16xf32> to vector<64x16xf32>
    %46 = arith.mulf %43, %45 : vector<64x16xf32>
    %47 = arith.addf %42, %46 : vector<64x16xf32>
    %48 = vector.extract_strided_slice %22 {offsets = [320, 0], sizes = [64, 16], strides = [1, 1]} : vector<576x16xf32> to vector<64x16xf32>
    %49 = vector.extract_strided_slice %23 {offsets = [5, 0], sizes = [1, 16], strides = [1, 1]} : vector<9x16xf32> to vector<1x16xf32>
    %50 = vector.broadcast %49 : vector<1x16xf32> to vector<64x16xf32>
    %51 = arith.mulf %48, %50 : vector<64x16xf32>
    %52 = arith.addf %47, %51 : vector<64x16xf32>
    %53 = vector.extract_strided_slice %22 {offsets = [384, 0], sizes = [64, 16], strides = [1, 1]} : vector<576x16xf32> to vector<64x16xf32>
    %54 = vector.extract_strided_slice %23 {offsets = [6, 0], sizes = [1, 16], strides = [1, 1]} : vector<9x16xf32> to vector<1x16xf32>
    %55 = vector.broadcast %54 : vector<1x16xf32> to vector<64x16xf32>
    %56 = arith.mulf %53, %55 : vector<64x16xf32>
    %57 = arith.addf %52, %56 : vector<64x16xf32>
    %58 = vector.extract_strided_slice %22 {offsets = [448, 0], sizes = [64, 16], strides = [1, 1]} : vector<576x16xf32> to vector<64x16xf32>
    %59 = vector.extract_strided_slice %23 {offsets = [7, 0], sizes = [1, 16], strides = [1, 1]} : vector<9x16xf32> to vector<1x16xf32>
    %60 = vector.broadcast %59 : vector<1x16xf32> to vector<64x16xf32>
    %61 = arith.mulf %58, %60 : vector<64x16xf32>
    %62 = arith.addf %57, %61 : vector<64x16xf32>
    %63 = vector.extract_strided_slice %22 {offsets = [512, 0], sizes = [64, 16], strides = [1, 1]} : vector<576x16xf32> to vector<64x16xf32>
    %64 = vector.extract_strided_slice %23 {offsets = [8, 0], sizes = [1, 16], strides = [1, 1]} : vector<9x16xf32> to vector<1x16xf32>
    %65 = vector.broadcast %64 : vector<1x16xf32> to vector<64x16xf32>
    %66 = arith.mulf %63, %65 : vector<64x16xf32>
    %67 = arith.addf %62, %66 : vector<64x16xf32>
    %c11 = arith.constant 11 : index
    %c0_13 = arith.constant 0 : index
    %68 = vector.load %arg3[%c11, %c0_13] : memref<152x256xf32, #tpu.memory_space<vmem>>, vector<2x16xf32>
    %69 = vector.extract_strided_slice %68 {offsets = [0, 0], sizes = [1, 16], strides = [1, 1]} : vector<2x16xf32> to vector<1x16xf32>
    %70 = vector.broadcast %69 : vector<1x16xf32> to vector<64x16xf32>
    %71 = arith.mulf %67, %70 : vector<64x16xf32>
    %72 = vector.extract_strided_slice %68 {offsets = [1, 0], sizes = [1, 16], strides = [1, 1]} : vector<2x16xf32> to vector<1x16xf32>
    %73 = vector.broadcast %72 : vector<1x16xf32> to vector<64x16xf32>
    %74 = arith.addf %71, %73 : vector<64x16xf32>
    %cst_14 = arith.constant 0.000000e+00 : f32
    %75 = vector.broadcast %cst_14 : f32 to vector<64x16xf32>
    %76 = arith.maximumf %74, %75 : vector<64x16xf32>
    %cst_15 = arith.constant dense<0.000000e+00> : vector<16xf32>
    %77 = vector.multi_reduction <add>, %76, %cst_15 [0] : vector<64x16xf32> to vector<16xf32>
    %78 = vector.shape_cast %77 : vector<16xf32> to vector<1x16xf32>
    %cst_16 = arith.constant 1.562500e-02 : f32
    %79 = vector.broadcast %cst_16 : f32 to vector<1x16xf32>
    %80 = arith.mulf %78, %79 : vector<1x16xf32>
    %81 = arith.truncf %80 : vector<1x16xf32> to vector<1x16xbf16>
    %c603 = arith.constant 603 : index
    %c0_17 = arith.constant 0 : index
    %82 = vector.load %arg2[%c603, %c0_17] : memref<3472x256xbf16, #tpu.memory_space<vmem>>, vector<16x8xbf16>
    %cst_18 = arith.constant dense<0.000000e+00> : vector<1x8xf32>
    %83 = tpu.matmul %81, %82, %cst_18 {dimension_numbers = #tpu.dot_dimension_numbers<[1], [0], [0], [1], [0, 0, 1, 1], [], []>} : vector<1x16xbf16>, vector<16x8xbf16>, vector<1x8xf32> -> vector<1x8xf32>
    %c13 = arith.constant 13 : index
    %c0_19 = arith.constant 0 : index
    %84 = vector.load %arg3[%c13, %c0_19] : memref<152x256xf32, #tpu.memory_space<vmem>>, vector<1x8xf32>
    %85 = arith.addf %83, %84 : vector<1x8xf32>
    %cst_20 = arith.constant 0.000000e+00 : f32
    %86 = vector.broadcast %cst_20 : f32 to vector<1x8xf32>
    %87 = arith.maximumf %85, %86 : vector<1x8xf32>
    %88 = arith.truncf %87 : vector<1x8xf32> to vector<1x8xbf16>
    %c619 = arith.constant 619 : index
    %c0_21 = arith.constant 0 : index
    %89 = vector.load %arg2[%c619, %c0_21] : memref<3472x256xbf16, #tpu.memory_space<vmem>>, vector<8x16xbf16>
    %cst_22 = arith.constant dense<0.000000e+00> : vector<1x16xf32>
    %90 = tpu.matmul %88, %89, %cst_22 {dimension_numbers = #tpu.dot_dimension_numbers<[1], [0], [0], [1], [0, 0, 1, 1], [], []>} : vector<1x8xbf16>, vector<8x16xbf16>, vector<1x16xf32> -> vector<1x16xf32>
    %c14 = arith.constant 14 : index
    %c0_23 = arith.constant 0 : index
    %91 = vector.load %arg3[%c14, %c0_23] : memref<152x256xf32, #tpu.memory_space<vmem>>, vector<1x16xf32>
    %92 = arith.addf %90, %91 : vector<1x16xf32>
    %cst_24 = arith.constant 3.000000e+00 : f32
    %93 = vector.broadcast %cst_24 : f32 to vector<1x16xf32>
    %94 = arith.addf %92, %93 : vector<1x16xf32>
    %cst_25 = arith.constant 0.000000e+00 : f32
    %cst_26 = arith.constant 6.000000e+00 : f32
    %95 = vector.broadcast %cst_25 : f32 to vector<1x16xf32>
    %96 = arith.maximumf %95, %94 : vector<1x16xf32>
    %97 = vector.broadcast %cst_26 : f32 to vector<1x16xf32>
    %98 = arith.minimumf %97, %96 : vector<1x16xf32>
    %cst_27 = arith.constant 0.166666672 : f32
    %99 = vector.broadcast %cst_27 : f32 to vector<1x16xf32>
    %100 = arith.mulf %98, %99 : vector<1x16xf32>
    %101 = vector.broadcast %100 : vector<1x16xf32> to vector<64x16xf32>
    %102 = arith.mulf %76, %101 : vector<64x16xf32>
    %c15 = arith.constant 15 : index
    %c0_28 = arith.constant 0 : index
    %103 = vector.load %arg3[%c15, %c0_28] : memref<152x256xf32, #tpu.memory_space<vmem>>, vector<2x16xf32>
    %104 = arith.truncf %102 : vector<64x16xf32> to vector<64x16xbf16>
    %c627 = arith.constant 627 : index
    %c0_29 = arith.constant 0 : index
    %105 = vector.load %arg2[%c627, %c0_29] : memref<3472x256xbf16, #tpu.memory_space<vmem>>, vector<16x16xbf16>
    %cst_30 = arith.constant dense<0.000000e+00> : vector<64x16xf32>
    %106 = tpu.matmul %104, %105, %cst_30 {dimension_numbers = #tpu.dot_dimension_numbers<[1], [0], [0], [1], [0, 0, 1, 1], [], []>} : vector<64x16xbf16>, vector<16x16xbf16>, vector<64x16xf32> -> vector<64x16xf32>
    %107 = vector.extract_strided_slice %103 {offsets = [0, 0], sizes = [1, 16], strides = [1, 1]} : vector<2x16xf32> to vector<1x16xf32>
    %108 = vector.broadcast %107 : vector<1x16xf32> to vector<64x16xf32>
    %109 = arith.mulf %106, %108 : vector<64x16xf32>
    %110 = vector.extract_strided_slice %103 {offsets = [1, 0], sizes = [1, 16], strides = [1, 1]} : vector<2x16xf32> to vector<1x16xf32>
    %111 = vector.broadcast %110 : vector<1x16xf32> to vector<64x16xf32>
    %112 = arith.addf %109, %111 : vector<64x16xf32>
    %c17 = arith.constant 17 : index
    %c0_31 = arith.constant 0 : index
    %113 = vector.load %arg3[%c17, %c0_31] : memref<152x256xf32, #tpu.memory_space<vmem>>, vector<2x72xf32>
    %114 = arith.truncf %112 : vector<64x16xf32> to vector<64x16xbf16>
    %c787 = arith.constant 787 : index
    %c0_32 = arith.constant 0 : index
    %115 = vector.load %arg2[%c787, %c0_32] : memref<3472x256xbf16, #tpu.memory_space<vmem>>, vector<16x72xbf16>
    %cst_33 = arith.constant dense<0.000000e+00> : vector<64x72xf32>
    %116 = tpu.matmul %114, %115, %cst_33 {dimension_numbers = #tpu.dot_dimension_numbers<[1], [0], [0], [1], [0, 0, 1, 1], [], []>} : vector<64x16xbf16>, vector<16x72xbf16>, vector<64x72xf32> -> vector<64x72xf32>
    %117 = vector.extract_strided_slice %113 {offsets = [0, 0], sizes = [1, 72], strides = [1, 1]} : vector<2x72xf32> to vector<1x72xf32>
    %118 = vector.broadcast %117 : vector<1x72xf32> to vector<64x72xf32>
    %119 = arith.mulf %116, %118 : vector<64x72xf32>
    %120 = vector.extract_strided_slice %113 {offsets = [1, 0], sizes = [1, 72], strides = [1, 1]} : vector<2x72xf32> to vector<1x72xf32>
    %121 = vector.broadcast %120 : vector<1x72xf32> to vector<64x72xf32>
    %122 = arith.addf %119, %121 : vector<64x72xf32>
    %cst_34 = arith.constant 0.000000e+00 : f32
    %123 = vector.broadcast %cst_34 : f32 to vector<64x72xf32>
    %124 = arith.maximumf %122, %123 : vector<64x72xf32>
    %c643 = arith.constant 643 : index
    %c0_35 = arith.constant 0 : index
    %125 = vector.load %arg2[%c643, %c0_35] : memref<3472x256xbf16, #tpu.memory_space<vmem>>, vector<144x64xbf16>
    %126 = arith.truncf %124 : vector<64x72xf32> to vector<64x72xbf16>
    %cst_36 = arith.constant dense<0.000000e+00> : vector<144x72xf32>
    %127 = tpu.matmul %125, %126, %cst_36 {dimension_numbers = #tpu.dot_dimension_numbers<[1], [0], [0], [1], [0, 0, 1, 1], [], []>} : vector<144x64xbf16>, vector<64x72xbf16>, vector<144x72xf32> -> vector<144x72xf32>
    %c19 = arith.constant 19 : index
    %c0_37 = arith.constant 0 : index
    %128 = vector.load %arg3[%c19, %c0_37] : memref<152x256xf32, #tpu.memory_space<vmem>>, vector<9x72xf32>
    %129 = vector.extract_strided_slice %127 {offsets = [0, 0], sizes = [16, 72], strides = [1, 1]} : vector<144x72xf32> to vector<16x72xf32>
    %130 = vector.extract_strided_slice %128 {offsets = [0, 0], sizes = [1, 72], strides = [1, 1]} : vector<9x72xf32> to vector<1x72xf32>
    %131 = vector.broadcast %130 : vector<1x72xf32> to vector<16x72xf32>
    %132 = arith.mulf %129, %131 : vector<16x72xf32>
    %133 = vector.extract_strided_slice %127 {offsets = [16, 0], sizes = [16, 72], strides = [1, 1]} : vector<144x72xf32> to vector<16x72xf32>
    %134 = vector.extract_strided_slice %128 {offsets = [1, 0], sizes = [1, 72], strides = [1, 1]} : vector<9x72xf32> to vector<1x72xf32>
    %135 = vector.broadcast %134 : vector<1x72xf32> to vector<16x72xf32>
    %136 = arith.mulf %133, %135 : vector<16x72xf32>
    %137 = arith.addf %132, %136 : vector<16x72xf32>
    %138 = vector.extract_strided_slice %127 {offsets = [32, 0], sizes = [16, 72], strides = [1, 1]} : vector<144x72xf32> to vector<16x72xf32>
    %139 = vector.extract_strided_slice %128 {offsets = [2, 0], sizes = [1, 72], strides = [1, 1]} : vector<9x72xf32> to vector<1x72xf32>
    %140 = vector.broadcast %139 : vector<1x72xf32> to vector<16x72xf32>
    %141 = arith.mulf %138, %140 : vector<16x72xf32>
    %142 = arith.addf %137, %141 : vector<16x72xf32>
    %143 = vector.extract_strided_slice %127 {offsets = [48, 0], sizes = [16, 72], strides = [1, 1]} : vector<144x72xf32> to vector<16x72xf32>
    %144 = vector.extract_strided_slice %128 {offsets = [3, 0], sizes = [1, 72], strides = [1, 1]} : vector<9x72xf32> to vector<1x72xf32>
    %145 = vector.broadcast %144 : vector<1x72xf32> to vector<16x72xf32>
    %146 = arith.mulf %143, %145 : vector<16x72xf32>
    %147 = arith.addf %142, %146 : vector<16x72xf32>
    %148 = vector.extract_strided_slice %127 {offsets = [64, 0], sizes = [16, 72], strides = [1, 1]} : vector<144x72xf32> to vector<16x72xf32>
    %149 = vector.extract_strided_slice %128 {offsets = [4, 0], sizes = [1, 72], strides = [1, 1]} : vector<9x72xf32> to vector<1x72xf32>
    %150 = vector.broadcast %149 : vector<1x72xf32> to vector<16x72xf32>
    %151 = arith.mulf %148, %150 : vector<16x72xf32>
    %152 = arith.addf %147, %151 : vector<16x72xf32>
    %153 = vector.extract_strided_slice %127 {offsets = [80, 0], sizes = [16, 72], strides = [1, 1]} : vector<144x72xf32> to vector<16x72xf32>
    %154 = vector.extract_strided_slice %128 {offsets = [5, 0], sizes = [1, 72], strides = [1, 1]} : vector<9x72xf32> to vector<1x72xf32>
    %155 = vector.broadcast %154 : vector<1x72xf32> to vector<16x72xf32>
    %156 = arith.mulf %153, %155 : vector<16x72xf32>
    %157 = arith.addf %152, %156 : vector<16x72xf32>
    %158 = vector.extract_strided_slice %127 {offsets = [96, 0], sizes = [16, 72], strides = [1, 1]} : vector<144x72xf32> to vector<16x72xf32>
    %159 = vector.extract_strided_slice %128 {offsets = [6, 0], sizes = [1, 72], strides = [1, 1]} : vector<9x72xf32> to vector<1x72xf32>
    %160 = vector.broadcast %159 : vector<1x72xf32> to vector<16x72xf32>
    %161 = arith.mulf %158, %160 : vector<16x72xf32>
    %162 = arith.addf %157, %161 : vector<16x72xf32>
    %163 = vector.extract_strided_slice %127 {offsets = [112, 0], sizes = [16, 72], strides = [1, 1]} : vector<144x72xf32> to vector<16x72xf32>
    %164 = vector.extract_strided_slice %128 {offsets = [7, 0], sizes = [1, 72], strides = [1, 1]} : vector<9x72xf32> to vector<1x72xf32>
    %165 = vector.broadcast %164 : vector<1x72xf32> to vector<16x72xf32>
    %166 = arith.mulf %163, %165 : vector<16x72xf32>
    %167 = arith.addf %162, %166 : vector<16x72xf32>
    %168 = vector.extract_strided_slice %127 {offsets = [128, 0], sizes = [16, 72], strides = [1, 1]} : vector<144x72xf32> to vector<16x72xf32>
    %169 = vector.extract_strided_slice %128 {offsets = [8, 0], sizes = [1, 72], strides = [1, 1]} : vector<9x72xf32> to vector<1x72xf32>
    %170 = vector.broadcast %169 : vector<1x72xf32> to vector<16x72xf32>
    %171 = arith.mulf %168, %170 : vector<16x72xf32>
    %172 = arith.addf %167, %171 : vector<16x72xf32>
    %c28 = arith.constant 28 : index
    %c0_38 = arith.constant 0 : index
    %173 = vector.load %arg3[%c28, %c0_38] : memref<152x256xf32, #tpu.memory_space<vmem>>, vector<2x72xf32>
    %174 = vector.extract_strided_slice %173 {offsets = [0, 0], sizes = [1, 72], strides = [1, 1]} : vector<2x72xf32> to vector<1x72xf32>
    %175 = vector.broadcast %174 : vector<1x72xf32> to vector<16x72xf32>
    %176 = arith.mulf %172, %175 : vector<16x72xf32>
    %177 = vector.extract_strided_slice %173 {offsets = [1, 0], sizes = [1, 72], strides = [1, 1]} : vector<2x72xf32> to vector<1x72xf32>
    %178 = vector.broadcast %177 : vector<1x72xf32> to vector<16x72xf32>
    %179 = arith.addf %176, %178 : vector<16x72xf32>
    %cst_39 = arith.constant 0.000000e+00 : f32
    %180 = vector.broadcast %cst_39 : f32 to vector<16x72xf32>
    %181 = arith.maximumf %179, %180 : vector<16x72xf32>
    %c30 = arith.constant 30 : index
    %c0_40 = arith.constant 0 : index
    %182 = vector.load %arg3[%c30, %c0_40] : memref<152x256xf32, #tpu.memory_space<vmem>>, vector<2x24xf32>
    %183 = arith.truncf %181 : vector<16x72xf32> to vector<16x72xbf16>
    %c803 = arith.constant 803 : index
    %c0_41 = arith.constant 0 : index
    %184 = vector.load %arg2[%c803, %c0_41] : memref<3472x256xbf16, #tpu.memory_space<vmem>>, vector<72x24xbf16>
    %cst_42 = arith.constant dense<0.000000e+00> : vector<16x24xf32>
    %185 = tpu.matmul %183, %184, %cst_42 {dimension_numbers = #tpu.dot_dimension_numbers<[1], [0], [0], [1], [0, 0, 1, 1], [], []>} : vector<16x72xbf16>, vector<72x24xbf16>, vector<16x24xf32> -> vector<16x24xf32>
    %186 = vector.extract_strided_slice %182 {offsets = [0, 0], sizes = [1, 24], strides = [1, 1]} : vector<2x24xf32> to vector<1x24xf32>
    %187 = vector.broadcast %186 : vector<1x24xf32> to vector<16x24xf32>
    %188 = arith.mulf %185, %187 : vector<16x24xf32>
    %189 = vector.extract_strided_slice %182 {offsets = [1, 0], sizes = [1, 24], strides = [1, 1]} : vector<2x24xf32> to vector<1x24xf32>
    %190 = vector.broadcast %189 : vector<1x24xf32> to vector<16x24xf32>
    %191 = arith.addf %188, %190 : vector<16x24xf32>
    %c32 = arith.constant 32 : index
    %c0_43 = arith.constant 0 : index
    %192 = vector.load %arg3[%c32, %c0_43] : memref<152x256xf32, #tpu.memory_space<vmem>>, vector<2x88xf32>
    %193 = arith.truncf %191 : vector<16x24xf32> to vector<16x24xbf16>
    %c1019 = arith.constant 1019 : index
    %c0_44 = arith.constant 0 : index
    %194 = vector.load %arg2[%c1019, %c0_44] : memref<3472x256xbf16, #tpu.memory_space<vmem>>, vector<24x88xbf16>
    %cst_45 = arith.constant dense<0.000000e+00> : vector<16x88xf32>
    %195 = tpu.matmul %193, %194, %cst_45 {dimension_numbers = #tpu.dot_dimension_numbers<[1], [0], [0], [1], [0, 0, 1, 1], [], []>} : vector<16x24xbf16>, vector<24x88xbf16>, vector<16x88xf32> -> vector<16x88xf32>
    %196 = vector.extract_strided_slice %192 {offsets = [0, 0], sizes = [1, 88], strides = [1, 1]} : vector<2x88xf32> to vector<1x88xf32>
    %197 = vector.broadcast %196 : vector<1x88xf32> to vector<16x88xf32>
    %198 = arith.mulf %195, %197 : vector<16x88xf32>
    %199 = vector.extract_strided_slice %192 {offsets = [1, 0], sizes = [1, 88], strides = [1, 1]} : vector<2x88xf32> to vector<1x88xf32>
    %200 = vector.broadcast %199 : vector<1x88xf32> to vector<16x88xf32>
    %201 = arith.addf %198, %200 : vector<16x88xf32>
    %cst_46 = arith.constant 0.000000e+00 : f32
    %202 = vector.broadcast %cst_46 : f32 to vector<16x88xf32>
    %203 = arith.maximumf %201, %202 : vector<16x88xf32>
    %c875 = arith.constant 875 : index
    %c0_47 = arith.constant 0 : index
    %204 = vector.load %arg2[%c875, %c0_47] : memref<3472x256xbf16, #tpu.memory_space<vmem>>, vector<144x16xbf16>
    %205 = arith.truncf %203 : vector<16x88xf32> to vector<16x88xbf16>
    %cst_48 = arith.constant dense<0.000000e+00> : vector<144x88xf32>
    %206 = tpu.matmul %204, %205, %cst_48 {dimension_numbers = #tpu.dot_dimension_numbers<[1], [0], [0], [1], [0, 0, 1, 1], [], []>} : vector<144x16xbf16>, vector<16x88xbf16>, vector<144x88xf32> -> vector<144x88xf32>
    %c34 = arith.constant 34 : index
    %c0_49 = arith.constant 0 : index
    %207 = vector.load %arg3[%c34, %c0_49] : memref<152x256xf32, #tpu.memory_space<vmem>>, vector<9x88xf32>
    %208 = vector.extract_strided_slice %206 {offsets = [0, 0], sizes = [16, 88], strides = [1, 1]} : vector<144x88xf32> to vector<16x88xf32>
    %209 = vector.extract_strided_slice %207 {offsets = [0, 0], sizes = [1, 88], strides = [1, 1]} : vector<9x88xf32> to vector<1x88xf32>
    %210 = vector.broadcast %209 : vector<1x88xf32> to vector<16x88xf32>
    %211 = arith.mulf %208, %210 : vector<16x88xf32>
    %212 = vector.extract_strided_slice %206 {offsets = [16, 0], sizes = [16, 88], strides = [1, 1]} : vector<144x88xf32> to vector<16x88xf32>
    %213 = vector.extract_strided_slice %207 {offsets = [1, 0], sizes = [1, 88], strides = [1, 1]} : vector<9x88xf32> to vector<1x88xf32>
    %214 = vector.broadcast %213 : vector<1x88xf32> to vector<16x88xf32>
    %215 = arith.mulf %212, %214 : vector<16x88xf32>
    %216 = arith.addf %211, %215 : vector<16x88xf32>
    %217 = vector.extract_strided_slice %206 {offsets = [32, 0], sizes = [16, 88], strides = [1, 1]} : vector<144x88xf32> to vector<16x88xf32>
    %218 = vector.extract_strided_slice %207 {offsets = [2, 0], sizes = [1, 88], strides = [1, 1]} : vector<9x88xf32> to vector<1x88xf32>
    %219 = vector.broadcast %218 : vector<1x88xf32> to vector<16x88xf32>
    %220 = arith.mulf %217, %219 : vector<16x88xf32>
    %221 = arith.addf %216, %220 : vector<16x88xf32>
    %222 = vector.extract_strided_slice %206 {offsets = [48, 0], sizes = [16, 88], strides = [1, 1]} : vector<144x88xf32> to vector<16x88xf32>
    %223 = vector.extract_strided_slice %207 {offsets = [3, 0], sizes = [1, 88], strides = [1, 1]} : vector<9x88xf32> to vector<1x88xf32>
    %224 = vector.broadcast %223 : vector<1x88xf32> to vector<16x88xf32>
    %225 = arith.mulf %222, %224 : vector<16x88xf32>
    %226 = arith.addf %221, %225 : vector<16x88xf32>
    %227 = vector.extract_strided_slice %206 {offsets = [64, 0], sizes = [16, 88], strides = [1, 1]} : vector<144x88xf32> to vector<16x88xf32>
    %228 = vector.extract_strided_slice %207 {offsets = [4, 0], sizes = [1, 88], strides = [1, 1]} : vector<9x88xf32> to vector<1x88xf32>
    %229 = vector.broadcast %228 : vector<1x88xf32> to vector<16x88xf32>
    %230 = arith.mulf %227, %229 : vector<16x88xf32>
    %231 = arith.addf %226, %230 : vector<16x88xf32>
    %232 = vector.extract_strided_slice %206 {offsets = [80, 0], sizes = [16, 88], strides = [1, 1]} : vector<144x88xf32> to vector<16x88xf32>
    %233 = vector.extract_strided_slice %207 {offsets = [5, 0], sizes = [1, 88], strides = [1, 1]} : vector<9x88xf32> to vector<1x88xf32>
    %234 = vector.broadcast %233 : vector<1x88xf32> to vector<16x88xf32>
    %235 = arith.mulf %232, %234 : vector<16x88xf32>
    %236 = arith.addf %231, %235 : vector<16x88xf32>
    %237 = vector.extract_strided_slice %206 {offsets = [96, 0], sizes = [16, 88], strides = [1, 1]} : vector<144x88xf32> to vector<16x88xf32>
    %238 = vector.extract_strided_slice %207 {offsets = [6, 0], sizes = [1, 88], strides = [1, 1]} : vector<9x88xf32> to vector<1x88xf32>
    %239 = vector.broadcast %238 : vector<1x88xf32> to vector<16x88xf32>
    %240 = arith.mulf %237, %239 : vector<16x88xf32>
    %241 = arith.addf %236, %240 : vector<16x88xf32>
    %242 = vector.extract_strided_slice %206 {offsets = [112, 0], sizes = [16, 88], strides = [1, 1]} : vector<144x88xf32> to vector<16x88xf32>
    %243 = vector.extract_strided_slice %207 {offsets = [7, 0], sizes = [1, 88], strides = [1, 1]} : vector<9x88xf32> to vector<1x88xf32>
    %244 = vector.broadcast %243 : vector<1x88xf32> to vector<16x88xf32>
    %245 = arith.mulf %242, %244 : vector<16x88xf32>
    %246 = arith.addf %241, %245 : vector<16x88xf32>
    %247 = vector.extract_strided_slice %206 {offsets = [128, 0], sizes = [16, 88], strides = [1, 1]} : vector<144x88xf32> to vector<16x88xf32>
    %248 = vector.extract_strided_slice %207 {offsets = [8, 0], sizes = [1, 88], strides = [1, 1]} : vector<9x88xf32> to vector<1x88xf32>
    %249 = vector.broadcast %248 : vector<1x88xf32> to vector<16x88xf32>
    %250 = arith.mulf %247, %249 : vector<16x88xf32>
    %251 = arith.addf %246, %250 : vector<16x88xf32>
    %c43 = arith.constant 43 : index
    %c0_50 = arith.constant 0 : index
    %252 = vector.load %arg3[%c43, %c0_50] : memref<152x256xf32, #tpu.memory_space<vmem>>, vector<2x88xf32>
    %253 = vector.extract_strided_slice %252 {offsets = [0, 0], sizes = [1, 88], strides = [1, 1]} : vector<2x88xf32> to vector<1x88xf32>
    %254 = vector.broadcast %253 : vector<1x88xf32> to vector<16x88xf32>
    %255 = arith.mulf %251, %254 : vector<16x88xf32>
    %256 = vector.extract_strided_slice %252 {offsets = [1, 0], sizes = [1, 88], strides = [1, 1]} : vector<2x88xf32> to vector<1x88xf32>
    %257 = vector.broadcast %256 : vector<1x88xf32> to vector<16x88xf32>
    %258 = arith.addf %255, %257 : vector<16x88xf32>
    %cst_51 = arith.constant 0.000000e+00 : f32
    %259 = vector.broadcast %cst_51 : f32 to vector<16x88xf32>
    %260 = arith.maximumf %258, %259 : vector<16x88xf32>
    %c45 = arith.constant 45 : index
    %c0_52 = arith.constant 0 : index
    %261 = vector.load %arg3[%c45, %c0_52] : memref<152x256xf32, #tpu.memory_space<vmem>>, vector<2x24xf32>
    %262 = arith.truncf %260 : vector<16x88xf32> to vector<16x88xbf16>
    %c1043 = arith.constant 1043 : index
    %c0_53 = arith.constant 0 : index
    %263 = vector.load %arg2[%c1043, %c0_53] : memref<3472x256xbf16, #tpu.memory_space<vmem>>, vector<88x24xbf16>
    %cst_54 = arith.constant dense<0.000000e+00> : vector<16x24xf32>
    %264 = tpu.matmul %262, %263, %cst_54 {dimension_numbers = #tpu.dot_dimension_numbers<[1], [0], [0], [1], [0, 0, 1, 1], [], []>} : vector<16x88xbf16>, vector<88x24xbf16>, vector<16x24xf32> -> vector<16x24xf32>
    %265 = vector.extract_strided_slice %261 {offsets = [0, 0], sizes = [1, 24], strides = [1, 1]} : vector<2x24xf32> to vector<1x24xf32>
    %266 = vector.broadcast %265 : vector<1x24xf32> to vector<16x24xf32>
    %267 = arith.mulf %264, %266 : vector<16x24xf32>
    %268 = vector.extract_strided_slice %261 {offsets = [1, 0], sizes = [1, 24], strides = [1, 1]} : vector<2x24xf32> to vector<1x24xf32>
    %269 = vector.broadcast %268 : vector<1x24xf32> to vector<16x24xf32>
    %270 = arith.addf %267, %269 : vector<16x24xf32>
    %271 = arith.addf %270, %191 : vector<16x24xf32>
    %c47 = arith.constant 47 : index
    %c0_55 = arith.constant 0 : index
    %272 = vector.load %arg3[%c47, %c0_55] : memref<152x256xf32, #tpu.memory_space<vmem>>, vector<2x96xf32>
    %273 = arith.truncf %271 : vector<16x24xf32> to vector<16x24xbf16>
    %c1231 = arith.constant 1231 : index
    %c0_56 = arith.constant 0 : index
    %274 = vector.load %arg2[%c1231, %c0_56] : memref<3472x256xbf16, #tpu.memory_space<vmem>>, vector<24x96xbf16>
    %cst_57 = arith.constant dense<0.000000e+00> : vector<16x96xf32>
    %275 = tpu.matmul %273, %274, %cst_57 {dimension_numbers = #tpu.dot_dimension_numbers<[1], [0], [0], [1], [0, 0, 1, 1], [], []>} : vector<16x24xbf16>, vector<24x96xbf16>, vector<16x96xf32> -> vector<16x96xf32>
    %276 = vector.extract_strided_slice %272 {offsets = [0, 0], sizes = [1, 96], strides = [1, 1]} : vector<2x96xf32> to vector<1x96xf32>
    %277 = vector.broadcast %276 : vector<1x96xf32> to vector<16x96xf32>
    %278 = arith.mulf %275, %277 : vector<16x96xf32>
    %279 = vector.extract_strided_slice %272 {offsets = [1, 0], sizes = [1, 96], strides = [1, 1]} : vector<2x96xf32> to vector<1x96xf32>
    %280 = vector.broadcast %279 : vector<1x96xf32> to vector<16x96xf32>
    %281 = arith.addf %278, %280 : vector<16x96xf32>
    %cst_58 = arith.constant 3.000000e+00 : f32
    %282 = vector.broadcast %cst_58 : f32 to vector<16x96xf32>
    %283 = arith.addf %281, %282 : vector<16x96xf32>
    %cst_59 = arith.constant 0.000000e+00 : f32
    %cst_60 = arith.constant 6.000000e+00 : f32
    %284 = vector.broadcast %cst_59 : f32 to vector<16x96xf32>
    %285 = arith.maximumf %284, %283 : vector<16x96xf32>
    %286 = vector.broadcast %cst_60 : f32 to vector<16x96xf32>
    %287 = arith.minimumf %286, %285 : vector<16x96xf32>
    %288 = arith.mulf %281, %287 : vector<16x96xf32>
    %cst_61 = arith.constant 0.166666672 : f32
    %289 = vector.broadcast %cst_61 : f32 to vector<16x96xf32>
    %290 = arith.mulf %288, %289 : vector<16x96xf32>
    %c1131 = arith.constant 1131 : index
    %c0_62 = arith.constant 0 : index
    %291 = vector.load %arg2[%c1131, %c0_62] : memref<3472x256xbf16, #tpu.memory_space<vmem>>, vector<100x16xbf16>
    %292 = arith.truncf %290 : vector<16x96xf32> to vector<16x96xbf16>
    %cst_63 = arith.constant dense<0.000000e+00> : vector<100x96xf32>
    %293 = tpu.matmul %291, %292, %cst_63 {dimension_numbers = #tpu.dot_dimension_numbers<[1], [0], [0], [1], [0, 0, 1, 1], [], []>} : vector<100x16xbf16>, vector<16x96xbf16>, vector<100x96xf32> -> vector<100x96xf32>
    %c49 = arith.constant 49 : index
    %c0_64 = arith.constant 0 : index
    %294 = vector.load %arg3[%c49, %c0_64] : memref<152x256xf32, #tpu.memory_space<vmem>>, vector<25x96xf32>
    %295 = vector.extract_strided_slice %293 {offsets = [0, 0], sizes = [4, 96], strides = [1, 1]} : vector<100x96xf32> to vector<4x96xf32>
    %296 = vector.extract_strided_slice %294 {offsets = [0, 0], sizes = [1, 96], strides = [1, 1]} : vector<25x96xf32> to vector<1x96xf32>
    %297 = vector.broadcast %296 : vector<1x96xf32> to vector<4x96xf32>
    %298 = arith.mulf %295, %297 : vector<4x96xf32>
    %299 = vector.extract_strided_slice %293 {offsets = [4, 0], sizes = [4, 96], strides = [1, 1]} : vector<100x96xf32> to vector<4x96xf32>
    %300 = vector.extract_strided_slice %294 {offsets = [1, 0], sizes = [1, 96], strides = [1, 1]} : vector<25x96xf32> to vector<1x96xf32>
    %301 = vector.broadcast %300 : vector<1x96xf32> to vector<4x96xf32>
    %302 = arith.mulf %299, %301 : vector<4x96xf32>
    %303 = arith.addf %298, %302 : vector<4x96xf32>
    %304 = vector.extract_strided_slice %293 {offsets = [8, 0], sizes = [4, 96], strides = [1, 1]} : vector<100x96xf32> to vector<4x96xf32>
    %305 = vector.extract_strided_slice %294 {offsets = [2, 0], sizes = [1, 96], strides = [1, 1]} : vector<25x96xf32> to vector<1x96xf32>
    %306 = vector.broadcast %305 : vector<1x96xf32> to vector<4x96xf32>
    %307 = arith.mulf %304, %306 : vector<4x96xf32>
    %308 = arith.addf %303, %307 : vector<4x96xf32>
    %309 = vector.extract_strided_slice %293 {offsets = [12, 0], sizes = [4, 96], strides = [1, 1]} : vector<100x96xf32> to vector<4x96xf32>
    %310 = vector.extract_strided_slice %294 {offsets = [3, 0], sizes = [1, 96], strides = [1, 1]} : vector<25x96xf32> to vector<1x96xf32>
    %311 = vector.broadcast %310 : vector<1x96xf32> to vector<4x96xf32>
    %312 = arith.mulf %309, %311 : vector<4x96xf32>
    %313 = arith.addf %308, %312 : vector<4x96xf32>
    %314 = vector.extract_strided_slice %293 {offsets = [16, 0], sizes = [4, 96], strides = [1, 1]} : vector<100x96xf32> to vector<4x96xf32>
    %315 = vector.extract_strided_slice %294 {offsets = [4, 0], sizes = [1, 96], strides = [1, 1]} : vector<25x96xf32> to vector<1x96xf32>
    %316 = vector.broadcast %315 : vector<1x96xf32> to vector<4x96xf32>
    %317 = arith.mulf %314, %316 : vector<4x96xf32>
    %318 = arith.addf %313, %317 : vector<4x96xf32>
    %319 = vector.extract_strided_slice %293 {offsets = [20, 0], sizes = [4, 96], strides = [1, 1]} : vector<100x96xf32> to vector<4x96xf32>
    %320 = vector.extract_strided_slice %294 {offsets = [5, 0], sizes = [1, 96], strides = [1, 1]} : vector<25x96xf32> to vector<1x96xf32>
    %321 = vector.broadcast %320 : vector<1x96xf32> to vector<4x96xf32>
    %322 = arith.mulf %319, %321 : vector<4x96xf32>
    %323 = arith.addf %318, %322 : vector<4x96xf32>
    %324 = vector.extract_strided_slice %293 {offsets = [24, 0], sizes = [4, 96], strides = [1, 1]} : vector<100x96xf32> to vector<4x96xf32>
    %325 = vector.extract_strided_slice %294 {offsets = [6, 0], sizes = [1, 96], strides = [1, 1]} : vector<25x96xf32> to vector<1x96xf32>
    %326 = vector.broadcast %325 : vector<1x96xf32> to vector<4x96xf32>
    %327 = arith.mulf %324, %326 : vector<4x96xf32>
    %328 = arith.addf %323, %327 : vector<4x96xf32>
    %329 = vector.extract_strided_slice %293 {offsets = [28, 0], sizes = [4, 96], strides = [1, 1]} : vector<100x96xf32> to vector<4x96xf32>
    %330 = vector.extract_strided_slice %294 {offsets = [7, 0], sizes = [1, 96], strides = [1, 1]} : vector<25x96xf32> to vector<1x96xf32>
    %331 = vector.broadcast %330 : vector<1x96xf32> to vector<4x96xf32>
    %332 = arith.mulf %329, %331 : vector<4x96xf32>
    %333 = arith.addf %328, %332 : vector<4x96xf32>
    %334 = vector.extract_strided_slice %293 {offsets = [32, 0], sizes = [4, 96], strides = [1, 1]} : vector<100x96xf32> to vector<4x96xf32>
    %335 = vector.extract_strided_slice %294 {offsets = [8, 0], sizes = [1, 96], strides = [1, 1]} : vector<25x96xf32> to vector<1x96xf32>
    %336 = vector.broadcast %335 : vector<1x96xf32> to vector<4x96xf32>
    %337 = arith.mulf %334, %336 : vector<4x96xf32>
    %338 = arith.addf %333, %337 : vector<4x96xf32>
    %339 = vector.extract_strided_slice %293 {offsets = [36, 0], sizes = [4, 96], strides = [1, 1]} : vector<100x96xf32> to vector<4x96xf32>
    %340 = vector.extract_strided_slice %294 {offsets = [9, 0], sizes = [1, 96], strides = [1, 1]} : vector<25x96xf32> to vector<1x96xf32>
    %341 = vector.broadcast %340 : vector<1x96xf32> to vector<4x96xf32>
    %342 = arith.mulf %339, %341 : vector<4x96xf32>
    %343 = arith.addf %338, %342 : vector<4x96xf32>
    %344 = vector.extract_strided_slice %293 {offsets = [40, 0], sizes = [4, 96], strides = [1, 1]} : vector<100x96xf32> to vector<4x96xf32>
    %345 = vector.extract_strided_slice %294 {offsets = [10, 0], sizes = [1, 96], strides = [1, 1]} : vector<25x96xf32> to vector<1x96xf32>
    %346 = vector.broadcast %345 : vector<1x96xf32> to vector<4x96xf32>
    %347 = arith.mulf %344, %346 : vector<4x96xf32>
    %348 = arith.addf %343, %347 : vector<4x96xf32>
    %349 = vector.extract_strided_slice %293 {offsets = [44, 0], sizes = [4, 96], strides = [1, 1]} : vector<100x96xf32> to vector<4x96xf32>
    %350 = vector.extract_strided_slice %294 {offsets = [11, 0], sizes = [1, 96], strides = [1, 1]} : vector<25x96xf32> to vector<1x96xf32>
    %351 = vector.broadcast %350 : vector<1x96xf32> to vector<4x96xf32>
    %352 = arith.mulf %349, %351 : vector<4x96xf32>
    %353 = arith.addf %348, %352 : vector<4x96xf32>
    %354 = vector.extract_strided_slice %293 {offsets = [48, 0], sizes = [4, 96], strides = [1, 1]} : vector<100x96xf32> to vector<4x96xf32>
    %355 = vector.extract_strided_slice %294 {offsets = [12, 0], sizes = [1, 96], strides = [1, 1]} : vector<25x96xf32> to vector<1x96xf32>
    %356 = vector.broadcast %355 : vector<1x96xf32> to vector<4x96xf32>
    %357 = arith.mulf %354, %356 : vector<4x96xf32>
    %358 = arith.addf %353, %357 : vector<4x96xf32>
    %359 = vector.extract_strided_slice %293 {offsets = [52, 0], sizes = [4, 96], strides = [1, 1]} : vector<100x96xf32> to vector<4x96xf32>
    %360 = vector.extract_strided_slice %294 {offsets = [13, 0], sizes = [1, 96], strides = [1, 1]} : vector<25x96xf32> to vector<1x96xf32>
    %361 = vector.broadcast %360 : vector<1x96xf32> to vector<4x96xf32>
    %362 = arith.mulf %359, %361 : vector<4x96xf32>
    %363 = arith.addf %358, %362 : vector<4x96xf32>
    %364 = vector.extract_strided_slice %293 {offsets = [56, 0], sizes = [4, 96], strides = [1, 1]} : vector<100x96xf32> to vector<4x96xf32>
    %365 = vector.extract_strided_slice %294 {offsets = [14, 0], sizes = [1, 96], strides = [1, 1]} : vector<25x96xf32> to vector<1x96xf32>
    %366 = vector.broadcast %365 : vector<1x96xf32> to vector<4x96xf32>
    %367 = arith.mulf %364, %366 : vector<4x96xf32>
    %368 = arith.addf %363, %367 : vector<4x96xf32>
    %369 = vector.extract_strided_slice %293 {offsets = [60, 0], sizes = [4, 96], strides = [1, 1]} : vector<100x96xf32> to vector<4x96xf32>
    %370 = vector.extract_strided_slice %294 {offsets = [15, 0], sizes = [1, 96], strides = [1, 1]} : vector<25x96xf32> to vector<1x96xf32>
    %371 = vector.broadcast %370 : vector<1x96xf32> to vector<4x96xf32>
    %372 = arith.mulf %369, %371 : vector<4x96xf32>
    %373 = arith.addf %368, %372 : vector<4x96xf32>
    %374 = vector.extract_strided_slice %293 {offsets = [64, 0], sizes = [4, 96], strides = [1, 1]} : vector<100x96xf32> to vector<4x96xf32>
    %375 = vector.extract_strided_slice %294 {offsets = [16, 0], sizes = [1, 96], strides = [1, 1]} : vector<25x96xf32> to vector<1x96xf32>
    %376 = vector.broadcast %375 : vector<1x96xf32> to vector<4x96xf32>
    %377 = arith.mulf %374, %376 : vector<4x96xf32>
    %378 = arith.addf %373, %377 : vector<4x96xf32>
    %379 = vector.extract_strided_slice %293 {offsets = [68, 0], sizes = [4, 96], strides = [1, 1]} : vector<100x96xf32> to vector<4x96xf32>
    %380 = vector.extract_strided_slice %294 {offsets = [17, 0], sizes = [1, 96], strides = [1, 1]} : vector<25x96xf32> to vector<1x96xf32>
    %381 = vector.broadcast %380 : vector<1x96xf32> to vector<4x96xf32>
    %382 = arith.mulf %379, %381 : vector<4x96xf32>
    %383 = arith.addf %378, %382 : vector<4x96xf32>
    %384 = vector.extract_strided_slice %293 {offsets = [72, 0], sizes = [4, 96], strides = [1, 1]} : vector<100x96xf32> to vector<4x96xf32>
    %385 = vector.extract_strided_slice %294 {offsets = [18, 0], sizes = [1, 96], strides = [1, 1]} : vector<25x96xf32> to vector<1x96xf32>
    %386 = vector.broadcast %385 : vector<1x96xf32> to vector<4x96xf32>
    %387 = arith.mulf %384, %386 : vector<4x96xf32>
    %388 = arith.addf %383, %387 : vector<4x96xf32>
    %389 = vector.extract_strided_slice %293 {offsets = [76, 0], sizes = [4, 96], strides = [1, 1]} : vector<100x96xf32> to vector<4x96xf32>
    %390 = vector.extract_strided_slice %294 {offsets = [19, 0], sizes = [1, 96], strides = [1, 1]} : vector<25x96xf32> to vector<1x96xf32>
    %391 = vector.broadcast %390 : vector<1x96xf32> to vector<4x96xf32>
    %392 = arith.mulf %389, %391 : vector<4x96xf32>
    %393 = arith.addf %388, %392 : vector<4x96xf32>
    %394 = vector.extract_strided_slice %293 {offsets = [80, 0], sizes = [4, 96], strides = [1, 1]} : vector<100x96xf32> to vector<4x96xf32>
    %395 = vector.extract_strided_slice %294 {offsets = [20, 0], sizes = [1, 96], strides = [1, 1]} : vector<25x96xf32> to vector<1x96xf32>
    %396 = vector.broadcast %395 : vector<1x96xf32> to vector<4x96xf32>
    %397 = arith.mulf %394, %396 : vector<4x96xf32>
    %398 = arith.addf %393, %397 : vector<4x96xf32>
    %399 = vector.extract_strided_slice %293 {offsets = [84, 0], sizes = [4, 96], strides = [1, 1]} : vector<100x96xf32> to vector<4x96xf32>
    %400 = vector.extract_strided_slice %294 {offsets = [21, 0], sizes = [1, 96], strides = [1, 1]} : vector<25x96xf32> to vector<1x96xf32>
    %401 = vector.broadcast %400 : vector<1x96xf32> to vector<4x96xf32>
    %402 = arith.mulf %399, %401 : vector<4x96xf32>
    %403 = arith.addf %398, %402 : vector<4x96xf32>
    %404 = vector.extract_strided_slice %293 {offsets = [88, 0], sizes = [4, 96], strides = [1, 1]} : vector<100x96xf32> to vector<4x96xf32>
    %405 = vector.extract_strided_slice %294 {offsets = [22, 0], sizes = [1, 96], strides = [1, 1]} : vector<25x96xf32> to vector<1x96xf32>
    %406 = vector.broadcast %405 : vector<1x96xf32> to vector<4x96xf32>
    %407 = arith.mulf %404, %406 : vector<4x96xf32>
    %408 = arith.addf %403, %407 : vector<4x96xf32>
    %409 = vector.extract_strided_slice %293 {offsets = [92, 0], sizes = [4, 96], strides = [1, 1]} : vector<100x96xf32> to vector<4x96xf32>
    %410 = vector.extract_strided_slice %294 {offsets = [23, 0], sizes = [1, 96], strides = [1, 1]} : vector<25x96xf32> to vector<1x96xf32>
    %411 = vector.broadcast %410 : vector<1x96xf32> to vector<4x96xf32>
    %412 = arith.mulf %409, %411 : vector<4x96xf32>
    %413 = arith.addf %408, %412 : vector<4x96xf32>
    %414 = vector.extract_strided_slice %293 {offsets = [96, 0], sizes = [4, 96], strides = [1, 1]} : vector<100x96xf32> to vector<4x96xf32>
    %415 = vector.extract_strided_slice %294 {offsets = [24, 0], sizes = [1, 96], strides = [1, 1]} : vector<25x96xf32> to vector<1x96xf32>
    %416 = vector.broadcast %415 : vector<1x96xf32> to vector<4x96xf32>
    %417 = arith.mulf %414, %416 : vector<4x96xf32>
    %418 = arith.addf %413, %417 : vector<4x96xf32>
    %c74 = arith.constant 74 : index
    %c0_65 = arith.constant 0 : index
    %419 = vector.load %arg3[%c74, %c0_65] : memref<152x256xf32, #tpu.memory_space<vmem>>, vector<2x96xf32>
    %420 = vector.extract_strided_slice %419 {offsets = [0, 0], sizes = [1, 96], strides = [1, 1]} : vector<2x96xf32> to vector<1x96xf32>
    %421 = vector.broadcast %420 : vector<1x96xf32> to vector<4x96xf32>
    %422 = arith.mulf %418, %421 : vector<4x96xf32>
    %423 = vector.extract_strided_slice %419 {offsets = [1, 0], sizes = [1, 96], strides = [1, 1]} : vector<2x96xf32> to vector<1x96xf32>
    %424 = vector.broadcast %423 : vector<1x96xf32> to vector<4x96xf32>
    %425 = arith.addf %422, %424 : vector<4x96xf32>
    %cst_66 = arith.constant 3.000000e+00 : f32
    %426 = vector.broadcast %cst_66 : f32 to vector<4x96xf32>
    %427 = arith.addf %425, %426 : vector<4x96xf32>
    %cst_67 = arith.constant 0.000000e+00 : f32
    %cst_68 = arith.constant 6.000000e+00 : f32
    %428 = vector.broadcast %cst_67 : f32 to vector<4x96xf32>
    %429 = arith.maximumf %428, %427 : vector<4x96xf32>
    %430 = vector.broadcast %cst_68 : f32 to vector<4x96xf32>
    %431 = arith.minimumf %430, %429 : vector<4x96xf32>
    %432 = arith.mulf %425, %431 : vector<4x96xf32>
    %cst_69 = arith.constant 0.166666672 : f32
    %433 = vector.broadcast %cst_69 : f32 to vector<4x96xf32>
    %434 = arith.mulf %432, %433 : vector<4x96xf32>
    %cst_70 = arith.constant dense<0.000000e+00> : vector<96xf32>
    %435 = vector.multi_reduction <add>, %434, %cst_70 [0] : vector<4x96xf32> to vector<96xf32>
    %436 = vector.shape_cast %435 : vector<96xf32> to vector<1x96xf32>
    %cst_71 = arith.constant 2.500000e-01 : f32
    %437 = vector.broadcast %cst_71 : f32 to vector<1x96xf32>
    %438 = arith.mulf %436, %437 : vector<1x96xf32>
    %439 = arith.truncf %438 : vector<1x96xf32> to vector<1x96xbf16>
    %c1255 = arith.constant 1255 : index
    %c0_72 = arith.constant 0 : index
    %440 = vector.load %arg2[%c1255, %c0_72] : memref<3472x256xbf16, #tpu.memory_space<vmem>>, vector<96x24xbf16>
    %cst_73 = arith.constant dense<0.000000e+00> : vector<1x24xf32>
    %441 = tpu.matmul %439, %440, %cst_73 {dimension_numbers = #tpu.dot_dimension_numbers<[1], [0], [0], [1], [0, 0, 1, 1], [], []>} : vector<1x96xbf16>, vector<96x24xbf16>, vector<1x24xf32> -> vector<1x24xf32>
    %c76 = arith.constant 76 : index
    %c0_74 = arith.constant 0 : index
    %442 = vector.load %arg3[%c76, %c0_74] : memref<152x256xf32, #tpu.memory_space<vmem>>, vector<1x24xf32>
    %443 = arith.addf %441, %442 : vector<1x24xf32>
    %cst_75 = arith.constant 0.000000e+00 : f32
    %444 = vector.broadcast %cst_75 : f32 to vector<1x24xf32>
    %445 = arith.maximumf %443, %444 : vector<1x24xf32>
    %446 = arith.truncf %445 : vector<1x24xf32> to vector<1x24xbf16>
    %c1351 = arith.constant 1351 : index
    %c0_76 = arith.constant 0 : index
    %447 = vector.load %arg2[%c1351, %c0_76] : memref<3472x256xbf16, #tpu.memory_space<vmem>>, vector<24x96xbf16>
    %cst_77 = arith.constant dense<0.000000e+00> : vector<1x96xf32>
    %448 = tpu.matmul %446, %447, %cst_77 {dimension_numbers = #tpu.dot_dimension_numbers<[1], [0], [0], [1], [0, 0, 1, 1], [], []>} : vector<1x24xbf16>, vector<24x96xbf16>, vector<1x96xf32> -> vector<1x96xf32>
    %c77 = arith.constant 77 : index
    %c0_78 = arith.constant 0 : index
    %449 = vector.load %arg3[%c77, %c0_78] : memref<152x256xf32, #tpu.memory_space<vmem>>, vector<1x96xf32>
    %450 = arith.addf %448, %449 : vector<1x96xf32>
    %cst_79 = arith.constant 3.000000e+00 : f32
    %451 = vector.broadcast %cst_79 : f32 to vector<1x96xf32>
    %452 = arith.addf %450, %451 : vector<1x96xf32>
    %cst_80 = arith.constant 0.000000e+00 : f32
    %cst_81 = arith.constant 6.000000e+00 : f32
    %453 = vector.broadcast %cst_80 : f32 to vector<1x96xf32>
    %454 = arith.maximumf %453, %452 : vector<1x96xf32>
    %455 = vector.broadcast %cst_81 : f32 to vector<1x96xf32>
    %456 = arith.minimumf %455, %454 : vector<1x96xf32>
    %cst_82 = arith.constant 0.166666672 : f32
    %457 = vector.broadcast %cst_82 : f32 to vector<1x96xf32>
    %458 = arith.mulf %456, %457 : vector<1x96xf32>
    %459 = vector.broadcast %458 : vector<1x96xf32> to vector<4x96xf32>
    %460 = arith.mulf %434, %459 : vector<4x96xf32>
    %c78 = arith.constant 78 : index
    %c0_83 = arith.constant 0 : index
    %461 = vector.load %arg3[%c78, %c0_83] : memref<152x256xf32, #tpu.memory_space<vmem>>, vector<2x40xf32>
    %462 = arith.truncf %460 : vector<4x96xf32> to vector<4x96xbf16>
    %c1375 = arith.constant 1375 : index
    %c0_84 = arith.constant 0 : index
    %463 = vector.load %arg2[%c1375, %c0_84] : memref<3472x256xbf16, #tpu.memory_space<vmem>>, vector<96x40xbf16>
    %cst_85 = arith.constant dense<0.000000e+00> : vector<4x40xf32>
    %464 = tpu.matmul %462, %463, %cst_85 {dimension_numbers = #tpu.dot_dimension_numbers<[1], [0], [0], [1], [0, 0, 1, 1], [], []>} : vector<4x96xbf16>, vector<96x40xbf16>, vector<4x40xf32> -> vector<4x40xf32>
    %465 = vector.extract_strided_slice %461 {offsets = [0, 0], sizes = [1, 40], strides = [1, 1]} : vector<2x40xf32> to vector<1x40xf32>
    %466 = vector.broadcast %465 : vector<1x40xf32> to vector<4x40xf32>
    %467 = arith.mulf %464, %466 : vector<4x40xf32>
    %468 = vector.extract_strided_slice %461 {offsets = [1, 0], sizes = [1, 40], strides = [1, 1]} : vector<2x40xf32> to vector<1x40xf32>
    %469 = vector.broadcast %468 : vector<1x40xf32> to vector<4x40xf32>
    %470 = arith.addf %467, %469 : vector<4x40xf32>
    %c80 = arith.constant 80 : index
    %c0_86 = arith.constant 0 : index
    %471 = vector.load %arg3[%c80, %c0_86] : memref<152x256xf32, #tpu.memory_space<vmem>>, vector<2x240xf32>
    %472 = arith.truncf %470 : vector<4x40xf32> to vector<4x40xbf16>
    %c1507 = arith.constant 1507 : index
    %c0_87 = arith.constant 0 : index
    %473 = vector.load %arg2[%c1507, %c0_87] : memref<3472x256xbf16, #tpu.memory_space<vmem>>, vector<40x240xbf16>
    %cst_88 = arith.constant dense<0.000000e+00> : vector<4x240xf32>
    %474 = tpu.matmul %472, %473, %cst_88 {dimension_numbers = #tpu.dot_dimension_numbers<[1], [0], [0], [1], [0, 0, 1, 1], [], []>} : vector<4x40xbf16>, vector<40x240xbf16>, vector<4x240xf32> -> vector<4x240xf32>
    %475 = vector.extract_strided_slice %471 {offsets = [0, 0], sizes = [1, 240], strides = [1, 1]} : vector<2x240xf32> to vector<1x240xf32>
    %476 = vector.broadcast %475 : vector<1x240xf32> to vector<4x240xf32>
    %477 = arith.mulf %474, %476 : vector<4x240xf32>
    %478 = vector.extract_strided_slice %471 {offsets = [1, 0], sizes = [1, 240], strides = [1, 1]} : vector<2x240xf32> to vector<1x240xf32>
    %479 = vector.broadcast %478 : vector<1x240xf32> to vector<4x240xf32>
    %480 = arith.addf %477, %479 : vector<4x240xf32>
    %cst_89 = arith.constant 3.000000e+00 : f32
    %481 = vector.broadcast %cst_89 : f32 to vector<4x240xf32>
    %482 = arith.addf %480, %481 : vector<4x240xf32>
    %cst_90 = arith.constant 0.000000e+00 : f32
    %cst_91 = arith.constant 6.000000e+00 : f32
    %483 = vector.broadcast %cst_90 : f32 to vector<4x240xf32>
    %484 = arith.maximumf %483, %482 : vector<4x240xf32>
    %485 = vector.broadcast %cst_91 : f32 to vector<4x240xf32>
    %486 = arith.minimumf %485, %484 : vector<4x240xf32>
    %487 = arith.mulf %480, %486 : vector<4x240xf32>
    %cst_92 = arith.constant 0.166666672 : f32
    %488 = vector.broadcast %cst_92 : f32 to vector<4x240xf32>
    %489 = arith.mulf %487, %488 : vector<4x240xf32>
    %c1471 = arith.constant 1471 : index
    %c0_93 = arith.constant 0 : index
    %490 = vector.load %arg2[%c1471, %c0_93] : memref<3472x256xbf16, #tpu.memory_space<vmem>>, vector<36x4xbf16>
    %491 = arith.truncf %489 : vector<4x240xf32> to vector<4x240xbf16>
    %cst_94 = arith.constant dense<0.000000e+00> : vector<36x240xf32>
    %492 = tpu.matmul %490, %491, %cst_94 {dimension_numbers = #tpu.dot_dimension_numbers<[1], [0], [0], [1], [0, 0, 1, 1], [], []>} : vector<36x4xbf16>, vector<4x240xbf16>, vector<36x240xf32> -> vector<36x240xf32>
    %c82 = arith.constant 82 : index
    %c0_95 = arith.constant 0 : index
    %493 = vector.load %arg3[%c82, %c0_95] : memref<152x256xf32, #tpu.memory_space<vmem>>, vector<9x240xf32>
    %494 = vector.extract_strided_slice %492 {offsets = [0, 0], sizes = [4, 240], strides = [1, 1]} : vector<36x240xf32> to vector<4x240xf32>
    %495 = vector.extract_strided_slice %493 {offsets = [0, 0], sizes = [1, 240], strides = [1, 1]} : vector<9x240xf32> to vector<1x240xf32>
    %496 = vector.broadcast %495 : vector<1x240xf32> to vector<4x240xf32>
    %497 = arith.mulf %494, %496 : vector<4x240xf32>
    %498 = vector.extract_strided_slice %492 {offsets = [4, 0], sizes = [4, 240], strides = [1, 1]} : vector<36x240xf32> to vector<4x240xf32>
    %499 = vector.extract_strided_slice %493 {offsets = [1, 0], sizes = [1, 240], strides = [1, 1]} : vector<9x240xf32> to vector<1x240xf32>
    %500 = vector.broadcast %499 : vector<1x240xf32> to vector<4x240xf32>
    %501 = arith.mulf %498, %500 : vector<4x240xf32>
    %502 = arith.addf %497, %501 : vector<4x240xf32>
    %503 = vector.extract_strided_slice %492 {offsets = [8, 0], sizes = [4, 240], strides = [1, 1]} : vector<36x240xf32> to vector<4x240xf32>
    %504 = vector.extract_strided_slice %493 {offsets = [2, 0], sizes = [1, 240], strides = [1, 1]} : vector<9x240xf32> to vector<1x240xf32>
    %505 = vector.broadcast %504 : vector<1x240xf32> to vector<4x240xf32>
    %506 = arith.mulf %503, %505 : vector<4x240xf32>
    %507 = arith.addf %502, %506 : vector<4x240xf32>
    %508 = vector.extract_strided_slice %492 {offsets = [12, 0], sizes = [4, 240], strides = [1, 1]} : vector<36x240xf32> to vector<4x240xf32>
    %509 = vector.extract_strided_slice %493 {offsets = [3, 0], sizes = [1, 240], strides = [1, 1]} : vector<9x240xf32> to vector<1x240xf32>
    %510 = vector.broadcast %509 : vector<1x240xf32> to vector<4x240xf32>
    %511 = arith.mulf %508, %510 : vector<4x240xf32>
    %512 = arith.addf %507, %511 : vector<4x240xf32>
    %513 = vector.extract_strided_slice %492 {offsets = [16, 0], sizes = [4, 240], strides = [1, 1]} : vector<36x240xf32> to vector<4x240xf32>
    %514 = vector.extract_strided_slice %493 {offsets = [4, 0], sizes = [1, 240], strides = [1, 1]} : vector<9x240xf32> to vector<1x240xf32>
    %515 = vector.broadcast %514 : vector<1x240xf32> to vector<4x240xf32>
    %516 = arith.mulf %513, %515 : vector<4x240xf32>
    %517 = arith.addf %512, %516 : vector<4x240xf32>
    %518 = vector.extract_strided_slice %492 {offsets = [20, 0], sizes = [4, 240], strides = [1, 1]} : vector<36x240xf32> to vector<4x240xf32>
    %519 = vector.extract_strided_slice %493 {offsets = [5, 0], sizes = [1, 240], strides = [1, 1]} : vector<9x240xf32> to vector<1x240xf32>
    %520 = vector.broadcast %519 : vector<1x240xf32> to vector<4x240xf32>
    %521 = arith.mulf %518, %520 : vector<4x240xf32>
    %522 = arith.addf %517, %521 : vector<4x240xf32>
    %523 = vector.extract_strided_slice %492 {offsets = [24, 0], sizes = [4, 240], strides = [1, 1]} : vector<36x240xf32> to vector<4x240xf32>
    %524 = vector.extract_strided_slice %493 {offsets = [6, 0], sizes = [1, 240], strides = [1, 1]} : vector<9x240xf32> to vector<1x240xf32>
    %525 = vector.broadcast %524 : vector<1x240xf32> to vector<4x240xf32>
    %526 = arith.mulf %523, %525 : vector<4x240xf32>
    %527 = arith.addf %522, %526 : vector<4x240xf32>
    %528 = vector.extract_strided_slice %492 {offsets = [28, 0], sizes = [4, 240], strides = [1, 1]} : vector<36x240xf32> to vector<4x240xf32>
    %529 = vector.extract_strided_slice %493 {offsets = [7, 0], sizes = [1, 240], strides = [1, 1]} : vector<9x240xf32> to vector<1x240xf32>
    %530 = vector.broadcast %529 : vector<1x240xf32> to vector<4x240xf32>
    %531 = arith.mulf %528, %530 : vector<4x240xf32>
    %532 = arith.addf %527, %531 : vector<4x240xf32>
    %533 = vector.extract_strided_slice %492 {offsets = [32, 0], sizes = [4, 240], strides = [1, 1]} : vector<36x240xf32> to vector<4x240xf32>
    %534 = vector.extract_strided_slice %493 {offsets = [8, 0], sizes = [1, 240], strides = [1, 1]} : vector<9x240xf32> to vector<1x240xf32>
    %535 = vector.broadcast %534 : vector<1x240xf32> to vector<4x240xf32>
    %536 = arith.mulf %533, %535 : vector<4x240xf32>
    %537 = arith.addf %532, %536 : vector<4x240xf32>
    %c91 = arith.constant 91 : index
    %c0_96 = arith.constant 0 : index
    %538 = vector.load %arg3[%c91, %c0_96] : memref<152x256xf32, #tpu.memory_space<vmem>>, vector<2x240xf32>
    %539 = vector.extract_strided_slice %538 {offsets = [0, 0], sizes = [1, 240], strides = [1, 1]} : vector<2x240xf32> to vector<1x240xf32>
    %540 = vector.broadcast %539 : vector<1x240xf32> to vector<4x240xf32>
    %541 = arith.mulf %537, %540 : vector<4x240xf32>
    %542 = vector.extract_strided_slice %538 {offsets = [1, 0], sizes = [1, 240], strides = [1, 1]} : vector<2x240xf32> to vector<1x240xf32>
    %543 = vector.broadcast %542 : vector<1x240xf32> to vector<4x240xf32>
    %544 = arith.addf %541, %543 : vector<4x240xf32>
    %cst_97 = arith.constant 3.000000e+00 : f32
    %545 = vector.broadcast %cst_97 : f32 to vector<4x240xf32>
    %546 = arith.addf %544, %545 : vector<4x240xf32>
    %cst_98 = arith.constant 0.000000e+00 : f32
    %cst_99 = arith.constant 6.000000e+00 : f32
    %547 = vector.broadcast %cst_98 : f32 to vector<4x240xf32>
    %548 = arith.maximumf %547, %546 : vector<4x240xf32>
    %549 = vector.broadcast %cst_99 : f32 to vector<4x240xf32>
    %550 = arith.minimumf %549, %548 : vector<4x240xf32>
    %551 = arith.mulf %544, %550 : vector<4x240xf32>
    %cst_100 = arith.constant 0.166666672 : f32
    %552 = vector.broadcast %cst_100 : f32 to vector<4x240xf32>
    %553 = arith.mulf %551, %552 : vector<4x240xf32>
    %cst_101 = arith.constant dense<0.000000e+00> : vector<240xf32>
    %554 = vector.multi_reduction <add>, %553, %cst_101 [0] : vector<4x240xf32> to vector<240xf32>
    %555 = vector.shape_cast %554 : vector<240xf32> to vector<1x240xf32>
    %cst_102 = arith.constant 2.500000e-01 : f32
    %556 = vector.broadcast %cst_102 : f32 to vector<1x240xf32>
    %557 = arith.mulf %555, %556 : vector<1x240xf32>
    %558 = arith.truncf %557 : vector<1x240xf32> to vector<1x240xbf16>
    %c1547 = arith.constant 1547 : index
    %c0_103 = arith.constant 0 : index
    %559 = vector.load %arg2[%c1547, %c0_103] : memref<3472x256xbf16, #tpu.memory_space<vmem>>, vector<240x64xbf16>
    %cst_104 = arith.constant dense<0.000000e+00> : vector<1x64xf32>
    %560 = tpu.matmul %558, %559, %cst_104 {dimension_numbers = #tpu.dot_dimension_numbers<[1], [0], [0], [1], [0, 0, 1, 1], [], []>} : vector<1x240xbf16>, vector<240x64xbf16>, vector<1x64xf32> -> vector<1x64xf32>
    %c93 = arith.constant 93 : index
    %c0_105 = arith.constant 0 : index
    %561 = vector.load %arg3[%c93, %c0_105] : memref<152x256xf32, #tpu.memory_space<vmem>>, vector<1x64xf32>
    %562 = arith.addf %560, %561 : vector<1x64xf32>
    %cst_106 = arith.constant 0.000000e+00 : f32
    %563 = vector.broadcast %cst_106 : f32 to vector<1x64xf32>
    %564 = arith.maximumf %562, %563 : vector<1x64xf32>
    %565 = arith.truncf %564 : vector<1x64xf32> to vector<1x64xbf16>
    %c1787 = arith.constant 1787 : index
    %c0_107 = arith.constant 0 : index
    %566 = vector.load %arg2[%c1787, %c0_107] : memref<3472x256xbf16, #tpu.memory_space<vmem>>, vector<64x240xbf16>
    %cst_108 = arith.constant dense<0.000000e+00> : vector<1x240xf32>
    %567 = tpu.matmul %565, %566, %cst_108 {dimension_numbers = #tpu.dot_dimension_numbers<[1], [0], [0], [1], [0, 0, 1, 1], [], []>} : vector<1x64xbf16>, vector<64x240xbf16>, vector<1x240xf32> -> vector<1x240xf32>
    %c94 = arith.constant 94 : index
    %c0_109 = arith.constant 0 : index
    %568 = vector.load %arg3[%c94, %c0_109] : memref<152x256xf32, #tpu.memory_space<vmem>>, vector<1x240xf32>
    %569 = arith.addf %567, %568 : vector<1x240xf32>
    %cst_110 = arith.constant 3.000000e+00 : f32
    %570 = vector.broadcast %cst_110 : f32 to vector<1x240xf32>
    %571 = arith.addf %569, %570 : vector<1x240xf32>
    %cst_111 = arith.constant 0.000000e+00 : f32
    %cst_112 = arith.constant 6.000000e+00 : f32
    %572 = vector.broadcast %cst_111 : f32 to vector<1x240xf32>
    %573 = arith.maximumf %572, %571 : vector<1x240xf32>
    %574 = vector.broadcast %cst_112 : f32 to vector<1x240xf32>
    %575 = arith.minimumf %574, %573 : vector<1x240xf32>
    %cst_113 = arith.constant 0.166666672 : f32
    %576 = vector.broadcast %cst_113 : f32 to vector<1x240xf32>
    %577 = arith.mulf %575, %576 : vector<1x240xf32>
    %578 = vector.broadcast %577 : vector<1x240xf32> to vector<4x240xf32>
    %579 = arith.mulf %553, %578 : vector<4x240xf32>
    %c95 = arith.constant 95 : index
    %c0_114 = arith.constant 0 : index
    %580 = vector.load %arg3[%c95, %c0_114] : memref<152x256xf32, #tpu.memory_space<vmem>>, vector<2x40xf32>
    %581 = arith.truncf %579 : vector<4x240xf32> to vector<4x240xbf16>
    %c1851 = arith.constant 1851 : index
    %c0_115 = arith.constant 0 : index
    %582 = vector.load %arg2[%c1851, %c0_115] : memref<3472x256xbf16, #tpu.memory_space<vmem>>, vector<240x40xbf16>
    %cst_116 = arith.constant dense<0.000000e+00> : vector<4x40xf32>
    %583 = tpu.matmul %581, %582, %cst_116 {dimension_numbers = #tpu.dot_dimension_numbers<[1], [0], [0], [1], [0, 0, 1, 1], [], []>} : vector<4x240xbf16>, vector<240x40xbf16>, vector<4x40xf32> -> vector<4x40xf32>
    %584 = vector.extract_strided_slice %580 {offsets = [0, 0], sizes = [1, 40], strides = [1, 1]} : vector<2x40xf32> to vector<1x40xf32>
    %585 = vector.broadcast %584 : vector<1x40xf32> to vector<4x40xf32>
    %586 = arith.mulf %583, %585 : vector<4x40xf32>
    %587 = vector.extract_strided_slice %580 {offsets = [1, 0], sizes = [1, 40], strides = [1, 1]} : vector<2x40xf32> to vector<1x40xf32>
    %588 = vector.broadcast %587 : vector<1x40xf32> to vector<4x40xf32>
    %589 = arith.addf %586, %588 : vector<4x40xf32>
    %590 = arith.addf %589, %470 : vector<4x40xf32>
    %c97 = arith.constant 97 : index
    %c0_117 = arith.constant 0 : index
    %591 = vector.load %arg3[%c97, %c0_117] : memref<152x256xf32, #tpu.memory_space<vmem>>, vector<2x240xf32>
    %592 = arith.truncf %590 : vector<4x40xf32> to vector<4x40xbf16>
    %c2127 = arith.constant 2127 : index
    %c0_118 = arith.constant 0 : index
    %593 = vector.load %arg2[%c2127, %c0_118] : memref<3472x256xbf16, #tpu.memory_space<vmem>>, vector<40x240xbf16>
    %cst_119 = arith.constant dense<0.000000e+00> : vector<4x240xf32>
    %594 = tpu.matmul %592, %593, %cst_119 {dimension_numbers = #tpu.dot_dimension_numbers<[1], [0], [0], [1], [0, 0, 1, 1], [], []>} : vector<4x40xbf16>, vector<40x240xbf16>, vector<4x240xf32> -> vector<4x240xf32>
    %595 = vector.extract_strided_slice %591 {offsets = [0, 0], sizes = [1, 240], strides = [1, 1]} : vector<2x240xf32> to vector<1x240xf32>
    %596 = vector.broadcast %595 : vector<1x240xf32> to vector<4x240xf32>
    %597 = arith.mulf %594, %596 : vector<4x240xf32>
    %598 = vector.extract_strided_slice %591 {offsets = [1, 0], sizes = [1, 240], strides = [1, 1]} : vector<2x240xf32> to vector<1x240xf32>
    %599 = vector.broadcast %598 : vector<1x240xf32> to vector<4x240xf32>
    %600 = arith.addf %597, %599 : vector<4x240xf32>
    %cst_120 = arith.constant 3.000000e+00 : f32
    %601 = vector.broadcast %cst_120 : f32 to vector<4x240xf32>
    %602 = arith.addf %600, %601 : vector<4x240xf32>
    %cst_121 = arith.constant 0.000000e+00 : f32
    %cst_122 = arith.constant 6.000000e+00 : f32
    %603 = vector.broadcast %cst_121 : f32 to vector<4x240xf32>
    %604 = arith.maximumf %603, %602 : vector<4x240xf32>
    %605 = vector.broadcast %cst_122 : f32 to vector<4x240xf32>
    %606 = arith.minimumf %605, %604 : vector<4x240xf32>
    %607 = arith.mulf %600, %606 : vector<4x240xf32>
    %cst_123 = arith.constant 0.166666672 : f32
    %608 = vector.broadcast %cst_123 : f32 to vector<4x240xf32>
    %609 = arith.mulf %607, %608 : vector<4x240xf32>
    %c2091 = arith.constant 2091 : index
    %c0_124 = arith.constant 0 : index
    %610 = vector.load %arg2[%c2091, %c0_124] : memref<3472x256xbf16, #tpu.memory_space<vmem>>, vector<36x4xbf16>
    %611 = arith.truncf %609 : vector<4x240xf32> to vector<4x240xbf16>
    %cst_125 = arith.constant dense<0.000000e+00> : vector<36x240xf32>
    %612 = tpu.matmul %610, %611, %cst_125 {dimension_numbers = #tpu.dot_dimension_numbers<[1], [0], [0], [1], [0, 0, 1, 1], [], []>} : vector<36x4xbf16>, vector<4x240xbf16>, vector<36x240xf32> -> vector<36x240xf32>
    %c99 = arith.constant 99 : index
    %c0_126 = arith.constant 0 : index
    %613 = vector.load %arg3[%c99, %c0_126] : memref<152x256xf32, #tpu.memory_space<vmem>>, vector<9x240xf32>
    %614 = vector.extract_strided_slice %612 {offsets = [0, 0], sizes = [4, 240], strides = [1, 1]} : vector<36x240xf32> to vector<4x240xf32>
    %615 = vector.extract_strided_slice %613 {offsets = [0, 0], sizes = [1, 240], strides = [1, 1]} : vector<9x240xf32> to vector<1x240xf32>
    %616 = vector.broadcast %615 : vector<1x240xf32> to vector<4x240xf32>
    %617 = arith.mulf %614, %616 : vector<4x240xf32>
    %618 = vector.extract_strided_slice %612 {offsets = [4, 0], sizes = [4, 240], strides = [1, 1]} : vector<36x240xf32> to vector<4x240xf32>
    %619 = vector.extract_strided_slice %613 {offsets = [1, 0], sizes = [1, 240], strides = [1, 1]} : vector<9x240xf32> to vector<1x240xf32>
    %620 = vector.broadcast %619 : vector<1x240xf32> to vector<4x240xf32>
    %621 = arith.mulf %618, %620 : vector<4x240xf32>
    %622 = arith.addf %617, %621 : vector<4x240xf32>
    %623 = vector.extract_strided_slice %612 {offsets = [8, 0], sizes = [4, 240], strides = [1, 1]} : vector<36x240xf32> to vector<4x240xf32>
    %624 = vector.extract_strided_slice %613 {offsets = [2, 0], sizes = [1, 240], strides = [1, 1]} : vector<9x240xf32> to vector<1x240xf32>
    %625 = vector.broadcast %624 : vector<1x240xf32> to vector<4x240xf32>
    %626 = arith.mulf %623, %625 : vector<4x240xf32>
    %627 = arith.addf %622, %626 : vector<4x240xf32>
    %628 = vector.extract_strided_slice %612 {offsets = [12, 0], sizes = [4, 240], strides = [1, 1]} : vector<36x240xf32> to vector<4x240xf32>
    %629 = vector.extract_strided_slice %613 {offsets = [3, 0], sizes = [1, 240], strides = [1, 1]} : vector<9x240xf32> to vector<1x240xf32>
    %630 = vector.broadcast %629 : vector<1x240xf32> to vector<4x240xf32>
    %631 = arith.mulf %628, %630 : vector<4x240xf32>
    %632 = arith.addf %627, %631 : vector<4x240xf32>
    %633 = vector.extract_strided_slice %612 {offsets = [16, 0], sizes = [4, 240], strides = [1, 1]} : vector<36x240xf32> to vector<4x240xf32>
    %634 = vector.extract_strided_slice %613 {offsets = [4, 0], sizes = [1, 240], strides = [1, 1]} : vector<9x240xf32> to vector<1x240xf32>
    %635 = vector.broadcast %634 : vector<1x240xf32> to vector<4x240xf32>
    %636 = arith.mulf %633, %635 : vector<4x240xf32>
    %637 = arith.addf %632, %636 : vector<4x240xf32>
    %638 = vector.extract_strided_slice %612 {offsets = [20, 0], sizes = [4, 240], strides = [1, 1]} : vector<36x240xf32> to vector<4x240xf32>
    %639 = vector.extract_strided_slice %613 {offsets = [5, 0], sizes = [1, 240], strides = [1, 1]} : vector<9x240xf32> to vector<1x240xf32>
    %640 = vector.broadcast %639 : vector<1x240xf32> to vector<4x240xf32>
    %641 = arith.mulf %638, %640 : vector<4x240xf32>
    %642 = arith.addf %637, %641 : vector<4x240xf32>
    %643 = vector.extract_strided_slice %612 {offsets = [24, 0], sizes = [4, 240], strides = [1, 1]} : vector<36x240xf32> to vector<4x240xf32>
    %644 = vector.extract_strided_slice %613 {offsets = [6, 0], sizes = [1, 240], strides = [1, 1]} : vector<9x240xf32> to vector<1x240xf32>
    %645 = vector.broadcast %644 : vector<1x240xf32> to vector<4x240xf32>
    %646 = arith.mulf %643, %645 : vector<4x240xf32>
    %647 = arith.addf %642, %646 : vector<4x240xf32>
    %648 = vector.extract_strided_slice %612 {offsets = [28, 0], sizes = [4, 240], strides = [1, 1]} : vector<36x240xf32> to vector<4x240xf32>
    %649 = vector.extract_strided_slice %613 {offsets = [7, 0], sizes = [1, 240], strides = [1, 1]} : vector<9x240xf32> to vector<1x240xf32>
    %650 = vector.broadcast %649 : vector<1x240xf32> to vector<4x240xf32>
    %651 = arith.mulf %648, %650 : vector<4x240xf32>
    %652 = arith.addf %647, %651 : vector<4x240xf32>
    %653 = vector.extract_strided_slice %612 {offsets = [32, 0], sizes = [4, 240], strides = [1, 1]} : vector<36x240xf32> to vector<4x240xf32>
    %654 = vector.extract_strided_slice %613 {offsets = [8, 0], sizes = [1, 240], strides = [1, 1]} : vector<9x240xf32> to vector<1x240xf32>
    %655 = vector.broadcast %654 : vector<1x240xf32> to vector<4x240xf32>
    %656 = arith.mulf %653, %655 : vector<4x240xf32>
    %657 = arith.addf %652, %656 : vector<4x240xf32>
    %c108 = arith.constant 108 : index
    %c0_127 = arith.constant 0 : index
    %658 = vector.load %arg3[%c108, %c0_127] : memref<152x256xf32, #tpu.memory_space<vmem>>, vector<2x240xf32>
    %659 = vector.extract_strided_slice %658 {offsets = [0, 0], sizes = [1, 240], strides = [1, 1]} : vector<2x240xf32> to vector<1x240xf32>
    %660 = vector.broadcast %659 : vector<1x240xf32> to vector<4x240xf32>
    %661 = arith.mulf %657, %660 : vector<4x240xf32>
    %662 = vector.extract_strided_slice %658 {offsets = [1, 0], sizes = [1, 240], strides = [1, 1]} : vector<2x240xf32> to vector<1x240xf32>
    %663 = vector.broadcast %662 : vector<1x240xf32> to vector<4x240xf32>
    %664 = arith.addf %661, %663 : vector<4x240xf32>
    %cst_128 = arith.constant 3.000000e+00 : f32
    %665 = vector.broadcast %cst_128 : f32 to vector<4x240xf32>
    %666 = arith.addf %664, %665 : vector<4x240xf32>
    %cst_129 = arith.constant 0.000000e+00 : f32
    %cst_130 = arith.constant 6.000000e+00 : f32
    %667 = vector.broadcast %cst_129 : f32 to vector<4x240xf32>
    %668 = arith.maximumf %667, %666 : vector<4x240xf32>
    %669 = vector.broadcast %cst_130 : f32 to vector<4x240xf32>
    %670 = arith.minimumf %669, %668 : vector<4x240xf32>
    %671 = arith.mulf %664, %670 : vector<4x240xf32>
    %cst_131 = arith.constant 0.166666672 : f32
    %672 = vector.broadcast %cst_131 : f32 to vector<4x240xf32>
    %673 = arith.mulf %671, %672 : vector<4x240xf32>
    %cst_132 = arith.constant dense<0.000000e+00> : vector<240xf32>
    %674 = vector.multi_reduction <add>, %673, %cst_132 [0] : vector<4x240xf32> to vector<240xf32>
    %675 = vector.shape_cast %674 : vector<240xf32> to vector<1x240xf32>
    %cst_133 = arith.constant 2.500000e-01 : f32
    %676 = vector.broadcast %cst_133 : f32 to vector<1x240xf32>
    %677 = arith.mulf %675, %676 : vector<1x240xf32>
    %678 = arith.truncf %677 : vector<1x240xf32> to vector<1x240xbf16>
    %c2167 = arith.constant 2167 : index
    %c0_134 = arith.constant 0 : index
    %679 = vector.load %arg2[%c2167, %c0_134] : memref<3472x256xbf16, #tpu.memory_space<vmem>>, vector<240x64xbf16>
    %cst_135 = arith.constant dense<0.000000e+00> : vector<1x64xf32>
    %680 = tpu.matmul %678, %679, %cst_135 {dimension_numbers = #tpu.dot_dimension_numbers<[1], [0], [0], [1], [0, 0, 1, 1], [], []>} : vector<1x240xbf16>, vector<240x64xbf16>, vector<1x64xf32> -> vector<1x64xf32>
    %c110 = arith.constant 110 : index
    %c0_136 = arith.constant 0 : index
    %681 = vector.load %arg3[%c110, %c0_136] : memref<152x256xf32, #tpu.memory_space<vmem>>, vector<1x64xf32>
    %682 = arith.addf %680, %681 : vector<1x64xf32>
    %cst_137 = arith.constant 0.000000e+00 : f32
    %683 = vector.broadcast %cst_137 : f32 to vector<1x64xf32>
    %684 = arith.maximumf %682, %683 : vector<1x64xf32>
    %685 = arith.truncf %684 : vector<1x64xf32> to vector<1x64xbf16>
    %c2407 = arith.constant 2407 : index
    %c0_138 = arith.constant 0 : index
    %686 = vector.load %arg2[%c2407, %c0_138] : memref<3472x256xbf16, #tpu.memory_space<vmem>>, vector<64x240xbf16>
    %cst_139 = arith.constant dense<0.000000e+00> : vector<1x240xf32>
    %687 = tpu.matmul %685, %686, %cst_139 {dimension_numbers = #tpu.dot_dimension_numbers<[1], [0], [0], [1], [0, 0, 1, 1], [], []>} : vector<1x64xbf16>, vector<64x240xbf16>, vector<1x240xf32> -> vector<1x240xf32>
    %c111 = arith.constant 111 : index
    %c0_140 = arith.constant 0 : index
    %688 = vector.load %arg3[%c111, %c0_140] : memref<152x256xf32, #tpu.memory_space<vmem>>, vector<1x240xf32>
    %689 = arith.addf %687, %688 : vector<1x240xf32>
    %cst_141 = arith.constant 3.000000e+00 : f32
    %690 = vector.broadcast %cst_141 : f32 to vector<1x240xf32>
    %691 = arith.addf %689, %690 : vector<1x240xf32>
    %cst_142 = arith.constant 0.000000e+00 : f32
    %cst_143 = arith.constant 6.000000e+00 : f32
    %692 = vector.broadcast %cst_142 : f32 to vector<1x240xf32>
    %693 = arith.maximumf %692, %691 : vector<1x240xf32>
    %694 = vector.broadcast %cst_143 : f32 to vector<1x240xf32>
    %695 = arith.minimumf %694, %693 : vector<1x240xf32>
    %cst_144 = arith.constant 0.166666672 : f32
    %696 = vector.broadcast %cst_144 : f32 to vector<1x240xf32>
    %697 = arith.mulf %695, %696 : vector<1x240xf32>
    %698 = vector.broadcast %697 : vector<1x240xf32> to vector<4x240xf32>
    %699 = arith.mulf %673, %698 : vector<4x240xf32>
    %c112 = arith.constant 112 : index
    %c0_145 = arith.constant 0 : index
    %700 = vector.load %arg3[%c112, %c0_145] : memref<152x256xf32, #tpu.memory_space<vmem>>, vector<2x40xf32>
    %701 = arith.truncf %699 : vector<4x240xf32> to vector<4x240xbf16>
    %c2471 = arith.constant 2471 : index
    %c0_146 = arith.constant 0 : index
    %702 = vector.load %arg2[%c2471, %c0_146] : memref<3472x256xbf16, #tpu.memory_space<vmem>>, vector<240x40xbf16>
    %cst_147 = arith.constant dense<0.000000e+00> : vector<4x40xf32>
    %703 = tpu.matmul %701, %702, %cst_147 {dimension_numbers = #tpu.dot_dimension_numbers<[1], [0], [0], [1], [0, 0, 1, 1], [], []>} : vector<4x240xbf16>, vector<240x40xbf16>, vector<4x40xf32> -> vector<4x40xf32>
    %704 = vector.extract_strided_slice %700 {offsets = [0, 0], sizes = [1, 40], strides = [1, 1]} : vector<2x40xf32> to vector<1x40xf32>
    %705 = vector.broadcast %704 : vector<1x40xf32> to vector<4x40xf32>
    %706 = arith.mulf %703, %705 : vector<4x40xf32>
    %707 = vector.extract_strided_slice %700 {offsets = [1, 0], sizes = [1, 40], strides = [1, 1]} : vector<2x40xf32> to vector<1x40xf32>
    %708 = vector.broadcast %707 : vector<1x40xf32> to vector<4x40xf32>
    %709 = arith.addf %706, %708 : vector<4x40xf32>
    %710 = arith.addf %709, %590 : vector<4x40xf32>
    %c114 = arith.constant 114 : index
    %c0_148 = arith.constant 0 : index
    %711 = vector.load %arg3[%c114, %c0_148] : memref<152x256xf32, #tpu.memory_space<vmem>>, vector<2x120xf32>
    %712 = arith.truncf %710 : vector<4x40xf32> to vector<4x40xbf16>
    %c2747 = arith.constant 2747 : index
    %c0_149 = arith.constant 0 : index
    %713 = vector.load %arg2[%c2747, %c0_149] : memref<3472x256xbf16, #tpu.memory_space<vmem>>, vector<40x120xbf16>
    %cst_150 = arith.constant dense<0.000000e+00> : vector<4x120xf32>
    %714 = tpu.matmul %712, %713, %cst_150 {dimension_numbers = #tpu.dot_dimension_numbers<[1], [0], [0], [1], [0, 0, 1, 1], [], []>} : vector<4x40xbf16>, vector<40x120xbf16>, vector<4x120xf32> -> vector<4x120xf32>
    %715 = vector.extract_strided_slice %711 {offsets = [0, 0], sizes = [1, 120], strides = [1, 1]} : vector<2x120xf32> to vector<1x120xf32>
    %716 = vector.broadcast %715 : vector<1x120xf32> to vector<4x120xf32>
    %717 = arith.mulf %714, %716 : vector<4x120xf32>
    %718 = vector.extract_strided_slice %711 {offsets = [1, 0], sizes = [1, 120], strides = [1, 1]} : vector<2x120xf32> to vector<1x120xf32>
    %719 = vector.broadcast %718 : vector<1x120xf32> to vector<4x120xf32>
    %720 = arith.addf %717, %719 : vector<4x120xf32>
    %cst_151 = arith.constant 3.000000e+00 : f32
    %721 = vector.broadcast %cst_151 : f32 to vector<4x120xf32>
    %722 = arith.addf %720, %721 : vector<4x120xf32>
    %cst_152 = arith.constant 0.000000e+00 : f32
    %cst_153 = arith.constant 6.000000e+00 : f32
    %723 = vector.broadcast %cst_152 : f32 to vector<4x120xf32>
    %724 = arith.maximumf %723, %722 : vector<4x120xf32>
    %725 = vector.broadcast %cst_153 : f32 to vector<4x120xf32>
    %726 = arith.minimumf %725, %724 : vector<4x120xf32>
    %727 = arith.mulf %720, %726 : vector<4x120xf32>
    %cst_154 = arith.constant 0.166666672 : f32
    %728 = vector.broadcast %cst_154 : f32 to vector<4x120xf32>
    %729 = arith.mulf %727, %728 : vector<4x120xf32>
    %c2711 = arith.constant 2711 : index
    %c0_155 = arith.constant 0 : index
    %730 = vector.load %arg2[%c2711, %c0_155] : memref<3472x256xbf16, #tpu.memory_space<vmem>>, vector<36x4xbf16>
    %731 = arith.truncf %729 : vector<4x120xf32> to vector<4x120xbf16>
    %cst_156 = arith.constant dense<0.000000e+00> : vector<36x120xf32>
    %732 = tpu.matmul %730, %731, %cst_156 {dimension_numbers = #tpu.dot_dimension_numbers<[1], [0], [0], [1], [0, 0, 1, 1], [], []>} : vector<36x4xbf16>, vector<4x120xbf16>, vector<36x120xf32> -> vector<36x120xf32>
    %c116 = arith.constant 116 : index
    %c0_157 = arith.constant 0 : index
    %733 = vector.load %arg3[%c116, %c0_157] : memref<152x256xf32, #tpu.memory_space<vmem>>, vector<9x120xf32>
    %734 = vector.extract_strided_slice %732 {offsets = [0, 0], sizes = [4, 120], strides = [1, 1]} : vector<36x120xf32> to vector<4x120xf32>
    %735 = vector.extract_strided_slice %733 {offsets = [0, 0], sizes = [1, 120], strides = [1, 1]} : vector<9x120xf32> to vector<1x120xf32>
    %736 = vector.broadcast %735 : vector<1x120xf32> to vector<4x120xf32>
    %737 = arith.mulf %734, %736 : vector<4x120xf32>
    %738 = vector.extract_strided_slice %732 {offsets = [4, 0], sizes = [4, 120], strides = [1, 1]} : vector<36x120xf32> to vector<4x120xf32>
    %739 = vector.extract_strided_slice %733 {offsets = [1, 0], sizes = [1, 120], strides = [1, 1]} : vector<9x120xf32> to vector<1x120xf32>
    %740 = vector.broadcast %739 : vector<1x120xf32> to vector<4x120xf32>
    %741 = arith.mulf %738, %740 : vector<4x120xf32>
    %742 = arith.addf %737, %741 : vector<4x120xf32>
    %743 = vector.extract_strided_slice %732 {offsets = [8, 0], sizes = [4, 120], strides = [1, 1]} : vector<36x120xf32> to vector<4x120xf32>
    %744 = vector.extract_strided_slice %733 {offsets = [2, 0], sizes = [1, 120], strides = [1, 1]} : vector<9x120xf32> to vector<1x120xf32>
    %745 = vector.broadcast %744 : vector<1x120xf32> to vector<4x120xf32>
    %746 = arith.mulf %743, %745 : vector<4x120xf32>
    %747 = arith.addf %742, %746 : vector<4x120xf32>
    %748 = vector.extract_strided_slice %732 {offsets = [12, 0], sizes = [4, 120], strides = [1, 1]} : vector<36x120xf32> to vector<4x120xf32>
    %749 = vector.extract_strided_slice %733 {offsets = [3, 0], sizes = [1, 120], strides = [1, 1]} : vector<9x120xf32> to vector<1x120xf32>
    %750 = vector.broadcast %749 : vector<1x120xf32> to vector<4x120xf32>
    %751 = arith.mulf %748, %750 : vector<4x120xf32>
    %752 = arith.addf %747, %751 : vector<4x120xf32>
    %753 = vector.extract_strided_slice %732 {offsets = [16, 0], sizes = [4, 120], strides = [1, 1]} : vector<36x120xf32> to vector<4x120xf32>
    %754 = vector.extract_strided_slice %733 {offsets = [4, 0], sizes = [1, 120], strides = [1, 1]} : vector<9x120xf32> to vector<1x120xf32>
    %755 = vector.broadcast %754 : vector<1x120xf32> to vector<4x120xf32>
    %756 = arith.mulf %753, %755 : vector<4x120xf32>
    %757 = arith.addf %752, %756 : vector<4x120xf32>
    %758 = vector.extract_strided_slice %732 {offsets = [20, 0], sizes = [4, 120], strides = [1, 1]} : vector<36x120xf32> to vector<4x120xf32>
    %759 = vector.extract_strided_slice %733 {offsets = [5, 0], sizes = [1, 120], strides = [1, 1]} : vector<9x120xf32> to vector<1x120xf32>
    %760 = vector.broadcast %759 : vector<1x120xf32> to vector<4x120xf32>
    %761 = arith.mulf %758, %760 : vector<4x120xf32>
    %762 = arith.addf %757, %761 : vector<4x120xf32>
    %763 = vector.extract_strided_slice %732 {offsets = [24, 0], sizes = [4, 120], strides = [1, 1]} : vector<36x120xf32> to vector<4x120xf32>
    %764 = vector.extract_strided_slice %733 {offsets = [6, 0], sizes = [1, 120], strides = [1, 1]} : vector<9x120xf32> to vector<1x120xf32>
    %765 = vector.broadcast %764 : vector<1x120xf32> to vector<4x120xf32>
    %766 = arith.mulf %763, %765 : vector<4x120xf32>
    %767 = arith.addf %762, %766 : vector<4x120xf32>
    %768 = vector.extract_strided_slice %732 {offsets = [28, 0], sizes = [4, 120], strides = [1, 1]} : vector<36x120xf32> to vector<4x120xf32>
    %769 = vector.extract_strided_slice %733 {offsets = [7, 0], sizes = [1, 120], strides = [1, 1]} : vector<9x120xf32> to vector<1x120xf32>
    %770 = vector.broadcast %769 : vector<1x120xf32> to vector<4x120xf32>
    %771 = arith.mulf %768, %770 : vector<4x120xf32>
    %772 = arith.addf %767, %771 : vector<4x120xf32>
    %773 = vector.extract_strided_slice %732 {offsets = [32, 0], sizes = [4, 120], strides = [1, 1]} : vector<36x120xf32> to vector<4x120xf32>
    %774 = vector.extract_strided_slice %733 {offsets = [8, 0], sizes = [1, 120], strides = [1, 1]} : vector<9x120xf32> to vector<1x120xf32>
    %775 = vector.broadcast %774 : vector<1x120xf32> to vector<4x120xf32>
    %776 = arith.mulf %773, %775 : vector<4x120xf32>
    %777 = arith.addf %772, %776 : vector<4x120xf32>
    %c125 = arith.constant 125 : index
    %c0_158 = arith.constant 0 : index
    %778 = vector.load %arg3[%c125, %c0_158] : memref<152x256xf32, #tpu.memory_space<vmem>>, vector<2x120xf32>
    %779 = vector.extract_strided_slice %778 {offsets = [0, 0], sizes = [1, 120], strides = [1, 1]} : vector<2x120xf32> to vector<1x120xf32>
    %780 = vector.broadcast %779 : vector<1x120xf32> to vector<4x120xf32>
    %781 = arith.mulf %777, %780 : vector<4x120xf32>
    %782 = vector.extract_strided_slice %778 {offsets = [1, 0], sizes = [1, 120], strides = [1, 1]} : vector<2x120xf32> to vector<1x120xf32>
    %783 = vector.broadcast %782 : vector<1x120xf32> to vector<4x120xf32>
    %784 = arith.addf %781, %783 : vector<4x120xf32>
    %cst_159 = arith.constant 3.000000e+00 : f32
    %785 = vector.broadcast %cst_159 : f32 to vector<4x120xf32>
    %786 = arith.addf %784, %785 : vector<4x120xf32>
    %cst_160 = arith.constant 0.000000e+00 : f32
    %cst_161 = arith.constant 6.000000e+00 : f32
    %787 = vector.broadcast %cst_160 : f32 to vector<4x120xf32>
    %788 = arith.maximumf %787, %786 : vector<4x120xf32>
    %789 = vector.broadcast %cst_161 : f32 to vector<4x120xf32>
    %790 = arith.minimumf %789, %788 : vector<4x120xf32>
    %791 = arith.mulf %784, %790 : vector<4x120xf32>
    %cst_162 = arith.constant 0.166666672 : f32
    %792 = vector.broadcast %cst_162 : f32 to vector<4x120xf32>
    %793 = arith.mulf %791, %792 : vector<4x120xf32>
    %cst_163 = arith.constant dense<0.000000e+00> : vector<120xf32>
    %794 = vector.multi_reduction <add>, %793, %cst_163 [0] : vector<4x120xf32> to vector<120xf32>
    %795 = vector.shape_cast %794 : vector<120xf32> to vector<1x120xf32>
    %cst_164 = arith.constant 2.500000e-01 : f32
    %796 = vector.broadcast %cst_164 : f32 to vector<1x120xf32>
    %797 = arith.mulf %795, %796 : vector<1x120xf32>
    %798 = arith.truncf %797 : vector<1x120xf32> to vector<1x120xbf16>
    %c2787 = arith.constant 2787 : index
    %c0_165 = arith.constant 0 : index
    %799 = vector.load %arg2[%c2787, %c0_165] : memref<3472x256xbf16, #tpu.memory_space<vmem>>, vector<120x32xbf16>
    %cst_166 = arith.constant dense<0.000000e+00> : vector<1x32xf32>
    %800 = tpu.matmul %798, %799, %cst_166 {dimension_numbers = #tpu.dot_dimension_numbers<[1], [0], [0], [1], [0, 0, 1, 1], [], []>} : vector<1x120xbf16>, vector<120x32xbf16>, vector<1x32xf32> -> vector<1x32xf32>
    %c127 = arith.constant 127 : index
    %c0_167 = arith.constant 0 : index
    %801 = vector.load %arg3[%c127, %c0_167] : memref<152x256xf32, #tpu.memory_space<vmem>>, vector<1x32xf32>
    %802 = arith.addf %800, %801 : vector<1x32xf32>
    %cst_168 = arith.constant 0.000000e+00 : f32
    %803 = vector.broadcast %cst_168 : f32 to vector<1x32xf32>
    %804 = arith.maximumf %802, %803 : vector<1x32xf32>
    %805 = arith.truncf %804 : vector<1x32xf32> to vector<1x32xbf16>
    %c2907 = arith.constant 2907 : index
    %c0_169 = arith.constant 0 : index
    %806 = vector.load %arg2[%c2907, %c0_169] : memref<3472x256xbf16, #tpu.memory_space<vmem>>, vector<32x120xbf16>
    %cst_170 = arith.constant dense<0.000000e+00> : vector<1x120xf32>
    %807 = tpu.matmul %805, %806, %cst_170 {dimension_numbers = #tpu.dot_dimension_numbers<[1], [0], [0], [1], [0, 0, 1, 1], [], []>} : vector<1x32xbf16>, vector<32x120xbf16>, vector<1x120xf32> -> vector<1x120xf32>
    %c128 = arith.constant 128 : index
    %c0_171 = arith.constant 0 : index
    %808 = vector.load %arg3[%c128, %c0_171] : memref<152x256xf32, #tpu.memory_space<vmem>>, vector<1x120xf32>
    %809 = arith.addf %807, %808 : vector<1x120xf32>
    %cst_172 = arith.constant 3.000000e+00 : f32
    %810 = vector.broadcast %cst_172 : f32 to vector<1x120xf32>
    %811 = arith.addf %809, %810 : vector<1x120xf32>
    %cst_173 = arith.constant 0.000000e+00 : f32
    %cst_174 = arith.constant 6.000000e+00 : f32
    %812 = vector.broadcast %cst_173 : f32 to vector<1x120xf32>
    %813 = arith.maximumf %812, %811 : vector<1x120xf32>
    %814 = vector.broadcast %cst_174 : f32 to vector<1x120xf32>
    %815 = arith.minimumf %814, %813 : vector<1x120xf32>
    %cst_175 = arith.constant 0.166666672 : f32
    %816 = vector.broadcast %cst_175 : f32 to vector<1x120xf32>
    %817 = arith.mulf %815, %816 : vector<1x120xf32>
    %818 = vector.broadcast %817 : vector<1x120xf32> to vector<4x120xf32>
    %819 = arith.mulf %793, %818 : vector<4x120xf32>
    %c129 = arith.constant 129 : index
    %c0_176 = arith.constant 0 : index
    %820 = vector.load %arg3[%c129, %c0_176] : memref<152x256xf32, #tpu.memory_space<vmem>>, vector<2x48xf32>
    %821 = arith.truncf %819 : vector<4x120xf32> to vector<4x120xbf16>
    %c2939 = arith.constant 2939 : index
    %c0_177 = arith.constant 0 : index
    %822 = vector.load %arg2[%c2939, %c0_177] : memref<3472x256xbf16, #tpu.memory_space<vmem>>, vector<120x48xbf16>
    %cst_178 = arith.constant dense<0.000000e+00> : vector<4x48xf32>
    %823 = tpu.matmul %821, %822, %cst_178 {dimension_numbers = #tpu.dot_dimension_numbers<[1], [0], [0], [1], [0, 0, 1, 1], [], []>} : vector<4x120xbf16>, vector<120x48xbf16>, vector<4x48xf32> -> vector<4x48xf32>
    %824 = vector.extract_strided_slice %820 {offsets = [0, 0], sizes = [1, 48], strides = [1, 1]} : vector<2x48xf32> to vector<1x48xf32>
    %825 = vector.broadcast %824 : vector<1x48xf32> to vector<4x48xf32>
    %826 = arith.mulf %823, %825 : vector<4x48xf32>
    %827 = vector.extract_strided_slice %820 {offsets = [1, 0], sizes = [1, 48], strides = [1, 1]} : vector<2x48xf32> to vector<1x48xf32>
    %828 = vector.broadcast %827 : vector<1x48xf32> to vector<4x48xf32>
    %829 = arith.addf %826, %828 : vector<4x48xf32>
    %c131 = arith.constant 131 : index
    %c0_179 = arith.constant 0 : index
    %830 = vector.load %arg3[%c131, %c0_179] : memref<152x256xf32, #tpu.memory_space<vmem>>, vector<2x144xf32>
    %831 = arith.truncf %829 : vector<4x48xf32> to vector<4x48xbf16>
    %c3095 = arith.constant 3095 : index
    %c0_180 = arith.constant 0 : index
    %832 = vector.load %arg2[%c3095, %c0_180] : memref<3472x256xbf16, #tpu.memory_space<vmem>>, vector<48x144xbf16>
    %cst_181 = arith.constant dense<0.000000e+00> : vector<4x144xf32>
    %833 = tpu.matmul %831, %832, %cst_181 {dimension_numbers = #tpu.dot_dimension_numbers<[1], [0], [0], [1], [0, 0, 1, 1], [], []>} : vector<4x48xbf16>, vector<48x144xbf16>, vector<4x144xf32> -> vector<4x144xf32>
    %834 = vector.extract_strided_slice %830 {offsets = [0, 0], sizes = [1, 144], strides = [1, 1]} : vector<2x144xf32> to vector<1x144xf32>
    %835 = vector.broadcast %834 : vector<1x144xf32> to vector<4x144xf32>
    %836 = arith.mulf %833, %835 : vector<4x144xf32>
    %837 = vector.extract_strided_slice %830 {offsets = [1, 0], sizes = [1, 144], strides = [1, 1]} : vector<2x144xf32> to vector<1x144xf32>
    %838 = vector.broadcast %837 : vector<1x144xf32> to vector<4x144xf32>
    %839 = arith.addf %836, %838 : vector<4x144xf32>
    %cst_182 = arith.constant 3.000000e+00 : f32
    %840 = vector.broadcast %cst_182 : f32 to vector<4x144xf32>
    %841 = arith.addf %839, %840 : vector<4x144xf32>
    %cst_183 = arith.constant 0.000000e+00 : f32
    %cst_184 = arith.constant 6.000000e+00 : f32
    %842 = vector.broadcast %cst_183 : f32 to vector<4x144xf32>
    %843 = arith.maximumf %842, %841 : vector<4x144xf32>
    %844 = vector.broadcast %cst_184 : f32 to vector<4x144xf32>
    %845 = arith.minimumf %844, %843 : vector<4x144xf32>
    %846 = arith.mulf %839, %845 : vector<4x144xf32>
    %cst_185 = arith.constant 0.166666672 : f32
    %847 = vector.broadcast %cst_185 : f32 to vector<4x144xf32>
    %848 = arith.mulf %846, %847 : vector<4x144xf32>
    %c3059 = arith.constant 3059 : index
    %c0_186 = arith.constant 0 : index
    %849 = vector.load %arg2[%c3059, %c0_186] : memref<3472x256xbf16, #tpu.memory_space<vmem>>, vector<36x4xbf16>
    %850 = arith.truncf %848 : vector<4x144xf32> to vector<4x144xbf16>
    %cst_187 = arith.constant dense<0.000000e+00> : vector<36x144xf32>
    %851 = tpu.matmul %849, %850, %cst_187 {dimension_numbers = #tpu.dot_dimension_numbers<[1], [0], [0], [1], [0, 0, 1, 1], [], []>} : vector<36x4xbf16>, vector<4x144xbf16>, vector<36x144xf32> -> vector<36x144xf32>
    %c133 = arith.constant 133 : index
    %c0_188 = arith.constant 0 : index
    %852 = vector.load %arg3[%c133, %c0_188] : memref<152x256xf32, #tpu.memory_space<vmem>>, vector<9x144xf32>
    %853 = vector.extract_strided_slice %851 {offsets = [0, 0], sizes = [4, 144], strides = [1, 1]} : vector<36x144xf32> to vector<4x144xf32>
    %854 = vector.extract_strided_slice %852 {offsets = [0, 0], sizes = [1, 144], strides = [1, 1]} : vector<9x144xf32> to vector<1x144xf32>
    %855 = vector.broadcast %854 : vector<1x144xf32> to vector<4x144xf32>
    %856 = arith.mulf %853, %855 : vector<4x144xf32>
    %857 = vector.extract_strided_slice %851 {offsets = [4, 0], sizes = [4, 144], strides = [1, 1]} : vector<36x144xf32> to vector<4x144xf32>
    %858 = vector.extract_strided_slice %852 {offsets = [1, 0], sizes = [1, 144], strides = [1, 1]} : vector<9x144xf32> to vector<1x144xf32>
    %859 = vector.broadcast %858 : vector<1x144xf32> to vector<4x144xf32>
    %860 = arith.mulf %857, %859 : vector<4x144xf32>
    %861 = arith.addf %856, %860 : vector<4x144xf32>
    %862 = vector.extract_strided_slice %851 {offsets = [8, 0], sizes = [4, 144], strides = [1, 1]} : vector<36x144xf32> to vector<4x144xf32>
    %863 = vector.extract_strided_slice %852 {offsets = [2, 0], sizes = [1, 144], strides = [1, 1]} : vector<9x144xf32> to vector<1x144xf32>
    %864 = vector.broadcast %863 : vector<1x144xf32> to vector<4x144xf32>
    %865 = arith.mulf %862, %864 : vector<4x144xf32>
    %866 = arith.addf %861, %865 : vector<4x144xf32>
    %867 = vector.extract_strided_slice %851 {offsets = [12, 0], sizes = [4, 144], strides = [1, 1]} : vector<36x144xf32> to vector<4x144xf32>
    %868 = vector.extract_strided_slice %852 {offsets = [3, 0], sizes = [1, 144], strides = [1, 1]} : vector<9x144xf32> to vector<1x144xf32>
    %869 = vector.broadcast %868 : vector<1x144xf32> to vector<4x144xf32>
    %870 = arith.mulf %867, %869 : vector<4x144xf32>
    %871 = arith.addf %866, %870 : vector<4x144xf32>
    %872 = vector.extract_strided_slice %851 {offsets = [16, 0], sizes = [4, 144], strides = [1, 1]} : vector<36x144xf32> to vector<4x144xf32>
    %873 = vector.extract_strided_slice %852 {offsets = [4, 0], sizes = [1, 144], strides = [1, 1]} : vector<9x144xf32> to vector<1x144xf32>
    %874 = vector.broadcast %873 : vector<1x144xf32> to vector<4x144xf32>
    %875 = arith.mulf %872, %874 : vector<4x144xf32>
    %876 = arith.addf %871, %875 : vector<4x144xf32>
    %877 = vector.extract_strided_slice %851 {offsets = [20, 0], sizes = [4, 144], strides = [1, 1]} : vector<36x144xf32> to vector<4x144xf32>
    %878 = vector.extract_strided_slice %852 {offsets = [5, 0], sizes = [1, 144], strides = [1, 1]} : vector<9x144xf32> to vector<1x144xf32>
    %879 = vector.broadcast %878 : vector<1x144xf32> to vector<4x144xf32>
    %880 = arith.mulf %877, %879 : vector<4x144xf32>
    %881 = arith.addf %876, %880 : vector<4x144xf32>
    %882 = vector.extract_strided_slice %851 {offsets = [24, 0], sizes = [4, 144], strides = [1, 1]} : vector<36x144xf32> to vector<4x144xf32>
    %883 = vector.extract_strided_slice %852 {offsets = [6, 0], sizes = [1, 144], strides = [1, 1]} : vector<9x144xf32> to vector<1x144xf32>
    %884 = vector.broadcast %883 : vector<1x144xf32> to vector<4x144xf32>
    %885 = arith.mulf %882, %884 : vector<4x144xf32>
    %886 = arith.addf %881, %885 : vector<4x144xf32>
    %887 = vector.extract_strided_slice %851 {offsets = [28, 0], sizes = [4, 144], strides = [1, 1]} : vector<36x144xf32> to vector<4x144xf32>
    %888 = vector.extract_strided_slice %852 {offsets = [7, 0], sizes = [1, 144], strides = [1, 1]} : vector<9x144xf32> to vector<1x144xf32>
    %889 = vector.broadcast %888 : vector<1x144xf32> to vector<4x144xf32>
    %890 = arith.mulf %887, %889 : vector<4x144xf32>
    %891 = arith.addf %886, %890 : vector<4x144xf32>
    %892 = vector.extract_strided_slice %851 {offsets = [32, 0], sizes = [4, 144], strides = [1, 1]} : vector<36x144xf32> to vector<4x144xf32>
    %893 = vector.extract_strided_slice %852 {offsets = [8, 0], sizes = [1, 144], strides = [1, 1]} : vector<9x144xf32> to vector<1x144xf32>
    %894 = vector.broadcast %893 : vector<1x144xf32> to vector<4x144xf32>
    %895 = arith.mulf %892, %894 : vector<4x144xf32>
    %896 = arith.addf %891, %895 : vector<4x144xf32>
    %c142 = arith.constant 142 : index
    %c0_189 = arith.constant 0 : index
    %897 = vector.load %arg3[%c142, %c0_189] : memref<152x256xf32, #tpu.memory_space<vmem>>, vector<2x144xf32>
    %898 = vector.extract_strided_slice %897 {offsets = [0, 0], sizes = [1, 144], strides = [1, 1]} : vector<2x144xf32> to vector<1x144xf32>
    %899 = vector.broadcast %898 : vector<1x144xf32> to vector<4x144xf32>
    %900 = arith.mulf %896, %899 : vector<4x144xf32>
    %901 = vector.extract_strided_slice %897 {offsets = [1, 0], sizes = [1, 144], strides = [1, 1]} : vector<2x144xf32> to vector<1x144xf32>
    %902 = vector.broadcast %901 : vector<1x144xf32> to vector<4x144xf32>
    %903 = arith.addf %900, %902 : vector<4x144xf32>
    %cst_190 = arith.constant 3.000000e+00 : f32
    %904 = vector.broadcast %cst_190 : f32 to vector<4x144xf32>
    %905 = arith.addf %903, %904 : vector<4x144xf32>
    %cst_191 = arith.constant 0.000000e+00 : f32
    %cst_192 = arith.constant 6.000000e+00 : f32
    %906 = vector.broadcast %cst_191 : f32 to vector<4x144xf32>
    %907 = arith.maximumf %906, %905 : vector<4x144xf32>
    %908 = vector.broadcast %cst_192 : f32 to vector<4x144xf32>
    %909 = arith.minimumf %908, %907 : vector<4x144xf32>
    %910 = arith.mulf %903, %909 : vector<4x144xf32>
    %cst_193 = arith.constant 0.166666672 : f32
    %911 = vector.broadcast %cst_193 : f32 to vector<4x144xf32>
    %912 = arith.mulf %910, %911 : vector<4x144xf32>
    %cst_194 = arith.constant dense<0.000000e+00> : vector<144xf32>
    %913 = vector.multi_reduction <add>, %912, %cst_194 [0] : vector<4x144xf32> to vector<144xf32>
    %914 = vector.shape_cast %913 : vector<144xf32> to vector<1x144xf32>
    %cst_195 = arith.constant 2.500000e-01 : f32
    %915 = vector.broadcast %cst_195 : f32 to vector<1x144xf32>
    %916 = arith.mulf %914, %915 : vector<1x144xf32>
    %917 = arith.truncf %916 : vector<1x144xf32> to vector<1x144xbf16>
    %c3143 = arith.constant 3143 : index
    %c0_196 = arith.constant 0 : index
    %918 = vector.load %arg2[%c3143, %c0_196] : memref<3472x256xbf16, #tpu.memory_space<vmem>>, vector<144x40xbf16>
    %cst_197 = arith.constant dense<0.000000e+00> : vector<1x40xf32>
    %919 = tpu.matmul %917, %918, %cst_197 {dimension_numbers = #tpu.dot_dimension_numbers<[1], [0], [0], [1], [0, 0, 1, 1], [], []>} : vector<1x144xbf16>, vector<144x40xbf16>, vector<1x40xf32> -> vector<1x40xf32>
    %c144 = arith.constant 144 : index
    %c0_198 = arith.constant 0 : index
    %920 = vector.load %arg3[%c144, %c0_198] : memref<152x256xf32, #tpu.memory_space<vmem>>, vector<1x40xf32>
    %921 = arith.addf %919, %920 : vector<1x40xf32>
    %cst_199 = arith.constant 0.000000e+00 : f32
    %922 = vector.broadcast %cst_199 : f32 to vector<1x40xf32>
    %923 = arith.maximumf %921, %922 : vector<1x40xf32>
    %924 = arith.truncf %923 : vector<1x40xf32> to vector<1x40xbf16>
    %c3287 = arith.constant 3287 : index
    %c0_200 = arith.constant 0 : index
    %925 = vector.load %arg2[%c3287, %c0_200] : memref<3472x256xbf16, #tpu.memory_space<vmem>>, vector<40x144xbf16>
    %cst_201 = arith.constant dense<0.000000e+00> : vector<1x144xf32>
    %926 = tpu.matmul %924, %925, %cst_201 {dimension_numbers = #tpu.dot_dimension_numbers<[1], [0], [0], [1], [0, 0, 1, 1], [], []>} : vector<1x40xbf16>, vector<40x144xbf16>, vector<1x144xf32> -> vector<1x144xf32>
    %c145 = arith.constant 145 : index
    %c0_202 = arith.constant 0 : index
    %927 = vector.load %arg3[%c145, %c0_202] : memref<152x256xf32, #tpu.memory_space<vmem>>, vector<1x144xf32>
    %928 = arith.addf %926, %927 : vector<1x144xf32>
    %cst_203 = arith.constant 3.000000e+00 : f32
    %929 = vector.broadcast %cst_203 : f32 to vector<1x144xf32>
    %930 = arith.addf %928, %929 : vector<1x144xf32>
    %cst_204 = arith.constant 0.000000e+00 : f32
    %cst_205 = arith.constant 6.000000e+00 : f32
    %931 = vector.broadcast %cst_204 : f32 to vector<1x144xf32>
    %932 = arith.maximumf %931, %930 : vector<1x144xf32>
    %933 = vector.broadcast %cst_205 : f32 to vector<1x144xf32>
    %934 = arith.minimumf %933, %932 : vector<1x144xf32>
    %cst_206 = arith.constant 0.166666672 : f32
    %935 = vector.broadcast %cst_206 : f32 to vector<1x144xf32>
    %936 = arith.mulf %934, %935 : vector<1x144xf32>
    %937 = vector.broadcast %936 : vector<1x144xf32> to vector<4x144xf32>
    %938 = arith.mulf %912, %937 : vector<4x144xf32>
    %c146 = arith.constant 146 : index
    %c0_207 = arith.constant 0 : index
    %939 = vector.load %arg3[%c146, %c0_207] : memref<152x256xf32, #tpu.memory_space<vmem>>, vector<2x48xf32>
    %940 = arith.truncf %938 : vector<4x144xf32> to vector<4x144xbf16>
    %c3327 = arith.constant 3327 : index
    %c0_208 = arith.constant 0 : index
    %941 = vector.load %arg2[%c3327, %c0_208] : memref<3472x256xbf16, #tpu.memory_space<vmem>>, vector<144x48xbf16>
    %cst_209 = arith.constant dense<0.000000e+00> : vector<4x48xf32>
    %942 = tpu.matmul %940, %941, %cst_209 {dimension_numbers = #tpu.dot_dimension_numbers<[1], [0], [0], [1], [0, 0, 1, 1], [], []>} : vector<4x144xbf16>, vector<144x48xbf16>, vector<4x48xf32> -> vector<4x48xf32>
    %943 = vector.extract_strided_slice %939 {offsets = [0, 0], sizes = [1, 48], strides = [1, 1]} : vector<2x48xf32> to vector<1x48xf32>
    %944 = vector.broadcast %943 : vector<1x48xf32> to vector<4x48xf32>
    %945 = arith.mulf %942, %944 : vector<4x48xf32>
    %946 = vector.extract_strided_slice %939 {offsets = [1, 0], sizes = [1, 48], strides = [1, 1]} : vector<2x48xf32> to vector<1x48xf32>
    %947 = vector.broadcast %946 : vector<1x48xf32> to vector<4x48xf32>
    %948 = arith.addf %945, %947 : vector<4x48xf32>
    %949 = arith.addf %948, %829 : vector<4x48xf32>
    %c148 = arith.constant 148 : index
    %c0_210 = arith.constant 0 : index
    %950 = vector.load %arg3[%c148, %c0_210] : memref<152x256xf32, #tpu.memory_space<vmem>>, vector<1x48xf32>
    %951 = vector.broadcast %950 : vector<1x48xf32> to vector<4x48xf32>
    %952 = arith.mulf %949, %951 : vector<4x48xf32>
    %cst_211 = arith.constant dense<0.000000e+00> : vector<4xf32>
    %953 = vector.multi_reduction <add>, %952, %cst_211 [1] : vector<4x48xf32> to vector<4xf32>
    %954 = vector.shape_cast %953 : vector<4xf32> to vector<4x1xf32>
    %955 = arith.negf %954 : vector<4x1xf32>
    %956 = math.exp %955 : vector<4x1xf32>
    %cst_212 = arith.constant 1.000000e+00 : f32
    %957 = vector.broadcast %cst_212 : f32 to vector<4x1xf32>
    %958 = arith.addf %957, %956 : vector<4x1xf32>
    %959 = arith.divf %957, %958 : vector<4x1xf32>
    %c0_213 = arith.constant 0 : index
    %c0_214 = arith.constant 0 : index
    %c0_215 = arith.constant 0 : index
    %960 = vector.load %arg4[%c0_213, %c0_214, %c0_215] : memref<1x4x1xf32, #tpu.memory_space<vmem>>, vector<1x4x1xf32>
    %961 = vector.shape_cast %960 : vector<1x4x1xf32> to vector<4x1xf32>
    %962 = vector.shape_cast %959 : vector<4x1xf32> to vector<1x4x1xf32>
    tpu.vector_store %arg4[%c0_213, %c0_214, %c0_215], %962 {strides = array<i32>} : memref<1x4x1xf32, #tpu.memory_space<vmem>>, vector<1x4x1xf32>,
    return
  }
  func.func @transform_0(%arg0: i32) -> (i32, i32, i32) {
    %c0_i32 = arith.constant 0 : i32
    %c0_i32_0 = arith.constant 0 : i32
    %c0_i32_1 = arith.constant 0 : i32
    return %arg0, %c0_i32, %c0_i32_0 : i32, i32, i32
  }
  func.func @transform_1(%arg0: i32) -> (i32, i32) {
    %c0_i32 = arith.constant 0 : i32
    %c0_i32_0 = arith.constant 0 : i32
    %c0_i32_1 = arith.constant 0 : i32
    return %c0_i32, %c0_i32_0 : i32, i32
  }
  func.func @transform_2(%arg0: i32) -> (i32, i32) {
    %c0_i32 = arith.constant 0 : i32
    %c0_i32_0 = arith.constant 0 : i32
    %c0_i32_1 = arith.constant 0 : i32
    return %c0_i32, %c0_i32_0 : i32, i32
  }
  func.func @transform_3(%arg0: i32) -> (i32, i32, i32) {
    %c0_i32 = arith.constant 0 : i32
    %c0_i32_0 = arith.constant 0 : i32
    %c0_i32_1 = arith.constant 0 : i32
    return %arg0, %c0_i32, %c0_i32_0 : i32, i32, i32
  }
}

</mosaic_0001>

<bundles_post_ra>
// kernel: mobilenet_v3_with_conv.1
= control target key start
LH: loop header
LB: loop body
LE: loop exit
PB: predicated region body
PF: predicated region fallthrough
CT: control target
= control target key end

     0   :  { %8 = vsyncpa [#allocation3], 0  ;;  %s12317_s0 = inlined_call_operand.vmem [shape: bf16[2,256,27], index: 0, kind: input, shape index: {}]   ;;  %s12318_s1 = inlined_call_operand.hbm [shape: bf16[3472,256], index: 1, kind: input, shape index: {}]   ;;  %s12319_s2 = inlined_call_operand.hbm [shape: f32[152,256], index: 2, kind: input, shape index: {}]   ;;  %s12320_s3 = inlined_call_operand.vmem [shape: f32[2,4,1], index: 3, kind: output, shape index: {}]  }
   0x1   :  { %9 = vsyncpa [#allocation5], 0  ;;  %s11067_s12 = smov 0  }
   0x2 LB: > { %s11037_s13 = smov [#allocation2]   ;;  %s11073_s15 = sadd.s32 4294967295, %s11035_s12   ;;  %s11035_s12 = sphi %s11067_s12, %s15_s12  }
   0x3   : > { %s126_s14 = sshll.u32 %s11037_s13, 4  ;;  %p9651_p0 = scmp.ge.s32.totalorder %s11035_s12, 1  ;;  %s127_s14 = int_to_ptr.vmem [resolvable:$true] %s126_s14 }
   0x4   : > { %p114_p1 = scmp.lt.s32.totalorder %s11035_s12, 3  ;;  %p12321_p3 = scmp.eq.s32.totalorder %s11073_s15, 0 }
   0x5   : > { %s11038_s17 = smov [#allocation4]   ;;  %s10965_s22 = scalar_lea.hbm %s12318_s1, 55552 }
   0x6   : > { %p11077_p2 = pnand %p9651_p0, %p114_p1  ;;  %s139_s18 = sshll.u32 %s11038_s17, 4  ;;  %s11090_s18 = int_to_ptr.vmem [resolvable:$true] %s139_s18 }
   0x7   : > { %p10966_p6 = scmp.ne.s32.totalorder %s12318_s1, %s10965_s22  ;;  %p10972_p10 = scmp.lt.u32.totalorder %s10965_s22, %s12318_s1 }
   0x8   : > { %s12323_s16 = scalar_select %p11077_p2, 1, 0 }
   0x9   : > { %p10555_p4 = pneg %p11077_p2 }
   0xb   : > { %p11086_p5 = pnand %p12321_p3, %p10555_p4 }
   0xd   : > { %p10967_p7 = pneg %p11086_p5 }
   0xf   : > { %p10968_p8 = pnand %p10967_p7, %p10966_p6 }
  0x11   : > { %p10969_p9 = pneg %p10968_p8 }
  0x13   : > { %p10974_p11 = pnand %p10972_p10, %p10969_p9 }
  0x15   : > { %10977 = shalt.err (!%p10974_p11)
}
  0x16   : > { %s10978_s27 = scalar_lea.vmem %s127_s14, 55552  ;;  %p10986_p1 = scmp.lt.s32.totalorder %s127_s14, %s127_s14 }
  0x17   : > { %p10979_p12 = scmp.ne.s32.totalorder %s127_s14, %s10978_s27  ;;  %p10987_p4 = scmp.lt.s32.totalorder %s10978_s27, %s10978_s27 }
  0x19   : > { %p10981_p13 = pnand %p10979_p12, %p10967_p7  ;;  %p10988_p3 = por %p10987_p4, %p10986_p1 }
  0x1b   : > { %p10982_p0 = pneg %p10981_p13 }
  0x1d   : > { %p10989_p2 = pnand %p10988_p3, %p10982_p0 }
  0x1f   : > { %10992 = shalt.err (!%p10989_p2)
}
  0x20   : > { %s11039_s28 = smov 128   ;;  %s11040_s29 = smov 8  }
  0x21   : > { %10558 = dma.hbm_to_vmem [thread:$0]  (!%p11086_p5), %s12318_s1, 55552, %s127_s14, [#allocation3], %s11039_s28, %s11039_s28, %s11040_s29  }
  0x22   : > { %s10993_s7 = scalar_lea.hbm %s12319_s2, 4864 }
  0x23   : > { %p10994_p6 = scmp.ne.s32.totalorder %s12319_s2, %s10993_s7  ;;  %p11000_p8 = scmp.lt.u32.totalorder %s10993_s7, %s12319_s2 }
  0x25   : > { %p10996_p2 = pnand %p10994_p6, %p10967_p7 }
  0x27   : > { %p10997_p3 = pneg %p10996_p2 }
  0x29   : > { %p11002_p9 = pnand %p11000_p8, %p10997_p3 }
  0x2b   : > { %11005 = shalt.err (!%p11002_p9)
}
  0x2c   : > { %s11006_s13 = scalar_lea.vmem %s11090_s18, 4864  ;;  %p11014_p13 = scmp.lt.s32.totalorder %s11090_s18, %s11090_s18 }
  0x2d   : > { %p11007_p10 = scmp.ne.s32.totalorder %s11090_s18, %s11006_s13  ;;  %p11015_p0 = scmp.lt.s32.totalorder %s11006_s13, %s11006_s13 }
  0x2f   : > { %p11009_p11 = pnand %p11007_p10, %p10967_p7  ;;  %p11016_p1 = por %p11015_p0, %p11014_p13 }
  0x31   : > { %p11010_p12 = pneg %p11009_p11 }
  0x33   : > { %p11017_p4 = pnand %p11016_p1, %p11010_p12 }
  0x35   : > { %11020 = shalt.err (!%p11017_p4)
}
  0x36   : > { %s11041_s14 = smov 256   ;;  %s11042_s17 = smov 16  }
  0x37   : > { %10561 = dma.hbm_to_vmem [thread:$0]  (!%p11086_p5), %s12319_s2, 4864, %s11090_s18, [#allocation5], %s11041_s14, %s11041_s14, %s11042_s17  }
  0x38   : > { %p12325_p6 = scmp.ne.s32.totalorder %s12323_s16, 0 }
  0x39   : > { %p12326_p7 = scmp.eq.s32.totalorder (!%p12325_p6), %s11073_s15, 0 }
  0x3a   : > { %163 = sbr.rel (%p12325_p6) target bundleno = 9070 (0x236e), region = 32 }
  0x41   : > { %11026 = dma.done.wait (%p12326_p7), [#allocation3], 55552   ;;  %p12327_p2 = pmov %p12326_p7 }
  0x43   : > { %11028 = vsyncadd (%p12327_p2), [#allocation3], 4294911744  ;;  %p12328_p3 = pmov %p12327_p2 }
  0x44   : > { %p12329_p8 = pmov %p12327_p2 }
  0x45   : > { %11030 = dma.done.wait (%p12328_p3), [#allocation5], 4864  }
  0x46   : > { %11032 = vsyncadd (%p12329_p8), [#allocation5], 4294962432  ;;  %vm376_vm0 = vcmask 1044480   ;;  %p190_p9 = scmp.lt.s32.totalorder %s11073_s15, 1  ;;  %vm377_vm1 = vcmask 1045504   ;;  %v11043_v0 = vmov 65535   ;;  %v545_v36 = vlaneseq }
  0x47   : > { %v378_v1 = vsel %vm376_vm0, 4294967295, %v11043_v0  ;;  %vm327_vm2 = vcmask 220160   ;;  %v10584_v3 = vld [vmem:[#allocation2] ss:$8 sps:$4 sm:$0xff]   ;;  %v11044_v22 = vmov 0   ;;  %vm11046_vm4 = vmmov 0  }
  0x48   : > { %s12331_s15 = smov (!%p190_p9, %s11073_s15), 1  ;;  %v379_v2 = vsel %vm377_vm1, %v378_v1, 0  ;;  %10209 = vmatprep.subr.bf16.mxu1 %v10584_v3  ;;  %v10585_v4 = vld [vmem:[#allocation2 + $0x10] ss:$8 sps:$4 sm:$0x3f]   ;;  %v11196_v37 = vshrl.u32 %v545_v36, 7 }
  0x49   : > { %s10080_s16 = sshll.u32 %s12331_s15, 7  ;;  %10210 = vmatpush3.bf16.msra.mxu1 %v10584_v3  ;;  %v381_v6 = vand.u32 %v10585_v4, %v379_v2  ;;  %v10604_v23 = vld [vmem:[#allocation2 + $0x1c] ss:$8 sps:$4 sm:$0xfe]   ;;  %v10607_v24 = vld [vmem:[#allocation2 + $0x2c] ss:$8 sps:$4 sm:$0xff]  }
  0x4a   : > { %s11157_s22 = scalar_lea.vmem %s12317_s0, %s10080_s16  ;;  %v1178_v25 = vshrl.u32 %v10604_v23, 16  ;;  %v1181_v26 = vshll.u32 %v10604_v23, 16  ;;  %v1186_v27 = vshrl.u32 %v10607_v24, 16  ;;  %v1189_v28 = vshll.u32 %v10607_v24, 16  ;;  %v544_v39 = vld [vmem:[#allocation4] sm:$0x3] }
  0x4b   : > { %v10586_v5 = vld [vmem:[%s11157_s22] sm:$0xff]   ;;  %10211 = vmatprep.subr.bf16.mxu1 %v381_v6  ;;  %v10587_v7 = vld [vmem:[%s11157_s22 + $0x8] sm:$0xff]   ;;  %v10588_v8 = vld [vmem:[%s11157_s22 + $0x10] sm:$0xff]   ;;  %vm1159_vm3 = vsmask.f32 6400  ;;  %v11199_v38 = vsub.s32 0, %v11196_v37 }
  0x4c   : > { %10213 = vmatprep.mubr.msk.bf16.mxu1 %vm327_vm2, %v10586_v5  ;;  %v10589_v9 = vld [vmem:[%s11157_s22 + $0x18] sm:$0xff]   ;;  %v10590_v10 = vld [vmem:[%s11157_s22 + $0x20] sm:$0xff]   ;;  %v10591_v11 = vld [vmem:[%s11157_s22 + $0x28] sm:$0xff]   ;;  %v1180_v29 = vrot.slane %v1178_v25, 1  ;;  %v1183_v30 = vrot.slane %v1181_v26, 2  ;;  %v1188_v31 = vrot.slane %v1186_v27, 1 }
  0x4d   : > { %10212 = vmatpush3.bf16.msra.mxu1 %v381_v6  ;;  %v10592_v12 = vld [vmem:[%s11157_s22 + $0x30] sm:$0xff]   ;;  %v10593_v13 = vld [vmem:[%s11157_s22 + $0x38] sm:$0xff]   ;;  %v10594_v14 = vld [vmem:[%s11157_s22 + $0x40] sm:$0xff]   ;;  %v1191_v32 = vrot.slane %v1189_v28, 2  ;;  %v11202_v40 = vsub.s32 1, %v11196_v37  ;;  %v11205_v41 = vrot.slane %v544_v39, %v11199_v38  ;;  %vm2424_vm5 = vcmask 130048  }
  0x4e   : > { %v10595_v15 = vld [vmem:[%s11157_s22 + $0x48] sm:$0xff]   ;;  %v10596_v16 = vld [vmem:[%s11157_s22 + $0x50] sm:$0xff]   ;;  %v10597_v17 = vld [vmem:[%s11157_s22 + $0x58] sm:$0xff]   ;;  %1896 = vmatprep.subr.bf16.mxu1 %v11044_v22  ;;  %v1184_v33 = vor.u32 %v1183_v30, %v1180_v29  ;;  %vm2543_vm6 = vcmask 1043456   ;;  %vm2539_vm7 = vcmask 64512   ;;  %vm3042_vm8 = vcmask 523264  }
  0x4f   : > { %v10598_v18 = vld [vmem:[%s11157_s22 + $0x60] sm:$0xff]   ;;  %v10599_v19 = vld [vmem:[%s11157_s22 + $0x68] sm:$0xff]   ;;  %v10600_v20 = vld [vmem:[%s11157_s22 + $0x70] sm:$0xff]   ;;  %v11192_v34 = vor.u32 %v1191_v32, %v1188_v31  ;;  %v11208_v42 = vrot.slane %v544_v39, %v11202_v40  ;;  %vm3347_vm9 = vcmask 588800   ;;  %vm3441_vm10 = vcmask 195584   ;;  %s9660_s23 = sshll.u32 %s12331_s15, 2 }
  0x50   : > { %10214 = vmatmul.mubr.msk.bf16.vlgmr.msra.gmra.mrb[0].mxu1 %vm327_vm2, %v10587_v7  ;;  %v10601_v21 = vld [vmem:[%s11157_s22 + $0x78] sm:$0xff]   ;;  %vm3981_vm11 = vcmask 719872   ;;  %vm4060_vm12 = vsmask.f32 4352  ;;  %vm4571_vm13 = vcmask 781312   ;;  %vm4696_vm14 = vcmask 785408   ;;  %s198_s26 = scalar_lea.vmem %s12320_s3, %s9660_s23 }
  0x51   : > { %10217 = vmatprep.mubr.msk.bf16.mxu1 %vm327_vm2, %v10588_v8  ;;  %v1193_v35 = vsel %vm1159_vm3, %v1184_v33, %v11192_v34  ;;  %vm5088_vm15 = vcmask 326656   ;;  %vm5228_vm0 = vcmask 1041408   ;;  %vm5218_vm1 = vcmask 31744  }
  0x58   : > { %10218 = vmatmul.mubr.msk.bf16.gmra.mrb[4].mxu1 %vm327_vm2, %v10589_v9 }
  0x59   : > { %10221 = vmatprep.mubr.msk.bf16.mxu1 %vm327_vm2, %v10590_v10 }
  0x60   : > { %10222 = vmatmul.mubr.msk.bf16.gmra.mrb[8].mxu1 %vm327_vm2, %v10591_v11 }
  0x61   : > { %10225 = vmatprep.mubr.msk.bf16.mxu1 %vm327_vm2, %v10592_v12 }
  0x68   : > { %10226 = vmatmul.mubr.msk.bf16.gmra.mrb[12].mxu1 %vm327_vm2, %v10593_v13 }
  0x69   : > { %10229 = vmatprep.mubr.msk.bf16.mxu1 %vm327_vm2, %v10594_v14 }
  0x70   : > { %10230 = vmatmul.mubr.msk.bf16.gmra.mrb[16].mxu1 %vm327_vm2, %v10595_v15 }
  0x71   : > { %10233 = vmatprep.mubr.msk.bf16.mxu1 %vm327_vm2, %v10596_v16 }
  0x78   : > { %10234 = vmatmul.mubr.msk.bf16.gmra.mrb[20].mxu1 %vm327_vm2, %v10597_v17 }
  0x79   : > { %10237 = vmatprep.mubr.msk.bf16.mxu1 %vm327_vm2, %v10598_v18 }
  0x80   : > { %10238 = vmatmul.mubr.msk.bf16.gmra.mrb[24].mxu1 %vm327_vm2, %v10599_v19 }
  0x81   : > { %10241 = vmatprep.mubr.msk.bf16.mxu1 %vm327_vm2, %v10600_v20 }
  0x88   : > { %10242 = vmatmul.mubr.msk.bf16.gmra.mrb[28].mxu1 %vm327_vm2, %v10601_v21  ;;  %vm5469_vm2 = vcmask 912384  }
  0x89   : > { %1928 = vmatprep.mubr.bf16.mxu1 %v1193_v35 }
 0x123   : > { %v10215_v43 = vpop.f32.mrb[0].mxu1 }
 0x124   : > { %v551_v44 = vmul.f32 %v10215_v43, %v11205_v41  ;;  %v417_v45 = vpop.f32.mrb[1].mxu1 }
 0x125   : > { %v549_v46 = vmul.f32 %v11205_v41, %v417_v45  ;;  %v10216_v47 = vpop.f32.mrb[2].mxu1 }
 0x126   : > { %v587_v48 = vadd.f32 %v11208_v42, %v551_v44  ;;  %v552_v49 = vmul.f32 %v10216_v47, %v11205_v41  ;;  %v420_v50 = vpop.f32.mrb[3].mxu1 }
 0x127   : > { %v585_v51 = vadd.f32 %v11208_v42, %v549_v46  ;;  %v550_v52 = vmul.f32 %v11205_v41, %v420_v50 }
 0x128   : > { %v619_v53 = vadd.f32 3.0, %v587_v48  ;;  %v588_v54 = vadd.f32 %v11208_v42, %v552_v49 }
 0x129   : > { %v617_v55 = vadd.f32 3.0, %v585_v51  ;;  %v586_v56 = vadd.f32 %v11208_v42, %v550_v52 }
 0x12a   : > { %v651_v57 = vmax.f32 %v619_v53, 0.0  ;;  %v620_v58 = vadd.f32 3.0, %v588_v54 }
 0x12b   : > { %v649_v59 = vmax.f32 %v617_v55, 0.0  ;;  %v618_v60 = vadd.f32 3.0, %v586_v56  ;;  %v10219_v61 = vpop.f32.mrb[4].mxu1 }
 0x12c   : > { %v683_v62 = vmin.f32 %v651_v57, 6.0  ;;  %v652_v63 = vmax.f32 %v620_v58, 0.0  ;;  %v555_v0 = vmul.f32 %v10219_v61, %v11205_v41  ;;  %v433_v1 = vpop.f32.mrb[5].mxu1 }
 0x12d   : > { %v681_v2 = vmin.f32 %v649_v59, 6.0  ;;  %v650_v3 = vmax.f32 %v618_v60, 0.0  ;;  %v553_v4 = vmul.f32 %v11205_v41, %v433_v1  ;;  %v10220_v5 = vpop.f32.mrb[6].mxu1 }
 0x12e   : > { %v715_v6 = vmul.f32 %v683_v62, %v587_v48  ;;  %v684_v7 = vmin.f32 %v652_v63, 6.0  ;;  %v591_v8 = vadd.f32 %v11208_v42, %v555_v0  ;;  %v556_v9 = vmul.f32 %v10220_v5, %v11205_v41  ;;  %v436_v10 = vpop.f32.mrb[7].mxu1 }
 0x12f   : > { %v713_v11 = vmul.f32 %v681_v2, %v585_v51  ;;  %v682_v12 = vmin.f32 %v650_v3, 6.0  ;;  %v589_v13 = vadd.f32 %v11208_v42, %v553_v4  ;;  %v554_v14 = vmul.f32 %v11205_v41, %v436_v10 }
 0x130   : > { %v716_v15 = vmul.f32 %v684_v7, %v588_v54  ;;  %v623_v16 = vadd.f32 3.0, %v591_v8  ;;  %v592_v17 = vadd.f32 %v11208_v42, %v556_v9  ;;  %v747_v18 = vmul.f32 0.16666667, %v715_v6 }
 0x131   : > { %v714_v19 = vmul.f32 %v682_v12, %v586_v56  ;;  %v621_v20 = vadd.f32 3.0, %v589_v13  ;;  %v590_v21 = vadd.f32 %v11208_v42, %v554_v14  ;;  %v745_v23 = vmul.f32 0.16666667, %v713_v11 }
 0x132   : > { %v748_v24 = vmul.f32 0.16666667, %v716_v15  ;;  %v655_v25 = vmax.f32 %v623_v16, 0.0  ;;  %v624_v26 = vadd.f32 3.0, %v592_v17 }
 0x133   : > { %v746_v27 = vmul.f32 0.16666667, %v714_v19  ;;  %v653_v28 = vmax.f32 %v621_v20, 0.0  ;;  %v622_v29 = vadd.f32 3.0, %v590_v21  ;;  %v10223_v30 = vpop.f32.mrb[8].mxu1 }
 0x134   : > { %v851_v31 = vpack.c.bf16 %v748_v24, %v747_v18  ;;  %v687_v32 = vmin.f32 %v655_v25, 6.0  ;;  %v656_v33 = vmax.f32 %v624_v26, 0.0  ;;  %v559_v35 = vmul.f32 %v10223_v30, %v11205_v41  ;;  %v449_v36 = vpop.f32.mrb[9].mxu1 }
 0x135   : > { %v850_v39 = vpack.c.bf16 %v746_v27, %v745_v23  ;;  %v685_v43 = vmin.f32 %v653_v28, 6.0  ;;  %v654_v44 = vmax.f32 %v622_v29, 0.0  ;;  %v557_v45 = vmul.f32 %v11205_v41, %v449_v36  ;;  %v10224_v46 = vpop.f32.mrb[10].mxu1 }
 0x136   : > { %v719_v47 = vmul.f32 %v687_v32, %v591_v8  ;;  %v688_v48 = vmin.f32 %v656_v33, 6.0  ;;  %v595_v49 = vadd.f32 %v11208_v42, %v559_v35  ;;  %v560_v50 = vmul.f32 %v10224_v46, %v11205_v41  ;;  %v452_v51 = vpop.f32.mrb[11].mxu1 }
 0x137   : > { %v717_v52 = vmul.f32 %v685_v43, %v589_v13  ;;  %v686_v53 = vmin.f32 %v654_v44, 6.0  ;;  %v593_v54 = vadd.f32 %v11208_v42, %v557_v45  ;;  %v558_v55 = vmul.f32 %v11205_v41, %v452_v51  ;;  %1897 = vmatpush1.bf16.msra.mxu1 %v850_v39 }
 0x138   : > { %v720_v56 = vmul.f32 %v688_v48, %v592_v17  ;;  %v627_v57 = vadd.f32 3.0, %v595_v49  ;;  %v596_v58 = vadd.f32 %v11208_v42, %v560_v50  ;;  %1898 = vmatprep.subr.bf16.mxu1 %v11044_v22  ;;  %v751_v59 = vmul.f32 0.16666667, %v719_v47 }
 0x139   : > { %v718_v60 = vmul.f32 %v686_v53, %v590_v21  ;;  %v625_v61 = vadd.f32 3.0, %v593_v54  ;;  %v594_v62 = vadd.f32 %v11208_v42, %v558_v55  ;;  %v749_v63 = vmul.f32 0.16666667, %v717_v52 }
 0x13a   : > { %v752_v0 = vmul.f32 0.16666667, %v720_v56  ;;  %v659_v1 = vmax.f32 %v627_v57, 0.0  ;;  %v628_v2 = vadd.f32 3.0, %v596_v58 }
 0x13b   : > { %v750_v3 = vmul.f32 0.16666667, %v718_v60  ;;  %v657_v4 = vmax.f32 %v625_v61, 0.0  ;;  %v626_v5 = vadd.f32 3.0, %v594_v62  ;;  %v10227_v6 = vpop.f32.mrb[12].mxu1  ;;  %1899 = vmatpush1.bf16.msra.mxu1 %v851_v31 }
 0x13c   : > { %v853_v7 = vpack.c.bf16 %v752_v0, %v751_v59  ;;  %v691_v8 = vmin.f32 %v659_v1, 6.0  ;;  %v660_v9 = vmax.f32 %v628_v2, 0.0  ;;  %v563_v10 = vmul.f32 %v10227_v6, %v11205_v41  ;;  %v465_v11 = vpop.f32.mrb[13].mxu1  ;;  %1900 = vmatprep.subr.bf16.mxu1 %v11044_v22 }
 0x13d   : > { %v852_v12 = vpack.c.bf16 %v750_v3, %v749_v63  ;;  %v689_v13 = vmin.f32 %v657_v4, 6.0  ;;  %v658_v14 = vmax.f32 %v626_v5, 0.0  ;;  %v561_v15 = vmul.f32 %v11205_v41, %v465_v11  ;;  %v10228_v16 = vpop.f32.mrb[14].mxu1 }
 0x13e   : > { %v723_v17 = vmul.f32 %v691_v8, %v595_v49  ;;  %v692_v18 = vmin.f32 %v660_v9, 6.0  ;;  %v599_v19 = vadd.f32 %v11208_v42, %v563_v10  ;;  %v564_v20 = vmul.f32 %v10228_v16, %v11205_v41  ;;  %v468_v21 = vpop.f32.mrb[15].mxu1 }
 0x13f   : > { %v721_v23 = vmul.f32 %v689_v13, %v593_v54  ;;  %v690_v24 = vmin.f32 %v658_v14, 6.0  ;;  %v597_v25 = vadd.f32 %v11208_v42, %v561_v15  ;;  %v562_v26 = vmul.f32 %v11205_v41, %v468_v21  ;;  %1901 = vmatpush1.bf16.msra.mxu1 %v852_v12 }
 0x140   : > { %v724_v27 = vmul.f32 %v692_v18, %v596_v58  ;;  %v631_v28 = vadd.f32 3.0, %v599_v19  ;;  %v600_v29 = vadd.f32 %v11208_v42, %v564_v20  ;;  %1902 = vmatprep.subr.bf16.mxu1 %v11044_v22  ;;  %v755_v30 = vmul.f32 0.16666667, %v723_v17 }
 0x141   : > { %v722_v31 = vmul.f32 %v690_v24, %v594_v62  ;;  %v629_v32 = vadd.f32 3.0, %v597_v25  ;;  %v598_v33 = vadd.f32 %v11208_v42, %v562_v26  ;;  %v753_v35 = vmul.f32 0.16666667, %v721_v23 }
 0x142   : > { %v756_v36 = vmul.f32 0.16666667, %v724_v27  ;;  %v663_v39 = vmax.f32 %v631_v28, 0.0  ;;  %v632_v43 = vadd.f32 3.0, %v600_v29 }
 0x143   : > { %v754_v44 = vmul.f32 0.16666667, %v722_v31  ;;  %v661_v45 = vmax.f32 %v629_v32, 0.0  ;;  %v630_v46 = vadd.f32 3.0, %v598_v33  ;;  %v10231_v47 = vpop.f32.mrb[16].mxu1  ;;  %1903 = vmatpush1.bf16.msra.mxu1 %v853_v7 }
 0x144   : > { %v855_v48 = vpack.c.bf16 %v756_v36, %v755_v30  ;;  %v695_v49 = vmin.f32 %v663_v39, 6.0  ;;  %v664_v50 = vmax.f32 %v632_v43, 0.0  ;;  %v567_v51 = vmul.f32 %v10231_v47, %v11205_v41  ;;  %v481_v52 = vpop.f32.mrb[17].mxu1  ;;  %1904 = vmatprep.subr.bf16.mxu1 %v11044_v22 }
 0x145   : > { %v854_v53 = vpack.c.bf16 %v754_v44, %v753_v35  ;;  %v693_v54 = vmin.f32 %v661_v45, 6.0  ;;  %v662_v55 = vmax.f32 %v630_v46, 0.0  ;;  %v565_v56 = vmul.f32 %v11205_v41, %v481_v52  ;;  %v10232_v57 = vpop.f32.mrb[18].mxu1 }
 0x146   : > { %v727_v58 = vmul.f32 %v695_v49, %v599_v19  ;;  %v696_v59 = vmin.f32 %v664_v50, 6.0  ;;  %v603_v60 = vadd.f32 %v11208_v42, %v567_v51  ;;  %v568_v61 = vmul.f32 %v10232_v57, %v11205_v41  ;;  %v484_v62 = vpop.f32.mrb[19].mxu1 }
 0x147   : > { %v725_v63 = vmul.f32 %v693_v54, %v597_v25  ;;  %v694_v0 = vmin.f32 %v662_v55, 6.0  ;;  %v601_v1 = vadd.f32 %v11208_v42, %v565_v56  ;;  %v566_v2 = vmul.f32 %v11205_v41, %v484_v62  ;;  %1905 = vmatpush1.bf16.msra.mxu1 %v854_v53 }
 0x148   : > { %v728_v3 = vmul.f32 %v696_v59, %v600_v29  ;;  %v635_v4 = vadd.f32 3.0, %v603_v60  ;;  %v604_v5 = vadd.f32 %v11208_v42, %v568_v61  ;;  %1906 = vmatprep.subr.bf16.mxu1 %v11044_v22  ;;  %v759_v6 = vmul.f32 0.16666667, %v727_v58 }
 0x149   : > { %v726_v7 = vmul.f32 %v694_v0, %v598_v33  ;;  %v633_v8 = vadd.f32 3.0, %v601_v1  ;;  %v602_v9 = vadd.f32 %v11208_v42, %v566_v2  ;;  %v757_v10 = vmul.f32 0.16666667, %v725_v63 }
 0x14a   : > { %v760_v11 = vmul.f32 0.16666667, %v728_v3  ;;  %v667_v12 = vmax.f32 %v635_v4, 0.0  ;;  %v636_v13 = vadd.f32 3.0, %v604_v5 }
 0x14b   : > { %v758_v14 = vmul.f32 0.16666667, %v726_v7  ;;  %v665_v15 = vmax.f32 %v633_v8, 0.0  ;;  %v634_v16 = vadd.f32 3.0, %v602_v9  ;;  %v10235_v17 = vpop.f32.mrb[20].mxu1  ;;  %1907 = vmatpush1.bf16.msra.mxu1 %v855_v48 }
 0x14c   : > { %v857_v18 = vpack.c.bf16 %v760_v11, %v759_v6  ;;  %v699_v19 = vmin.f32 %v667_v12, 6.0  ;;  %v668_v20 = vmax.f32 %v636_v13, 0.0  ;;  %v571_v21 = vmul.f32 %v10235_v17, %v11205_v41  ;;  %v497_v23 = vpop.f32.mrb[21].mxu1  ;;  %1908 = vmatprep.subr.bf16.mxu1 %v11044_v22 }
 0x14d   : > { %v856_v24 = vpack.c.bf16 %v758_v14, %v757_v10  ;;  %v697_v25 = vmin.f32 %v665_v15, 6.0  ;;  %v666_v26 = vmax.f32 %v634_v16, 0.0  ;;  %v569_v27 = vmul.f32 %v11205_v41, %v497_v23  ;;  %v10236_v28 = vpop.f32.mrb[22].mxu1 }
 0x14e   : > { %v731_v29 = vmul.f32 %v699_v19, %v603_v60  ;;  %v700_v30 = vmin.f32 %v668_v20, 6.0  ;;  %v607_v31 = vadd.f32 %v11208_v42, %v571_v21  ;;  %v572_v32 = vmul.f32 %v10236_v28, %v11205_v41  ;;  %v500_v33 = vpop.f32.mrb[23].mxu1 }
 0x14f   : > { %v729_v35 = vmul.f32 %v697_v25, %v601_v1  ;;  %v698_v36 = vmin.f32 %v666_v26, 6.0  ;;  %v605_v39 = vadd.f32 %v11208_v42, %v569_v27  ;;  %v570_v43 = vmul.f32 %v11205_v41, %v500_v33  ;;  %1909 = vmatpush1.bf16.msra.mxu1 %v856_v24 }
 0x150   : > { %v732_v44 = vmul.f32 %v700_v30, %v604_v5  ;;  %v639_v45 = vadd.f32 3.0, %v607_v31  ;;  %v608_v46 = vadd.f32 %v11208_v42, %v572_v32  ;;  %1910 = vmatprep.subr.bf16.mxu1 %v11044_v22  ;;  %v763_v47 = vmul.f32 0.16666667, %v731_v29 }
 0x151   : > { %v730_v48 = vmul.f32 %v698_v36, %v602_v9  ;;  %v637_v49 = vadd.f32 3.0, %v605_v39  ;;  %v606_v50 = vadd.f32 %v11208_v42, %v570_v43  ;;  %v761_v51 = vmul.f32 0.16666667, %v729_v35 }
 0x152   : > { %v764_v52 = vmul.f32 0.16666667, %v732_v44  ;;  %v671_v53 = vmax.f32 %v639_v45, 0.0  ;;  %v640_v54 = vadd.f32 3.0, %v608_v46 }
 0x153   : > { %v762_v55 = vmul.f32 0.16666667, %v730_v48  ;;  %v669_v56 = vmax.f32 %v637_v49, 0.0  ;;  %v638_v57 = vadd.f32 3.0, %v606_v50  ;;  %v10239_v58 = vpop.f32.mrb[24].mxu1  ;;  %1911 = vmatpush1.bf16.msra.mxu1 %v857_v18 }
 0x154   : > { %v859_v59 = vpack.c.bf16 %v764_v52, %v763_v47  ;;  %v703_v60 = vmin.f32 %v671_v53, 6.0  ;;  %v672_v61 = vmax.f32 %v640_v54, 0.0  ;;  %v575_v62 = vmul.f32 %v10239_v58, %v11205_v41  ;;  %v513_v63 = vpop.f32.mrb[25].mxu1  ;;  %1912 = vmatprep.subr.bf16.mxu1 %v11044_v22  ;;  %v10602_v58 = vld [vmem:[#allocation2 + $0x18] ss:$8 sps:$4 sm:$0xfe]  }
 0x155   : > { %v858_v0 = vpack.c.bf16 %v762_v55, %v761_v51  ;;  %v701_v1 = vmin.f32 %v669_v56, 6.0  ;;  %v670_v2 = vmax.f32 %v638_v57, 0.0  ;;  %v573_v3 = vmul.f32 %v11205_v41, %v513_v63  ;;  %v10240_v4 = vpop.f32.mrb[26].mxu1 }
 0x156   : > { %v735_v5 = vmul.f32 %v703_v60, %v607_v31  ;;  %v704_v6 = vmin.f32 %v672_v61, 6.0  ;;  %v611_v7 = vadd.f32 %v11208_v42, %v575_v62  ;;  %v576_v8 = vmul.f32 %v10240_v4, %v11205_v41  ;;  %v516_v9 = vpop.f32.mrb[27].mxu1  ;;  %v10605_v62 = vld [vmem:[#allocation2 + $0x28] ss:$8 sps:$4 sm:$0xff]  }
 0x157   : > { %v733_v10 = vmul.f32 %v701_v1, %v605_v39  ;;  %v702_v11 = vmin.f32 %v670_v2, 6.0  ;;  %v609_v12 = vadd.f32 %v11208_v42, %v573_v3  ;;  %v574_v13 = vmul.f32 %v11205_v41, %v516_v9  ;;  %1913 = vmatpush1.bf16.msra.mxu1 %v858_v0 }
 0x158   : > { %v736_v14 = vmul.f32 %v704_v6, %v608_v46  ;;  %v643_v15 = vadd.f32 3.0, %v611_v7  ;;  %v612_v16 = vadd.f32 %v11208_v42, %v576_v8  ;;  %1914 = vmatprep.subr.bf16.mxu1 %v11044_v22  ;;  %v767_v17 = vmul.f32 0.16666667, %v735_v5 }
 0x159   : > { %v734_v18 = vmul.f32 %v702_v11, %v606_v50  ;;  %v641_v19 = vadd.f32 3.0, %v609_v12  ;;  %v610_v20 = vadd.f32 %v11208_v42, %v574_v13  ;;  %v765_v21 = vmul.f32 0.16666667, %v733_v10  ;;  %v10608_v10 = vld [vmem:[#allocation2 + $0x3c] ss:$8 sps:$4 sm:$0xff]  }
 0x15a   : > { %v768_v23 = vmul.f32 0.16666667, %v736_v14  ;;  %v675_v24 = vmax.f32 %v643_v15, 0.0  ;;  %v644_v25 = vadd.f32 3.0, %v612_v16  ;;  %v1161_v9 = vshrl.u32 %v10602_v58, 16 }
 0x15b   : > { %v766_v26 = vmul.f32 0.16666667, %v734_v18  ;;  %v673_v27 = vmax.f32 %v641_v19, 0.0  ;;  %v642_v28 = vadd.f32 3.0, %v610_v20  ;;  %v10243_v29 = vpop.f32.mrb[28].mxu1  ;;  %1915 = vmatpush1.bf16.msra.mxu1 %v859_v59  ;;  %v1164_v13 = vshll.u32 %v10602_v58, 16 }
 0x15c   : > { %v861_v30 = vpack.c.bf16 %v768_v23, %v767_v17  ;;  %v707_v31 = vmin.f32 %v675_v24, 6.0  ;;  %v676_v32 = vmax.f32 %v644_v25, 0.0  ;;  %v579_v33 = vmul.f32 %v10243_v29, %v11205_v41  ;;  %v529_v35 = vpop.f32.mrb[29].mxu1  ;;  %1916 = vmatprep.subr.bf16.mxu1 %v11044_v22 }
 0x15d   : > { %v860_v36 = vpack.c.bf16 %v766_v26, %v765_v21  ;;  %v705_v39 = vmin.f32 %v673_v27, 6.0  ;;  %v674_v43 = vmax.f32 %v642_v28, 0.0  ;;  %v577_v44 = vmul.f32 %v11205_v41, %v529_v35  ;;  %v10244_v45 = vpop.f32.mrb[30].mxu1 }
 0x15e   : > { %v739_v46 = vmul.f32 %v707_v31, %v611_v7  ;;  %v708_v47 = vmin.f32 %v676_v32, 6.0  ;;  %v615_v48 = vadd.f32 %v11208_v42, %v579_v33  ;;  %v580_v49 = vmul.f32 %v10244_v45, %v11205_v41  ;;  %v532_v50 = vpop.f32.mrb[31].mxu1  ;;  %v10610_v33 = vld [vmem:[#allocation2 + $0x38] ss:$8 sps:$4 sm:$0xff]  }
 0x15f   : > { %v737_v51 = vmul.f32 %v705_v39, %v609_v12  ;;  %v706_v52 = vmin.f32 %v674_v43, 6.0  ;;  %v613_v53 = vadd.f32 %v11208_v42, %v577_v44  ;;  %v578_v54 = vmul.f32 %v11205_v41, %v532_v50  ;;  %1917 = vmatpush1.bf16.msra.mxu1 %v860_v36  ;;  %v10611_v43 = vld [vmem:[#allocation2 + $0x4c] ss:$8 sps:$4 sm:$0xff]  }
 0x160   : > { %v740_v55 = vmul.f32 %v708_v47, %v612_v16  ;;  %v647_v56 = vadd.f32 3.0, %v615_v48  ;;  %v616_v57 = vadd.f32 %v11208_v42, %v580_v49  ;;  %1918 = vmatprep.subr.bf16.mxu1 %v11044_v22  ;;  %v771_v63 = vmul.f32 0.16666667, %v739_v46 }
 0x161   : > { %v738_v59 = vmul.f32 %v706_v52, %v610_v20  ;;  %v645_v60 = vadd.f32 3.0, %v613_v53  ;;  %v614_v61 = vadd.f32 %v11208_v42, %v578_v54  ;;  %v769_v3 = vmul.f32 0.16666667, %v737_v51 }
 0x162   : > { %v772_v0 = vmul.f32 0.16666667, %v740_v55  ;;  %v679_v1 = vmax.f32 %v647_v56, 0.0  ;;  %v648_v2 = vadd.f32 3.0, %v616_v57  ;;  %v1169_v16 = vshrl.u32 %v10605_v62, 16 }
 0x163   : > { %v770_v4 = vmul.f32 0.16666667, %v738_v59  ;;  %v677_v41 = vmax.f32 %v645_v60, 0.0  ;;  %v646_v5 = vadd.f32 3.0, %v614_v61  ;;  %1919 = vmatpush1.bf16.msra.mxu1 %v861_v30  ;;  %v1172_v17 = vshll.u32 %v10605_v62, 16 }
 0x164   : > { %v863_v6 = vpack.c.bf16 %v772_v0, %v771_v63  ;;  %v711_v7 = vmin.f32 %v679_v1, 6.0  ;;  %v680_v8 = vmax.f32 %v648_v2, 0.0  ;;  %1920 = vmatprep.subr.bf16.mxu1 %v11044_v22  ;;  %v1204_v21 = vshrl.u32 %v10608_v10, 16  ;;  %v10613_v55 = vld [vmem:[#allocation2 + $0x48] ss:$8 sps:$4 sm:$0xff]  }
 0x165   : > { %v862_v11 = vpack.c.bf16 %v770_v4, %v769_v3  ;;  %v709_v12 = vmin.f32 %v677_v41, 6.0  ;;  %v678_v42 = vmax.f32 %v646_v5, 0.0  ;;  %v1207_v23 = vshll.u32 %v10608_v10, 16  ;;  %v10614_v59 = vld [vmem:[#allocation2 + $0x5c] ss:$8 sps:$4 sm:$0xff]  }
 0x166   : > { %v743_v14 = vmul.f32 %v711_v7, %v615_v48  ;;  %v712_v15 = vmin.f32 %v680_v8, 6.0  ;;  %v1163_v25 = vrot.slane %v1161_v9, 1  ;;  %v1166_v26 = vrot.slane %v1164_v13, 2  ;;  %v10616_v41 = vld [vmem:[#allocation2 + $0x58] ss:$8 sps:$4 sm:$0xff]  }
 0x167   : > { %v741_v18 = vmul.f32 %v709_v12, %v613_v53  ;;  %v710_v19 = vmin.f32 %v678_v42, 6.0  ;;  %1921 = vmatpush1.bf16.msra.mxu1 %v862_v11  ;;  %v1171_v29 = vrot.slane %v1169_v16, 1  ;;  %v1174_v30 = vrot.slane %v1172_v17, 2  ;;  %v10617_v7 = vld [vmem:[#allocation2 + $0x6c] ss:$8 sps:$4 sm:$0xff]  }
 0x168   : > { %v744_v20 = vmul.f32 %v712_v15, %v616_v57  ;;  %1922 = vmatprep.subr.bf16.mxu1 %v11044_v22  ;;  %v775_v27 = vmul.f32 0.16666667, %v743_v14  ;;  %v1206_v36 = vrot.slane %v1204_v21, 1  ;;  %v1209_v39 = vrot.slane %v1207_v23, 2  ;;  %v10619_v16 = vld [vmem:[#allocation2 + $0x68] ss:$8 sps:$4 sm:$0xff]  }
 0x169   : > { %v742_v24 = vmul.f32 %v710_v19, %v614_v61  ;;  %v773_v31 = vmul.f32 0.16666667, %v741_v18  ;;  %v1167_v45 = vor.u32 %v1166_v26, %v1163_v25  ;;  %v1175_v46 = vor.u32 %v1174_v30, %v1171_v29 }
 0x16a   : > { %v776_v28 = vmul.f32 0.16666667, %v744_v20  ;;  %v1195_v47 = vshrl.u32 %v10610_v33, 16  ;;  %v1198_v48 = vshll.u32 %v10610_v33, 16  ;;  %v1210_v49 = vor.u32 %v1209_v39, %v1206_v36  ;;  %v10620_v20 = vld [vmem:[#allocation2 + $0x7c] ss:$8 sps:$4 sm:$0xff]  }
 0x16b   : > { %v774_v32 = vmul.f32 0.16666667, %v742_v24  ;;  %1923 = vmatpush1.bf16.msra.mxu1 %v863_v6  ;;  %v1222_v50 = vshrl.u32 %v10611_v43, 16  ;;  %v1225_v51 = vshll.u32 %v10611_v43, 16  ;;  %v1176_v52 = vsel %vm1159_vm3, %v1167_v45, %v1175_v46  ;;  %v10623_v36 = vld [vmem:[#allocation2 + $0x8c] ss:$8 sps:$4 sm:$0xff]  }
 0x16c   : > { %v865_v35 = vpack.c.bf16 %v776_v28, %v775_v27  ;;  %1924 = vmatprep.subr.bf16.mxu1 %v11044_v22  ;;  %v1197_v53 = vrot.slane %v1195_v47, 1  ;;  %v1200_v54 = vrot.slane %v1198_v48, 2  ;;  %v1211_v56 = vsel %vm1159_vm3, %v11192_v34, %v1210_v49 }
 0x16d   : > { %v864_v44 = vpack.c.bf16 %v774_v32, %v773_v31  ;;  %v1224_v57 = vrot.slane %v1222_v50, 1  ;;  %v1227_v58 = vrot.slane %v1225_v51, 2  ;;  %v1213_v61 = vshrl.u32 %v10613_v55, 16  ;;  %v10622_v31 = vld [vmem:[#allocation2 + $0x78] ss:$8 sps:$4 sm:$0xff]  }
 0x16e   : > { %v1201_v60 = vor.u32 %v1200_v54, %v1197_v53  ;;  %v1216_v62 = vshll.u32 %v10613_v55, 16  ;;  %v1240_v0 = vshrl.u32 %v10614_v59, 16  ;;  %v1243_v1 = vshll.u32 %v10614_v59, 16  ;;  %v10625_v51 = vld [vmem:[#allocation2 + $0x88] ss:$8 sps:$4 sm:$0xff]  }
 0x16f   : > { %1925 = vmatpush1.bf16.msra.mxu1 %v864_v44  ;;  %v1228_v63 = vor.u32 %v1227_v58, %v1224_v57  ;;  %v1215_v3 = vrot.slane %v1213_v61, 1  ;;  %v1231_v9 = vshrl.u32 %v10616_v41, 16  ;;  %v1234_v10 = vshll.u32 %v10616_v41, 16  ;;  %v10626_v55 = vld [vmem:[#allocation2 + $0x9c] ss:$8 sps:$4 sm:$0xff]  }
 0x170   : > { %1926 = vmatprep.subr.bf16.mxu1 %v11044_v22  ;;  %v1202_v2 = vsel %vm1159_vm3, %v1175_v46, %v1201_v60  ;;  %v1218_v4 = vrot.slane %v1216_v62, 2  ;;  %v1242_v6 = vrot.slane %v1240_v0, 1  ;;  %v1245_v34 = vrot.slane %v1243_v1, 2  ;;  %v10628_v1 = vld [vmem:[#allocation2 + $0x98] ss:$8 sps:$4 sm:$0xff]  }
 0x171   : > { %v1229_v5 = vsel %vm1159_vm3, %v1210_v49, %v1228_v63  ;;  %v1258_v12 = vshrl.u32 %v10617_v7, 16  ;;  %v1261_v42 = vshll.u32 %v10617_v7, 16  ;;  %v1233_v14 = vrot.slane %v1231_v9, 1  ;;  %v10629_v41 = vld [vmem:[#allocation2 + $0xac] ss:$8 sps:$4 sm:$0xff]  }
 0x172   : > { %v1219_v8 = vor.u32 %v1218_v4, %v1215_v3  ;;  %v1246_v11 = vor.u32 %v1245_v34, %v1242_v6  ;;  %v1236_v15 = vrot.slane %v1234_v10, 2  ;;  %v1249_v23 = vshrl.u32 %v10619_v16, 16 }
 0x173   : > { %1927 = vmatpush1.bf16.msra.mxu1 %v865_v35  ;;  %v1260_v18 = vrot.slane %v1258_v12, 1  ;;  %v1263_v19 = vrot.slane %v1261_v42, 2  ;;  %v1252_v24 = vshll.u32 %v10619_v16, 16  ;;  %v1276_v26 = vshrl.u32 %v10620_v20, 16  ;;  %v10631_v42 = vld [vmem:[#allocation2 + $0xa8] ss:$8 sps:$4 sm:$0xff]  }
 0x174   : > { %v1220_v13 = vsel %vm1159_vm3, %v1201_v60, %v1219_v8  ;;  %v1247_v17 = vsel %vm1159_vm3, %v1228_v63, %v1246_v11  ;;  %v1237_v21 = vor.u32 %v1236_v15, %v1233_v14  ;;  %v1279_v27 = vshll.u32 %v10620_v20, 16  ;;  %v10632_v16 = vld [vmem:[#allocation2 + $0xbc] ss:$8 sps:$4 sm:$0xff]  }
 0x175   : > { %v1264_v25 = vor.u32 %v1263_v19, %v1260_v18  ;;  %v1251_v29 = vrot.slane %v1249_v23, 1  ;;  %v1254_v30 = vrot.slane %v1252_v24, 2  ;;  %v1278_v33 = vrot.slane %v1276_v26, 1 }
 0x176   : > { %1929 = vmatmul.mubr.bf16.vlgmr.msra.gmra.mrb[32].mxu1 %v1176_v52  ;;  %v1238_v28 = vsel %vm1159_vm3, %v1219_v8, %v1237_v21  ;;  %v1281_v35 = vrot.slane %v1279_v27, 2  ;;  %v1267_v43 = vshrl.u32 %v10622_v31, 16  ;;  %v1270_v44 = vshll.u32 %v10622_v31, 16  ;;  %v10634_v27 = vld [vmem:[#allocation2 + $0xb8] ss:$8 sps:$4 sm:$0xff]  }
 0x177   : > { %1936 = vmatprep.mubr.bf16.mxu1 %v1211_v56  ;;  %v1265_v32 = vsel %vm1159_vm3, %v1246_v11, %v1264_v25  ;;  %v1255_v39 = vor.u32 %v1254_v30, %v1251_v29  ;;  %v1294_v46 = vshrl.u32 %v10623_v36, 16  ;;  %v1297_v47 = vshll.u32 %v10623_v36, 16  ;;  %v10635_v31 = vld [vmem:[#allocation2 + $0xcc] ss:$8 sps:$4 sm:$0xff]  }
 0x178   : > { %v1282_v45 = vor.u32 %v1281_v35, %v1278_v33  ;;  %v1269_v49 = vrot.slane %v1267_v43, 1  ;;  %v1272_v50 = vrot.slane %v1270_v44, 2  ;;  %v1285_v57 = vshrl.u32 %v10625_v51, 16 }
 0x179   : > { %v1256_v48 = vsel %vm1159_vm3, %v1237_v21, %v1255_v39  ;;  %v1296_v53 = vrot.slane %v1294_v46, 1  ;;  %v1299_v54 = vrot.slane %v1297_v47, 2  ;;  %v1288_v58 = vshll.u32 %v10625_v51, 16  ;;  %v10637_v47 = vld [vmem:[#allocation2 + $0xc8] ss:$8 sps:$4 sm:$0xff]  }
 0x17a   : > { %v1283_v52 = vsel %vm1159_vm3, %v1264_v25, %v1282_v45  ;;  %v1273_v56 = vor.u32 %v1272_v50, %v1269_v49  ;;  %v1312_v60 = vshrl.u32 %v10626_v55, 16  ;;  %v1315_v61 = vshll.u32 %v10626_v55, 16  ;;  %v10638_v51 = vld [vmem:[#allocation2 + $0xdc] ss:$8 sps:$4 sm:$0xff]  }
 0x17b   : > { %v1300_v59 = vor.u32 %v1299_v54, %v1296_v53  ;;  %v1287_v63 = vrot.slane %v1285_v57, 1  ;;  %v1290_v0 = vrot.slane %v1288_v58, 2  ;;  %v1303_v6 = vshrl.u32 %v10628_v1, 16 }
 0x17c   : > { %v1274_v62 = vsel %vm1159_vm3, %v1255_v39, %v1273_v56  ;;  %v1314_v3 = vrot.slane %v1312_v60, 1  ;;  %v1317_v4 = vrot.slane %v1315_v61, 2  ;;  %v1306_v34 = vshll.u32 %v10628_v1, 16  ;;  %v10640_v61 = vld [vmem:[#allocation2 + $0xd8] ss:$8 sps:$4 sm:$0xff]  }
 0x17d   : > { %v1330_v8 = vshrl.u32 %v10629_v41, 16  ;;  %v1333_v9 = vshll.u32 %v10629_v41, 16  ;;  %v1305_v11 = vrot.slane %v1303_v6, 1  ;;  %v1321_v18 = vshrl.u32 %v10631_v42, 16  ;;  %v10641_v1 = vld [vmem:[#allocation2 + $0xec] ss:$8 sps:$4 sm:$0xff]  }
 0x17e   : > { %1937 = vmatmul.mubr.bf16.gmra.mrb[36].mxu1 %v1202_v2  ;;  %v1301_v2 = vsel %vm1159_vm3, %v1282_v45, %v1300_v59  ;;  %v1318_v7 = vor.u32 %v1317_v4, %v1314_v3  ;;  %v1308_v12 = vrot.slane %v1306_v34, 2  ;;  %v1324_v19 = vshll.u32 %v10631_v42, 16  ;;  %v10644_v42 = vld [vmem:[#allocation2 + $0xfc] ss:$8 sps:$4 sm:$0xff]  }
 0x17f   : > { %1944 = vmatprep.mubr.bf16.mxu1 %v1229_v5  ;;  %v1291_v5 = vor.u32 %v1290_v0, %v1287_v63  ;;  %v1332_v14 = vrot.slane %v1330_v8, 1  ;;  %v1335_v15 = vrot.slane %v1333_v9, 2  ;;  %v1348_v21 = vshrl.u32 %v10632_v16, 16  ;;  %v10643_v9 = vld [vmem:[#allocation2 + $0xe8] ss:$8 sps:$4 sm:$0xff]  }
 0x180   : > { %v1351_v23 = vshll.u32 %v10632_v16, 16  ;;  %v1323_v25 = vrot.slane %v1321_v18, 1  ;;  %v1326_v26 = vrot.slane %v1324_v19, 2  ;;  %v1339_v33 = vshrl.u32 %v10634_v27, 16 }
 0x181   : > { %v1292_v10 = vsel %vm1159_vm3, %v1273_v56, %v1291_v5  ;;  %v1336_v20 = vor.u32 %v1335_v15, %v1332_v14  ;;  %v1350_v29 = vrot.slane %v1348_v21, 1  ;;  %v1342_v35 = vshll.u32 %v10634_v27, 16  ;;  %v10647_v27 = vld [vmem:[#allocation2 + $0x10c] ss:$8 sps:$4 sm:$0xff]  }
 0x182   : > { %v1353_v30 = vrot.slane %v1351_v23, 2  ;;  %v1366_v39 = vshrl.u32 %v10635_v31, 16  ;;  %v1369_v43 = vshll.u32 %v10635_v31, 16  ;;  %v1341_v45 = vrot.slane %v1339_v33, 1  ;;  %v10646_v23 = vld [vmem:[#allocation2 + $0xf8] ss:$8 sps:$4 sm:$0xff]  }
 0x183   : > { %v1344_v46 = vrot.slane %v1342_v35, 2  ;;  %v1357_v53 = vshrl.u32 %v10637_v47, 16  ;;  %v1360_v54 = vshll.u32 %v10637_v47, 16  ;;  %v1384_v56 = vshrl.u32 %v10638_v51, 16  ;;  %v10650_v47 = vld [vmem:[#allocation2 + $0x11c] ss:$8 sps:$4 sm:$0xff]  }
 0x184   : > { %v1354_v36 = vor.u32 %v1353_v30, %v1350_v29  ;;  %v1368_v49 = vrot.slane %v1366_v39, 1  ;;  %v1371_v50 = vrot.slane %v1369_v43, 2  ;;  %v1387_v57 = vshll.u32 %v10638_v51, 16  ;;  %v10649_v43 = vld [vmem:[#allocation2 + $0x108] ss:$8 sps:$4 sm:$0xff]  }
 0x185   : > { %v1362_v60 = vrot.slane %v1360_v54, 2  ;;  %v1386_v63 = vrot.slane %v1384_v56, 1  ;;  %v1375_v3 = vshrl.u32 %v10640_v61, 16  ;;  %v1378_v4 = vshll.u32 %v10640_v61, 16  ;;  %v10653_v61 = vld [vmem:[#allocation2 + $0x12c] ss:$8 sps:$4 sm:$0xff]  }
 0x186   : > { %1945 = vmatmul.mubr.bf16.gmra.mrb[40].mxu1 %v1220_v13  ;;  %v1319_v13 = vsel %vm1159_vm3, %v1300_v59, %v1318_v7  ;;  %v1372_v55 = vor.u32 %v1371_v50, %v1368_v49  ;;  %v1359_v59 = vrot.slane %v1357_v53, 1  ;;  %v1389_v0 = vrot.slane %v1387_v57, 2  ;;  %v10652_v57 = vld [vmem:[#allocation2 + $0x118] ss:$8 sps:$4 sm:$0xff]  }
 0x187   : > { %1952 = vmatprep.mubr.bf16.mxu1 %v1247_v17  ;;  %v1309_v17 = vor.u32 %v1308_v12, %v1305_v11  ;;  %v1405_v6 = vshll.u32 %v10641_v1, 16  ;;  %v1380_v8 = vrot.slane %v1378_v4, 2  ;;  %v1393_v14 = vshrl.u32 %v10643_v9, 16 }
 0x188   : > { %v1390_v41 = vor.u32 %v1389_v0, %v1386_v63  ;;  %v1396_v15 = vshll.u32 %v10643_v9, 16  ;;  %v1423_v18 = vshll.u32 %v10644_v42, 16  ;;  %v1411_v29 = vshrl.u32 %v10646_v23, 16  ;;  %v10656_v9 = vld [vmem:[#allocation2 + $0x13c] ss:$8 sps:$4 sm:$0xff]  }
 0x189   : > { %v1310_v24 = vsel %vm1159_vm3, %v1291_v5, %v1309_v17  ;;  %v1402_v5 = vshrl.u32 %v10641_v1, 16  ;;  %v1407_v12 = vrot.slane %v1405_v6, 2  ;;  %v1414_v30 = vshll.u32 %v10646_v23, 16  ;;  %v10655_v6 = vld [vmem:[#allocation2 + $0x128] ss:$8 sps:$4 sm:$0xff]  }
 0x18a   : > { %v1398_v21 = vrot.slane %v1396_v15, 2  ;;  %v1441_v33 = vshll.u32 %v10647_v27, 16  ;;  %v1429_v49 = vshrl.u32 %v10649_v43, 16  ;;  %v1432_v50 = vshll.u32 %v10649_v43, 16  ;;  %v10659_v23 = vld [vmem:[#allocation2 + $0x14c] ss:$8 sps:$4 sm:$0xff]  }
 0x18b   : > { %v1404_v11 = vrot.slane %v1402_v5, 1  ;;  %v1416_v39 = vrot.slane %v1414_v30, 2  ;;  %v1459_v53 = vshll.u32 %v10650_v47, 16  ;;  %v1447_v63 = vshrl.u32 %v10652_v57, 16  ;;  %v10662_v43 = vld [vmem:[#allocation2 + $0x15c] ss:$8 sps:$4 sm:$0xff]  }
 0x18c   : > { %v1434_v56 = vrot.slane %v1432_v50, 2  ;;  %v1450_v0 = vshll.u32 %v10652_v57, 16  ;;  %v10665_v57 = vld [vmem:[#allocation2 + $0x16c] ss:$8 sps:$4 sm:$0xff]  }
 0x18d   : > { %v1408_v16 = vor.u32 %v1407_v12, %v1404_v11  ;;  %v1465_v11 = vshrl.u32 %v10655_v6, 16  ;;  %v1468_v12 = vshll.u32 %v10655_v6, 16  ;;  %v10668_v6 = vld [vmem:[#allocation2 + $0x17c] ss:$8 sps:$4 sm:$0xff]  }
 0x18e   : > { %1953 = vmatmul.mubr.bf16.gmra.mrb[44].mxu1 %v1238_v28  ;;  %v1337_v28 = vsel %vm1159_vm3, %v1318_v7, %v1336_v20  ;;  %v1377_v7 = vrot.slane %v1375_v3, 1  ;;  %v1477_v3 = vshll.u32 %v10653_v61, 16  ;;  %v1452_v5 = vrot.slane %v1450_v0, 2 }
 0x18f   : > { %1960 = vmatprep.mubr.bf16.mxu1 %v1265_v32  ;;  %v1327_v32 = vor.u32 %v1326_v26, %v1323_v25  ;;  %v1425_v26 = vrot.slane %v1423_v18, 2  ;;  %v10658_v18 = vld [vmem:[#allocation2 + $0x138] ss:$8 sps:$4 sm:$0xff]  }
 0x191   : > { %v1328_v44 = vsel %vm1159_vm3, %v1309_v17, %v1327_v32  ;;  %v1420_v17 = vshrl.u32 %v10644_v42, 16 }
 0x193   : > { %v1422_v25 = vrot.slane %v1420_v17, 1  ;;  %v1470_v17 = vrot.slane %v1468_v12, 2 }
 0x195   : > { %v1426_v31 = vor.u32 %v1425_v26, %v1422_v25  ;;  %v1483_v25 = vshrl.u32 %v10658_v18, 16  ;;  %v1486_v26 = vshll.u32 %v10658_v18, 16  ;;  %v10671_v18 = vld [vmem:[#allocation2 + $0x18c] ss:$8 sps:$4 sm:$0xff]  }
 0x196   : > { %1961 = vmatmul.mubr.bf16.gmra.mrb[48].mxu1 %v1256_v48  ;;  %v1355_v48 = vsel %vm1159_vm3, %v1336_v20, %v1354_v36  ;;  %v1395_v20 = vrot.slane %v1393_v14, 1  ;;  %v1495_v14 = vshll.u32 %v10656_v9, 16 }
 0x197   : > { %1968 = vmatprep.mubr.bf16.mxu1 %v1283_v52  ;;  %v1345_v52 = vor.u32 %v1344_v46, %v1341_v45  ;;  %v1443_v46 = vrot.slane %v1441_v33, 2  ;;  %v10661_v33 = vld [vmem:[#allocation2 + $0x148] ss:$8 sps:$4 sm:$0xff]  }
 0x199   : > { %v1346_v58 = vsel %vm1159_vm3, %v1327_v32, %v1345_v52  ;;  %v1438_v32 = vshrl.u32 %v10647_v27, 16 }
 0x19b   : > { %v1440_v45 = vrot.slane %v1438_v32, 1  ;;  %v1488_v32 = vrot.slane %v1486_v26, 2 }
 0x19d   : > { %v1444_v51 = vor.u32 %v1443_v46, %v1440_v45  ;;  %v1501_v45 = vshrl.u32 %v10661_v33, 16  ;;  %v1504_v46 = vshll.u32 %v10661_v33, 16  ;;  %v10674_v33 = vld [vmem:[#allocation2 + $0x19c] ss:$8 sps:$4 sm:$0xff]  }
 0x19e   : > { %1969 = vmatmul.mubr.bf16.gmra.mrb[52].mxu1 %v1274_v62  ;;  %v1373_v62 = vsel %vm1159_vm3, %v1354_v36, %v1372_v55  ;;  %v1413_v36 = vrot.slane %v1411_v29, 1  ;;  %v1513_v29 = vshll.u32 %v10659_v23, 16 }
 0x19f   : > { %1976 = vmatprep.mubr.bf16.mxu1 %v1301_v2  ;;  %v1363_v2 = vor.u32 %v1362_v60, %v1359_v59  ;;  %v1461_v60 = vrot.slane %v1459_v53, 2  ;;  %v10664_v53 = vld [vmem:[#allocation2 + $0x158] ss:$8 sps:$4 sm:$0xff]  }
 0x1a1   : > { %v1364_v34 = vsel %vm1159_vm3, %v1345_v52, %v1363_v2  ;;  %v1456_v52 = vshrl.u32 %v10650_v47, 16 }
 0x1a3   : > { %v1458_v59 = vrot.slane %v1456_v52, 1  ;;  %v1506_v52 = vrot.slane %v1504_v46, 2 }
 0x1a5   : > { %v1462_v1 = vor.u32 %v1461_v60, %v1458_v59  ;;  %v1519_v59 = vshrl.u32 %v10664_v53, 16  ;;  %v1522_v60 = vshll.u32 %v10664_v53, 16  ;;  %v10677_v53 = vld [vmem:[#allocation2 + $0x1ac] ss:$8 sps:$4 sm:$0xff]  }
 0x1a6   : > { %1977 = vmatmul.mubr.bf16.gmra.mrb[56].mxu1 %v1292_v10  ;;  %v1391_v10 = vsel %vm1159_vm3, %v1372_v55, %v1390_v41  ;;  %v1431_v55 = vrot.slane %v1429_v49, 1  ;;  %v1531_v49 = vshll.u32 %v10662_v43, 16 }
 0x1a7   : > { %1984 = vmatprep.mubr.bf16.mxu1 %v1319_v13  ;;  %v1381_v13 = vor.u32 %v1380_v8, %v1377_v7  ;;  %v1479_v8 = vrot.slane %v1477_v3, 2  ;;  %v10667_v3 = vld [vmem:[#allocation2 + $0x168] ss:$8 sps:$4 sm:$0xff]  }
 0x1a9   : > { %v1382_v19 = vsel %vm1159_vm3, %v1363_v2, %v1381_v13  ;;  %v1474_v2 = vshrl.u32 %v10653_v61, 16 }
 0x1ab   : > { %v1476_v7 = vrot.slane %v1474_v2, 1  ;;  %v1524_v2 = vrot.slane %v1522_v60, 2 }
 0x1ad   : > { %v1480_v42 = vor.u32 %v1479_v8, %v1476_v7  ;;  %v1537_v7 = vshrl.u32 %v10667_v3, 16  ;;  %v1540_v8 = vshll.u32 %v10667_v3, 16  ;;  %v10680_v3 = vld [vmem:[#allocation2 + $0x1bc] ss:$8 sps:$4 sm:$0xff]  }
 0x1ae   : > { %1985 = vmatmul.mubr.bf16.gmra.mrb[60].mxu1 %v1310_v24  ;;  %v1409_v24 = vsel %vm1159_vm3, %v1390_v41, %v1408_v16  ;;  %v1449_v41 = vrot.slane %v1447_v63, 1  ;;  %v1549_v63 = vshll.u32 %v10665_v57, 16 }
 0x1af   : > { %1992 = vmatprep.mubr.bf16.mxu1 %v1337_v28  ;;  %v1399_v28 = vor.u32 %v1398_v21, %v1395_v20  ;;  %v1497_v21 = vrot.slane %v1495_v14, 2  ;;  %v10670_v14 = vld [vmem:[#allocation2 + $0x178] ss:$8 sps:$4 sm:$0xff]  }
 0x1b1   : > { %v1400_v35 = vsel %vm1159_vm3, %v1381_v13, %v1399_v28  ;;  %v1492_v13 = vshrl.u32 %v10656_v9, 16 }
 0x1b3   : > { %v1494_v20 = vrot.slane %v1492_v13, 1  ;;  %v1542_v13 = vrot.slane %v1540_v8, 2 }
 0x1b5   : > { %v1498_v27 = vor.u32 %v1497_v21, %v1494_v20  ;;  %v1555_v20 = vshrl.u32 %v10670_v14, 16  ;;  %v1558_v21 = vshll.u32 %v10670_v14, 16  ;;  %v10683_v14 = vld [vmem:[#allocation2 + $0x1cc] ss:$8 sps:$4 sm:$0xff]  }
 0x1b6   : > { %1993 = vmatmul.mubr.bf16.gmra.mrb[64].mxu1 %v1328_v44  ;;  %v1427_v44 = vsel %vm1159_vm3, %v1408_v16, %v1426_v31  ;;  %v1467_v16 = vrot.slane %v1465_v11, 1  ;;  %v1567_v11 = vshll.u32 %v10668_v6, 16 }
 0x1b7   : > { %2000 = vmatprep.mubr.bf16.mxu1 %v1355_v48  ;;  %v1417_v48 = vor.u32 %v1416_v39, %v1413_v36  ;;  %v1515_v39 = vrot.slane %v1513_v29, 2  ;;  %v10673_v29 = vld [vmem:[#allocation2 + $0x188] ss:$8 sps:$4 sm:$0xff]  }
 0x1b9   : > { %v1418_v54 = vsel %vm1159_vm3, %v1399_v28, %v1417_v48  ;;  %v1510_v28 = vshrl.u32 %v10659_v23, 16 }
 0x1bb   : > { %v1512_v36 = vrot.slane %v1510_v28, 1  ;;  %v1560_v28 = vrot.slane %v1558_v21, 2 }
 0x1bd   : > { %v1516_v47 = vor.u32 %v1515_v39, %v1512_v36  ;;  %v1573_v36 = vshrl.u32 %v10673_v29, 16  ;;  %v1576_v39 = vshll.u32 %v10673_v29, 16  ;;  %v10686_v29 = vld [vmem:[#allocation2 + $0x1dc] ss:$8 sps:$4 sm:$0xff]  }
 0x1be   : > { %2001 = vmatmul.mubr.bf16.gmra.mrb[68].mxu1 %v1346_v58  ;;  %v1445_v58 = vsel %vm1159_vm3, %v1426_v31, %v1444_v51  ;;  %v1485_v31 = vrot.slane %v1483_v25, 1  ;;  %v1585_v25 = vshll.u32 %v10671_v18, 16 }
 0x1bf   : > { %2008 = vmatprep.mubr.bf16.mxu1 %v1373_v62  ;;  %v1435_v62 = vor.u32 %v1434_v56, %v1431_v55  ;;  %v1533_v56 = vrot.slane %v1531_v49, 2  ;;  %v10676_v49 = vld [vmem:[#allocation2 + $0x198] ss:$8 sps:$4 sm:$0xff]  }
 0x1c1   : > { %v1436_v4 = vsel %vm1159_vm3, %v1417_v48, %v1435_v62  ;;  %v1528_v48 = vshrl.u32 %v10662_v43, 16 }
 0x1c3   : > { %v1530_v55 = vrot.slane %v1528_v48, 1  ;;  %v1578_v48 = vrot.slane %v1576_v39, 2 }
 0x1c5   : > { %v1534_v61 = vor.u32 %v1533_v56, %v1530_v55  ;;  %v1591_v55 = vshrl.u32 %v10676_v49, 16  ;;  %v1594_v56 = vshll.u32 %v10676_v49, 16  ;;  %v10689_v49 = vld [vmem:[#allocation2 + $0x1ec] ss:$8 sps:$4 sm:$0xff]  }
 0x1c6   : > { %2009 = vmatmul.mubr.bf16.gmra.mrb[72].mxu1 %v1364_v34  ;;  %v1463_v34 = vsel %vm1159_vm3, %v1444_v51, %v1462_v1  ;;  %v1503_v51 = vrot.slane %v1501_v45, 1  ;;  %v1603_v45 = vshll.u32 %v10674_v33, 16 }
 0x1c7   : > { %2016 = vmatprep.mubr.bf16.mxu1 %v1391_v10  ;;  %v1453_v10 = vor.u32 %v1452_v5, %v1449_v41  ;;  %v1551_v5 = vrot.slane %v1549_v63, 2  ;;  %v10679_v63 = vld [vmem:[#allocation2 + $0x1a8] ss:$8 sps:$4 sm:$0xff]  }
 0x1c9   : > { %v1454_v15 = vsel %vm1159_vm3, %v1435_v62, %v1453_v10  ;;  %v1546_v62 = vshrl.u32 %v10665_v57, 16 }
 0x1cb   : > { %v1548_v41 = vrot.slane %v1546_v62, 1  ;;  %v1596_v62 = vrot.slane %v1594_v56, 2 }
 0x1cd   : > { %v1552_v9 = vor.u32 %v1551_v5, %v1548_v41  ;;  %v1609_v41 = vshrl.u32 %v10679_v63, 16  ;;  %v1612_v5 = vshll.u32 %v10679_v63, 16  ;;  %v10692_v63 = vld [vmem:[#allocation2 + $0x1fc] ss:$8 sps:$4 sm:$0xff]  }
 0x1ce   : > { %2017 = vmatmul.mubr.bf16.gmra.mrb[76].mxu1 %v1382_v19  ;;  %v1481_v19 = vsel %vm1159_vm3, %v1462_v1, %v1480_v42  ;;  %v1521_v1 = vrot.slane %v1519_v59, 1  ;;  %v1621_v59 = vshll.u32 %v10677_v53, 16 }
 0x1cf   : > { %2024 = vmatprep.mubr.bf16.mxu1 %v1409_v24  ;;  %v1471_v24 = vor.u32 %v1470_v17, %v1467_v16  ;;  %v1569_v17 = vrot.slane %v1567_v11, 2  ;;  %v10682_v11 = vld [vmem:[#allocation2 + $0x1b8] ss:$8 sps:$4 sm:$0xff]  }
 0x1d1   : > { %v1472_v30 = vsel %vm1159_vm3, %v1453_v10, %v1471_v24  ;;  %v1564_v10 = vshrl.u32 %v10668_v6, 16 }
 0x1d3   : > { %v1566_v16 = vrot.slane %v1564_v10, 1  ;;  %v1614_v10 = vrot.slane %v1612_v5, 2 }
 0x1d5   : > { %v1570_v23 = vor.u32 %v1569_v17, %v1566_v16  ;;  %v1627_v16 = vshrl.u32 %v10682_v11, 16  ;;  %v1630_v17 = vshll.u32 %v10682_v11, 16 }
 0x1d6   : > { %2025 = vmatmul.mubr.bf16.gmra.mrb[80].mxu1 %v1400_v35  ;;  %v1499_v35 = vsel %vm1159_vm3, %v1480_v42, %v1498_v27  ;;  %v1539_v42 = vrot.slane %v1537_v7, 1  ;;  %v1639_v7 = vshll.u32 %v10680_v3, 16 }
 0x1d7   : > { %2032 = vmatprep.mubr.bf16.mxu1 %v1427_v44  ;;  %v1489_v44 = vor.u32 %v1488_v32, %v1485_v31  ;;  %v1587_v32 = vrot.slane %v1585_v25, 2  ;;  %v10685_v25 = vld [vmem:[#allocation2 + $0x1c8] ss:$8 sps:$4 sm:$0xff]  }
 0x1d9   : > { %v1490_v50 = vsel %vm1159_vm3, %v1471_v24, %v1489_v44  ;;  %v1582_v24 = vshrl.u32 %v10671_v18, 16 }
 0x1db   : > { %v1584_v31 = vrot.slane %v1582_v24, 1  ;;  %v1632_v24 = vrot.slane %v1630_v17, 2 }
 0x1dd   : > { %v1588_v43 = vor.u32 %v1587_v32, %v1584_v31  ;;  %v1645_v31 = vshrl.u32 %v10685_v25, 16  ;;  %v1648_v32 = vshll.u32 %v10685_v25, 16 }
 0x1de   : > { %2033 = vmatmul.mubr.bf16.gmra.mrb[84].mxu1 %v1418_v54  ;;  %v1517_v54 = vsel %vm1159_vm3, %v1498_v27, %v1516_v47  ;;  %v1557_v27 = vrot.slane %v1555_v20, 1  ;;  %v1657_v20 = vshll.u32 %v10683_v14, 16 }
 0x1df   : > { %2040 = vmatprep.mubr.bf16.mxu1 %v1445_v58  ;;  %v1507_v58 = vor.u32 %v1506_v52, %v1503_v51  ;;  %v1605_v52 = vrot.slane %v1603_v45, 2  ;;  %v10688_v45 = vld [vmem:[#allocation2 + $0x1d8] ss:$8 sps:$4 sm:$0xff]  }
 0x1e1   : > { %v1508_v0 = vsel %vm1159_vm3, %v1489_v44, %v1507_v58  ;;  %v1600_v44 = vshrl.u32 %v10674_v33, 16 }
 0x1e3   : > { %v1602_v51 = vrot.slane %v1600_v44, 1  ;;  %v1650_v44 = vrot.slane %v1648_v32, 2 }
 0x1e5   : > { %v1606_v57 = vor.u32 %v1605_v52, %v1602_v51  ;;  %v1663_v51 = vshrl.u32 %v10688_v45, 16  ;;  %v1666_v52 = vshll.u32 %v10688_v45, 16 }
 0x1e6   : > { %2041 = vmatmul.mubr.bf16.gmra.mrb[88].mxu1 %v1436_v4  ;;  %v1535_v4 = vsel %vm1159_vm3, %v1516_v47, %v1534_v61  ;;  %v1575_v47 = vrot.slane %v1573_v36, 1  ;;  %v1675_v36 = vshll.u32 %v10686_v29, 16 }
 0x1e7   : > { %2048 = vmatprep.mubr.bf16.mxu1 %v1463_v34  ;;  %v1525_v34 = vor.u32 %v1524_v2, %v1521_v1  ;;  %v1623_v2 = vrot.slane %v1621_v59, 2  ;;  %v10691_v59 = vld [vmem:[#allocation2 + $0x1e8] ss:$8 sps:$4 sm:$0xff]  }
 0x1e9   : > { %v1526_v12 = vsel %vm1159_vm3, %v1507_v58, %v1525_v34  ;;  %v1618_v58 = vshrl.u32 %v10677_v53, 16 }
 0x1eb   : > { %v1620_v1 = vrot.slane %v1618_v58, 1  ;;  %v1668_v58 = vrot.slane %v1666_v52, 2 }
 0x1ed   : > { %v1624_v6 = vor.u32 %v1623_v2, %v1620_v1  ;;  %v1681_v1 = vshrl.u32 %v10691_v59, 16  ;;  %v1684_v2 = vshll.u32 %v10691_v59, 16 }
 0x1ee   : > { %2049 = vmatmul.mubr.bf16.gmra.mrb[92].mxu1 %v1454_v15  ;;  %v1553_v15 = vsel %vm1159_vm3, %v1534_v61, %v1552_v9  ;;  %v1593_v61 = vrot.slane %v1591_v55, 1  ;;  %v1693_v55 = vshll.u32 %v10689_v49, 16 }
 0x1ef   : > { %2056 = vmatprep.mubr.bf16.mxu1 %v1481_v19  ;;  %v1543_v19 = vor.u32 %v1542_v13, %v1539_v42  ;;  %v1641_v13 = vrot.slane %v1639_v7, 2 }
 0x1f1   : > { %v1544_v26 = vsel %vm1159_vm3, %v1525_v34, %v1543_v19  ;;  %v1636_v34 = vshrl.u32 %v10680_v3, 16 }
 0x1f3   : > { %v1638_v42 = vrot.slane %v1636_v34, 1 }
 0x1f5   : > { %v1642_v18 = vor.u32 %v1641_v13, %v1638_v42 }
 0x1f6   : > { %2057 = vmatmul.mubr.bf16.gmra.mrb[96].mxu1 %v1472_v30  ;;  %v1571_v30 = vsel %vm1159_vm3, %v1552_v9, %v1570_v23  ;;  %v1611_v9 = vrot.slane %v1609_v41, 1  ;;  %v1711_v41 = vshll.u32 %v10692_v63, 16 }
 0x1f7   : > { %2064 = vmatprep.mubr.bf16.mxu1 %v1499_v35  ;;  %v1561_v35 = vor.u32 %v1560_v28, %v1557_v27  ;;  %v1659_v28 = vrot.slane %v1657_v20, 2 }
 0x1f8   : > { %v1713_v13 = vrot.slane %v1711_v41, 2 }
 0x1f9   : > { %v1562_v46 = vsel %vm1159_vm3, %v1543_v19, %v1561_v35  ;;  %v1654_v19 = vshrl.u32 %v10683_v14, 16  ;;  %v10695_v14 = vld [vmem:[#allocation2 + $0x20c] ss:$8 sps:$4 sm:$0xff]  }
 0x1fa   : > { %v1729_v20 = vshll.u32 %v10695_v14, 16 }
 0x1fb   : > { %v1656_v27 = vrot.slane %v1654_v19, 1  ;;  %v1726_v19 = vshrl.u32 %v10695_v14, 16 }
 0x1fc   : > { %v1731_v32 = vrot.slane %v1729_v20, 2 }
 0x1fd   : > { %v1660_v33 = vor.u32 %v1659_v28, %v1656_v27  ;;  %v10697_v28 = vld [vmem:[#allocation2 + $0x208] ss:$8 sps:$4 sm:$0xff]  }
 0x1fe   : > { %2065 = vmatmul.mubr.bf16.gmra.mrb[100].mxu1 %v1490_v50  ;;  %v1589_v50 = vsel %vm1159_vm3, %v1570_v23, %v1588_v43  ;;  %v1629_v23 = vrot.slane %v1627_v16, 1 }
 0x1ff   : > { %2072 = vmatprep.mubr.bf16.mxu1 %v1517_v54  ;;  %v1579_v54 = vor.u32 %v1578_v48, %v1575_v47  ;;  %v1677_v48 = vrot.slane %v1675_v36, 2  ;;  %v1717_v36 = vshrl.u32 %v10697_v28, 16 }
 0x201   : > { %v1580_v60 = vsel %vm1159_vm3, %v1561_v35, %v1579_v54  ;;  %v1672_v35 = vshrl.u32 %v10686_v29, 16 }
 0x203   : > { %v1674_v47 = vrot.slane %v1672_v35, 1 }
 0x205   : > { %v1678_v53 = vor.u32 %v1677_v48, %v1674_v47  ;;  %v10700_v48 = vld [vmem:[#allocation2 + $0x218] ss:$8 sps:$4 sm:$0xff]  }
 0x206   : > { %2073 = vmatmul.mubr.bf16.gmra.mrb[104].mxu1 %v1508_v0  ;;  %v1607_v0 = vsel %vm1159_vm3, %v1588_v43, %v1606_v57  ;;  %v1647_v43 = vrot.slane %v1645_v31, 1  ;;  %v1728_v31 = vrot.slane %v1726_v19, 1  ;;  %v1738_v59 = vshll.u32 %v10700_v48, 16 }
 0x207   : > { %2080 = vmatprep.mubr.bf16.mxu1 %v1535_v4  ;;  %v1597_v4 = vor.u32 %v1596_v62, %v1593_v61  ;;  %v1695_v62 = vrot.slane %v1693_v55, 2 }
 0x209   : > { %v1598_v8 = vsel %vm1159_vm3, %v1579_v54, %v1597_v4  ;;  %v1690_v54 = vshrl.u32 %v10689_v49, 16 }
 0x20b   : > { %v1692_v61 = vrot.slane %v1690_v54, 1 }
 0x20d   : > { %v1696_v3 = vor.u32 %v1695_v62, %v1692_v61 }
 0x20e   : > { %2081 = vmatmul.mubr.bf16.gmra.mrb[108].mxu1 %v1526_v12  ;;  %v1625_v12 = vsel %vm1159_vm3, %v1606_v57, %v1624_v6  ;;  %v1665_v57 = vrot.slane %v1663_v51, 1  ;;  %v1719_v51 = vrot.slane %v1717_v36, 1 }
 0x20f   : > { %2088 = vmatprep.mubr.bf16.mxu1 %v1553_v15  ;;  %v1615_v15 = vor.u32 %v1614_v10, %v1611_v9  ;;  %v1686_v9 = vrot.slane %v1684_v2, 2  ;;  %v10694_v10 = vld [vmem:[#allocation2 + $0x1f8] ss:$8 sps:$4 sm:$0xff]  }
 0x210   : > { %v1699_v16 = vshrl.u32 %v10694_v10, 16  ;;  %v1702_v17 = vshll.u32 %v10694_v10, 16 }
 0x211   : > { %v1616_v21 = vsel %vm1159_vm3, %v1597_v4, %v1615_v15  ;;  %v1708_v4 = vshrl.u32 %v10692_v63, 16 }
 0x212   : > { %v1704_v27 = vrot.slane %v1702_v17, 2 }
 0x213   : > { %v1710_v42 = vrot.slane %v1708_v4, 1  ;;  %v11370_v4 = vsub.s32 3, %v11196_v37 }
 0x216   : > { %2089 = vmatmul.mubr.bf16.gmra.mrb[112].mxu1 %v1544_v26  ;;  %v1643_v26 = vsel %vm1159_vm3, %v1624_v6, %v1642_v18 }
 0x217   : > { %2096 = vmatprep.mubr.bf16.mxu1 %v1571_v30  ;;  %v1633_v30 = vor.u32 %v1632_v24, %v1629_v23 }
 0x219   : > { %v1634_v39 = vsel %vm1159_vm3, %v1615_v15, %v1633_v30 }
 0x21e   : > { %2097 = vmatmul.mubr.bf16.gmra.mrb[116].mxu1 %v1562_v46  ;;  %v1661_v46 = vsel %vm1159_vm3, %v1642_v18, %v1660_v33  ;;  %v1714_v18 = vor.u32 %v1713_v13, %v1710_v42 }
 0x21f   : > { %2104 = vmatprep.mubr.bf16.mxu1 %v1589_v50  ;;  %v1651_v50 = vor.u32 %v1650_v44, %v1647_v43  ;;  %v1732_v43 = vor.u32 %v1731_v32, %v1728_v31 }
 0x221   : > { %v1652_v56 = vsel %vm1159_vm3, %v1633_v30, %v1651_v50  ;;  %v1715_v30 = vsel %vm1159_vm3, %v1696_v3, %v1714_v18  ;;  %v1733_v55 = vsel %vm1159_vm3, %v1714_v18, %v1732_v43 }
 0x226   : > { %2105 = vmatmul.mubr.bf16.gmra.mrb[120].mxu1 %v1580_v60  ;;  %v1679_v60 = vsel %vm1159_vm3, %v1660_v33, %v1678_v53  ;;  %v10698_v33 = vld [vmem:[#allocation2 + $0x21c] ss:$8 sps:$4 sm:$0xff]  }
 0x227   : > { %2112 = vmatprep.mubr.bf16.mxu1 %v1607_v0  ;;  %v1669_v0 = vor.u32 %v1668_v58, %v1665_v57  ;;  %v1744_v44 = vshrl.u32 %v10698_v33, 16  ;;  %v1747_v45 = vshll.u32 %v10698_v33, 16  ;;  %v1735_v58 = vshrl.u32 %v10700_v48, 16 }
 0x229   : > { %v1670_v7 = vsel %vm1159_vm3, %v1651_v50, %v1669_v0  ;;  %v1749_v57 = vrot.slane %v1747_v45, 2  ;;  %v1737_v41 = vrot.slane %v1735_v58, 1 }
 0x22e   : > { %2113 = vmatmul.mubr.bf16.gmra.mrb[124].mxu1 %v1598_v8  ;;  %v1683_v8 = vrot.slane %v1681_v1, 1  ;;  %v11365_v1 = vsub.s32 2, %v11196_v37 }
 0x22f   : > { %2120 = vmatprep.mubr.bf16.mxu1 %v1625_v12  ;;  %v1697_v12 = vsel %vm1159_vm3, %v1678_v53, %v1696_v3  ;;  %v10701_v53 = vld [vmem:[#allocation2 + $0x22c] ss:$8 sps:$4 sm:$0xff]  }
 0x230   : > { %v1687_v15 = vor.u32 %v1686_v9, %v1683_v8  ;;  %v1762_v61 = vshrl.u32 %v10701_v53, 16  ;;  %v1765_v62 = vshll.u32 %v10701_v53, 16 }
 0x232   : > { %v1688_v25 = vsel %vm1159_vm3, %v1669_v0, %v1687_v15  ;;  %v11362_v0 = vld [vmem:[#allocation4] sm:$0xfc]  ;;  %v1764_v10 = vrot.slane %v1762_v61, 1 }
 0x233   : > { %v11378_v14 = vrot.slane %v11362_v0, %v11365_v1 }
 0x236   : > { %2121 = vmatmul.mubr.bf16.gmra.mrb[128].mxu1 %v1616_v21 }
 0x237   : > { %2128 = vmatprep.mubr.bf16.mxu1 %v1643_v26  ;;  %v1701_v26 = vrot.slane %v1699_v16, 1 }
 0x239   : > { %v1705_v35 = vor.u32 %v1704_v27, %v1701_v26 }
 0x23b   : > { %v1706_v50 = vsel %vm1159_vm3, %v1687_v15, %v1705_v35  ;;  %v11382_v15 = vrot.slane %v11362_v0, %v11370_v4 }
 0x23e   : > { %2129 = vmatmul.mubr.bf16.gmra.mrb[132].mxu1 %v1634_v39  ;;  %v1720_v39 = vshll.u32 %v10697_v28, 16 }
 0x23f   : > { %2136 = vmatprep.mubr.bf16.mxu1 %v1661_v46 }
 0x240   : > { %v1722_v52 = vrot.slane %v1720_v39, 2  ;;  %v10707_v39 = vld [vmem:[#allocation2 + $0x24c] ss:$8 sps:$4 sm:$0xff]  }
 0x241   : > { %v1798_v53 = vshrl.u32 %v10707_v39, 16 }
 0x246   : > { %2137 = vmatmul.mubr.bf16.gmra.mrb[136].mxu1 %v1652_v56  ;;  %v1746_v56 = vrot.slane %v1744_v44, 1 }
 0x247   : > { %2144 = vmatprep.mubr.bf16.mxu1 %v1679_v60  ;;  %v1723_v60 = vor.u32 %v1722_v52, %v1719_v51 }
 0x248   : > { %v1750_v63 = vor.u32 %v1749_v57, %v1746_v56  ;;  %v849_v56 = vld [vmem:[#allocation2 + $0x258] sm:$0x33] }
 0x249   : > { %v11344_v5 = vpop.f32.mrb[32].mxu1  ;;  %v1724_v9 = vsel %vm1159_vm3, %v1705_v35, %v1723_v60 }
 0x24a   : > { %v1932_v6 = vpop.f32.mrb[33].mxu1  ;;  %v1751_v13 = vsel %vm1159_vm3, %v1732_v43, %v1750_v63  ;;  %v2223_v26 = vmul.f32 %v11378_v14, %v11344_v5 }
 0x24b   : > { %v11346_v34 = vpop.f32.mrb[34].mxu1  ;;  %v1740_v6 = vrot.slane %v1738_v59, 2 }
 0x24c   : > { %v1935_v11 = vpop.f32.mrb[35].mxu1  ;;  %v2224_v43 = vmul.f32 %v11378_v14, %v11346_v34 }
 0x24d   : > { %v1767_v11 = vrot.slane %v1765_v62, 2  ;;  %v1741_v16 = vor.u32 %v1740_v6, %v1737_v41  ;;  %v10709_v62 = vld [vmem:[#allocation2 + $0x248] ss:$8 sps:$4 sm:$0xff]   ;;  %v1800_v41 = vrot.slane %v1798_v53, 1 }
 0x24e   : > { %2145 = vmatmul.mubr.bf16.gmra.mrb[140].mxu1 %v1670_v7  ;;  %v10703_v7 = vld [vmem:[#allocation2 + $0x228] ss:$8 sps:$4 sm:$0xff]  }
 0x24f   : > { %2152 = vmatprep.mubr.bf16.mxu1 %v1697_v12  ;;  %v10704_v12 = vld [vmem:[#allocation2 + $0x23c] ss:$8 sps:$4 sm:$0xff]   ;;  %v1768_v17 = vor.u32 %v1767_v11, %v1764_v10  ;;  %v1753_v18 = vshrl.u32 %v10703_v7, 16  ;;  %v1756_v19 = vshll.u32 %v10703_v7, 16  ;;  %v9768_v7 = vcombine.high %v849_v56, %v849_v56 }
 0x250   : > { %v1780_v20 = vshrl.u32 %v10704_v12, 16 }
 0x251   : > { %v11350_v21 = vpop.f32.mrb[36].mxu1  ;;  %v1769_v32 = vsel %vm1159_vm3, %v1750_v63, %v1768_v17  ;;  %v1755_v33 = vrot.slane %v1753_v18, 1  ;;  %v1758_v35 = vrot.slane %v1756_v19, 2  ;;  %v1789_v18 = vshrl.u32 %v10709_v62, 16 }
 0x252   : > { %v1940_v23 = vpop.f32.mrb[37].mxu1  ;;  %v1782_v36 = vrot.slane %v1780_v20, 1  ;;  %v2225_v34 = vmul.f32 %v11378_v14, %v11350_v21  ;;  %v1792_v19 = vshll.u32 %v10709_v62, 16  ;;  %v1816_v20 = vshrl.u32 %v9768_v7, 16 }
 0x253   : > { %v11352_v24 = vpop.f32.mrb[38].mxu1  ;;  %v1783_v23 = vshll.u32 %v10704_v12, 16  ;;  %v1759_v52 = vor.u32 %v1758_v35, %v1755_v33  ;;  %v9767_v33 = vcombine.low %v849_v56, %v849_v56 }
 0x254   : > { %v1943_v29 = vpop.f32.mrb[39].mxu1 }
 0x255   : > { %v1742_v29 = vsel %vm1159_vm3, %v1723_v60, %v1741_v16 }
 0x256   : > { %2153 = vmatmul.mubr.bf16.gmra.mrb[144].mxu1 %v1688_v25 }
 0x257   : > { %2160 = vmatprep.mubr.bf16.mxu1 %v1715_v30  ;;  %v10706_v30 = vld [vmem:[#allocation2 + $0x238] ss:$8 sps:$4 sm:$0xff]  }
 0x258   : > { %v1774_v51 = vshll.u32 %v10706_v30, 16 }
 0x259   : > { %v11356_v46 = vpop.f32.mrb[40].mxu1 }
 0x25a   : > { %v1948_v47 = vpop.f32.mrb[41].mxu1  ;;  %v1776_v61 = vrot.slane %v1774_v51, 2 }
 0x25b   : > { %v11358_v49 = vpop.f32.mrb[42].mxu1  ;;  %v1785_v47 = vrot.slane %v1783_v23, 2  ;;  %v1819_v23 = vshll.u32 %v9768_v7, 16 }
 0x25c   : > { %v1951_v54 = vpop.f32.mrb[43].mxu1  ;;  %v2228_v35 = vmul.f32 %v11378_v14, %v11358_v49  ;;  %v11420_v49 = vsub.s32 4, %v11196_v37 }
 0x25d   : > { %v1801_v54 = vshll.u32 %v10707_v39, 16 }
 0x25e   : > { %2161 = vmatmul.mubr.bf16.gmra.mrb[148].mxu1 %v1706_v50  ;;  %v1771_v50 = vshrl.u32 %v10706_v30, 16 }
 0x25f   : > { %2168 = vmatprep.mubr.bf16.mxu1 %v1733_v55  ;;  %v1786_v55 = vor.u32 %v1785_v47, %v1782_v36  ;;  %v1803_v6 = vrot.slane %v1801_v54, 2  ;;  %v1807_v47 = vshrl.u32 %v9767_v33, 16 }
 0x260   : > { %v1773_v60 = vrot.slane %v1771_v50, 1  ;;  %v1810_v50 = vshll.u32 %v9767_v33, 16 }
 0x261   : > { %v11367_v2 = vpop.f32.mrb[44].mxu1  ;;  %v1787_v12 = vsel %vm1159_vm3, %v1768_v17, %v1786_v55  ;;  %v1791_v17 = vrot.slane %v1789_v18, 1 }
 0x262   : > { %v1956_v3 = vpop.f32.mrb[45].mxu1  ;;  %v2229_v53 = vmul.f32 %v11378_v14, %v11367_v2 }
 0x263   : > { %v11372_v8 = vpop.f32.mrb[46].mxu1  ;;  %v1760_v3 = vsel %vm1159_vm3, %v1741_v16, %v1759_v52  ;;  %v1804_v16 = vor.u32 %v1803_v6, %v1800_v41 }
 0x264   : > { %v1959_v42 = vpop.f32.mrb[47].mxu1 }
 0x265   : > { %v1805_v30 = vsel %vm1159_vm3, %v1786_v55, %v1804_v16 }
 0x266   : > { %2169 = vmatmul.mubr.bf16.gmra.mrb[152].mxu1 %v1724_v9  ;;  %v2226_v9 = vmul.f32 %v11378_v14, %v11352_v24  ;;  %v2227_v24 = vmul.f32 %v11378_v14, %v11356_v46  ;;  %v1821_v46 = vrot.slane %v1819_v23, 2 }
 0x267   : > { %2176 = vmatprep.mubr.bf16.mxu1 %v1751_v13  ;;  %v1777_v13 = vor.u32 %v1776_v61, %v1773_v60 }
 0x269   : > { %v1962_v25 = vpop.f32.mrb[48].mxu1 }
 0x26a   : > { %v2235_v27 = vmul.f32 %v11382_v15, %v1962_v25  ;;  %v1964_v28 = vpop.f32.mrb[49].mxu1 }
 0x26b   : > { %v1965_v31 = vpop.f32.mrb[50].mxu1  ;;  %v1778_v28 = vsel %vm1159_vm3, %v1759_v52, %v1777_v13 }
 0x26c   : > { %v11391_v44 = vadd.f32 %v2235_v27, %v2223_v26  ;;  %v2236_v5 = vmul.f32 %v11382_v15, %v1965_v31  ;;  %v1967_v45 = vpop.f32.mrb[51].mxu1  ;;  %v1794_v31 = vrot.slane %v1792_v19, 2 }
 0x26e   : > { %v11394_v48 = vadd.f32 %v2236_v5, %v2224_v43  ;;  %2177 = vmatmul.mubr.bf16.gmra.mrb[156].mxu1 %v1742_v29  ;;  %v1795_v45 = vor.u32 %v1794_v31, %v1791_v17 }
 0x26f   : > { %2184 = vmatprep.mubr.bf16.mxu1 %v1769_v32  ;;  %v1818_v32 = vrot.slane %v1816_v20, 1 }
 0x271   : > { %v1970_v57 = vpop.f32.mrb[52].mxu1  ;;  %v1822_v51 = vor.u32 %v1821_v46, %v1818_v32 }
 0x272   : > { %v2237_v58 = vmul.f32 %v11382_v15, %v1970_v57  ;;  %v1972_v59 = vpop.f32.mrb[53].mxu1  ;;  %v1796_v57 = vsel %vm1159_vm3, %v1777_v13, %v1795_v45 }
 0x273   : > { %v1973_v63 = vpop.f32.mrb[54].mxu1  ;;  %v2230_v59 = vmul.f32 %v11378_v14, %v11372_v8  ;;  %v1823_v2 = vsel %vm1159_vm3, %v1804_v16, %v1822_v51 }
 0x274   : > { %v11402_v10 = vadd.f32 %v2237_v58, %v2225_v34  ;;  %v2238_v11 = vmul.f32 %v11382_v15, %v1973_v63  ;;  %v1975_v21 = vpop.f32.mrb[55].mxu1  ;;  %v1809_v34 = vrot.slane %v1807_v47, 1  ;;  %v1812_v58 = vrot.slane %v1810_v50, 2 }
 0x276   : > { %v11406_v42 = vadd.f32 %v2238_v11, %v2226_v9  ;;  %2185 = vmatmul.mubr.bf16.gmra.mrb[160].mxu1 %v1760_v3  ;;  %v2254_v3 = vrot.slane %v11362_v0, %v11420_v49  ;;  %v1813_v41 = vor.u32 %v1812_v58, %v1809_v34 }
 0x277   : > { %2192 = vmatprep.mubr.bf16.mxu1 %v1787_v12 }
 0x278   : > { %v1814_v21 = vsel %vm1159_vm3, %v1795_v45, %v1813_v41 }
 0x279   : > { %v1978_v25 = vpop.f32.mrb[56].mxu1 }
 0x27a   : > { %v2239_v26 = vmul.f32 %v11382_v15, %v1978_v25  ;;  %v1980_v27 = vpop.f32.mrb[57].mxu1 }
 0x27b   : > { %v1981_v29 = vpop.f32.mrb[58].mxu1 }
 0x27c   : > { %v2247_v36 = vadd.f32 %v2239_v26, %v2227_v24  ;;  %v2240_v39 = vmul.f32 %v11382_v15, %v1981_v29  ;;  %v1983_v43 = vpop.f32.mrb[59].mxu1 }
 0x27e   : > { %v2248_v5 = vadd.f32 %v2240_v39, %v2228_v35  ;;  %2193 = vmatmul.mubr.bf16.gmra.mrb[164].mxu1 %v1778_v28  ;;  %v11435_v35 = vsub.s32 5, %v11196_v37 }
 0x27f   : > { %2200 = vmatprep.mubr.bf16.mxu1 %v1805_v30 }
 0x281   : > { %v1986_v52 = vpop.f32.mrb[60].mxu1 }
 0x282   : > { %v2241_v54 = vmul.f32 %v11382_v15, %v1986_v52  ;;  %v1988_v55 = vpop.f32.mrb[61].mxu1 }
 0x283   : > { %v1989_v56 = vpop.f32.mrb[62].mxu1 }
 0x284   : > { %v2249_v60 = vadd.f32 %v2241_v54, %v2229_v53  ;;  %v2242_v61 = vmul.f32 %v11382_v15, %v1989_v56  ;;  %v1991_v62 = vpop.f32.mrb[63].mxu1 }
 0x286   : > { %v2250_v63 = vadd.f32 %v2242_v61, %v2230_v59  ;;  %2201 = vmatmul.mubr.bf16.gmra.mrb[168].mxu1 %v1796_v57 }
 0x287   : > { %2208 = vmatprep.mubr.bf16.mxu1 %v1823_v2 }
 0x289   : > { %v1994_v6 = vpop.f32.mrb[64].mxu1 }
 0x28a   : > { %v2255_v7 = vmul.f32 %v2254_v3, %v1994_v6  ;;  %v1996_v9 = vpop.f32.mrb[65].mxu1 }
 0x28b   : > { %v1997_v11 = vpop.f32.mrb[66].mxu1 }
 0x28c   : > { %v2263_v8 = vadd.f32 %v2255_v7, %v11391_v44  ;;  %v2256_v14 = vmul.f32 %v2254_v3, %v1997_v11  ;;  %v1999_v15 = vpop.f32.mrb[67].mxu1 }
 0x28e   : > { %v2264_v12 = vadd.f32 %v2256_v14, %v11394_v48  ;;  %2209 = vmatmul.mubr.bf16.gmra.mrb[172].mxu1 %v1814_v21  ;;  %v11440_v14 = vsub.s32 6, %v11196_v37 }
 0x291   : > { %v2002_v13 = vpop.f32.mrb[68].mxu1 }
 0x292   : > { %v2257_v18 = vmul.f32 %v2254_v3, %v2002_v13  ;;  %v2004_v16 = vpop.f32.mrb[69].mxu1 }
 0x293   : > { %v2005_v19 = vpop.f32.mrb[70].mxu1 }
 0x294   : > { %v2265_v20 = vadd.f32 %v2257_v18, %v11402_v10  ;;  %v2258_v23 = vmul.f32 %v2254_v3, %v2005_v19  ;;  %v2007_v25 = vpop.f32.mrb[71].mxu1  ;;  %v2294_v19 = vrot.slane %v11362_v0, %v11440_v14 }
 0x296   : > { %v2266_v24 = vadd.f32 %v2258_v23, %v11406_v42  ;;  %v2274_v42 = vrot.slane %v11362_v0, %v11435_v35 }
 0x299   : > { %v2010_v26 = vpop.f32.mrb[72].mxu1 }
 0x29a   : > { %v2259_v27 = vmul.f32 %v2254_v3, %v2010_v26  ;;  %v2012_v28 = vpop.f32.mrb[73].mxu1 }
 0x29b   : > { %v2013_v17 = vpop.f32.mrb[74].mxu1 }
 0x29c   : > { %v2267_v44 = vadd.f32 %v2259_v27, %v2247_v36  ;;  %v2260_v29 = vmul.f32 %v2254_v3, %v2013_v17  ;;  %v2015_v30 = vpop.f32.mrb[75].mxu1 }
 0x29e   : > { %v2268_v31 = vadd.f32 %v2260_v29, %v2248_v5 }
 0x2a1   : > { %v2018_v48 = vpop.f32.mrb[76].mxu1 }
 0x2a2   : > { %v2261_v32 = vmul.f32 %v2254_v3, %v2018_v48  ;;  %v2020_v33 = vpop.f32.mrb[77].mxu1 }
 0x2a3   : > { %v2021_v39 = vpop.f32.mrb[78].mxu1 }
 0x2a4   : > { %v2269_v10 = vadd.f32 %v2261_v32, %v2249_v60  ;;  %v2262_v43 = vmul.f32 %v2254_v3, %v2021_v39  ;;  %v2023_v46 = vpop.f32.mrb[79].mxu1 }
 0x2a6   : > { %v2270_v45 = vadd.f32 %v2262_v43, %v2250_v63 }
 0x2a9   : > { %v2026_v47 = vpop.f32.mrb[80].mxu1 }
 0x2aa   : > { %v2275_v50 = vmul.f32 %v2274_v42, %v2026_v47  ;;  %v2028_v36 = vpop.f32.mrb[81].mxu1 }
 0x2ab   : > { %v2029_v51 = vpop.f32.mrb[82].mxu1 }
 0x2ac   : > { %v2283_v52 = vadd.f32 %v2275_v50, %v2263_v8  ;;  %v2276_v5 = vmul.f32 %v2274_v42, %v2029_v51  ;;  %v2031_v53 = vpop.f32.mrb[83].mxu1 }
 0x2ad   : > { %v11445_v53 = vsub.s32 7, %v11196_v37 }
 0x2ae   : > { %v2284_v54 = vadd.f32 %v2276_v5, %v2264_v12 }
 0x2b1   : > { %v2034_v55 = vpop.f32.mrb[84].mxu1 }
 0x2b2   : > { %v2277_v56 = vmul.f32 %v2274_v42, %v2034_v55  ;;  %v2036_v57 = vpop.f32.mrb[85].mxu1 }
 0x2b3   : > { %v2037_v34 = vpop.f32.mrb[86].mxu1 }
 0x2b4   : > { %v2285_v58 = vadd.f32 %v2277_v56, %v2265_v20  ;;  %v2278_v59 = vmul.f32 %v2274_v42, %v2037_v34  ;;  %v2039_v60 = vpop.f32.mrb[87].mxu1 }
 0x2b6   : > { %v2286_v61 = vadd.f32 %v2278_v59, %v2266_v24 }
 0x2b9   : > { %v2042_v62 = vpop.f32.mrb[88].mxu1 }
 0x2ba   : > { %v2279_v2 = vmul.f32 %v2274_v42, %v2042_v62  ;;  %v2044_v63 = vpop.f32.mrb[89].mxu1 }
 0x2bb   : > { %v2045_v3 = vpop.f32.mrb[90].mxu1 }
 0x2bc   : > { %v2287_v41 = vadd.f32 %v2279_v2, %v2267_v44  ;;  %v2280_v6 = vmul.f32 %v2274_v42, %v2045_v3  ;;  %v2047_v7 = vpop.f32.mrb[91].mxu1 }
 0x2be   : > { %v2288_v9 = vadd.f32 %v2280_v6, %v2268_v31 }
 0x2c1   : > { %v2050_v11 = vpop.f32.mrb[92].mxu1 }
 0x2c2   : > { %v2281_v21 = vmul.f32 %v2274_v42, %v2050_v11  ;;  %v2052_v8 = vpop.f32.mrb[93].mxu1  ;;  %v10712_v11 = vld [vmem:[#allocation2 + $0x258] ss:$8 sps:$4 sm:$0xfe]  }
 0x2c3   : > { %v2053_v15 = vpop.f32.mrb[94].mxu1 }
 0x2c4   : > { %v2289_v12 = vadd.f32 %v2281_v21, %v2269_v10  ;;  %v2282_v13 = vmul.f32 %v2274_v42, %v2053_v15  ;;  %v2055_v18 = vpop.f32.mrb[95].mxu1 }
 0x2c5   : > { %v2464_v18 = vshll.u32 %v10712_v11, 16 }
 0x2c6   : > { %v2290_v16 = vadd.f32 %v2282_v13, %v2270_v45  ;;  %v2461_v13 = vshrl.u32 %v10712_v11, 16 }
 0x2c9   : > { %v2058_v20 = vpop.f32.mrb[96].mxu1 }
 0x2ca   : > { %v2295_v23 = vmul.f32 %v2294_v19, %v2058_v20  ;;  %v2060_v25 = vpop.f32.mrb[97].mxu1 }
 0x2cb   : > { %v2061_v24 = vpop.f32.mrb[98].mxu1  ;;  %v2466_v25 = vrot.slane %v2464_v18, 2 }
 0x2cc   : > { %v2303_v26 = vadd.f32 %v2295_v23, %v2283_v52  ;;  %v2296_v27 = vmul.f32 %v2294_v19, %v2061_v24  ;;  %v2063_v28 = vpop.f32.mrb[99].mxu1  ;;  %v2463_v23 = vrot.slane %v2461_v13, 1 }
 0x2ce   : > { %v2304_v17 = vadd.f32 %v2296_v27, %v2284_v54  ;;  %v2467_v28 = vor.u32 %v2466_v25, %v2463_v23 }
 0x2d1   : > { %v2066_v44 = vpop.f32.mrb[100].mxu1 }
 0x2d2   : > { %v2297_v29 = vmul.f32 %v2294_v19, %v2066_v44  ;;  %v2068_v30 = vpop.f32.mrb[101].mxu1 }
 0x2d3   : > { %v2069_v31 = vpop.f32.mrb[102].mxu1 }
 0x2d4   : > { %v2305_v48 = vadd.f32 %v2297_v29, %v2285_v58  ;;  %v2298_v32 = vmul.f32 %v2294_v19, %v2069_v31  ;;  %v2071_v33 = vpop.f32.mrb[103].mxu1  ;;  %v2314_v58 = vrot.slane %v11362_v0, %v11445_v53  ;;  %v10713_v0 = vld [vmem:[#allocation2 + $0x268] ss:$0 sps:$4 sm:$0x33]  }
 0x2d5   : > { %v2472_v20 = vshll.u32 %v10713_v0, 16 }
 0x2d6   : > { %v2306_v39 = vadd.f32 %v2298_v32, %v2286_v61 }
 0x2d9   : > { %v2074_v10 = vpop.f32.mrb[104].mxu1 }
 0x2da   : > { %v2299_v43 = vmul.f32 %v2294_v19, %v2074_v10  ;;  %v2076_v46 = vpop.f32.mrb[105].mxu1 }
 0x2db   : > { %v2077_v45 = vpop.f32.mrb[106].mxu1 }
 0x2dc   : > { %v2307_v42 = vadd.f32 %v2299_v43, %v2287_v41  ;;  %v2300_v47 = vmul.f32 %v2294_v19, %v2077_v45  ;;  %v2079_v50 = vpop.f32.mrb[107].mxu1 }
 0x2de   : > { %v2308_v36 = vadd.f32 %v2300_v47, %v2288_v9  ;;  %v11457_v47 = vld [vmem:[#allocation4 + $0x10] sm:$0x7] }
 0x2e1   : > { %v2082_v51 = vpop.f32.mrb[108].mxu1 }
 0x2e2   : > { %v2301_v52 = vmul.f32 %v2294_v19, %v2082_v51  ;;  %v2084_v5 = vpop.f32.mrb[109].mxu1 }
 0x2e3   : > { %v2085_v54 = vpop.f32.mrb[110].mxu1 }
 0x2e4   : > { %v2309_v55 = vadd.f32 %v2301_v52, %v2289_v12  ;;  %v2302_v56 = vmul.f32 %v2294_v19, %v2085_v54  ;;  %v2087_v57 = vpop.f32.mrb[111].mxu1  ;;  %v11045_v12 = vmov 0.0   ;;  %v2469_v19 = vshrl.u32 %v10713_v0, 16 }
 0x2e5   : > { %10245 = vmatprep.subr.bf16.mxu0 %v11045_v12  ;;  %10247 = vmatprep.mubr.msk.bf16.mxu0 %vm11046_vm4, %v11045_v12 }
 0x2e6   : > { %v2310_v34 = vadd.f32 %v2302_v56, %v2290_v16  ;;  %10451 = vmatprep.subr.bf16.mxu1 %v11045_v12  ;;  %10455 = vmatprep.mubr.msk.bf16.mxu1 %vm11046_vm4, %v11045_v12  ;;  %v2471_v24 = vrot.slane %v2469_v19, 1 }
 0x2e9   : > { %v2090_v59 = vpop.f32.mrb[112].mxu1 }
 0x2ea   : > { %v2315_v60 = vmul.f32 %v2314_v58, %v2090_v59  ;;  %v2092_v61 = vpop.f32.mrb[113].mxu1 }
 0x2eb   : > { %v2093_v62 = vpop.f32.mrb[114].mxu1 }
 0x2ec   : > { %v2323_v2 = vadd.f32 %v2315_v60, %v2303_v26  ;;  %v2316_v63 = vmul.f32 %v2314_v58, %v2093_v62  ;;  %v2095_v3 = vpop.f32.mrb[115].mxu1  ;;  %v2474_v26 = vrot.slane %v2472_v20, 2 }
 0x2ee   : > { %v2324_v41 = vadd.f32 %v2316_v63, %v2304_v17  ;;  %v2475_v29 = vor.u32 %v2474_v26, %v2471_v24 }
 0x2f0   : > { %v2476_v33 = vsel %vm1159_vm3, %v2467_v28, %v2475_v29 }
 0x2f1   : > { %v2098_v6 = vpop.f32.mrb[116].mxu1  ;;  %10246 = vmatpush3.bf16.msra.mxu0 %v2476_v33 }
 0x2f2   : > { %v2317_v7 = vmul.f32 %v2314_v58, %v2098_v6  ;;  %v2100_v37 = vpop.f32.mrb[117].mxu1  ;;  %10251 = vmatprep.subr.bf16.mxu0 %v11045_v12 }
 0x2f3   : > { %v2101_v9 = vpop.f32.mrb[118].mxu1 }
 0x2f4   : > { %v2325_v21 = vadd.f32 %v2317_v7, %v2305_v48  ;;  %v2318_v8 = vmul.f32 %v2314_v58, %v2101_v9  ;;  %v2103_v15 = vpop.f32.mrb[119].mxu1 }
 0x2f6   : > { %v2326_v16 = vadd.f32 %v2318_v8, %v2306_v39 }
 0x2f9   : > { %v2106_v27 = vpop.f32.mrb[120].mxu1 }
 0x2fa   : > { %v2319_v17 = vmul.f32 %v2314_v58, %v2106_v27  ;;  %v2108_v44 = vpop.f32.mrb[121].mxu1 }
 0x2fb   : > { %v2109_v30 = vpop.f32.mrb[122].mxu1 }
 0x2fc   : > { %v2327_v31 = vadd.f32 %v2319_v17, %v2307_v42  ;;  %v2320_v48 = vmul.f32 %v2314_v58, %v2109_v30  ;;  %v2111_v32 = vpop.f32.mrb[123].mxu1  ;;  %v2334_v42 = vrot.slane %v11457_v47, %v11199_v38 }
 0x2fe   : > { %v2328_v10 = vadd.f32 %v2320_v48, %v2308_v36 }
 0x301   : > { %v2114_v39 = vpop.f32.mrb[124].mxu1 }
 0x302   : > { %v2321_v43 = vmul.f32 %v2314_v58, %v2114_v39  ;;  %v2116_v46 = vpop.f32.mrb[125].mxu1 }
 0x303   : > { %v2117_v45 = vpop.f32.mrb[126].mxu1 }
 0x304   : > { %v2329_v50 = vadd.f32 %v2321_v43, %v2309_v55  ;;  %v2322_v51 = vmul.f32 %v2314_v58, %v2117_v45  ;;  %v2119_v52 = vpop.f32.mrb[127].mxu1 }
 0x306   : > { %v2330_v5 = vadd.f32 %v2322_v51, %v2310_v34 }
 0x309   : > { %v2122_v54 = vpop.f32.mrb[128].mxu1 }
 0x30a   : > { %v2335_v56 = vmul.f32 %v2334_v42, %v2122_v54  ;;  %v2124_v57 = vpop.f32.mrb[129].mxu1 }
 0x30b   : > { %v2125_v59 = vpop.f32.mrb[130].mxu1 }
 0x30c   : > { %v2343_v36 = vadd.f32 %v2335_v56, %v2323_v2  ;;  %v2336_v60 = vmul.f32 %v2334_v42, %v2125_v59  ;;  %v2127_v61 = vpop.f32.mrb[131].mxu1 }
 0x30e   : > { %v2344_v62 = vadd.f32 %v2336_v60, %v2324_v41 }
 0x311   : > { %v2130_v63 = vpop.f32.mrb[132].mxu1 }
 0x312   : > { %v2337_v3 = vmul.f32 %v2334_v42, %v2130_v63  ;;  %v2132_v6 = vpop.f32.mrb[133].mxu1 }
 0x313   : > { %v2133_v7 = vpop.f32.mrb[134].mxu1 }
 0x314   : > { %v2345_v37 = vadd.f32 %v2337_v3, %v2325_v21  ;;  %v2338_v55 = vmul.f32 %v2334_v42, %v2133_v7  ;;  %v2135_v58 = vpop.f32.mrb[135].mxu1  ;;  %v2354_v21 = vrot.slane %v11457_v47, %v11202_v40 }
 0x316   : > { %v2346_v9 = vadd.f32 %v2338_v55, %v2326_v16 }
 0x319   : > { %v2138_v34 = vpop.f32.mrb[136].mxu1 }
 0x31a   : > { %v2339_v11 = vmul.f32 %v2334_v42, %v2138_v34  ;;  %v2140_v8 = vpop.f32.mrb[137].mxu1 }
 0x31b   : > { %v2141_v15 = vpop.f32.mrb[138].mxu1 }
 0x31c   : > { %v2347_v0 = vadd.f32 %v2339_v11, %v2327_v31  ;;  %v2340_v13 = vmul.f32 %v2334_v42, %v2141_v15  ;;  %v2143_v18 = vpop.f32.mrb[139].mxu1 }
 0x31e   : > { %v2348_v19 = vadd.f32 %v2340_v13, %v2328_v10 }
 0x321   : > { %v2146_v2 = vpop.f32.mrb[140].mxu1 }
 0x322   : > { %v2341_v20 = vmul.f32 %v2334_v42, %v2146_v2  ;;  %v2148_v23 = vpop.f32.mrb[141].mxu1 }
 0x323   : > { %v2149_v41 = vpop.f32.mrb[142].mxu1 }
 0x324   : > { %v2349_v25 = vadd.f32 %v2341_v20, %v2329_v50  ;;  %v2342_v24 = vmul.f32 %v2334_v42, %v2149_v41  ;;  %v2151_v26 = vpop.f32.mrb[143].mxu1 }
 0x326   : > { %v2350_v27 = vadd.f32 %v2342_v24, %v2330_v5 }
 0x329   : > { %v2154_v16 = vpop.f32.mrb[144].mxu1 }
 0x32a   : > { %v2355_v28 = vmul.f32 %v2354_v21, %v2154_v16  ;;  %v2156_v17 = vpop.f32.mrb[145].mxu1 }
 0x32b   : > { %v2157_v44 = vpop.f32.mrb[146].mxu1 }
 0x32c   : > { %v2363_v29 = vadd.f32 %v2355_v28, %v2343_v36  ;;  %v2356_v30 = vmul.f32 %v2354_v21, %v2157_v44  ;;  %v2159_v31 = vpop.f32.mrb[147].mxu1 }
 0x32e   : > { %v2364_v48 = vadd.f32 %v2356_v30, %v2344_v62 }
 0x331   : > { %v2162_v32 = vpop.f32.mrb[148].mxu1 }
 0x332   : > { %v2357_v33 = vmul.f32 %v2354_v21, %v2162_v32  ;;  %v2164_v10 = vpop.f32.mrb[149].mxu1 }
 0x333   : > { %v2165_v39 = vpop.f32.mrb[150].mxu1 }
 0x334   : > { %v2365_v43 = vadd.f32 %v2357_v33, %v2345_v37  ;;  %v2358_v46 = vmul.f32 %v2354_v21, %v2165_v39  ;;  %v2167_v45 = vpop.f32.mrb[151].mxu1  ;;  %v2374_v37 = vrot.slane %v11457_v47, %v11365_v1 }
 0x336   : > { %v2366_v50 = vadd.f32 %v2358_v46, %v2346_v9  ;;  %v2391_v9 = vld [vmem:[#allocation4 + $0x10] sm:$0x18] }
 0x337   : > { %v2395_v13 = vrot.slane %v2391_v9, %v11370_v4  ;;  %v2407_v20 = vrot.slane %v2391_v9, %v11420_v49 }
 0x339   : > { %v2170_v51 = vpop.f32.mrb[152].mxu1 }
 0x33a   : > { %v2359_v52 = vmul.f32 %v2354_v21, %v2170_v51  ;;  %v2172_v5 = vpop.f32.mrb[153].mxu1 }
 0x33b   : > { %v2173_v42 = vpop.f32.mrb[154].mxu1 }
 0x33c   : > { %v2367_v54 = vadd.f32 %v2359_v52, %v2347_v0  ;;  %v2360_v56 = vmul.f32 %v2354_v21, %v2173_v42  ;;  %v2175_v57 = vpop.f32.mrb[155].mxu1 }
 0x33e   : > { %v2368_v59 = vadd.f32 %v2360_v56, %v2348_v19 }
 0x341   : > { %v2178_v36 = vpop.f32.mrb[156].mxu1 }
 0x342   : > { %v2361_v60 = vmul.f32 %v2354_v21, %v2178_v36  ;;  %v2180_v61 = vpop.f32.mrb[157].mxu1 }
 0x343   : > { %v2181_v62 = vpop.f32.mrb[158].mxu1 }
 0x344   : > { %v2369_v63 = vadd.f32 %v2361_v60, %v2349_v25  ;;  %v2362_v3 = vmul.f32 %v2354_v21, %v2181_v62  ;;  %v2183_v6 = vpop.f32.mrb[159].mxu1 }
 0x346   : > { %v11463_v7 = vadd.f32 %v2362_v3, %v2350_v27 }
 0x349   : > { %v2186_v55 = vpop.f32.mrb[160].mxu1 }
 0x34a   : > { %v2375_v58 = vmul.f32 %v2374_v37, %v2186_v55  ;;  %v2188_v34 = vpop.f32.mrb[161].mxu1 }
 0x34b   : > { %v2189_v11 = vpop.f32.mrb[162].mxu1 }
 0x34c   : > { %v2383_v8 = vadd.f32 %v2375_v58, %v2363_v29  ;;  %v2376_v15 = vmul.f32 %v2374_v37, %v2189_v11  ;;  %v2191_v0 = vpop.f32.mrb[163].mxu1 }
 0x34e   : > { %v2384_v18 = vadd.f32 %v2376_v15, %v2364_v48  ;;  %v2396_v2 = vmul.f32 %v2395_v13, %v2383_v8 }
 0x350   : > { %v2397_v19 = vmul.f32 %v2395_v13, %v2384_v18  ;;  %v11471_v16 = vadd.f32 %v2407_v20, %v2396_v2 }
 0x351   : > { %v2194_v23 = vpop.f32.mrb[164].mxu1 }
 0x352   : > { %v2377_v41 = vmul.f32 %v2374_v37, %v2194_v23  ;;  %v2196_v25 = vpop.f32.mrb[165].mxu1  ;;  %v11469_v47 = vadd.f32 %v2407_v20, %v2397_v19  ;;  %v2416_v31 = vmax.f32 %v11471_v16, 0.0 }
 0x353   : > { %v2197_v24 = vpop.f32.mrb[166].mxu1 }
 0x354   : > { %v2385_v26 = vadd.f32 %v2377_v41, %v2365_v43  ;;  %v2378_v27 = vmul.f32 %v2374_v37, %v2197_v24  ;;  %v2199_v21 = vpop.f32.mrb[167].mxu1  ;;  %v2417_v44 = vmax.f32 %v11469_v47, 0.0  ;;  %v2425_v52 = vsel %vm2424_vm5, %v2416_v31, 0.0 }
 0x356   : > { %v2398_v28 = vmul.f32 %v2395_v13, %v2385_v26  ;;  %v2386_v17 = vadd.f32 %v2378_v27, %v2366_v50  ;;  %v2426_v46 = vsel %vm2424_vm5, %v2417_v44, 0.0 }
 0x357   : > { %v2427_v36 = vadd.f32 %v2426_v46, %v2425_v52 }
 0x358   : > { %v11474_v29 = vadd.f32 %v2407_v20, %v2398_v28  ;;  %v2399_v30 = vmul.f32 %v2395_v13, %v2386_v17 }
 0x359   : > { %v2202_v48 = vpop.f32.mrb[168].mxu1 }
 0x35a   : > { %v2418_v32 = vmax.f32 %v11474_v29, 0.0  ;;  %v11478_v33 = vadd.f32 %v2407_v20, %v2399_v30  ;;  %v2379_v10 = vmul.f32 %v2374_v37, %v2202_v48  ;;  %v2204_v39 = vpop.f32.mrb[169].mxu1 }
 0x35b   : > { %v2205_v43 = vpop.f32.mrb[170].mxu1 }
 0x35c   : > { %v2387_v45 = vadd.f32 %v2379_v10, %v2367_v54  ;;  %v2380_v50 = vmul.f32 %v2374_v37, %v2205_v43  ;;  %v2207_v51 = vpop.f32.mrb[171].mxu1  ;;  %v2428_v5 = vsel %vm2424_vm5, %v2418_v32, 0.0  ;;  %v2419_v42 = vmax.f32 %v11478_v33, 0.0 }
 0x35d   : > { %v2429_v62 = vadd.f32 %v2428_v5, %v2427_v36  ;;  %v2451_v36 = vld [vmem:[#allocation4 + $0x15] ss:$0 sm:$0xff] }
 0x35e   : > { %v2400_v56 = vmul.f32 %v2395_v13, %v2387_v45  ;;  %v2388_v57 = vadd.f32 %v2380_v50, %v2368_v59  ;;  %v2430_v3 = vsel %vm2424_vm5, %v2419_v42, 0.0  ;;  %v10714_v45 = vld [vmem:[#allocation2 + $0x268] ss:$8 sps:$4 sm:$0x3e]  }
 0x35f   : > { %v2431_v18 = vadd.f32 %v2430_v3, %v2429_v62  ;;  %v2532_v50 = vshrl.u32 %v10714_v45, 16  ;;  %v2535_v51 = vshll.u32 %v10714_v45, 16 }
 0x360   : > { %v11490_v60 = vadd.f32 %v2407_v20, %v2400_v56  ;;  %v2401_v61 = vmul.f32 %v2395_v13, %v2388_v57 }
 0x361   : > { %v2210_v54 = vpop.f32.mrb[172].mxu1  ;;  %v2534_v52 = vrot.slane %v2532_v50, 1  ;;  %v2537_v5 = vrot.slane %v2535_v51, 2 }
 0x362   : > { %v2420_v6 = vmax.f32 %v11490_v60, 0.0  ;;  %v11496_v55 = vadd.f32 %v2407_v20, %v2401_v61  ;;  %v2381_v58 = vmul.f32 %v2374_v37, %v2210_v54  ;;  %v2212_v9 = vpop.f32.mrb[173].mxu1 }
 0x363   : > { %v2213_v34 = vpop.f32.mrb[174].mxu1  ;;  %v2538_v56 = vor.u32 %v2537_v5, %v2534_v52  ;;  %v2525_v52 = vld [vmem:[#allocation4 + $0x16] ss:$0 sm:$0xff] }
 0x364   : > { %v2432_v59 = vsel %vm2424_vm5, %v2420_v6, 0.0  ;;  %v2421_v11 = vmax.f32 %v11496_v55, 0.0  ;;  %v2389_v8 = vadd.f32 %v2381_v58, %v2369_v63  ;;  %v2382_v15 = vmul.f32 %v2374_v37, %v2213_v34  ;;  %v2215_v0 = vpop.f32.mrb[175].mxu1 }
 0x365   : > { %v2433_v23 = vadd.f32 %v2432_v59, %v2431_v18  ;;  %v2545_v57 = vsel %vm2543_vm6, %v2538_v56, 0  ;;  %v10715_v59 = vld [vmem:[#allocation2 + $0x270] ss:$8 sps:$4 sm:$0xfe]  }
 0x366   : > { %v2402_v19 = vmul.f32 %v2395_v13, %v2389_v8  ;;  %v2390_v2 = vadd.f32 %v2382_v15, %v11463_v7  ;;  %v2434_v41 = vsel %vm2424_vm5, %v2421_v11, 0.0  ;;  %v10716_v8 = vld [vmem:[#allocation2 + $0x280] ss:$0 sps:$4 sm:$0x33]   ;;  %v2621_v15 = vshrl.u32 %v10715_v59, 16 }
 0x367   : > { %v2435_v21 = vadd.f32 %v2434_v41, %v2433_v23  ;;  %v2624_v0 = vshll.u32 %v10715_v59, 16  ;;  %v2629_v18 = vshrl.u32 %v10716_v8, 16 }
 0x368   : > { %v11506_v25 = vadd.f32 %v2407_v20, %v2402_v19  ;;  %v2403_v24 = vmul.f32 %v2395_v13, %v2390_v2  ;;  %v2632_v19 = vshll.u32 %v10716_v8, 16  ;;  %v2623_v2 = vrot.slane %v2621_v15, 1 }
 0x369   : > { %v2626_v23 = vrot.slane %v2624_v0, 2  ;;  %v2631_v41 = vrot.slane %v2629_v18, 1 }
 0x36a   : > { %v2422_v26 = vmax.f32 %v11506_v25, 0.0  ;;  %v11509_v27 = vadd.f32 %v2407_v20, %v2403_v24  ;;  %v2634_v24 = vrot.slane %v2632_v19, 2 }
 0x36c   : > { %v2436_v63 = vsel %vm2424_vm5, %v2422_v26, 0.0  ;;  %v2423_v37 = vmax.f32 %v11509_v27, 0.0 }
 0x36d   : > { %v2437_v7 = vadd.f32 %v2436_v63, %v2435_v21  ;;  %v2627_v21 = vor.u32 %v2626_v23, %v2623_v2  ;;  %v2635_v63 = vor.u32 %v2634_v24, %v2631_v41 }
 0x36e   : > { %v2438_v28 = vsel %vm2424_vm5, %v2423_v37, 0.0 }
 0x36f   : > { %v2439_v17 = vadd.f32 %v2438_v28, %v2437_v7  ;;  %v2636_v7 = vsel %vm1159_vm3, %v2627_v21, %v2635_v63  ;;  %v10717_v28 = vld [vmem:[#allocation2 + $0x310] ss:$8 sps:$4 sm:$0xfe]  }
 0x371   : > { %v2440_v30 = vrot.slane %v2439_v17, 4 }
 0x373   : > { %v2441_v48 = vadd.f32 %v2440_v30, %v2439_v17  ;;  %v10718_v17 = vld [vmem:[#allocation2 + $0x320] ss:$0 sps:$4 sm:$0x33]   ;;  %v2756_v30 = vshrl.u32 %v10717_v28, 16 }
 0x375   : > { %v2442_v13 = vrot.slane %v2441_v48, 2 }
 0x377   : > { %v2443_v10 = vadd.f32 %v2442_v13, %v2441_v48  ;;  %v2759_v48 = vshll.u32 %v10717_v28, 16  ;;  %v2764_v13 = vshrl.u32 %v10718_v17, 16 }
 0x379   : > { %v2444_v39 = vrot.slane %v2443_v10, 1 }
 0x37b   : > { %v2445_v20 = vadd.f32 %v2444_v39, %v2443_v10  ;;  %v2767_v10 = vshll.u32 %v10718_v17, 16  ;;  %v2758_v39 = vrot.slane %v2756_v30, 1 }
 0x37d   : > { %v2446_v43 = vmul.f32 0.015625, %v2445_v20  ;;  %v2761_v20 = vrot.slane %v2759_v48, 2 }
 0x37f   : > { %v2447_v46 = vpack.c.bf16 %v2446_v43, %v2446_v43  ;;  %v2766_v43 = vrot.slane %v2764_v13, 1  ;;  %v2762_v45 = vor.u32 %v2761_v20, %v2758_v39 }
 0x381   : > { %10248 = vmatmul.mubr.msk.bf16.vlgmr.msra.gmra.mrb[0].mxu0 %vm2424_vm5, %v2447_v46  ;;  %v2769_v46 = vrot.slane %v2767_v10, 2 }
 0x382   : > { %10253 = vmatprep.mubr.msk.bf16.mxu0 %vm11046_vm4, %v11045_v12  ;;  %10252 = vmatpush3.bf16.msra.mxu0 %v2545_v57 }
 0x383   : > { %10257 = vmatprep.subr.bf16.mxu0 %v2636_v7  ;;  %v2770_v50 = vor.u32 %v2769_v46, %v2766_v43 }
 0x385   : > { %v2771_v51 = vsel %vm1159_vm3, %v2762_v45, %v2770_v50 }
 0x454   : > { %v2515_v61 = vpop.f32.mrb[0].mxu0 }
 0x455   : > { %v2516_v62 = vadd.f32 %v2515_v61, %v2451_v36  ;;  %v10249_v54 = vpop.f32.mrb[1].mxu0 }
 0x456   : > { %v2518_v3 = vpop.f32.mrb[2].mxu0 }
 0x457   : > { %v2521_v58 = vmax.f32 %v2516_v62, 0.0  ;;  %v10250_v9 = vpop.f32.mrb[3].mxu0 }
 0x459   : > { %v2522_v34 = vpack.c.bf16 %v2521_v58, %v2521_v58 }
 0x45b   : > { %10254 = vmatmul.mubr.msk.bf16.vlgmr.msra.gmra.mrb[4].mxu0 %vm2539_vm7, %v2522_v34  ;;  %vm5749_vm7 = vcmask 916480  }
 0x45c   : > { %10258 = vmatpush3.bf16.msra.mxu0 %v2636_v7 }
 0x45d   : > { %10267 = vmatprep.subr.bf16.mxu0 %v2771_v51 }
 0x52e   : > { %v2581_v5 = vpop.f32.mrb[4].mxu0 }
 0x52f   : > { %v2582_v56 = vadd.f32 %v2581_v5, %v2525_v52  ;;  %v10255_v57 = vpop.f32.mrb[5].mxu0  ;;  %v2739_v52 = vld [vmem:[#allocation4 + $0x20] sm:$0x6] }
 0x530   : > { %v2584_v36 = vpop.f32.mrb[6].mxu0  ;;  %v2853_v5 = vrot.slane %v2739_v52, %v11202_v40 }
 0x531   : > { %v2587_v61 = vadd.f32 3.0, %v2582_v56  ;;  %v10256_v62 = vpop.f32.mrb[7].mxu0  ;;  %v2865_v56 = vrot.slane %v2739_v52, %v11365_v1 }
 0x533   : > { %v2588_v54 = vmax.f32 %v2587_v61, 0.0 }
 0x535   : > { %v2589_v3 = vmin.f32 %v2588_v54, 6.0 }
 0x537   : > { %v2590_v58 = vmul.f32 0.16666667, %v2589_v3 }
 0x539   : > { %v2594_v9 = vrot.slane %v2590_v58, %v11199_v38 }
 0x53b   : > { %v2595_v34 = vmul.f32 %v2594_v9, %v2416_v31  ;;  %v2596_v59 = vmul.f32 %v2594_v9, %v2417_v44  ;;  %v2597_v8 = vmul.f32 %v2594_v9, %v2418_v32  ;;  %v2598_v15 = vmul.f32 %v2594_v9, %v2419_v42  ;;  %v2603_v31 = vld [vmem:[#allocation4 + $0x10] sm:$0x80] }
 0x53c   : > { %v2599_v0 = vmul.f32 %v2594_v9, %v2420_v6  ;;  %v2600_v18 = vmul.f32 %v2594_v9, %v2421_v11  ;;  %v2601_v47 = vmul.f32 %v2594_v9, %v2422_v26  ;;  %v2602_v44 = vmul.f32 %v2594_v9, %v2423_v37  ;;  %v9780_v6 = vld [vmem:[#allocation4 + $0x20] ss:$0 sm:$0xff] }
 0x53d   : > { %v2605_v19 = vpack.c.bf16 %v2596_v59, %v2595_v34  ;;  %v2606_v2 = vpack.c.bf16 %v2598_v15, %v2597_v8  ;;  %v2718_v32 = vrot.slane %v2603_v31, %v11445_v53 }
 0x53e   : > { %v2607_v16 = vpack.c.bf16 %v2600_v18, %v2599_v0  ;;  %v2608_v29 = vpack.c.bf16 %v2602_v44, %v2601_v47  ;;  %v10720_v44 = vld [vmem:[#allocation2 + $0x290] ss:$8 sps:$4 sm:$0xff]  }
 0x53f   : > { %10259 = vmatprep.mubr.msk.bf16.mxu0 %vm2424_vm5, %v2605_v19  ;;  %v10719_v19 = vld [vmem:[#allocation2 + $0x280] ss:$8 sps:$4 sm:$0xfe]  }
 0x540   : > { %10260 = vmatmul.mubr.msk.bf16.vlgmr.msra.gmra.mrb[8].mxu0 %vm2424_vm5, %v2606_v2 }
 0x541   : > { %10263 = vmatprep.mubr.msk.bf16.mxu0 %vm2424_vm5, %v2607_v16  ;;  %10268 = vmatpush3.bf16.msra.mxu0 %v2771_v51 }
 0x542   : > { %10277 = vmatprep.subr.bf16.mxu0 %v11045_v12 }
 0x548   : > { %10264 = vmatmul.mubr.msk.bf16.gmra.mrb[12].mxu0 %vm2424_vm5, %v2608_v29 }
 0x613   : > { %v10261_v33 = vpop.f32.mrb[8].mxu0 }
 0x614   : > { %v2721_v42 = vmul.f32 %v10261_v33, %v2718_v32  ;;  %v2684_v60 = vpop.f32.mrb[9].mxu0 }
 0x615   : > { %v2719_v55 = vmul.f32 %v2718_v32, %v2684_v60  ;;  %v10262_v11 = vpop.f32.mrb[10].mxu0 }
 0x616   : > { %v2722_v23 = vmul.f32 %v10262_v11, %v2718_v32  ;;  %v2687_v25 = vpop.f32.mrb[11].mxu0  ;;  %v2733_v41 = vadd.f32 %v9780_v6, %v2721_v42 }
 0x617   : > { %v2720_v26 = vmul.f32 %v2718_v32, %v2687_v25  ;;  %v2731_v37 = vadd.f32 %v9780_v6, %v2719_v55  ;;  %v2957_v25 = vshll.u32 %v10719_v19, 16 }
 0x618   : > { %v2734_v27 = vadd.f32 %v9780_v6, %v2722_v23  ;;  %v2954_v23 = vshrl.u32 %v10719_v19, 16  ;;  %v10724_v19 = vld [vmem:[#allocation2 + $0x2d0] ss:$8 sps:$4 sm:$0xff]  }
 0x619   : > { %v2732_v24 = vadd.f32 %v9780_v6, %v2720_v26 }
 0x61a   : > { %v2741_v21 = vpack.c.bf16 %v2734_v27, %v2733_v41  ;;  %v2962_v27 = vshrl.u32 %v10720_v44, 16 }
 0x61b   : > { %v2740_v63 = vpack.c.bf16 %v2732_v24, %v2731_v37  ;;  %v10265_v7 = vpop.f32.mrb[12].mxu0  ;;  %v2965_v37 = vshll.u32 %v10720_v44, 16 }
 0x61c   : > { %v2725_v28 = vmul.f32 %v10265_v7, %v2718_v32  ;;  %v2700_v17 = vpop.f32.mrb[13].mxu0 }
 0x61d   : > { %v2723_v30 = vmul.f32 %v2718_v32, %v2700_v17  ;;  %v10266_v48 = vpop.f32.mrb[14].mxu0  ;;  %10269 = vmatprep.mubr.msk.bf16.mxu0 %vm2424_vm5, %v2740_v63  ;;  %v2959_v17 = vrot.slane %v2957_v25, 2 }
 0x61e   : > { %v2726_v13 = vmul.f32 %v10266_v48, %v2718_v32  ;;  %v2703_v10 = vpop.f32.mrb[15].mxu0  ;;  %10270 = vmatmul.mubr.msk.bf16.vlgmr.msra.gmra.mrb[16].mxu0 %vm2424_vm5, %v2741_v21  ;;  %v2737_v20 = vadd.f32 %v9780_v6, %v2725_v28  ;;  %v2956_v28 = vrot.slane %v2954_v23, 1  ;;  %v10726_v23 = vld [vmem:[#allocation2 + $0x2f0] ss:$8 sps:$4 sm:$0xff]  }
 0x61f   : > { %v2724_v39 = vmul.f32 %v2718_v32, %v2703_v10  ;;  %v2735_v46 = vadd.f32 %v9780_v6, %v2723_v30  ;;  %v2967_v10 = vrot.slane %v2965_v37, 2 }
 0x620   : > { %v2738_v43 = vadd.f32 %v9780_v6, %v2726_v13  ;;  %v2964_v13 = vrot.slane %v2962_v27, 1 }
 0x621   : > { %v2736_v45 = vadd.f32 %v9780_v6, %v2724_v39  ;;  %v10721_v39 = vld [vmem:[#allocation2 + $0x2a0] ss:$8 sps:$4 sm:$0xff]  }
 0x622   : > { %v2743_v50 = vpack.c.bf16 %v2738_v43, %v2737_v20 }
 0x623   : > { %v2742_v51 = vpack.c.bf16 %v2736_v45, %v2735_v46  ;;  %v2960_v46 = vor.u32 %v2959_v17, %v2956_v28  ;;  %v2968_v45 = vor.u32 %v2967_v10, %v2964_v13  ;;  %v10728_v13 = vld [vmem:[#allocation2 + $0x310] ss:$0 sps:$4 sm:$0x33]  }
 0x625   : > { %10273 = vmatprep.mubr.msk.bf16.mxu0 %vm2424_vm5, %v2742_v51  ;;  %v2974_v51 = vshll.u32 %v10721_v39, 16  ;;  %v2969_v52 = vsel %vm1159_vm3, %v2960_v46, %v2968_v45 }
 0x626   : > { %10274 = vmatmul.mubr.msk.bf16.gmra.mrb[20].mxu0 %vm2424_vm5, %v2743_v50  ;;  %v2971_v50 = vshrl.u32 %v10721_v39, 16  ;;  %v3034_v39 = vshrl.u32 %v10728_v13, 16 }
 0x627   : > { %10285 = vmatprep.mubr.msk.bf16.mxu0 %vm11046_vm4, %v11045_v12 }
 0x628   : > { %v3036_v46 = vrot.slane %v3034_v39, 1 }
 0x6f1   : > { %v10271_v57 = vpop.f32.mrb[16].mxu0 }
 0x6f2   : > { %v2856_v36 = vmul.f32 %v10271_v57, %v2853_v5  ;;  %v2819_v61 = vpop.f32.mrb[17].mxu0  ;;  %v10722_v57 = vld [vmem:[#allocation2 + $0x2b0] ss:$8 sps:$4 sm:$0xff]  }
 0x6f3   : > { %v2854_v62 = vmul.f32 %v2853_v5, %v2819_v61  ;;  %v10272_v54 = vpop.f32.mrb[18].mxu0  ;;  %v2980_v61 = vshrl.u32 %v10722_v57, 16 }
 0x6f4   : > { %v2868_v3 = vadd.f32 %v2865_v56, %v2856_v36  ;;  %v2857_v58 = vmul.f32 %v10272_v54, %v2853_v5  ;;  %v2822_v9 = vpop.f32.mrb[19].mxu0 }
 0x6f5   : > { %v2866_v34 = vadd.f32 %v2865_v56, %v2854_v62  ;;  %v2855_v59 = vmul.f32 %v2853_v5, %v2822_v9  ;;  %v2983_v62 = vshll.u32 %v10722_v57, 16  ;;  %v10723_v9 = vld [vmem:[#allocation2 + $0x2c0] ss:$8 sps:$4 sm:$0xff]  }
 0x6f6   : > { %v2869_v8 = vadd.f32 %v2865_v56, %v2857_v58  ;;  %v2876_v0 = vmax.f32 %v2868_v3, 0.0  ;;  %v2982_v3 = vrot.slane %v2980_v61, 1 }
 0x6f7   : > { %v2867_v15 = vadd.f32 %v2865_v56, %v2855_v59  ;;  %v2874_v2 = vmax.f32 %v2866_v34, 0.0  ;;  %v2985_v58 = vrot.slane %v2983_v62, 2  ;;  %v2989_v59 = vshrl.u32 %v10723_v9, 16 }
 0x6f8   : > { %v2877_v18 = vmax.f32 %v2869_v8, 0.0  ;;  %v2992_v8 = vshll.u32 %v10723_v9, 16 }
 0x6f9   : > { %v2875_v16 = vmax.f32 %v2867_v15, 0.0  ;;  %v10275_v47 = vpop.f32.mrb[20].mxu0  ;;  %v2986_v34 = vor.u32 %v2985_v58, %v2982_v3 }
 0x6fa   : > { %v2902_v29 = vpack.c.bf16 %v2877_v18, %v2876_v0  ;;  %v2860_v31 = vmul.f32 %v10275_v47, %v2853_v5  ;;  %v2835_v32 = vpop.f32.mrb[21].mxu0  ;;  %v2991_v0 = vrot.slane %v2989_v59, 1  ;;  %v2994_v18 = vrot.slane %v2992_v8, 2  ;;  %v10731_v8 = vld [vmem:[#allocation2 + $0x340] ss:$8 sps:$4 sm:$0xff]  }
 0x6fb   : > { %v2901_v33 = vpack.c.bf16 %v2875_v16, %v2874_v2  ;;  %v2858_v42 = vmul.f32 %v2853_v5, %v2835_v32  ;;  %v10276_v60 = vpop.f32.mrb[22].mxu0  ;;  %v2998_v16 = vshrl.u32 %v10724_v19, 16  ;;  %v3001_v47 = vshll.u32 %v10724_v19, 16  ;;  %v10725_v32 = vld [vmem:[#allocation2 + $0x2e0] ss:$8 sps:$4 sm:$0xff]  }
 0x6fc   : > { %v2872_v6 = vadd.f32 %v2865_v56, %v2860_v31  ;;  %v2861_v55 = vmul.f32 %v10276_v60, %v2853_v5  ;;  %v2838_v11 = vpop.f32.mrb[23].mxu0  ;;  %v2995_v2 = vor.u32 %v2994_v18, %v2991_v0  ;;  %v3010_v60 = vshll.u32 %v10725_v32, 16 }
 0x6fd   : > { %v2870_v26 = vadd.f32 %v2865_v56, %v2858_v42  ;;  %v2859_v41 = vmul.f32 %v2853_v5, %v2838_v11  ;;  %10278 = vmatpush3.bf16.msra.mxu0 %v2901_v33  ;;  %v2973_v5 = vrot.slane %v2971_v50, 1  ;;  %v3003_v31 = vrot.slane %v3001_v47, 2  ;;  %v10732_v47 = vld [vmem:[#allocation2 + $0x350] ss:$8 sps:$4 sm:$0xff]  }
 0x6fe   : > { %v2873_v24 = vadd.f32 %v2865_v56, %v2861_v55  ;;  %10279 = vmatprep.subr.bf16.mxu0 %v11045_v12  ;;  %v2880_v63 = vmax.f32 %v2872_v6, 0.0  ;;  %v2996_v44 = vsel %vm1159_vm3, %v2986_v34, %v2995_v2  ;;  %v3007_v42 = vshrl.u32 %v10725_v32, 16 }
 0x6ff   : > { %v2871_v21 = vadd.f32 %v2865_v56, %v2859_v41  ;;  %v2878_v30 = vmax.f32 %v2870_v26, 0.0  ;;  %v2976_v56 = vrot.slane %v2974_v51, 2  ;;  %v3012_v11 = vrot.slane %v3010_v60, 2  ;;  %v10733_v60 = vld [vmem:[#allocation2 + $0x360] ss:$8 sps:$4 sm:$0x3f]  }
 0x700   : > { %v2881_v7 = vmax.f32 %v2873_v24, 0.0  ;;  %v3009_v55 = vrot.slane %v3007_v42, 1  ;;  %v3016_v26 = vshrl.u32 %v10726_v23, 16  ;;  %v3019_v41 = vshll.u32 %v10726_v23, 16 }
 0x701   : > { %v2879_v48 = vmax.f32 %v2871_v21, 0.0  ;;  %10280 = vmatpush3.bf16.msra.mxu0 %v2902_v29  ;;  %v2977_v36 = vor.u32 %v2976_v56, %v2973_v5  ;;  %v3000_v29 = vrot.slane %v2998_v16, 1  ;;  %v10727_v21 = vld [vmem:[#allocation2 + $0x300] ss:$8 sps:$4 sm:$0xff]   ;;  %v10730_v5 = vld [vmem:[#allocation2 + $0x330] ss:$8 sps:$4 sm:$0xff]  }
 0x702   : > { %v2904_v20 = vpack.c.bf16 %v2881_v7, %v2880_v63  ;;  %10281 = vmatprep.subr.bf16.mxu0 %v11045_v12  ;;  %v3013_v25 = vor.u32 %v3012_v11, %v3009_v55  ;;  %v3018_v37 = vrot.slane %v3016_v26, 1  ;;  %v3021_v24 = vrot.slane %v3019_v41, 2 }
 0x703   : > { %v2903_v43 = vpack.c.bf16 %v2879_v48, %v2878_v30  ;;  %v2978_v54 = vsel %vm1159_vm3, %v2968_v45, %v2977_v36  ;;  %v2987_v15 = vsel %vm1159_vm3, %v2977_v36, %v2986_v34  ;;  %v3004_v33 = vor.u32 %v3003_v31, %v3000_v29 }
 0x704   : > { %v3022_v63 = vor.u32 %v3021_v24, %v3018_v37  ;;  %v3025_v7 = vshrl.u32 %v10727_v21, 16  ;;  %v3028_v28 = vshll.u32 %v10727_v21, 16  ;;  %v3308_v36 = vshrl.u32 %v10730_v5, 16  ;;  %v3175_v24 = vld [vmem:[#allocation4 + $0x20] sm:$0xf8] }
 0x705   : > { %10282 = vmatpush3.bf16.msra.mxu0 %v2903_v43  ;;  %v3005_v6 = vsel %vm1159_vm3, %v2995_v2, %v3004_v33  ;;  %v3014_v27 = vsel %vm1159_vm3, %v3004_v33, %v3013_v25  ;;  %v3311_v61 = vshll.u32 %v10730_v5, 16  ;;  %v3320_v0 = vshll.u32 %v10731_v8, 16 }
 0x706   : > { %10283 = vmatprep.subr.bf16.mxu0 %v11045_v12  ;;  %v3023_v17 = vsel %vm1159_vm3, %v3013_v25, %v3022_v63  ;;  %v3027_v30 = vrot.slane %v3025_v7, 1  ;;  %v3030_v48 = vrot.slane %v3028_v28, 2  ;;  %v3310_v3 = vrot.slane %v3308_v36, 1 }
 0x707   : > { %v3313_v58 = vrot.slane %v3311_v61, 2  ;;  %v3322_v19 = vrot.slane %v3320_v0, 2  ;;  %v3329_v29 = vshll.u32 %v10732_v47, 16  ;;  %v3338_v55 = vshll.u32 %v10733_v60, 16 }
 0x708   : > { %v3031_v10 = vor.u32 %v3030_v48, %v3027_v30  ;;  %v3180_v7 = vrot.slane %v3175_v24, %v11370_v4  ;;  %v3186_v28 = vrot.slane %v3175_v24, %v11420_v49 }
 0x709   : > { %10284 = vmatpush3.bf16.msra.mxu0 %v2904_v20  ;;  %v3037_v20 = vshll.u32 %v10728_v13, 16  ;;  %v3314_v34 = vor.u32 %v3313_v58, %v3310_v3  ;;  %v3331_v32 = vrot.slane %v3329_v29, 2  ;;  %v3340_v23 = vrot.slane %v3338_v55, 2 }
 0x70a   : > { %10321 = vmatprep.subr.bf16.mxu0 %v11045_v12  ;;  %v3032_v43 = vsel %vm1159_vm3, %v3022_v63, %v3031_v10 }
 0x70b   : > { %v3039_v45 = vrot.slane %v3037_v20, 2 }
 0x70c   : > { %10286 = vmatmul.mubr.msk.bf16.vlgmr.msra.gmra.mrb[24].mxu0 %vm3042_vm8, %v2969_v52  ;;  %v10729_v52 = vld [vmem:[#allocation2 + $0x320] ss:$8 sps:$4 sm:$0xfe]  }
 0x70d   : > { %10289 = vmatprep.mubr.msk.bf16.mxu0 %vm11046_vm4, %v11045_v12  ;;  %v3040_v50 = vor.u32 %v3039_v45, %v3036_v46  ;;  %v3300_v56 = vshrl.u32 %v10729_v52, 16  ;;  %v3303_v57 = vshll.u32 %v10729_v52, 16 }
 0x70f   : > { %v3041_v51 = vsel %vm1159_vm3, %v3031_v10, %v3040_v50  ;;  %v3302_v62 = vrot.slane %v3300_v56, 1  ;;  %v3194_v50 = vrot.slane %v3175_v24, %v11435_v35 }
 0x714   : > { %10290 = vmatmul.mubr.msk.bf16.gmra.mrb[28].mxu0 %vm3042_vm8, %v2978_v54  ;;  %v3305_v54 = vrot.slane %v3303_v57, 2 }
 0x715   : > { %10293 = vmatprep.mubr.msk.bf16.mxu0 %vm11046_vm4, %v11045_v12 }
 0x716   : > { %v3306_v9 = vor.u32 %v3305_v54, %v3302_v62  ;;  %v3202_v54 = vrot.slane %v3175_v24, %v11440_v14 }
 0x718   : > { %v3315_v59 = vsel %vm1159_vm3, %v3306_v9, %v3314_v34 }
 0x719   : > { %10322 = vmatpush3.bf16.msra.mxu0 %v3315_v59 }
 0x71a   : > { %10323 = vmatprep.subr.bf16.mxu0 %v11045_v12 }
 0x71c   : > { %10294 = vmatmul.mubr.msk.bf16.gmra.mrb[32].mxu0 %vm3042_vm8, %v2987_v15  ;;  %v3317_v15 = vshrl.u32 %v10731_v8, 16 }
 0x71d   : > { %10297 = vmatprep.mubr.msk.bf16.mxu0 %vm11046_vm4, %v11045_v12 }
 0x71e   : > { %v3319_v18 = vrot.slane %v3317_v15, 1 }
 0x720   : > { %v3323_v2 = vor.u32 %v3322_v19, %v3319_v18  ;;  %v3210_v18 = vrot.slane %v3175_v24, %v11445_v53 }
 0x722   : > { %v3324_v16 = vsel %vm1159_vm3, %v3314_v34, %v3323_v2 }
 0x723   : > { %10324 = vmatpush3.bf16.msra.mxu0 %v3324_v16 }
 0x724   : > { %10298 = vmatmul.mubr.msk.bf16.gmra.mrb[36].mxu0 %vm3042_vm8, %v2996_v44  ;;  %10325 = vmatprep.subr.bf16.mxu0 %v11045_v12  ;;  %v3326_v44 = vshrl.u32 %v10732_v47, 16 }
 0x725   : > { %10301 = vmatprep.mubr.msk.bf16.mxu0 %vm11046_vm4, %v11045_v12 }
 0x726   : > { %v3328_v31 = vrot.slane %v3326_v44, 1  ;;  %v3176_v44 = vld [vmem:[#allocation4 + $0x30] sm:$0xf] }
 0x728   : > { %v3332_v33 = vor.u32 %v3331_v32, %v3328_v31 }
 0x72a   : > { %v3333_v42 = vsel %vm1159_vm3, %v3323_v2, %v3332_v33 }
 0x72b   : > { %10326 = vmatpush3.bf16.msra.mxu0 %v3333_v42  ;;  %v3218_v42 = vrot.slane %v3176_v44, %v11199_v38 }
 0x72c   : > { %10302 = vmatmul.mubr.msk.bf16.gmra.mrb[40].mxu0 %vm3042_vm8, %v3005_v6  ;;  %10327 = vmatprep.subr.bf16.mxu0 %v11045_v12  ;;  %v3335_v6 = vshrl.u32 %v10733_v60, 16 }
 0x72d   : > { %10305 = vmatprep.mubr.msk.bf16.mxu0 %vm11046_vm4, %v11045_v12 }
 0x72e   : > { %v3337_v11 = vrot.slane %v3335_v6, 1 }
 0x730   : > { %v3341_v25 = vor.u32 %v3340_v23, %v3337_v11 }
 0x732   : > { %v3342_v26 = vsel %vm1159_vm3, %v3332_v33, %v3341_v25  ;;  %v3352_v41 = vsel %vm2543_vm6, %v3341_v25, 0 }
 0x733   : > { %10328 = vmatpush3.bf16.msra.mxu0 %v3342_v26 }
 0x734   : > { %10306 = vmatmul.mubr.msk.bf16.gmra.mrb[44].mxu0 %vm3042_vm8, %v3014_v27  ;;  %10329 = vmatprep.subr.bf16.mxu0 %v11045_v12 }
 0x735   : > { %10309 = vmatprep.mubr.msk.bf16.mxu0 %vm11046_vm4, %v11045_v12 }
 0x737   : > { %10330 = vmatpush3.bf16.msra.mxu0 %v3352_v41 }
 0x738   : > { %10335 = vmatprep.subr.bf16.mxu0 %v11045_v12 }
 0x73c   : > { %10310 = vmatmul.mubr.msk.bf16.gmra.mrb[48].mxu0 %vm3042_vm8, %v3023_v17 }
 0x73d   : > { %10313 = vmatprep.mubr.msk.bf16.mxu0 %vm11046_vm4, %v11045_v12 }
 0x744   : > { %10314 = vmatmul.mubr.msk.bf16.gmra.mrb[52].mxu0 %vm3042_vm8, %v3032_v43 }
 0x745   : > { %10317 = vmatprep.mubr.msk.bf16.mxu0 %vm11046_vm4, %v11045_v12 }
 0x74c   : > { %10318 = vmatmul.mubr.msk.bf16.gmra.mrb[56].mxu0 %vm3042_vm8, %v3041_v51 }
 0x74d   : > { %10331 = vmatprep.mubr.msk.bf16.mxu0 %vm11046_vm4, %v11045_v12 }
 0x7df   : > { %v3104_v27 = vpop.f32.mrb[24].mxu0 }
 0x7e0   : > { %v10287_v37 = vpop.f32.mrb[25].mxu0  ;;  %v3181_v30 = vmul.f32 %v3180_v7, %v3104_v27  ;;  %v3226_v27 = vrot.slane %v3176_v44, %v11202_v40 }
 0x7e1   : > { %v3107_v21 = vpop.f32.mrb[26].mxu0 }
 0x7e2   : > { %v10288_v63 = vpop.f32.mrb[27].mxu0  ;;  %v3182_v39 = vmul.f32 %v3180_v7, %v3107_v21 }
 0x7e7   : > { %v3112_v17 = vpop.f32.mrb[28].mxu0 }
 0x7e8   : > { %v3187_v48 = vmul.f32 %v3186_v28, %v3112_v17  ;;  %v10291_v13 = vpop.f32.mrb[29].mxu0 }
 0x7e9   : > { %v3115_v10 = vpop.f32.mrb[30].mxu0 }
 0x7ea   : > { %v3189_v20 = vadd.f32 %v3187_v48, %v3181_v30  ;;  %v3188_v43 = vmul.f32 %v3186_v28, %v3115_v10  ;;  %v10292_v46 = vpop.f32.mrb[31].mxu0  ;;  %v3234_v48 = vrot.slane %v3176_v44, %v11365_v1 }
 0x7ec   : > { %v3190_v45 = vadd.f32 %v3188_v43, %v3182_v39 }
 0x7ef   : > { %v3120_v51 = vpop.f32.mrb[32].mxu0 }
 0x7f0   : > { %v3195_v52 = vmul.f32 %v3194_v50, %v3120_v51  ;;  %v10295_v5 = vpop.f32.mrb[33].mxu0  ;;  %v3242_v51 = vrot.slane %v3176_v44, %v11370_v4 }
 0x7f1   : > { %v3123_v56 = vpop.f32.mrb[34].mxu0 }
 0x7f2   : > { %v3197_v57 = vadd.f32 %v3195_v52, %v3189_v20  ;;  %v3196_v36 = vmul.f32 %v3194_v50, %v3123_v56  ;;  %v10296_v61 = vpop.f32.mrb[35].mxu0  ;;  %v3247_v52 = vld [vmem:[#allocation4 + $0x30] sm:$0x30] }
 0x7f4   : > { %v3198_v62 = vadd.f32 %v3196_v36, %v3190_v45 }
 0x7f7   : > { %v3128_v3 = vpop.f32.mrb[36].mxu0 }
 0x7f8   : > { %v3203_v58 = vmul.f32 %v3202_v54, %v3128_v3  ;;  %v10299_v9 = vpop.f32.mrb[37].mxu0 }
 0x7f9   : > { %v3131_v34 = vpop.f32.mrb[38].mxu0 }
 0x7fa   : > { %v3205_v59 = vadd.f32 %v3203_v58, %v3197_v57  ;;  %v3204_v8 = vmul.f32 %v3202_v54, %v3131_v34  ;;  %v10300_v15 = vpop.f32.mrb[39].mxu0  ;;  %v3251_v57 = vrot.slane %v3247_v52, %v11420_v49  ;;  %v3257_v54 = vrot.slane %v3247_v52, %v11435_v35 }
 0x7fc   : > { %v3206_v0 = vadd.f32 %v3204_v8, %v3198_v62 }
 0x7ff   : > { %v3136_v19 = vpop.f32.mrb[40].mxu0 }
 0x800   : > { %v3211_v2 = vmul.f32 %v3210_v18, %v3136_v19  ;;  %v10303_v16 = vpop.f32.mrb[41].mxu0 }
 0x801   : > { %v3139_v47 = vpop.f32.mrb[42].mxu0  ;;  %v10735_v16 = vld [vmem:[#allocation2 + $0x408] ss:$8 sps:$4 sm:$0x3f]  }
 0x802   : > { %v3213_v29 = vadd.f32 %v3211_v2, %v3205_v59  ;;  %v3212_v31 = vmul.f32 %v3210_v18, %v3139_v47  ;;  %v10304_v32 = vpop.f32.mrb[43].mxu0  ;;  %v10734_v2 = vld [vmem:[#allocation2 + $0x3f8] ss:$8 sps:$4 sm:$0xfe]  }
 0x803   : > { %v3424_v47 = vshrl.u32 %v10734_v2, 16  ;;  %v3427_v44 = vshll.u32 %v10734_v2, 16 }
 0x804   : > { %v3214_v33 = vadd.f32 %v3212_v31, %v3206_v0  ;;  %v3435_v31 = vshll.u32 %v10735_v16, 16 }
 0x805   : > { %v3426_v32 = vrot.slane %v3424_v47, 1 }
 0x807   : > { %v3144_v60 = vpop.f32.mrb[44].mxu0 }
 0x808   : > { %v3219_v6 = vmul.f32 %v3218_v42, %v3144_v60  ;;  %v10307_v55 = vpop.f32.mrb[45].mxu0  ;;  %v3437_v60 = vrot.slane %v3435_v31, 2 }
 0x809   : > { %v3147_v11 = vpop.f32.mrb[46].mxu0 }
 0x80a   : > { %v3221_v23 = vadd.f32 %v3219_v6, %v3213_v29  ;;  %v3220_v25 = vmul.f32 %v3218_v42, %v3147_v11  ;;  %v10308_v26 = vpop.f32.mrb[47].mxu0  ;;  %v3432_v29 = vshrl.u32 %v10735_v16, 16 }
 0x80c   : > { %v3222_v41 = vadd.f32 %v3220_v25, %v3214_v33  ;;  %v3429_v33 = vrot.slane %v3427_v44, 2  ;;  %v3434_v42 = vrot.slane %v3432_v29, 1  ;;  %v3262_v25 = vld [vmem:[#allocation4 + $0x30] sm:$0xc0]  ;;  %v10739_v29 = vld [vmem:[#allocation2 + $0x398] ss:$8 sps:$4 sm:$0xff]  }
 0x80d   : > { %v3398_v26 = vrot.slane %v3262_v25, %v11440_v14 }
 0x80e   : > { %v3430_v6 = vor.u32 %v3429_v33, %v3426_v32  ;;  %v3438_v55 = vor.u32 %v3437_v60, %v3434_v42  ;;  %v3598_v32 = vshrl.u32 %v10739_v29, 16  ;;  %v3601_v33 = vshll.u32 %v10739_v29, 16  ;;  %v10747_v29 = vld [vmem:[#allocation2 + $0x420] ss:$8 sps:$4 sm:$0xff]  }
 0x80f   : > { %v3152_v37 = vpop.f32.mrb[48].mxu0 }
 0x810   : > { %v3227_v24 = vmul.f32 %v3226_v27, %v3152_v37  ;;  %v10311_v21 = vpop.f32.mrb[49].mxu0  ;;  %v3439_v11 = vsel %vm1159_vm3, %v3430_v6, %v3438_v55  ;;  %v3404_v37 = vrot.slane %v3262_v25, %v11445_v53  ;;  %v3600_v60 = vrot.slane %v3598_v32, 1 }
 0x811   : > { %v3155_v63 = vpop.f32.mrb[50].mxu0  ;;  %v3603_v6 = vrot.slane %v3601_v33, 2  ;;  %v3932_v33 = vshrl.u32 %v10747_v29, 16 }
 0x812   : > { %v3229_v7 = vadd.f32 %v3227_v24, %v3221_v23  ;;  %v3228_v28 = vmul.f32 %v3226_v27, %v3155_v63  ;;  %v10312_v17 = vpop.f32.mrb[51].mxu0  ;;  %v3446_v23 = vsel %vm2543_vm6, %v3438_v55, 0  ;;  %v10740_v55 = vld [vmem:[#allocation2 + $0x3a8] ss:$8 sps:$4 sm:$0xff]  }
 0x813   : > { %v3610_v25 = vshll.u32 %v10740_v55, 16 }
 0x814   : > { %v3230_v30 = vadd.f32 %v3228_v28, %v3222_v41 }
 0x817   : > { %v3160_v13 = vpop.f32.mrb[52].mxu0 }
 0x818   : > { %v3235_v10 = vmul.f32 %v3234_v48, %v3160_v13  ;;  %v10315_v39 = vpop.f32.mrb[53].mxu0  ;;  %v10736_v13 = vld [vmem:[#allocation2 + $0x368] ss:$8 sps:$4 sm:$0xfe]  }
 0x819   : > { %v3163_v20 = vpop.f32.mrb[54].mxu0 }
 0x81a   : > { %v3237_v43 = vadd.f32 %v3235_v10, %v3229_v7  ;;  %v3236_v46 = vmul.f32 %v3234_v48, %v3163_v20  ;;  %v10316_v45 = vpop.f32.mrb[55].mxu0  ;;  %v3407_v48 = vld [vmem:[#allocation4 + $0x40] sm:$0x3]  ;;  %v10737_v10 = vld [vmem:[#allocation2 + $0x378] ss:$8 sps:$4 sm:$0xff]   ;;  %v3572_v20 = vshrl.u32 %v10736_v13, 16 }
 0x81b   : > { %v3492_v39 = vrot.slane %v3407_v48, %v11199_v38  ;;  %v3583_v45 = vshll.u32 %v10737_v10, 16 }
 0x81c   : > { %v3238_v50 = vadd.f32 %v3236_v46, %v3230_v30  ;;  %v3580_v46 = vshrl.u32 %v10737_v10, 16 }
 0x81f   : > { %v3168_v5 = vpop.f32.mrb[56].mxu0 }
 0x820   : > { %v3243_v56 = vmul.f32 %v3242_v51, %v3168_v5  ;;  %v10319_v36 = vpop.f32.mrb[57].mxu0 }
 0x821   : > { %v3171_v61 = vpop.f32.mrb[58].mxu0 }
 0x822   : > { %v3245_v62 = vadd.f32 %v3243_v56, %v3237_v43  ;;  %v3244_v3 = vmul.f32 %v3242_v51, %v3171_v61  ;;  %v10320_v58 = vpop.f32.mrb[59].mxu0  ;;  %v3575_v43 = vshll.u32 %v10736_v13, 16  ;;  %v3582_v61 = vrot.slane %v3580_v46, 1  ;;  %v10742_v13 = vld [vmem:[#allocation2 + $0x3c8] ss:$8 sps:$4 sm:$0xff]  }
 0x824   : > { %v3252_v9 = vmul.f32 %v3251_v57, %v3245_v62  ;;  %v3246_v34 = vadd.f32 %v3244_v3, %v3238_v50  ;;  %v3498_v50 = vrot.slane %v3407_v48, %v11202_v40  ;;  %v3577_v36 = vrot.slane %v3575_v43, 2 }
 0x825   : > { %v3585_v62 = vrot.slane %v3583_v45, 2 }
 0x826   : > { %v3258_v59 = vadd.f32 %v3257_v54, %v3252_v9  ;;  %v3253_v8 = vmul.f32 %v3251_v57, %v3246_v34  ;;  %v3574_v57 = vrot.slane %v3572_v20, 1  ;;  %v10738_v9 = vld [vmem:[#allocation2 + $0x388] ss:$8 sps:$4 sm:$0xff]   ;;  %v3628_v20 = vshll.u32 %v10742_v13, 16 }
 0x828   : > { %v3259_v15 = vadd.f32 %v3257_v54, %v3253_v8  ;;  %v3260_v0 = vmax.f32 %v3258_v59, 0.0  ;;  %v3578_v59 = vor.u32 %v3577_v36, %v3574_v57  ;;  %v3586_v8 = vor.u32 %v3585_v62, %v3582_v61  ;;  %v10744_v61 = vld [vmem:[#allocation2 + $0x3e8] ss:$8 sps:$4 sm:$0xff]  }
 0x829   : > { %v3630_v45 = vrot.slane %v3628_v20, 2 }
 0x82a   : > { %v3261_v18 = vmax.f32 %v3259_v15, 0.0  ;;  %v3587_v16 = vsel %vm1159_vm3, %v3578_v59, %v3586_v8  ;;  %v10745_v59 = vld [vmem:[#allocation2 + $0x3f8] ss:$0 sps:$4 sm:$0x33]  }
 0x82c   : > { %v3263_v19 = vpack.c.bf16 %v3261_v18, %v3260_v0  ;;  %v3589_v18 = vshrl.u32 %v10738_v9, 16 }
 0x82e   : > { %10332 = vmatmul.mubr.msk.bf16.vlgmr.msra.gmra.mrb[60].mxu0 %vm3347_vm9, %v3263_v19  ;;  %v3592_v19 = vshll.u32 %v10738_v9, 16  ;;  %v3591_v47 = vrot.slane %v3589_v18, 1  ;;  %vm8122_vm9 = vcmask 982016  }
 0x82f   : > { %10339 = vmatprep.mubr.msk.bf16.mxu0 %vm11046_vm4, %v11045_v12  ;;  %10336 = vmatpush3.bf16.msra.mxu0 %v3439_v11  ;;  %v3604_v11 = vor.u32 %v3603_v6, %v3600_v60 }
 0x830   : > { %10337 = vmatprep.subr.bf16.mxu0 %v11045_v12  ;;  %v3594_v44 = vrot.slane %v3592_v19, 2 }
 0x832   : > { %v3595_v31 = vor.u32 %v3594_v44, %v3591_v47  ;;  %v10746_v44 = vld [vmem:[#allocation2 + $0x410] ss:$8 sps:$4 sm:$0xfe]  }
 0x833   : > { %10338 = vmatpush3.bf16.msra.mxu0 %v3446_v23  ;;  %v3607_v23 = vshrl.u32 %v10740_v55, 16  ;;  %v3927_v32 = vshll.u32 %v10746_v44, 16  ;;  %v3934_v55 = vrot.slane %v3932_v33, 1 }
 0x834   : > { %10343 = vmatprep.subr.bf16.mxu0 %v11045_v12  ;;  %v3596_v42 = vsel %vm1159_vm3, %v3586_v8, %v3595_v31 }
 0x835   : > { %v3929_v6 = vrot.slane %v3927_v32, 2 }
 0x901   : > { %v3388_v41 = vpop.f32.mrb[60].mxu0 }
 0x902   : > { %v3399_v27 = vmul.f32 %v3398_v26, %v3388_v41  ;;  %v10333_v24 = vpop.f32.mrb[61].mxu0  ;;  %v3609_v41 = vrot.slane %v3607_v23, 1 }
 0x903   : > { %v3391_v21 = vpop.f32.mrb[62].mxu0 }
 0x904   : > { %v3400_v63 = vmul.f32 %v3398_v26, %v3391_v21  ;;  %v10334_v7 = vpop.f32.mrb[63].mxu0  ;;  %v11624_v28 = vadd.f32 %v3404_v37, %v3399_v27  ;;  %v3605_v26 = vsel %vm1159_vm3, %v3595_v31, %v3604_v11  ;;  %v3612_v27 = vrot.slane %v3610_v25, 2 }
 0x905   : > { %v3924_v31 = vshrl.u32 %v10746_v44, 16 }
 0x906   : > { %v11626_v17 = vadd.f32 %v3404_v37, %v3400_v63  ;;  %v10741_v37 = vld [vmem:[#allocation2 + $0x3b8] ss:$8 sps:$4 sm:$0xff]   ;;  %v3613_v24 = vor.u32 %v3612_v27, %v3609_v41 }
 0x907   : > { %v3616_v21 = vshrl.u32 %v10741_v37, 16  ;;  %v3619_v63 = vshll.u32 %v10741_v37, 16  ;;  %v3926_v60 = vrot.slane %v3924_v31, 1  ;;  %v10748_v41 = vld [vmem:[#allocation2 + $0x430] ss:$8 sps:$4 sm:$0xff]  }
 0x908   : > { %v3408_v30 = vpack.c.bf16 %v11626_v17, %v11624_v28  ;;  %v3614_v7 = vsel %vm1159_vm3, %v3604_v11, %v3613_v24  ;;  %v3941_v27 = vshrl.u32 %v10748_v41, 16  ;;  %v3944_v37 = vshll.u32 %v10748_v41, 16 }
 0x909   : > { %v3621_v48 = vrot.slane %v3619_v63, 2  ;;  %v3930_v23 = vor.u32 %v3929_v6, %v3926_v60 }
 0x90a   : > { %10340 = vmatmul.mubr.msk.bf16.vlgmr.msra.gmra.mrb[64].mxu0 %vm3441_vm10, %v3408_v30  ;;  %v3618_v30 = vrot.slane %v3616_v21, 1  ;;  %v3946_v21 = vrot.slane %v3944_v37, 2 }
 0x90b   : > { %10345 = vmatprep.mubr.msk.bf16.mxu0 %vm11046_vm4, %v11045_v12 }
 0x90c   : > { %v3622_v10 = vor.u32 %v3621_v48, %v3618_v30  ;;  %v10749_v30 = vld [vmem:[#allocation2 + $0x440] ss:$8 sps:$4 sm:$0xff]  }
 0x90d   : > { %v3950_v48 = vshrl.u32 %v10749_v30, 16 }
 0x90e   : > { %v3623_v43 = vsel %vm1159_vm3, %v3613_v24, %v3622_v10  ;;  %v3943_v24 = vrot.slane %v3941_v27, 1 }
 0x910   : > { %v3947_v63 = vor.u32 %v3946_v21, %v3943_v24 }
 0x9dd   : > { %v3482_v51 = vpop.f32.mrb[64].mxu0 }
 0x9de   : > { %v3493_v52 = vmul.f32 %v3492_v39, %v3482_v51  ;;  %v10341_v5 = vpop.f32.mrb[65].mxu0 }
 0x9df   : > { %v3485_v56 = vpop.f32.mrb[66].mxu0 }
 0x9e0   : > { %v3499_v54 = vadd.f32 %v3498_v50, %v3493_v52  ;;  %v3494_v3 = vmul.f32 %v3492_v39, %v3485_v56  ;;  %v10342_v58 = vpop.f32.mrb[67].mxu0  ;;  %v3625_v39 = vshrl.u32 %v10742_v13, 16  ;;  %v3953_v13 = vshll.u32 %v10749_v30, 16 }
 0x9e2   : > { %v3500_v34 = vadd.f32 %v3498_v50, %v3494_v3  ;;  %v3501_v15 = vmax.f32 %v3499_v54, 0.0  ;;  %v3627_v46 = vrot.slane %v3625_v39, 1  ;;  %v10743_v50 = vld [vmem:[#allocation2 + $0x3d8] ss:$8 sps:$4 sm:$0xff]   ;;  %v3643_v54 = vshrl.u32 %v10744_v61, 16 }
 0x9e3   : > { %v3634_v52 = vshrl.u32 %v10743_v50, 16  ;;  %v3637_v5 = vshll.u32 %v10743_v50, 16  ;;  %v3646_v3 = vshll.u32 %v10744_v61, 16  ;;  %v3955_v39 = vrot.slane %v3953_v13, 2 }
 0x9e4   : > { %v3502_v0 = vmax.f32 %v3500_v34, 0.0  ;;  %v3631_v51 = vor.u32 %v3630_v45, %v3627_v46  ;;  %v3645_v9 = vrot.slane %v3643_v54, 1  ;;  %v10750_v46 = vld [vmem:[#allocation2 + $0x450] ss:$8 sps:$4 sm:$0xff]  }
 0x9e5   : > { %v3636_v57 = vrot.slane %v3634_v52, 1  ;;  %v3639_v36 = vrot.slane %v3637_v5, 2  ;;  %v3648_v34 = vrot.slane %v3646_v3, 2  ;;  %v3959_v45 = vshrl.u32 %v10750_v46, 16 }
 0x9e6   : > { %v3522_v2 = vpack.c.bf16 %v3502_v0, %v3501_v15  ;;  %v3632_v56 = vsel %vm1159_vm3, %v3622_v10, %v3631_v51  ;;  %v3652_v15 = vshrl.u32 %v10745_v59, 16  ;;  %v3655_v0 = vshll.u32 %v10745_v59, 16 }
 0x9e7   : > { %v3640_v62 = vor.u32 %v3639_v36, %v3636_v57  ;;  %v3649_v8 = vor.u32 %v3648_v34, %v3645_v9  ;;  %v3952_v10 = vrot.slane %v3950_v48, 1  ;;  %v3962_v50 = vshll.u32 %v10750_v46, 16  ;;  %v10751_v57 = vld [vmem:[#allocation2 + $0x460] ss:$8 sps:$4 sm:$0x3f]  }
 0x9e8   : > { %10344 = vmatpush3.bf16.msra.mxu0 %v3522_v2  ;;  %v3654_v19 = vrot.slane %v3652_v15, 1  ;;  %v3657_v2 = vrot.slane %v3655_v0, 2  ;;  %v3968_v36 = vshrl.u32 %v10751_v57, 16  ;;  %v3971_v61 = vshll.u32 %v10751_v57, 16 }
 0x9e9   : > { %10381 = vmatprep.subr.bf16.mxu0 %v11045_v12  ;;  %v3641_v58 = vsel %vm1159_vm3, %v3631_v51, %v3640_v62  ;;  %v3650_v18 = vsel %vm1159_vm3, %v3640_v62, %v3649_v8  ;;  %v3956_v20 = vor.u32 %v3955_v39, %v3952_v10  ;;  %v3961_v51 = vrot.slane %v3959_v45, 1 }
 0x9ea   : > { %v3964_v52 = vrot.slane %v3962_v50, 2  ;;  %v3970_v62 = vrot.slane %v3968_v36, 1  ;;  %v3973_v54 = vrot.slane %v3971_v61, 2 }
 0x9eb   : > { %10346 = vmatmul.mubr.msk.bf16.vlgmr.msra.gmra.mrb[68].mxu0 %vm2424_vm5, %v3587_v16  ;;  %v3658_v16 = vor.u32 %v3657_v2, %v3654_v19 }
 0x9ec   : > { %10349 = vmatprep.mubr.msk.bf16.mxu0 %vm11046_vm4, %v11045_v12  ;;  %v3965_v5 = vor.u32 %v3964_v52, %v3961_v51  ;;  %v3974_v3 = vor.u32 %v3973_v54, %v3970_v62 }
 0x9ed   : > { %v3659_v47 = vsel %vm1159_vm3, %v3649_v8, %v3658_v16  ;;  %v3792_v8 = vld [vmem:[#allocation4 + $0x40] sm:$0xfc] }
 0x9ee   : > { %v3986_v9 = vsel %vm2543_vm6, %v3974_v3, 0  ;;  %v3803_v19 = vrot.slane %v3792_v8, %v11370_v4  ;;  %v3811_v6 = vrot.slane %v3792_v8, %v11420_v49  ;;  %v3819_v24 = vrot.slane %v3792_v8, %v11435_v35 }
 0x9ef   : > { %v3835_v57 = vrot.slane %v3792_v8, %v11445_v53 }
 0x9f3   : > { %10350 = vmatmul.mubr.msk.bf16.gmra.mrb[72].mxu0 %vm2424_vm5, %v3596_v42  ;;  %v3935_v42 = vshll.u32 %v10747_v29, 16 }
 0x9f4   : > { %10353 = vmatprep.mubr.msk.bf16.mxu0 %vm11046_vm4, %v11045_v12 }
 0x9f5   : > { %v3937_v11 = vrot.slane %v3935_v42, 2 }
 0x9f7   : > { %v3938_v25 = vor.u32 %v3937_v11, %v3934_v55 }
 0x9fb   : > { %10354 = vmatmul.mubr.msk.bf16.gmra.mrb[76].mxu0 %vm2424_vm5, %v3605_v26  ;;  %v3939_v26 = vsel %vm1159_vm3, %v3930_v23, %v3938_v25 }
 0x9fc   : > { %10357 = vmatprep.mubr.msk.bf16.mxu0 %vm11046_vm4, %v11045_v12  ;;  %10382 = vmatpush3.bf16.msra.mxu0 %v3939_v26 }
 0x9fd   : > { %10383 = vmatprep.subr.bf16.mxu0 %v11045_v12 }
 0xa03   : > { %10358 = vmatmul.mubr.msk.bf16.gmra.mrb[80].mxu0 %vm2424_vm5, %v3614_v7  ;;  %v3948_v7 = vsel %vm1159_vm3, %v3938_v25, %v3947_v63 }
 0xa04   : > { %10361 = vmatprep.mubr.msk.bf16.mxu0 %vm11046_vm4, %v11045_v12  ;;  %10384 = vmatpush3.bf16.msra.mxu0 %v3948_v7 }
 0xa05   : > { %10385 = vmatprep.subr.bf16.mxu0 %v11045_v12 }
 0xa0b   : > { %10362 = vmatmul.mubr.msk.bf16.gmra.mrb[84].mxu0 %vm2424_vm5, %v3623_v43  ;;  %v3957_v43 = vsel %vm1159_vm3, %v3947_v63, %v3956_v20 }
 0xa0c   : > { %10365 = vmatprep.mubr.msk.bf16.mxu0 %vm11046_vm4, %v11045_v12  ;;  %10386 = vmatpush3.bf16.msra.mxu0 %v3957_v43 }
 0xa0d   : > { %10387 = vmatprep.subr.bf16.mxu0 %v11045_v12 }
 0xa13   : > { %10366 = vmatmul.mubr.msk.bf16.gmra.mrb[88].mxu0 %vm2424_vm5, %v3632_v56  ;;  %v3966_v56 = vsel %vm1159_vm3, %v3956_v20, %v3965_v5  ;;  %v3827_v20 = vrot.slane %v3792_v8, %v11440_v14 }
 0xa14   : > { %10369 = vmatprep.mubr.msk.bf16.mxu0 %vm11046_vm4, %v11045_v12  ;;  %10388 = vmatpush3.bf16.msra.mxu0 %v3966_v56 }
 0xa15   : > { %10389 = vmatprep.subr.bf16.mxu0 %v11045_v12 }
 0xa1b   : > { %10370 = vmatmul.mubr.msk.bf16.gmra.mrb[92].mxu0 %vm2424_vm5, %v3641_v58  ;;  %v3975_v58 = vsel %vm1159_vm3, %v3965_v5, %v3974_v3  ;;  %v3793_v3 = vld [vmem:[#allocation4 + $0x50] sm:$0x7] }
 0xa1c   : > { %10373 = vmatprep.mubr.msk.bf16.mxu0 %vm11046_vm4, %v11045_v12  ;;  %10390 = vmatpush3.bf16.msra.mxu0 %v3975_v58 }
 0xa1d   : > { %10391 = vmatprep.subr.bf16.mxu0 %v11045_v12 }
 0xa20   : > { %10392 = vmatpush3.bf16.msra.mxu0 %v3986_v9 }
 0xa21   : > { %10397 = vmatprep.subr.bf16.mxu0 %v11045_v12 }
 0xa23   : > { %10374 = vmatmul.mubr.msk.bf16.gmra.mrb[96].mxu0 %vm2424_vm5, %v3650_v18  ;;  %v3797_v18 = vrot.slane %v3792_v8, %v11365_v1  ;;  %v3851_v8 = vrot.slane %v3793_v3, %v11202_v40 }
 0xa24   : > { %10377 = vmatprep.mubr.msk.bf16.mxu0 %vm11046_vm4, %v11045_v12 }
 0xa2b   : > { %10378 = vmatmul.mubr.msk.bf16.gmra.mrb[100].mxu0 %vm2424_vm5, %v3659_v47 }
 0xa2c   : > { %10393 = vmatprep.mubr.msk.bf16.mxu0 %vm11046_vm4, %v11045_v12 }
 0xabe   : > { %v3721_v34 = vpop.f32.mrb[68].mxu0 }
 0xabf   : > { %v10347_v59 = vpop.f32.mrb[69].mxu0  ;;  %v3798_v16 = vmul.f32 %v3797_v18, %v3721_v34 }
 0xac0   : > { %v3724_v15 = vpop.f32.mrb[70].mxu0 }
 0xac1   : > { %v10348_v0 = vpop.f32.mrb[71].mxu0  ;;  %v3799_v31 = vmul.f32 %v3797_v18, %v3724_v15  ;;  %v3843_v15 = vrot.slane %v3793_v3, %v11199_v38 }
 0xac6   : > { %v3729_v2 = vpop.f32.mrb[72].mxu0 }
 0xac7   : > { %v3804_v47 = vmul.f32 %v3803_v19, %v3729_v2  ;;  %v10351_v44 = vpop.f32.mrb[73].mxu0 }
 0xac8   : > { %v3732_v29 = vpop.f32.mrb[74].mxu0 }
 0xac9   : > { %v3806_v32 = vadd.f32 %v3804_v47, %v3798_v16  ;;  %v3805_v33 = vmul.f32 %v3803_v19, %v3732_v29  ;;  %v10352_v42 = vpop.f32.mrb[75].mxu0 }
 0xacb   : > { %v3807_v60 = vadd.f32 %v3805_v33, %v3799_v31 }
 0xace   : > { %v3737_v55 = vpop.f32.mrb[76].mxu0 }
 0xacf   : > { %v3812_v11 = vmul.f32 %v3811_v6, %v3737_v55  ;;  %v10355_v23 = vpop.f32.mrb[77].mxu0 }
 0xad0   : > { %v3740_v25 = vpop.f32.mrb[78].mxu0  ;;  %v3859_v23 = vrot.slane %v3793_v3, %v11365_v1 }
 0xad1   : > { %v3814_v26 = vadd.f32 %v3812_v11, %v3806_v32  ;;  %v3813_v41 = vmul.f32 %v3811_v6, %v3740_v25  ;;  %v10356_v27 = vpop.f32.mrb[79].mxu0  ;;  %v3864_v25 = vld [vmem:[#allocation4 + $0x50] sm:$0x18] }
 0xad2   : > { %v3868_v27 = vrot.slane %v3864_v25, %v11370_v4 }
 0xad3   : > { %v3815_v37 = vadd.f32 %v3813_v41, %v3807_v60 }
 0xad6   : > { %v3745_v21 = vpop.f32.mrb[80].mxu0 }
 0xad7   : > { %v3820_v63 = vmul.f32 %v3819_v24, %v3745_v21  ;;  %v10359_v7 = vpop.f32.mrb[81].mxu0 }
 0xad8   : > { %v3748_v30 = vpop.f32.mrb[82].mxu0 }
 0xad9   : > { %v3822_v48 = vadd.f32 %v3820_v63, %v3814_v26  ;;  %v3821_v13 = vmul.f32 %v3819_v24, %v3748_v30  ;;  %v10360_v10 = vpop.f32.mrb[83].mxu0  ;;  %v3874_v63 = vrot.slane %v3864_v25, %v11420_v49 }
 0xadb   : > { %v3823_v39 = vadd.f32 %v3821_v13, %v3815_v37 }
 0xade   : > { %v3753_v43 = vpop.f32.mrb[84].mxu0 }
 0xadf   : > { %v3828_v46 = vmul.f32 %v3827_v20, %v3753_v43  ;;  %v10363_v45 = vpop.f32.mrb[85].mxu0 }
 0xae0   : > { %v3756_v50 = vpop.f32.mrb[86].mxu0 }
 0xae1   : > { %v3830_v51 = vadd.f32 %v3828_v46, %v3822_v48  ;;  %v3829_v52 = vmul.f32 %v3827_v20, %v3756_v50  ;;  %v10364_v5 = vpop.f32.mrb[87].mxu0  ;;  %v10752_v50 = vld [vmem:[#allocation2 + $0x4c8] ss:$8 sps:$4 sm:$0xf8]  }
 0xae2   : > { %v4065_v5 = vshll.u32 %v10752_v50, 16 }
 0xae3   : > { %v3831_v56 = vadd.f32 %v3829_v52, %v3823_v39  ;;  %v4062_v52 = vshrl.u32 %v10752_v50, 16 }
 0xae6   : > { %v3761_v36 = vpop.f32.mrb[88].mxu0 }
 0xae7   : > { %v3836_v61 = vmul.f32 %v3835_v57, %v3761_v36  ;;  %v10367_v62 = vpop.f32.mrb[89].mxu0  ;;  %v4064_v36 = vrot.slane %v4062_v52, 3  ;;  %v10756_v52 = vld [vmem:[#allocation2 + $0x488] ss:$8 sps:$4 sm:$0xff]  }
 0xae8   : > { %v3764_v54 = vpop.f32.mrb[90].mxu0 }
 0xae9   : > { %v3838_v58 = vadd.f32 %v3836_v61, %v3830_v51  ;;  %v3837_v9 = vmul.f32 %v3835_v57, %v3764_v54  ;;  %v10368_v34 = vpop.f32.mrb[91].mxu0  ;;  %v10753_v51 = vld [vmem:[#allocation2 + $0x4d8] ss:$8 sps:$4 sm:$0xff]   ;;  %v4067_v61 = vrot.slane %v4065_v5, 4 }
 0xaea   : > { %v4073_v57 = vshll.u32 %v10753_v51, 16 }
 0xaeb   : > { %v3839_v59 = vadd.f32 %v3837_v9, %v3831_v56  ;;  %v4070_v56 = vshrl.u32 %v10753_v51, 16  ;;  %v4068_v3 = vor.u32 %v4067_v61, %v4064_v36 }
 0xaec   : > { %v4075_v54 = vrot.slane %v4073_v57, 4 }
 0xaed   : > { %v4072_v62 = vrot.slane %v4070_v56, 3 }
 0xaee   : > { %v3769_v0 = vpop.f32.mrb[92].mxu0 }
 0xaef   : > { %v3844_v18 = vmul.f32 %v3843_v15, %v3769_v0  ;;  %v10371_v19 = vpop.f32.mrb[93].mxu0 }
 0xaf0   : > { %v3772_v2 = vpop.f32.mrb[94].mxu0 }
 0xaf1   : > { %v3846_v16 = vadd.f32 %v3844_v18, %v3838_v58  ;;  %v3845_v47 = vmul.f32 %v3843_v15, %v3772_v2  ;;  %v10372_v44 = vpop.f32.mrb[95].mxu0  ;;  %v4076_v58 = vor.u32 %v4075_v54, %v4072_v62  ;;  %v4213_v62 = vshrl.u32 %v10756_v52, 16 }
 0xaf2   : > { %v4216_v54 = vshll.u32 %v10756_v52, 16 }
 0xaf3   : > { %v3847_v29 = vadd.f32 %v3845_v47, %v3839_v59  ;;  %v4077_v9 = vsel %vm4060_vm12, %v4068_v3, %v4076_v58  ;;  %v4083_v34 = vsel %vm2543_vm6, %v4076_v58, 0  ;;  %v3879_v59 = vld [vmem:[#allocation4 + $0x50] sm:$0x60] }
 0xaf4   : > { %v4032_v15 = vrot.slane %v3879_v59, %v11435_v35  ;;  %v4038_v0 = vrot.slane %v3879_v59, %v11440_v14  ;;  %v10757_v59 = vld [vmem:[#allocation2 + $0x498] ss:$8 sps:$4 sm:$0xff]  }
 0xaf6   : > { %v3777_v31 = vpop.f32.mrb[96].mxu0 }
 0xaf7   : > { %v3852_v32 = vmul.f32 %v3851_v8, %v3777_v31  ;;  %v10375_v33 = vpop.f32.mrb[97].mxu0 }
 0xaf8   : > { %v3780_v42 = vpop.f32.mrb[98].mxu0 }
 0xaf9   : > { %v3854_v60 = vadd.f32 %v3852_v32, %v3846_v16  ;;  %v3853_v6 = vmul.f32 %v3851_v8, %v3780_v42  ;;  %v10376_v55 = vpop.f32.mrb[99].mxu0  ;;  %v4043_v42 = vld [vmem:[#allocation4 + $0x50] sm:$0x80] }
 0xafb   : > { %v3855_v11 = vadd.f32 %v3853_v6, %v3847_v29  ;;  %v9844_v6 = vld [vmem:[#allocation4 + $0x60] ss:$0 sm:$0xff] }
 0xafe   : > { %v3785_v26 = vpop.f32.mrb[100].mxu0 }
 0xaff   : > { %v3860_v41 = vmul.f32 %v3859_v23, %v3785_v26  ;;  %v10379_v37 = vpop.f32.mrb[101].mxu0  ;;  %v10754_v26 = vld [vmem:[#allocation2 + $0x468] ss:$8 sps:$4 sm:$0xfe]  }
 0xb00   : > { %v3788_v24 = vpop.f32.mrb[102].mxu0 }
 0xb01   : > { %v3862_v21 = vadd.f32 %v3860_v41, %v3854_v60  ;;  %v3861_v7 = vmul.f32 %v3859_v23, %v3788_v24  ;;  %v10380_v30 = vpop.f32.mrb[103].mxu0  ;;  %v4129_v60 = vrot.slane %v4043_v42, %v11445_v53  ;;  %v10755_v41 = vld [vmem:[#allocation2 + $0x478] ss:$8 sps:$4 sm:$0xff]  }
 0xb02   : > { %v4207_v30 = vshll.u32 %v10755_v41, 16  ;;  %v10759_v42 = vld [vmem:[#allocation2 + $0x4b8] ss:$8 sps:$4 sm:$0xff]  }
 0xb03   : > { %v3869_v48 = vmul.f32 %v3868_v27, %v3862_v21  ;;  %v3863_v13 = vadd.f32 %v3861_v7, %v3855_v11  ;;  %v4196_v21 = vshrl.u32 %v10754_v26, 16  ;;  %v4204_v7 = vshrl.u32 %v10755_v41, 16 }
 0xb05   : > { %v3875_v10 = vadd.f32 %v3874_v63, %v3869_v48  ;;  %v3870_v39 = vmul.f32 %v3868_v27, %v3863_v13 }
 0xb07   : > { %v3876_v20 = vadd.f32 %v3874_v63, %v3870_v39  ;;  %v3877_v43 = vmax.f32 %v3875_v10, 0.0  ;;  %v4199_v63 = vshll.u32 %v10754_v26, 16  ;;  %v10760_v26 = vld [vmem:[#allocation2 + $0x4c8] ss:$0 sps:$4 sm:$0xff]  }
 0xb09   : > { %v3878_v46 = vmax.f32 %v3876_v20, 0.0  ;;  %v4198_v20 = vrot.slane %v4196_v21, 1 }
 0xb0b   : > { %v3880_v45 = vpack.c.bf16 %v3878_v46, %v3877_v43  ;;  %v4201_v43 = vrot.slane %v4199_v63, 2  ;;  %v4206_v46 = vrot.slane %v4204_v7, 1  ;;  %v10761_v7 = vld [vmem:[#allocation2 + $0x540] ss:$8 sps:$4 sm:$0xf8]  }
 0xb0d   : > { %10394 = vmatmul.mubr.msk.bf16.vlgmr.msra.gmra.mrb[104].mxu0 %vm3981_vm11, %v3880_v45  ;;  %v4209_v45 = vrot.slane %v4207_v30, 2  ;;  %v4202_v56 = vor.u32 %v4201_v43, %v4198_v20  ;;  %v10762_v30 = vld [vmem:[#allocation2 + $0x550] ss:$8 sps:$4 sm:$0xff]  }
 0xb0e   : > { %10401 = vmatprep.mubr.msk.bf16.mxu0 %vm11046_vm4, %v11045_v12  ;;  %10398 = vmatpush3.bf16.msra.mxu0 %v4077_v9  ;;  %v4215_v9 = vrot.slane %v4213_v62, 1 }
 0xb0f   : > { %10399 = vmatprep.subr.bf16.mxu0 %v11045_v12  ;;  %v4210_v57 = vor.u32 %v4209_v45, %v4206_v46 }
 0xb11   : > { %v4211_v58 = vsel %vm1159_vm3, %v4202_v56, %v4210_v57  ;;  %v10764_v56 = vld [vmem:[#allocation2 + $0x4f0] ss:$8 sps:$4 sm:$0xff]  }
 0xb12   : > { %10400 = vmatpush3.bf16.msra.mxu0 %v4083_v34  ;;  %v4218_v34 = vrot.slane %v4216_v54, 2  ;;  %v4640_v62 = vshll.u32 %v10764_v56, 16 }
 0xb13   : > { %10405 = vmatprep.subr.bf16.mxu0 %v11045_v12 }
 0xbe0   : > { %v4022_v18 = vpop.f32.mrb[104].mxu0 }
 0xbe1   : > { %v4033_v19 = vmul.f32 %v4032_v15, %v4022_v18  ;;  %v10395_v2 = vpop.f32.mrb[105].mxu0  ;;  %v4225_v18 = vshll.u32 %v10757_v59, 16 }
 0xbe2   : > { %v4025_v16 = vpop.f32.mrb[106].mxu0 }
 0xbe3   : > { %v4039_v47 = vadd.f32 %v4038_v0, %v4033_v19  ;;  %v4034_v44 = vmul.f32 %v4032_v15, %v4025_v16  ;;  %v10396_v29 = vpop.f32.mrb[107].mxu0  ;;  %v4219_v15 = vor.u32 %v4218_v34, %v4215_v9  ;;  %v4227_v16 = vrot.slane %v4225_v18, 2 }
 0xbe4   : > { %v4642_v9 = vrot.slane %v4640_v62, 4 }
 0xbe5   : > { %v4040_v8 = vadd.f32 %v4038_v0, %v4034_v44  ;;  %v4041_v31 = vadd.f32 %v4039_v47, %v11624_v28  ;;  %v4222_v0 = vshrl.u32 %v10757_v59, 16  ;;  %v4220_v19 = vsel %vm1159_vm3, %v4210_v57, %v4219_v15  ;;  %v10758_v47 = vld [vmem:[#allocation2 + $0x4a8] ss:$8 sps:$4 sm:$0xff]  }
 0xbe6   : > { %v4231_v29 = vshrl.u32 %v10758_v47, 16 }
 0xbe7   : > { %v4042_v32 = vadd.f32 %v4040_v8, %v11626_v17  ;;  %v4224_v2 = vrot.slane %v4222_v0, 1  ;;  %v4234_v8 = vshll.u32 %v10758_v47, 16  ;;  %v10765_v0 = vld [vmem:[#allocation2 + $0x500] ss:$8 sps:$4 sm:$0xff]  }
 0xbe8   : > { %v4646_v18 = vshrl.u32 %v10765_v0, 16 }
 0xbe9   : > { %v4045_v33 = vpack.c.bf16 %v4042_v32, %v4041_v31  ;;  %v4228_v44 = vor.u32 %v4227_v16, %v4224_v2  ;;  %v4233_v32 = vrot.slane %v4231_v29, 1  ;;  %v10766_v29 = vld [vmem:[#allocation2 + $0x510] ss:$8 sps:$4 sm:$0xff]  }
 0xbea   : > { %v4648_v2 = vrot.slane %v4646_v18, 3 }
 0xbeb   : > { %10402 = vmatmul.mubr.msk.bf16.vlgmr.msra.gmra.mrb[108].mxu0 %vm3441_vm10, %v4045_v33  ;;  %v4229_v31 = vsel %vm1159_vm3, %v4219_v15, %v4228_v44  ;;  %v4236_v33 = vrot.slane %v4234_v8, 2  ;;  %v4655_v8 = vshrl.u32 %v10766_v29, 16 }
 0xbec   : > { %10407 = vmatprep.mubr.msk.bf16.mxu0 %vm11046_vm4, %v11045_v12 }
 0xcbe   : > { %v4119_v55 = vpop.f32.mrb[108].mxu0 }
 0xcbf   : > { %v4130_v11 = vmul.f32 %v4129_v60, %v4119_v55  ;;  %v10403_v23 = vpop.f32.mrb[109].mxu0  ;;  %v4243_v55 = vshll.u32 %v10759_v42, 16 }
 0xcc0   : > { %v4122_v25 = vpop.f32.mrb[110].mxu0 }
 0xcc1   : > { %v4136_v27 = vadd.f32 %v9844_v6, %v4130_v11  ;;  %v4131_v28 = vmul.f32 %v4129_v60, %v4122_v25  ;;  %v10404_v37 = vpop.f32.mrb[111].mxu0  ;;  %v4237_v60 = vor.u32 %v4236_v33, %v4233_v32  ;;  %v4245_v25 = vrot.slane %v4243_v55, 2 }
 0xcc2   : > { %v4657_v32 = vrot.slane %v4655_v8, 3 }
 0xcc3   : > { %v4138_v17 = vadd.f32 3.0, %v4136_v27  ;;  %v4137_v24 = vadd.f32 %v9844_v6, %v4131_v28  ;;  %v4240_v6 = vshrl.u32 %v10759_v42, 16  ;;  %v4238_v11 = vsel %vm1159_vm3, %v4228_v44, %v4237_v60  ;;  %v10767_v42 = vld [vmem:[#allocation2 + $0x520] ss:$8 sps:$4 sm:$0xff]  }
 0xcc4   : > { %v4252_v28 = vshll.u32 %v10760_v26, 16  ;;  %v4667_v55 = vshll.u32 %v10767_v42, 16 }
 0xcc5   : > { %v4140_v48 = vmax.f32 %v4138_v17, 0.0  ;;  %v4139_v13 = vadd.f32 3.0, %v4137_v24  ;;  %v4242_v23 = vrot.slane %v4240_v6, 1  ;;  %v4664_v6 = vshrl.u32 %v10767_v42, 16 }
 0xcc7   : > { %v4142_v10 = vmin.f32 %v4140_v48, 6.0  ;;  %v4141_v39 = vmax.f32 %v4139_v13, 0.0  ;;  %v4246_v41 = vor.u32 %v4245_v25, %v4242_v23  ;;  %v4758_v48 = vshrl.u32 %v10761_v7, 16 }
 0xcc8   : > { %v4761_v13 = vshll.u32 %v10761_v7, 16  ;;  %v4666_v23 = vrot.slane %v4664_v6, 3  ;;  %v4669_v25 = vrot.slane %v4667_v55, 4 }
 0xcc9   : > { %v4144_v50 = vmul.f32 %v4142_v10, %v4136_v27  ;;  %v4143_v51 = vmin.f32 %v4141_v39, 6.0  ;;  %v4249_v27 = vshrl.u32 %v10760_v26, 16  ;;  %v4247_v37 = vsel %vm1159_vm3, %v4237_v60, %v4246_v41  ;;  %v10768_v26 = vld [vmem:[#allocation2 + $0x530] ss:$8 sps:$4 sm:$0xff]  }
 0xcca   : > { %v4766_v10 = vshrl.u32 %v10762_v30, 16  ;;  %v4769_v39 = vshll.u32 %v10762_v30, 16  ;;  %v4760_v20 = vrot.slane %v4758_v48, 3  ;;  %v4763_v43 = vrot.slane %v4761_v13, 4 }
 0xccb   : > { %v4145_v5 = vmul.f32 %v4143_v51, %v4137_v24  ;;  %v4146_v36 = vmul.f32 0.16666667, %v4144_v50  ;;  %v4251_v17 = vrot.slane %v4249_v27, 1  ;;  %v4254_v24 = vrot.slane %v4252_v28, 2 }
 0xccc   : > { %v4768_v46 = vrot.slane %v4766_v10, 3  ;;  %v4771_v45 = vrot.slane %v4769_v39, 4  ;;  %v4764_v50 = vor.u32 %v4763_v43, %v4760_v20  ;;  %v4673_v27 = vshrl.u32 %v10768_v26, 16 }
 0xccd   : > { %v4147_v61 = vmul.f32 0.16666667, %v4145_v5  ;;  %v4255_v21 = vor.u32 %v4254_v24, %v4251_v17  ;;  %v10763_v5 = vld [vmem:[#allocation2 + $0x4e0] ss:$8 sps:$4 sm:$0xf8]   ;;  %v4676_v28 = vshll.u32 %v10768_v26, 16 }
 0xcce   : > { %v11737_v51 = vor.u32 %v4771_v45, %v4768_v46  ;;  %v4629_v57 = vshrl.u32 %v10763_v5, 16  ;;  %v4675_v17 = vrot.slane %v4673_v27, 3  ;;  %v4366_v46 = vld [vmem:[#allocation4 + $0x60] sm:$0xfe] }
 0xccf   : > { %v4161_v3 = vpack.c.bf16 %v4147_v61, %v4146_v36  ;;  %v4256_v63 = vsel %vm1159_vm3, %v4246_v41, %v4255_v21  ;;  %v4632_v36 = vshll.u32 %v10763_v5, 16  ;;  %v4637_v61 = vshrl.u32 %v10764_v56, 16 }
 0xcd0   : > { %v4773_v52 = vsel %vm4060_vm12, %v4764_v50, %v11737_v51  ;;  %v4631_v54 = vrot.slane %v4629_v57, 3  ;;  %v4670_v41 = vor.u32 %v4669_v25, %v4666_v23  ;;  %v4678_v24 = vrot.slane %v4676_v28, 4 }
 0xcd1   : > { %10406 = vmatpush3.bf16.msra.mxu0 %v4161_v3  ;;  %10452 = vmatpush3.bf16.msra.mxu1 %v4773_v52  ;;  %v4634_v3 = vrot.slane %v4632_v36, 4  ;;  %v4779_v43 = vsel %vm2543_vm6, %v11737_v51, 0  ;;  %v4378_v45 = vrot.slane %v4366_v46, %v11365_v1  ;;  %v4373_v50 = vrot.slane %v4366_v46, %v11202_v40 }
 0xcd2   : > { %10435 = vmatprep.subr.bf16.mxu0 %v11045_v12  ;;  %10453 = vmatprep.subr.bf16.mxu1 %v11045_v12  ;;  %v4393_v52 = vrot.slane %v4366_v46, %v11420_v49  ;;  %v4387_v36 = vrot.slane %v4366_v46, %v11370_v4  ;;  %v4417_v8 = vrot.slane %v4366_v46, %v11445_v53 }
 0xcd3   : > { %v4635_v34 = vor.u32 %v4634_v3, %v4631_v54 }
 0xcd4   : > { %10408 = vmatmul.mubr.msk.bf16.vlgmr.msra.gmra.mrb[112].mxu0 %vm2424_vm5, %v4211_v58  ;;  %v4639_v58 = vrot.slane %v4637_v61, 3 }
 0xcd5   : > { %10411 = vmatprep.mubr.msk.bf16.mxu0 %vm11046_vm4, %v11045_v12  ;;  %10454 = vmatpush3.bf16.msra.mxu1 %v4779_v43 }
 0xcd6   : > { %v4643_v59 = vor.u32 %v4642_v9, %v4639_v58  ;;  %v4367_v9 = vld [vmem:[#allocation4 + $0x70] sm:$0xff] }
 0xcd7   : > { %v4438_v23 = vrot.slane %v4367_v9, %v11365_v1  ;;  %v4462_v43 = vrot.slane %v4367_v9, %v11435_v35 }
 0xcd8   : > { %v4644_v15 = vsel %vm4060_vm12, %v4635_v34, %v4643_v59 }
 0xcd9   : > { %10436 = vmatpush3.bf16.msra.mxu0 %v4644_v15  ;;  %v4408_v15 = vrot.slane %v4366_v46, %v11440_v14 }
 0xcda   : > { %10437 = vmatprep.subr.bf16.mxu0 %v11045_v12 }
 0xcdc   : > { %10412 = vmatmul.mubr.msk.bf16.gmra.mrb[116].mxu0 %vm2424_vm5, %v4220_v19  ;;  %v4649_v19 = vshll.u32 %v10765_v0, 16 }
 0xcdd   : > { %10415 = vmatprep.mubr.msk.bf16.mxu0 %vm11046_vm4, %v11045_v12 }
 0xcde   : > { %v4651_v16 = vrot.slane %v4649_v19, 4  ;;  %v4423_v19 = vrot.slane %v4367_v9, %v11199_v38 }
 0xce0   : > { %v4652_v47 = vor.u32 %v4651_v16, %v4648_v2 }
 0xce2   : > { %v4653_v44 = vsel %vm4060_vm12, %v4643_v59, %v4652_v47  ;;  %v4402_v59 = vrot.slane %v4366_v46, %v11435_v35  ;;  %v4468_v46 = vrot.slane %v4367_v9, %v11440_v14 }
 0xce3   : > { %10438 = vmatpush3.bf16.msra.mxu0 %v4653_v44 }
 0xce4   : > { %10416 = vmatmul.mubr.msk.bf16.gmra.mrb[120].mxu0 %vm2424_vm5, %v4229_v31  ;;  %10439 = vmatprep.subr.bf16.mxu0 %v11045_v12  ;;  %v4658_v31 = vshll.u32 %v10766_v29, 16 }
 0xce5   : > { %10419 = vmatprep.mubr.msk.bf16.mxu0 %vm11046_vm4, %v11045_v12 }
 0xce6   : > { %v4660_v33 = vrot.slane %v4658_v31, 4 }
 0xce8   : > { %v4661_v60 = vor.u32 %v4660_v33, %v4657_v32 }
 0xcec   : > { %10420 = vmatmul.mubr.msk.bf16.gmra.mrb[124].mxu0 %vm2424_vm5, %v4238_v11  ;;  %v4662_v11 = vsel %vm4060_vm12, %v4652_v47, %v4661_v60 }
 0xced   : > { %10423 = vmatprep.mubr.msk.bf16.mxu0 %vm11046_vm4, %v11045_v12  ;;  %10440 = vmatpush3.bf16.msra.mxu0 %v4662_v11  ;;  %v4432_v11 = vrot.slane %v4367_v9, %v11202_v40 }
 0xcee   : > { %10441 = vmatprep.subr.bf16.mxu0 %v11045_v12 }
 0xcf4   : > { %10424 = vmatmul.mubr.msk.bf16.gmra.mrb[128].mxu0 %vm2424_vm5, %v4247_v37  ;;  %v4671_v37 = vsel %vm4060_vm12, %v4661_v60, %v4670_v41 }
 0xcf5   : > { %10427 = vmatprep.mubr.msk.bf16.mxu0 %vm11046_vm4, %v11045_v12  ;;  %10442 = vmatpush3.bf16.msra.mxu0 %v4671_v37 }
 0xcf6   : > { %10443 = vmatprep.subr.bf16.mxu0 %v11045_v12 }
 0xcfc   : > { %10428 = vmatmul.mubr.msk.bf16.gmra.mrb[132].mxu0 %vm2424_vm5, %v4256_v63  ;;  %v4679_v63 = vor.u32 %v4678_v24, %v4675_v17 }
 0xcfd   : > { %10431 = vmatprep.mubr.msk.bf16.mxu0 %vm11046_vm4, %v11045_v12 }
 0xcfe   : > { %v4680_v48 = vsel %vm4060_vm12, %v4670_v41, %v4679_v63  ;;  %v4453_v41 = vrot.slane %v4367_v9, %v11420_v49 }
 0xcff   : > { %10444 = vmatpush3.bf16.msra.mxu0 %v4680_v48 }
 0xd00   : > { %10445 = vmatprep.subr.bf16.mxu0 %v11045_v12 }
 0xd04   : > { %10432 = vmatmul.mubr.msk.bf16.gmra.mrb[136].mxu0 %vm2424_vm5, %v4255_v21  ;;  %v10769_v21 = vld [vmem:[#allocation2 + $0x540] ss:$0 sps:$4 sm:$0xff]  }
 0xd05   : > { %10447 = vmatprep.mubr.msk.bf16.mxu0 %vm11046_vm4, %v11045_v12  ;;  %v4682_v7 = vshrl.u32 %v10769_v21, 16  ;;  %v4685_v30 = vshll.u32 %v10769_v21, 16  ;;  %v4447_v21 = vrot.slane %v4367_v9, %v11370_v4 }
 0xd07   : > { %v4684_v13 = vrot.slane %v4682_v7, 3  ;;  %v4687_v10 = vrot.slane %v4685_v30, 4 }
 0xd09   : > { %v4688_v39 = vor.u32 %v4687_v10, %v4684_v13  ;;  %v4368_v10 = vld [vmem:[#allocation4 + $0x80] sm:$0xff] }
 0xd0b   : > { %v4689_v20 = vsel %vm4060_vm12, %v4679_v63, %v4688_v39 }
 0xd0c   : > { %10446 = vmatpush3.bf16.msra.mxu0 %v4689_v20 }
 0xd0d   : > { %10459 = vmatprep.subr.bf16.mxu0 %v11045_v12 }
 0xda7   : > { %v4312_v5 = vpop.f32.mrb[112].mxu0 }
 0xda8   : > { %v4379_v56 = vmul.f32 %v4378_v45, %v4312_v5  ;;  %v10409_v57 = vpop.f32.mrb[113].mxu0  ;;  %v4374_v62 = vmul.f32 %v4373_v50, %v4312_v5 }
 0xda9   : > { %v4315_v61 = vpop.f32.mrb[114].mxu0 }
 0xdaa   : > { %v4381_v54 = vrot.slane %v4379_v56, 4  ;;  %v4394_v3 = vmul.f32 %v4393_v52, %v4315_v61  ;;  %v10410_v58 = vpop.f32.mrb[115].mxu0  ;;  %v4388_v34 = vmul.f32 %v4387_v36, %v4315_v61  ;;  %v4483_v52 = vrot.slane %v4368_v10, %v11199_v38 }
 0xdac   : > { %v4383_v51 = vadd.f32 %v4381_v54, %v4374_v62  ;;  %v4396_v18 = vrot.slane %v4394_v3, 4  ;;  %v4477_v62 = vrot.slane %v4367_v9, %v11445_v53 }
 0xdae   : > { %v4389_v0 = vadd.f32 %v4388_v34, %v4383_v51 }
 0xdaf   : > { %v4320_v2 = vpop.f32.mrb[116].mxu0 }
 0xdb0   : > { %v4398_v16 = vadd.f32 %v4396_v18, %v4389_v0  ;;  %v4403_v47 = vmul.f32 %v4402_v59, %v4320_v2  ;;  %v4409_v44 = vmul.f32 %v4408_v15, %v4320_v2  ;;  %v10413_v29 = vpop.f32.mrb[117].mxu0  ;;  %v4492_v0 = vrot.slane %v4368_v10, %v11202_v40 }
 0xdb1   : > { %v4323_v31 = vpop.f32.mrb[118].mxu0  ;;  %v4498_v18 = vrot.slane %v4368_v10, %v11365_v1 }
 0xdb2   : > { %v4404_v32 = vadd.f32 %v4403_v47, %v4398_v16  ;;  %v4411_v33 = vrot.slane %v4409_v44, 4  ;;  %v4424_v42 = vmul.f32 %v4423_v19, %v4323_v31  ;;  %v10414_v60 = vpop.f32.mrb[119].mxu0  ;;  %v4418_v55 = vmul.f32 %v4417_v8, %v4323_v31 }
 0xdb3   : > { %v4513_v16 = vrot.slane %v4368_v10, %v11420_v49  ;;  %v4507_v31 = vrot.slane %v4368_v10, %v11370_v4 }
 0xdb4   : > { %v4413_v6 = vadd.f32 %v4411_v33, %v4404_v32  ;;  %v4426_v26 = vrot.slane %v4424_v42, 4 }
 0xdb6   : > { %v4419_v25 = vadd.f32 %v4418_v55, %v4413_v6  ;;  %v4369_v55 = vld [vmem:[#allocation4 + $0x90] sm:$0x3] }
 0xdb7   : > { %v4328_v27 = vpop.f32.mrb[120].mxu0 }
 0xdb8   : > { %v4428_v28 = vadd.f32 %v4426_v26, %v4419_v25  ;;  %v4433_v37 = vmul.f32 %v4432_v11, %v4328_v27  ;;  %v4439_v17 = vmul.f32 %v4438_v23, %v4328_v27  ;;  %v10417_v24 = vpop.f32.mrb[121].mxu0  ;;  %v4522_v25 = vrot.slane %v4368_v10, %v11435_v35 }
 0xdb9   : > { %v4331_v63 = vpop.f32.mrb[122].mxu0  ;;  %v4528_v26 = vrot.slane %v4368_v10, %v11440_v14 }
 0xdba   : > { %v4434_v7 = vadd.f32 %v4433_v37, %v4428_v28  ;;  %v4441_v30 = vrot.slane %v4439_v17, 4  ;;  %v4454_v48 = vmul.f32 %v4453_v41, %v4331_v63  ;;  %v10418_v13 = vpop.f32.mrb[123].mxu0  ;;  %v4448_v20 = vmul.f32 %v4447_v21, %v4331_v63 }
 0xdbb   : > { %v4543_v28 = vrot.slane %v4369_v55, %v11199_v38 }
 0xdbc   : > { %v4443_v39 = vadd.f32 %v4441_v30, %v4434_v7  ;;  %v4456_v50 = vrot.slane %v4454_v48, 4  ;;  %v4537_v7 = vrot.slane %v4368_v10, %v11445_v53 }
 0xdbe   : > { %v4449_v45 = vadd.f32 %v4448_v20, %v4443_v39 }
 0xdbf   : > { %v4336_v5 = vpop.f32.mrb[124].mxu0 }
 0xdc0   : > { %v4458_v56 = vadd.f32 %v4456_v50, %v4449_v45  ;;  %v4463_v57 = vmul.f32 %v4462_v43, %v4336_v5  ;;  %v4469_v36 = vmul.f32 %v4468_v46, %v4336_v5  ;;  %v10421_v61 = vpop.f32.mrb[125].mxu0  ;;  %v4552_v45 = vrot.slane %v4369_v55, %v11202_v40  ;;  %v4555_v50 = vld [vmem:[#allocation4 + $0x90] sm:$0xc] }
 0xdc1   : > { %v4339_v54 = vpop.f32.mrb[126].mxu0  ;;  %v4559_v61 = vrot.slane %v4555_v50, %v11365_v1 }
 0xdc2   : > { %v4464_v3 = vadd.f32 %v4463_v57, %v4458_v56  ;;  %v4471_v58 = vrot.slane %v4469_v36, 4  ;;  %v4484_v51 = vmul.f32 %v4483_v52, %v4339_v54  ;;  %v10422_v34 = vpop.f32.mrb[127].mxu0  ;;  %v4478_v15 = vmul.f32 %v4477_v62, %v4339_v54 }
 0xdc4   : > { %v4473_v59 = vadd.f32 %v4471_v58, %v4464_v3  ;;  %v4486_v2 = vrot.slane %v4484_v51, 4  ;;  %v4564_v3 = vrot.slane %v4555_v50, %v11370_v4 }
 0xdc6   : > { %v4479_v19 = vadd.f32 %v4478_v15, %v4473_v59 }
 0xdc7   : > { %v4344_v47 = vpop.f32.mrb[128].mxu0 }
 0xdc8   : > { %v4488_v44 = vadd.f32 %v4486_v2, %v4479_v19  ;;  %v4493_v29 = vmul.f32 %v4492_v0, %v4344_v47  ;;  %v4499_v8 = vmul.f32 %v4498_v18, %v4344_v47  ;;  %v10425_v9 = vpop.f32.mrb[129].mxu0 }
 0xdc9   : > { %v4347_v32 = vpop.f32.mrb[130].mxu0 }
 0xdca   : > { %v4494_v33 = vadd.f32 %v4493_v29, %v4488_v44  ;;  %v4501_v42 = vrot.slane %v4499_v8, 4  ;;  %v4514_v60 = vmul.f32 %v4513_v16, %v4347_v32  ;;  %v10426_v6 = vpop.f32.mrb[131].mxu0  ;;  %v4508_v23 = vmul.f32 %v4507_v31, %v4347_v32 }
 0xdcc   : > { %v4503_v11 = vadd.f32 %v4501_v42, %v4494_v33  ;;  %v4516_v27 = vrot.slane %v4514_v60, 4  ;;  %v10770_v33 = vld [vmem:[#allocation2 + $0x558] ss:$8 sps:$4 sm:$0xf8]   ;;  %v10771_v42 = vld [vmem:[#allocation2 + $0x568] ss:$8 sps:$4 sm:$0xff]  }
 0xdcd   : > { %v10772_v60 = vld [vmem:[#allocation2 + $0x578] ss:$8 sps:$4 sm:$0xff]   ;;  %v4879_v6 = vshrl.u32 %v10770_v33, 16  ;;  %v4882_v55 = vshll.u32 %v10770_v33, 16 }
 0xdce   : > { %v4509_v41 = vadd.f32 %v4508_v23, %v4503_v11  ;;  %v4887_v11 = vshrl.u32 %v10771_v42, 16  ;;  %v4890_v23 = vshll.u32 %v10771_v42, 16 }
 0xdcf   : > { %v4352_v37 = vpop.f32.mrb[132].mxu0 }
 0xdd0   : > { %v4518_v17 = vadd.f32 %v4516_v27, %v4509_v41  ;;  %v4523_v24 = vmul.f32 %v4522_v25, %v4352_v37  ;;  %v4529_v21 = vmul.f32 %v4528_v26, %v4352_v37  ;;  %v10429_v63 = vpop.f32.mrb[133].mxu0  ;;  %v4896_v25 = vshrl.u32 %v10772_v60, 16 }
 0xdd1   : > { %v4355_v30 = vpop.f32.mrb[134].mxu0  ;;  %v4899_v26 = vshll.u32 %v10772_v60, 16  ;;  %v4881_v41 = vrot.slane %v4879_v6, 3  ;;  %v4884_v27 = vrot.slane %v4882_v55, 4  ;;  %v4892_v37 = vrot.slane %v4890_v23, 4 }
 0xdd2   : > { %v4524_v48 = vadd.f32 %v4523_v24, %v4518_v17  ;;  %v4531_v13 = vrot.slane %v4529_v21, 4  ;;  %v4544_v39 = vmul.f32 %v4543_v28, %v4355_v30  ;;  %v10430_v20 = vpop.f32.mrb[135].mxu0  ;;  %v4538_v46 = vmul.f32 %v4537_v7, %v4355_v30  ;;  %v10777_v6 = vld [vmem:[#allocation2 + $0x5e4] ss:$8 sps:$4 sm:$0xfe]  }
 0xdd3   : > { %v4889_v28 = vrot.slane %v4887_v11, 3  ;;  %v4898_v17 = vrot.slane %v4896_v25, 3  ;;  %v4901_v24 = vrot.slane %v4899_v26, 4  ;;  %v4885_v21 = vor.u32 %v4884_v27, %v4881_v41  ;;  %v10779_v55 = vld [vmem:[#allocation2 + $0x5f4] ss:$8 sps:$4 sm:$0xff]  }
 0xdd4   : > { %v4533_v43 = vadd.f32 %v4531_v13, %v4524_v48  ;;  %v4546_v5 = vrot.slane %v4544_v39, 4  ;;  %v4594_v13 = vld [vmem:[#allocation4 + $0x94] ss:$0 sm:$0xff]  ;;  %v10781_v11 = vld [vmem:[#allocation2 + $0x5e0] ss:$8 sps:$4 sm:$0xfe]  }
 0xdd5   : > { %v4893_v63 = vor.u32 %v4892_v37, %v4889_v28  ;;  %v4902_v7 = vor.u32 %v4901_v24, %v4898_v17  ;;  %v10782_v23 = vld [vmem:[#allocation2 + $0x5f0] ss:$8 sps:$4 sm:$0xff]   ;;  %v5050_v25 = vshrl.u32 %v10777_v6, 16  ;;  %v5053_v26 = vshll.u32 %v10777_v6, 16 }
 0xdd6   : > { %v4539_v52 = vadd.f32 %v4538_v46, %v4533_v43  ;;  %v5058_v41 = vshrl.u32 %v10779_v55, 16  ;;  %v5061_v27 = vshll.u32 %v10779_v55, 16  ;;  %v5033_v28 = vshrl.u32 %v10781_v11, 16 }
 0xdd7   : > { %v4360_v56 = vpop.f32.mrb[136].mxu0  ;;  %v4894_v30 = vsel %vm4060_vm12, %v4885_v21, %v4893_v63  ;;  %v4903_v48 = vsel %vm4060_vm12, %v4893_v63, %v4902_v7  ;;  %v5036_v37 = vshll.u32 %v10781_v11, 16  ;;  %v5041_v17 = vshrl.u32 %v10782_v23, 16 }
 0xdd8   : > { %v4548_v57 = vadd.f32 %v4546_v5, %v4539_v52  ;;  %v4553_v36 = vmul.f32 %v4552_v45, %v4360_v56  ;;  %v10433_v62 = vpop.f32.mrb[137].mxu0  ;;  %v10773_v5 = vld [vmem:[#allocation2 + $0x588] ss:$8 sps:$4 sm:$0xff]   ;;  %v5044_v24 = vshll.u32 %v10782_v23, 16  ;;  %v5052_v21 = vrot.slane %v5050_v25, 1 }
 0xdd9   : > { %v4363_v54 = vpop.f32.mrb[138].mxu0  ;;  %v4905_v56 = vshrl.u32 %v10773_v5, 16  ;;  %v10774_v62 = vld [vmem:[#allocation2 + $0x598] ss:$8 sps:$4 sm:$0xff]   ;;  %v5055_v63 = vrot.slane %v5053_v26, 2 }
 0xdda   : > { %v4554_v10 = vadd.f32 %v4553_v36, %v4548_v57  ;;  %v10434_v58 = vpop.f32.mrb[139].mxu0  ;;  %v4908_v57 = vshll.u32 %v10773_v5, 16 }
 0xddb   : > { %v4907_v36 = vrot.slane %v4905_v56, 3 }
 0xddc   : > { %v4560_v51 = vmul.f32 %v4559_v61, %v4554_v10  ;;  %v4910_v61 = vrot.slane %v4908_v57, 4  ;;  %v4914_v10 = vshrl.u32 %v10774_v62, 16 }
 0xdde   : > { %v4565_v34 = vadd.f32 %v4564_v3, %v4560_v51  ;;  %v4911_v54 = vor.u32 %v4910_v61, %v4907_v36  ;;  %v4917_v3 = vshll.u32 %v10774_v62, 16  ;;  %v4916_v51 = vrot.slane %v4914_v10, 3 }
 0xde0   : > { %v4566_v59 = vadd.f32 3.0, %v4565_v34  ;;  %v4912_v58 = vsel %vm4060_vm12, %v4902_v7, %v4911_v54  ;;  %v5060_v7 = vrot.slane %v5058_v41, 1 }
 0xde2   : > { %v4567_v15 = vmax.f32 %v4566_v59, 0.0  ;;  %v10775_v59 = vld [vmem:[#allocation2 + $0x5a8] ss:$8 sps:$4 sm:$0xff]  }
 0xde4   : > { %v4568_v0 = vmin.f32 %v4567_v15, 6.0 }
 0xde6   : > { %v4569_v18 = vmul.f32 %v4568_v0, %v4565_v34  ;;  %v4919_v34 = vrot.slane %v4917_v3, 4  ;;  %v4923_v0 = vshrl.u32 %v10775_v59, 16  ;;  %v4746_v3 = vld [vmem:[#allocation4 + $0x95] ss:$0 sm:$0xff] }
 0xde8   : > { %v11783_v19 = vmul.f32 0.16666667, %v4569_v18  ;;  %v4920_v15 = vor.u32 %v4919_v34, %v4916_v51  ;;  %v4926_v18 = vshll.u32 %v10775_v59, 16 }
 0xdea   : > { %v4572_v2 = vsel %vm4571_vm13, %v11783_v19, 0.0 }
 0xdeb   : > { %v4573_v16 = vrot.slane %v4572_v2, 4 }
 0xded   : > { %v4574_v47 = vadd.f32 %v4573_v16, %v4572_v2  ;;  %v4921_v2 = vsel %vm4060_vm12, %v4911_v54, %v4920_v15  ;;  %v4925_v16 = vrot.slane %v4923_v0, 3 }
 0xdef   : > { %v4575_v44 = vrot.slane %v4574_v47, 2 }
 0xdf1   : > { %v4576_v29 = vadd.f32 %v4575_v44, %v4574_v47  ;;  %v4928_v47 = vrot.slane %v4926_v18, 4  ;;  %v10776_v44 = vld [vmem:[#allocation2 + $0x5b8] ss:$0 sps:$4 sm:$0xff]  }
 0xdf3   : > { %v4577_v8 = vrot.slane %v4576_v29, 1 }
 0xdf5   : > { %v4578_v9 = vadd.f32 %v4577_v8, %v4576_v29  ;;  %v4929_v29 = vor.u32 %v4928_v47, %v4925_v16  ;;  %v4932_v8 = vshrl.u32 %v10776_v44, 16 }
 0xdf7   : > { %v4579_v31 = vmul.f32 0.25, %v4578_v9  ;;  %v4935_v9 = vshll.u32 %v10776_v44, 16 }
 0xdf9   : > { %v4580_v32 = vpack.c.bf16 %v4579_v31, %v4579_v31  ;;  %v4930_v31 = vsel %vm4060_vm12, %v4920_v15, %v4929_v29  ;;  %v4937_v33 = vrot.slane %v4935_v9, 4 }
 0xdfb   : > { %10448 = vmatmul.mubr.msk.bf16.vlgmr.msra.gmra.mrb[140].mxu0 %vm4696_vm14, %v4580_v32  ;;  %v4934_v32 = vrot.slane %v4932_v8, 3  ;;  %v10785_v8 = vld [vmem:[#allocation2 + $0x600] ss:$8 sps:$4 sm:$0x3f]  }
 0xdfc   : > { %10471 = vmatprep.mubr.msk.bf16.mxu0 %vm11046_vm4, %v11045_v12  ;;  %10460 = vmatpush3.bf16.msra.mxu0 %v4894_v30  ;;  %v5063_v30 = vrot.slane %v5061_v27, 2  ;;  %v5067_v9 = vshrl.u32 %v10785_v8, 16 }
 0xdfd   : > { %10461 = vmatprep.subr.bf16.mxu0 %v11045_v12  ;;  %v4938_v42 = vor.u32 %v4937_v33, %v4934_v32 }
 0xdfe   : > { %v5069_v32 = vrot.slane %v5067_v9, 1 }
 0xdff   : > { %v4939_v60 = vsel %vm4060_vm12, %v4929_v29, %v4938_v42 }
 0xe00   : > { %10462 = vmatpush3.bf16.msra.mxu0 %v4903_v48  ;;  %v5035_v48 = vrot.slane %v5033_v28, 1 }
 0xe01   : > { %10463 = vmatprep.subr.bf16.mxu0 %v11045_v12 }
 0xe04   : > { %10464 = vmatpush3.bf16.msra.mxu0 %v4912_v58 }
 0xe05   : > { %10465 = vmatprep.subr.bf16.mxu0 %v11045_v12 }
 0xe08   : > { %10466 = vmatpush3.bf16.msra.mxu0 %v4921_v2 }
 0xe09   : > { %10467 = vmatprep.subr.bf16.mxu0 %v11045_v12 }
 0xe0c   : > { %10468 = vmatpush3.bf16.msra.mxu0 %v4930_v31  ;;  %v5070_v31 = vshll.u32 %v10785_v8, 16 }
 0xe0d   : > { %10469 = vmatprep.subr.bf16.mxu0 %v11045_v12 }
 0xe0e   : > { %v5072_v33 = vrot.slane %v5070_v31, 2  ;;  %v10788_v31 = vld [vmem:[#allocation2 + $0x5d8] ss:$8 sps:$4 sm:$0x3f]  }
 0xe10   : > { %10470 = vmatpush3.bf16.msra.mxu0 %v4939_v60  ;;  %v5073_v42 = vor.u32 %v5072_v33, %v5069_v32 }
 0xe12   : > { %v5093_v6 = vsel %vm2543_vm6, %v5073_v42, 0 }
 0xece   : > { %v4734_v39 = vpop.f32.mrb[140].mxu0 }
 0xecf   : > { %v4735_v20 = vadd.f32 %v4734_v39, %v4594_v13  ;;  %v10449_v43 = vpop.f32.mrb[141].mxu0  ;;  %v5038_v13 = vrot.slane %v5036_v37, 2  ;;  %v5043_v39 = vrot.slane %v5041_v17, 1  ;;  %v4999_v17 = vld [vmem:[#allocation4 + $0xa0] sm:$0x3] }
 0xed0   : > { %v4737_v46 = vpop.f32.mrb[142].mxu0  ;;  %v5056_v43 = vor.u32 %v5055_v63, %v5052_v21  ;;  %v5142_v21 = vrot.slane %v4999_v17, %v11199_v38 }
 0xed1   : > { %v4740_v45 = vmax.f32 %v4735_v20, 0.0  ;;  %v10450_v50 = vpop.f32.mrb[143].mxu0  ;;  %v5046_v20 = vrot.slane %v5044_v24, 2  ;;  %v5064_v46 = vor.u32 %v5063_v30, %v5060_v7  ;;  %v5000_v24 = vld [vmem:[#allocation4 + $0xa8] sm:$0x3]  ;;  %v5152_v7 = vrot.slane %v4999_v17, %v11202_v40 }
 0xed2   : > { %v5039_v50 = vor.u32 %v5038_v13, %v5035_v48  ;;  %v5146_v63 = vrot.slane %v5000_v24, %v11199_v38  ;;  %v5156_v48 = vrot.slane %v5000_v24, %v11202_v40 }
 0xed3   : > { %v4741_v52 = vpack.c.bf16 %v4740_v45, %v4740_v45  ;;  %v10783_v45 = vld [vmem:[#allocation2 + $0x604] ss:$8 sps:$4 sm:$0x3f]   ;;  %v5065_v5 = vsel %vm1159_vm3, %v5056_v43, %v5064_v46 }
 0xed4   : > { %v5076_v56 = vshrl.u32 %v10783_v45, 16  ;;  %v5079_v57 = vshll.u32 %v10783_v45, 16  ;;  %5098 = vmatprep.subr.bf16.mxu1 %v5065_v5  ;;  %v10787_v45 = vld [vmem:[#allocation2 + $0x5c8] ss:$8 sps:$4 sm:$0xff]  }
 0xed5   : > { %10456 = vmatmul.mubr.msk.bf16.vlgmr.msra.gmra.mrb[176].mxu1 %vm3441_vm10, %v4741_v52  ;;  %v5047_v52 = vor.u32 %v5046_v20, %v5043_v39  ;;  %v10786_v20 = vld [vmem:[#allocation2 + $0x5b8] ss:$8 sps:$4 sm:$0xf8]   ;;  %v10789_v5 = vld [vmem:[#allocation2 + $0x608] ss:$8 sps:$4 sm:$0xfe]  }
 0xed6   : > { %5130 = vmatprep.mubr.bf16.mxu1 %v11044_v22  ;;  %v5078_v61 = vrot.slane %v5076_v56, 1  ;;  %v5081_v62 = vrot.slane %v5079_v57, 2  ;;  %v10790_v57 = vld [vmem:[#allocation2 + $0x618] ss:$8 sps:$4 sm:$0xff]   ;;  %vm8218_vm10 = vcmask 261120  }
 0xed7   : > { %v5048_v36 = vsel %vm1159_vm3, %v5039_v50, %v5047_v52  ;;  %v5074_v60 = vsel %vm1159_vm3, %v5047_v52, %v5073_v42 }
 0xed8   : > { %5099 = vmatpush1.bf16.msra.mxu1 %v5048_v36  ;;  %v5082_v54 = vor.u32 %v5081_v62, %v5078_v61  ;;  %v5193_v61 = vshrl.u32 %v10786_v20, 16 }
 0xeda   : > { %v5083_v10 = vsel %vm1159_vm3, %v5064_v46, %v5082_v54 }
 0xedb   : > { %5100 = vmatprep.subr.bf16.mxu1 %v5083_v10  ;;  %v5201_v10 = vshrl.u32 %v10787_v45, 16 }
 0xedc   : > { %5101 = vmatpush1.bf16.msra.mxu1 %v5074_v60 }
 0xedd   : > { %9884 = vmatprep.subr.msk.bf16.mxu1 %vm2543_vm6, %v5082_v54  ;;  %v5196_v54 = vshll.u32 %v10786_v20, 16 }
 0xee0   : > { %5103 = vmatpush1.bf16.msra.mxu1 %v5093_v6 }
 0xfa8   : > { %v4815_v58 = vpop.f32.mrb[176].mxu1 }
 0xfa9   : > { %v4816_v51 = vadd.f32 %v4815_v58, %v4746_v3  ;;  %v10457_v34 = vpop.f32.mrb[177].mxu1  ;;  %v5204_v3 = vshll.u32 %v10787_v45, 16 }
 0xfaa   : > { %v4818_v59 = vpop.f32.mrb[178].mxu1  ;;  %v10791_v34 = vld [vmem:[#allocation2 + $0x628] ss:$8 sps:$4 sm:$0xff]  }
 0xfab   : > { %v4821_v15 = vadd.f32 3.0, %v4816_v51  ;;  %v10458_v0 = vpop.f32.mrb[179].mxu1  ;;  %v5592_v51 = vshrl.u32 %v10789_v5, 16  ;;  %v5206_v8 = vrot.slane %v5204_v3, 4  ;;  %v5609_v33 = vshrl.u32 %v10791_v34, 16 }
 0xfac   : > { %v5600_v0 = vshrl.u32 %v10790_v57, 16  ;;  %v5612_v42 = vshll.u32 %v10791_v34, 16 }
 0xfad   : > { %v4822_v18 = vmax.f32 %v4821_v15, 0.0  ;;  %v5595_v15 = vshll.u32 %v10789_v5, 16  ;;  %v5594_v32 = vrot.slane %v5592_v51, 1  ;;  %v5611_v17 = vrot.slane %v5609_v33, 1  ;;  %v10794_v51 = vld [vmem:[#allocation2 + $0x658] ss:$8 sps:$4 sm:$0xff]  }
 0xfaf   : > { %v4823_v2 = vmin.f32 %v4822_v18, 6.0  ;;  %v5603_v18 = vshll.u32 %v10790_v57, 16  ;;  %v5597_v6 = vrot.slane %v5595_v15, 2  ;;  %v5639_v15 = vshll.u32 %v10794_v51, 16 }
 0xfb1   : > { %v4824_v16 = vmul.f32 0.16666667, %v4823_v2 }
 0xfb3   : > { %v4828_v47 = vrot.slane %v4824_v16, %v11199_v38  ;;  %v5195_v16 = vrot.slane %v5193_v61, 3  ;;  %v10793_v61 = vld [vmem:[#allocation2 + $0x648] ss:$8 sps:$4 sm:$0xff]  }
 0xfb5   : > { %v4829_v44 = vmul.f32 %v4828_v47, %v11783_v19  ;;  %v4830_v19 = vld [vmem:[#allocation4 + $0x90] sm:$0xc0] }
 0xfb6   : > { %v4992_v55 = vrot.slane %v4830_v19, %v11440_v14  ;;  %v4997_v11 = vrot.slane %v4830_v19, %v11445_v53  ;;  %v5602_v19 = vrot.slane %v5600_v0, 1 }
 0xfb7   : > { %v4831_v29 = vpack.c.bf16 %v4829_v44, %v4829_v44  ;;  %v5198_v44 = vrot.slane %v5196_v54, 4  ;;  %v5627_v54 = vshrl.u32 %v10793_v61, 16 }
 0xfb9   : > { %10472 = vmatmul.mubr.msk.bf16.vlgmr.msra.gmra.mrb[144].mxu0 %vm4696_vm14, %v4831_v29  ;;  %v5203_v29 = vrot.slane %v5201_v10, 3  ;;  %v5630_v10 = vshll.u32 %v10793_v61, 16 }
 0xfba   : > { %5985 = vmatprep.mubr.bf16.mxu0 %v11044_v22 }
 0xfbb   : > { %v5632_v34 = vrot.slane %v5630_v10, 2  ;;  %v10801_v10 = vld [vmem:[#allocation2 + $0x6c8] ss:$8 sps:$4 sm:$0xff]  }
0x108c   : > { %v4983_v23 = vpop.f32.mrb[144].mxu0 }
0x108d   : > { %v4993_v25 = vmul.f32 %v4992_v55, %v4983_v23  ;;  %v10473_v26 = vpop.f32.mrb[145].mxu0  ;;  %v5605_v55 = vrot.slane %v5603_v18, 2 }
0x108e   : > { %v4986_v41 = vpop.f32.mrb[146].mxu0  ;;  %v5207_v26 = vor.u32 %v5206_v8, %v5203_v29 }
0x108f   : > { %v11814_v27 = vadd.f32 %v4997_v11, %v4993_v25  ;;  %v10474_v28 = vpop.f32.mrb[147].mxu0  ;;  %v5199_v25 = vor.u32 %v5198_v44, %v5195_v16  ;;  %v10795_v16 = vld [vmem:[#allocation2 + $0x668] ss:$8 sps:$4 sm:$0xff]  }
0x1090   : > { %v5210_v28 = vshrl.u32 %v10788_v31, 16  ;;  %v5645_v29 = vshrl.u32 %v10795_v16, 16  ;;  %v5648_v8 = vshll.u32 %v10795_v16, 16 }
0x1091   : > { %v5001_v37 = vpack.c.bf16 %v11814_v27, %v11814_v27 }
0x1092   : > { %v5650_v33 = vrot.slane %v5648_v8, 2  ;;  %v10803_v8 = vld [vmem:[#allocation2 + $0x6e8] ss:$8 sps:$4 sm:$0xff]  }
0x1093   : > { %9885 = vmatmul.mubr.msk.bf16.vlgmr.msra.gmra.mrb[180].mxu1 %vm5088_vm15, %v5001_v37  ;;  %v5213_v37 = vshll.u32 %v10788_v31, 16  ;;  %v5647_v31 = vrot.slane %v5645_v29, 1 }
0x1094   : > { %5267 = vmatprep.mubr.bf16.mxu1 %v11044_v22 }
0x1166   : > { %v5132_v30 = vpop.f32.mrb[180].mxu1 }
0x1167   : > { %v5147_v13 = vmul.f32 %v5142_v21, %v5132_v30  ;;  %v5134_v39 = vpop.f32.mrb[181].mxu1  ;;  %v5598_v21 = vor.u32 %v5597_v6, %v5594_v32  ;;  %v10796_v32 = vld [vmem:[#allocation2 + $0x678] ss:$8 sps:$4 sm:$0xff]   ;;  %v5651_v6 = vor.u32 %v5650_v33, %v5647_v31  ;;  %v5717_v31 = vshrl.u32 %v10803_v8, 16 }
0x1168   : > { %v5148_v43 = vmul.f32 %v5146_v63, %v5134_v39  ;;  %v5136_v46 = vpop.f32.mrb[182].mxu1  ;;  %v5606_v63 = vor.u32 %v5605_v55, %v5602_v19  ;;  %v5215_v39 = vrot.slane %v5213_v37, 4  ;;  %v10804_v33 = vld [vmem:[#allocation2 + $0x6f8] ss:$0 sps:$4 sm:$0x33]  }
0x1169   : > { %v5157_v50 = vadd.f32 %v5152_v7, %v5147_v13  ;;  %v5137_v52 = vpop.f32.mrb[183].mxu1  ;;  %v5614_v7 = vrot.slane %v5612_v42, 2  ;;  %v5212_v13 = vrot.slane %v5210_v28, 3  ;;  %v5654_v42 = vshrl.u32 %v10796_v32, 16 }
0x116a   : > { %v5158_v56 = vadd.f32 %v5156_v48, %v5148_v43  ;;  %v5208_v48 = vsel %vm4060_vm12, %v5199_v25, %v5207_v26  ;;  %v5607_v20 = vsel %vm1159_vm3, %v5598_v21, %v5606_v63  ;;  %v10792_v52 = vld [vmem:[#allocation2 + $0x638] ss:$8 sps:$4 sm:$0xff]  }
0x116b   : > { %v5159_v36 = vadd.f32 3.0, %v5157_v50  ;;  %v5615_v43 = vor.u32 %v5614_v7, %v5611_v17  ;;  %v5216_v46 = vor.u32 %v5215_v39, %v5212_v13  ;;  %v5618_v5 = vshrl.u32 %v10792_v52, 16  ;;  %v10799_v13 = vld [vmem:[#allocation2 + $0x6a8] ss:$8 sps:$4 sm:$0xff]  }
0x116c   : > { %v5160_v62 = vadd.f32 3.0, %v5158_v56  ;;  %v5656_v19 = vrot.slane %v5654_v42, 1 }
0x116d   : > { %v5161_v58 = vmax.f32 %v5159_v36, 0.0  ;;  %v5616_v45 = vsel %vm1159_vm3, %v5606_v63, %v5615_v43  ;;  %v5620_v57 = vrot.slane %v5618_v5, 1 }
0x116e   : > { %v5162_v59 = vmax.f32 %v5160_v62, 0.0 }
0x116f   : > { %v5163_v2 = vmin.f32 %v5161_v58, 6.0  ;;  %v5629_v58 = vrot.slane %v5627_v54, 1 }
0x1170   : > { %v5164_v47 = vmin.f32 %v5162_v59, 6.0  ;;  %v5636_v59 = vshrl.u32 %v10794_v51, 16  ;;  %v5702_v51 = vshll.u32 %v10801_v10, 16 }
0x1171   : > { %v5165_v9 = vmul.f32 %v5163_v2, %v5157_v50  ;;  %v5217_v50 = vsel %vm4060_vm12, %v5207_v26, %v5216_v46  ;;  %v5633_v0 = vor.u32 %v5632_v34, %v5629_v58  ;;  %v5641_v2 = vrot.slane %v5639_v15, 2 }
0x1172   : > { %v5166_v60 = vmul.f32 %v5164_v47, %v5158_v56  ;;  %v5621_v56 = vshll.u32 %v10792_v52, 16  ;;  %v5638_v18 = vrot.slane %v5636_v59, 1  ;;  %v10800_v52 = vld [vmem:[#allocation2 + $0x6b8] ss:$8 sps:$4 sm:$0xff]   ;;  %v5699_v58 = vshrl.u32 %v10801_v10, 16 }
0x1173   : > { %v5167_v11 = vmul.f32 0.16666667, %v5165_v9  ;;  %v5704_v15 = vrot.slane %v5702_v51, 2 }
0x1174   : > { %v5168_v23 = vmul.f32 0.16666667, %v5166_v60  ;;  %v5623_v36 = vrot.slane %v5621_v56, 2  ;;  %v5642_v44 = vor.u32 %v5641_v2, %v5638_v18  ;;  %v5657_v60 = vshll.u32 %v10796_v32, 16 }
0x1175   : > { %v5175_v41 = vpack.c.bf16 %v5167_v11, %v5167_v11  ;;  %v10797_v11 = vld [vmem:[#allocation2 + $0x688] ss:$8 sps:$4 sm:$0xff]   ;;  %v5701_v59 = vrot.slane %v5699_v58, 1  ;;  %v5720_v32 = vshll.u32 %v10803_v8, 16 }
0x1176   : > { %v5176_v24 = vpack.c.bf16 %v5168_v23, %v5168_v23  ;;  %v5624_v62 = vor.u32 %v5623_v36, %v5620_v57  ;;  %v5643_v9 = vsel %vm1159_vm3, %v5633_v0, %v5642_v44  ;;  %v5659_v55 = vrot.slane %v5657_v60, 2 }
0x1177   : > { %v5230_v30 = vsel %vm5228_vm0, %v5175_v41, 0  ;;  %v5652_v23 = vsel %vm1159_vm3, %v5642_v44, %v5651_v6  ;;  %v5663_v26 = vshrl.u32 %v10797_v11, 16  ;;  %v5666_v41 = vshll.u32 %v10797_v11, 16 }
0x1178   : > { %9889 = vmatprep.subr.msk.bf16.mxu1 %vm5228_vm0, %v5176_v24  ;;  %v5625_v3 = vsel %vm1159_vm3, %v5615_v43, %v5624_v62  ;;  %v5634_v47 = vsel %vm1159_vm3, %v5624_v62, %v5633_v0  ;;  %v5660_v25 = vor.u32 %v5659_v55, %v5656_v19  ;;  %v10798_v24 = vld [vmem:[#allocation2 + $0x698] ss:$8 sps:$4 sm:$0xff]   ;;  %v5684_v43 = vshll.u32 %v10799_v13, 16 }
0x1179   : > { %5236 = vmatpush1.bf16.msra.mxu1 %v5230_v30  ;;  %v5665_v37 = vrot.slane %v5663_v26, 1  ;;  %v5668_v17 = vrot.slane %v5666_v41, 2  ;;  %v5672_v63 = vshrl.u32 %v10798_v24, 16  ;;  %v5675_v7 = vshll.u32 %v10798_v24, 16  ;;  %v10802_v0 = vld [vmem:[#allocation2 + $0x6d8] ss:$8 sps:$4 sm:$0xff]  }
0x117a   : > { %5753 = vmatprep.subr.bf16.mxu1 %v11044_v22  ;;  %v5661_v28 = vsel %vm1159_vm3, %v5651_v6, %v5660_v25  ;;  %v5690_v57 = vshrl.u32 %v10800_v52, 16  ;;  %v5693_v36 = vshll.u32 %v10800_v52, 16  ;;  %v5705_v18 = vor.u32 %v5704_v15, %v5701_v59  ;;  %v10809_v24 = vld [vmem:[#allocation2 + $0x6f8] ss:$8 sps:$4 sm:$0xfe]  }
0x117b   : > { %v5669_v21 = vor.u32 %v5668_v17, %v5665_v37  ;;  %v5677_v39 = vrot.slane %v5675_v7, 2  ;;  %v5708_v2 = vshrl.u32 %v10802_v0, 16  ;;  %v5711_v16 = vshll.u32 %v10802_v0, 16  ;;  %v10805_v37 = vld [vmem:[#allocation2 + $0x6fc] ss:$8 sps:$4 sm:$0xfe]  }
0x117c   : > { %9890 = vmatmul.mubr.msk.bf16.vlgmr.msra.gmra.mrb[184].mxu1 %vm5218_vm1, %v5208_v48  ;;  %v5674_v48 = vrot.slane %v5672_v63, 1  ;;  %v5692_v62 = vrot.slane %v5690_v57, 1  ;;  %v5695_v54 = vrot.slane %v5693_v36, 2  ;;  %v5719_v60 = vrot.slane %v5717_v31, 1  ;;  %v10807_v17 = vld [vmem:[#allocation2 + $0x70c] ss:$8 sps:$4 sm:$0xff]  }
0x117d   : > { %5277 = vmatprep.mubr.bf16.mxu1 %v11044_v22  ;;  %5754 = vmatpush1.bf16.msra.mxu1 %v5607_v20  ;;  %v5670_v30 = vsel %vm1159_vm3, %v5660_v25, %v5669_v21  ;;  %v5681_v20 = vshrl.u32 %v10799_v13, 16  ;;  %v5710_v44 = vrot.slane %v5708_v2, 1  ;;  %v5713_v29 = vrot.slane %v5711_v16, 2  ;;  %v10811_v13 = vld [vmem:[#allocation2 + $0x71c] ss:$8 sps:$4 sm:$0xff]  }
0x117e   : > { %5755 = vmatprep.subr.bf16.mxu1 %v11044_v22  ;;  %v5722_v6 = vrot.slane %v5720_v32, 2  ;;  %v5726_v19 = vshrl.u32 %v10804_v33, 16  ;;  %v5729_v55 = vshll.u32 %v10804_v33, 16  ;;  %v5861_v63 = vshrl.u32 %v10805_v37, 16  ;;  %v10814_v57 = vld [vmem:[#allocation2 + $0x72c] ss:$8 sps:$4 sm:$0xff]  }
0x117f   : > { %v5864_v7 = vshll.u32 %v10805_v37, 16  ;;  %v5887_v58 = vshrl.u32 %v10811_v13, 16  ;;  %v5890_v51 = vshll.u32 %v10811_v13, 16 }
0x1180   : > { %v5723_v11 = vor.u32 %v5722_v6, %v5719_v60  ;;  %v5731_v25 = vrot.slane %v5729_v55, 2 }
0x1181   : > { %5756 = vmatpush1.bf16.msra.mxu1 %v5616_v45  ;;  %v5683_v45 = vrot.slane %v5681_v20, 1  ;;  %v5847_v20 = vshll.u32 %v10809_v24, 16  ;;  %v5866_v52 = vrot.slane %v5864_v7, 2  ;;  %v5889_v2 = vrot.slane %v5887_v58, 1 }
0x1182   : > { %5757 = vmatprep.subr.bf16.mxu1 %v11044_v22  ;;  %v5892_v16 = vrot.slane %v5890_v51, 2 }
0x1184   : > { %9891 = vmatmul.mubr.msk.bf16.gmra.mrb[188].mxu1 %vm5218_vm1, %v5217_v50  ;;  %v5686_v50 = vrot.slane %v5684_v43, 2  ;;  %v5893_v31 = vor.u32 %v5892_v16, %v5889_v2 }
0x1185   : > { %5287 = vmatprep.mubr.bf16.mxu1 %v11044_v22  ;;  %5758 = vmatpush1.bf16.msra.mxu1 %v5625_v3  ;;  %v5696_v3 = vor.u32 %v5695_v54, %v5692_v62 }
0x1186   : > { %5759 = vmatprep.subr.bf16.mxu1 %v11044_v22  ;;  %v5687_v56 = vor.u32 %v5686_v50, %v5683_v45  ;;  %v10813_v45 = vld [vmem:[#allocation2 + $0x718] ss:$8 sps:$4 sm:$0xff]   ;;  %v5863_v50 = vrot.slane %v5861_v63, 1 }
0x1187   : > { %v5878_v15 = vshrl.u32 %v10813_v45, 16  ;;  %v5881_v0 = vshll.u32 %v10813_v45, 16 }
0x1188   : > { %v5697_v34 = vsel %vm1159_vm3, %v5687_v56, %v5696_v3  ;;  %v5867_v10 = vor.u32 %v5866_v52, %v5863_v50 }
0x1189   : > { %5760 = vmatpush1.bf16.msra.mxu1 %v5634_v47  ;;  %v5706_v47 = vsel %vm1159_vm3, %v5696_v3, %v5705_v18  ;;  %v5883_v8 = vrot.slane %v5881_v0, 2 }
0x118a   : > { %5761 = vmatprep.subr.bf16.mxu1 %v11044_v22 }
0x118c   : > { %9892 = vmatmul.mubr.msk.bf16.gmra.mrb[192].mxu1 %vm5218_vm1, %v5216_v46  ;;  %v5678_v46 = vor.u32 %v5677_v39, %v5674_v48  ;;  %v5872_v48 = vshll.u32 %v10807_v17, 16  ;;  %v5844_v39 = vshrl.u32 %v10809_v24, 16 }
0x118d   : > { %5762 = vmatpush1.bf16.msra.mxu1 %v5643_v9  ;;  %v5714_v9 = vor.u32 %v5713_v29, %v5710_v44  ;;  %v5880_v29 = vrot.slane %v5878_v15, 1 }
0x118e   : > { %5763 = vmatprep.subr.bf16.mxu1 %v11044_v22  ;;  %v5679_v5 = vsel %vm1159_vm3, %v5669_v21, %v5678_v46  ;;  %v5688_v61 = vsel %vm1159_vm3, %v5678_v46, %v5687_v56  ;;  %v10810_v21 = vld [vmem:[#allocation2 + $0x708] ss:$8 sps:$4 sm:$0xff]   ;;  %v5874_v56 = vrot.slane %v5872_v48, 2  ;;  %v5846_v36 = vrot.slane %v5844_v39, 1 }
0x118f   : > { %v5715_v42 = vsel %vm1159_vm3, %v5705_v18, %v5714_v9  ;;  %v5724_v26 = vsel %vm1159_vm3, %v5714_v9, %v5723_v11  ;;  %v5852_v43 = vshrl.u32 %v10810_v21, 16  ;;  %v5855_v46 = vshll.u32 %v10810_v21, 16 }
0x1190   : > { %v5908_v9 = vshll.u32 %v10814_v57, 16  ;;  %v11865_v33 = vor.u32 %v5883_v8, %v5880_v29 }
0x1191   : > { %5764 = vmatpush1.bf16.msra.mxu1 %v5652_v23  ;;  %v5728_v23 = vrot.slane %v5726_v19, 1  ;;  %v5854_v62 = vrot.slane %v5852_v43, 1  ;;  %v5857_v54 = vrot.slane %v5855_v46, 2 }
0x1192   : > { %5765 = vmatprep.subr.bf16.mxu1 %v11044_v22 }
0x1193   : > { %v5732_v41 = vor.u32 %v5731_v25, %v5728_v23  ;;  %v5858_v59 = vor.u32 %v5857_v54, %v5854_v62  ;;  %v5297_v23 = vld [vmem:[#allocation4 + $0xa8] sm:$0xfc]  ;;  %v5299_v62 = vld [vmem:[#allocation4 + $0xb8] sm:$0x7] }
0x1194   : > { %v5347_v24 = vrot.slane %v5297_v23, %v11435_v35  ;;  %v5335_v13 = vrot.slane %v5297_v23, %v11420_v49  ;;  %v5377_v58 = vrot.slane %v5297_v23, %v11445_v53  ;;  %v5407_v2 = vrot.slane %v5299_v62, %v11202_v40 }
0x1195   : > { %5766 = vmatpush1.bf16.msra.mxu1 %v5661_v28  ;;  %v5733_v28 = vsel %vm1159_vm3, %v5723_v11, %v5732_v41  ;;  %v5885_v6 = vsel %vm1159_vm3, %v5858_v59, %v11865_v33  ;;  %v5296_v11 = vld [vmem:[#allocation4 + $0xa0] sm:$0xfc] }
0x1196   : > { %5767 = vmatprep.subr.bf16.mxu1 %v11044_v22  ;;  %v5313_v25 = vrot.slane %v5296_v11, %v11370_v4  ;;  %v5303_v41 = vrot.slane %v5296_v11, %v11365_v1  ;;  %v5331_v7 = vrot.slane %v5296_v11, %v11420_v49 }
0x1199   : > { %5768 = vmatpush1.bf16.msra.mxu1 %v5670_v30  ;;  %v5869_v30 = vshrl.u32 %v10807_v17, 16  ;;  %v5307_v17 = vrot.slane %v5297_v23, %v11365_v1 }
0x119a   : > { %5769 = vmatprep.subr.bf16.mxu1 %v11044_v22 }
0x119d   : > { %5770 = vmatpush1.bf16.msra.mxu1 %v5679_v5  ;;  %v5871_v5 = vrot.slane %v5869_v30, 1 }
0x119e   : > { %5771 = vmatprep.subr.bf16.mxu1 %v11044_v22 }
0x119f   : > { %v5875_v3 = vor.u32 %v5874_v56, %v5871_v5  ;;  %v5298_v5 = vld [vmem:[#allocation4 + $0xb0] sm:$0x7] }
0x11a0   : > { %v5391_v8 = vrot.slane %v5298_v5, %v11199_v38 }
0x11a1   : > { %5772 = vmatpush1.bf16.msra.mxu1 %v5688_v61  ;;  %v5849_v61 = vrot.slane %v5847_v20, 2  ;;  %v5876_v18 = vsel %vm1159_vm3, %v5867_v10, %v5875_v3  ;;  %v5894_v60 = vsel %vm1159_vm3, %v5875_v3, %v5893_v31  ;;  %v5365_v3 = vrot.slane %v5297_v23, %v11440_v14 }
0x11a2   : > { %5773 = vmatprep.subr.bf16.mxu1 %v11044_v22  ;;  %5953 = vmatprep.subr.bf16.mxu0 %v5876_v18 }
0x11a5   : > { %5774 = vmatpush1.bf16.msra.mxu1 %v5697_v34  ;;  %v5850_v34 = vor.u32 %v5849_v61, %v5846_v36  ;;  %v5361_v36 = vrot.slane %v5296_v11, %v11440_v14  ;;  %v5373_v61 = vrot.slane %v5296_v11, %v11445_v53 }
0x11a6   : > { %5775 = vmatprep.subr.bf16.mxu1 %v11044_v22 }
0x11a7   : > { %v5859_v44 = vsel %vm1159_vm3, %v5850_v34, %v5858_v59  ;;  %v5403_v59 = vrot.slane %v5298_v5, %v11202_v40 }
0x11a8   : > { %5954 = vmatpush1.bf16.msra.mxu0 %v5859_v44 }
0x11a9   : > { %5776 = vmatpush1.bf16.msra.mxu1 %v5706_v47  ;;  %v5905_v47 = vshrl.u32 %v10814_v57, 16  ;;  %5955 = vmatprep.subr.bf16.mxu0 %v5894_v60  ;;  %v5395_v60 = vrot.slane %v5299_v62, %v11199_v38 }
0x11aa   : > { %5777 = vmatprep.subr.bf16.mxu1 %v11044_v22 }
0x11ab   : > { %v5907_v32 = vrot.slane %v5905_v47, 1 }
0x11ac   : > { %5956 = vmatpush1.bf16.msra.mxu0 %v5885_v6 }
0x11ad   : > { %5778 = vmatpush1.bf16.msra.mxu1 %v5715_v42  ;;  %v5910_v42 = vrot.slane %v5908_v9, 2 }
0x11ae   : > { %5779 = vmatprep.subr.bf16.mxu1 %v11044_v22 }
0x11af   : > { %v11870_v19 = vor.u32 %v5910_v42, %v5907_v32 }
0x11b1   : > { %5780 = vmatpush1.bf16.msra.mxu1 %v5724_v26  ;;  %v5912_v55 = vsel %vm1159_vm3, %v5893_v31, %v11870_v19  ;;  %v5317_v26 = vrot.slane %v5297_v23, %v11370_v4 }
0x11b2   : > { %5781 = vmatprep.subr.bf16.mxu1 %v11044_v22  ;;  %5957 = vmatprep.subr.bf16.mxu0 %v5912_v55 }
0x11b5   : > { %5782 = vmatpush1.bf16.msra.mxu1 %v5733_v28  ;;  %v5343_v28 = vrot.slane %v5296_v11, %v11435_v35 }
0x124f   : > { %v5269_v37 = vpop.f32.mrb[184].mxu1 }
0x1250   : > { %v5318_v21 = vmul.f32 %v5313_v25, %v5269_v37  ;;  %v5271_v63 = vpop.f32.mrb[185].mxu1  ;;  %v5308_v39 = vmul.f32 %v5303_v41, %v5269_v37 }
0x1251   : > { %v5319_v30 = vmul.f32 %v5317_v26, %v5271_v63  ;;  %v5273_v48 = vpop.f32.mrb[186].mxu1  ;;  %v5309_v45 = vmul.f32 %v5307_v17, %v5271_v63  ;;  %v5421_v17 = vrot.slane %v5298_v5, %v11365_v1  ;;  %v5430_v63 = vld [vmem:[#allocation4 + $0xb0] sm:$0x18] }
0x1252   : > { %v5322_v20 = vrot.slane %v5318_v21, 4  ;;  %v5348_v43 = vmul.f32 %v5343_v28, %v5273_v48  ;;  %v5275_v46 = vpop.f32.mrb[187].mxu1  ;;  %v5336_v57 = vmul.f32 %v5331_v7, %v5273_v48  ;;  %v5425_v7 = vrot.slane %v5299_v62, %v11365_v1 }
0x1253   : > { %v5323_v50 = vrot.slane %v5319_v30, 4  ;;  %v5349_v52 = vmul.f32 %v5347_v24, %v5275_v46  ;;  %v5337_v10 = vmul.f32 %v5335_v13, %v5275_v46  ;;  %v5431_v13 = vld [vmem:[#allocation4 + $0xb8] sm:$0x18] }
0x1254   : > { %v5326_v56 = vadd.f32 %v5322_v20, %v5308_v39  ;;  %v5352_v34 = vrot.slane %v5348_v43, 4  ;;  %v5439_v5 = vrot.slane %v5431_v13, %v11370_v4 }
0x1255   : > { %v5327_v54 = vadd.f32 %v5323_v50, %v5309_v45  ;;  %v5353_v0 = vrot.slane %v5349_v52, 4  ;;  %v5435_v50 = vrot.slane %v5430_v63, %v11370_v4 }
0x1256   : > { %v5338_v51 = vadd.f32 %v5336_v57, %v5326_v56 }
0x1257   : > { %v5339_v15 = vadd.f32 %v5337_v10, %v5327_v54  ;;  %v5279_v18 = vpop.f32.mrb[188].mxu1  ;;  %v5445_v54 = vrot.slane %v5430_v63, %v11420_v49 }
0x1258   : > { %v5356_v16 = vadd.f32 %v5352_v34, %v5338_v51  ;;  %v5366_v47 = vmul.f32 %v5361_v36, %v5279_v18  ;;  %v5378_v44 = vmul.f32 %v5373_v61, %v5279_v18  ;;  %v5281_v29 = vpop.f32.mrb[189].mxu1 }
0x1259   : > { %v5357_v9 = vadd.f32 %v5353_v0, %v5339_v15  ;;  %v5367_v31 = vmul.f32 %v5365_v3, %v5281_v29  ;;  %v5379_v32 = vmul.f32 %v5377_v58, %v5281_v29  ;;  %v5283_v42 = vpop.f32.mrb[190].mxu1  ;;  %v5449_v3 = vrot.slane %v5431_v13, %v11420_v49 }
0x125a   : > { %v5368_v6 = vadd.f32 %v5366_v47, %v5356_v16  ;;  %v5382_v55 = vrot.slane %v5378_v44, 4  ;;  %v5408_v11 = vmul.f32 %v5403_v59, %v5283_v42  ;;  %v5285_v23 = vpop.f32.mrb[191].mxu1  ;;  %v5396_v37 = vmul.f32 %v5391_v8, %v5283_v42 }
0x125b   : > { %v5369_v25 = vadd.f32 %v5367_v31, %v5357_v9  ;;  %v5383_v26 = vrot.slane %v5379_v32, 4  ;;  %v5409_v41 = vmul.f32 %v5407_v2, %v5285_v23  ;;  %v5397_v21 = vmul.f32 %v5395_v60, %v5285_v23 }
0x125c   : > { %v5386_v28 = vadd.f32 %v5382_v55, %v5368_v6  ;;  %v5412_v48 = vrot.slane %v5408_v11, 4 }
0x125d   : > { %v5387_v24 = vadd.f32 %v5383_v26, %v5369_v25  ;;  %v5413_v20 = vrot.slane %v5409_v41, 4 }
0x125e   : > { %v5398_v30 = vadd.f32 %v5396_v37, %v5386_v28 }
0x125f   : > { %v5399_v39 = vadd.f32 %v5397_v21, %v5387_v24  ;;  %v5289_v43 = vpop.f32.mrb[192].mxu1 }
0x1260   : > { %v5416_v46 = vadd.f32 %v5412_v48, %v5398_v30  ;;  %v5426_v45 = vmul.f32 %v5421_v17, %v5289_v43  ;;  %v5291_v52 = vpop.f32.mrb[193].mxu1  ;;  %v10816_v30 = vld [vmem:[#allocation2 + $0x728] ss:$8 sps:$4 sm:$0xff]  }
0x1261   : > { %v5417_v56 = vadd.f32 %v5413_v20, %v5399_v39  ;;  %v5427_v57 = vmul.f32 %v5425_v7, %v5291_v52  ;;  %v5293_v36 = vpop.f32.mrb[194].mxu1  ;;  %v5896_v48 = vshrl.u32 %v10816_v30, 16  ;;  %v5899_v13 = vshll.u32 %v10816_v30, 16  ;;  %v5803_v39 = vld [vmem:[#allocation2 + $0x738] sm:$0x33] }
0x1262   : > { %v5428_v61 = vadd.f32 %v5426_v45, %v5416_v46  ;;  %v5294_v62 = vpop.f32.mrb[195].mxu1  ;;  %v9919_v20 = vcombine.high %v5803_v39, %v5803_v39  ;;  %v9918_v45 = vcombine.low %v5803_v39, %v5803_v39 }
0x1263   : > { %v5429_v10 = vadd.f32 %v5427_v57, %v5417_v56  ;;  %v5898_v43 = vrot.slane %v5896_v48, 1  ;;  %v5901_v46 = vrot.slane %v5899_v13, 2 }
0x1264   : > { %v5440_v58 = vmul.f32 %v5435_v50, %v5428_v61  ;;  %v5923_v50 = vshrl.u32 %v9919_v20, 16  ;;  %v5926_v52 = vshll.u32 %v9919_v20, 16  ;;  %v5914_v57 = vshrl.u32 %v9918_v45, 16 }
0x1265   : > { %v5441_v51 = vmul.f32 %v5439_v5, %v5429_v10  ;;  %v5902_v56 = vor.u32 %v5901_v46, %v5898_v43  ;;  %v5917_v5 = vshll.u32 %v9918_v45, 16  ;;  %v10824_v46 = vld [vmem:[#allocation2 + $0x788] ss:$8 sps:$4 sm:$0xff]  }
0x1266   : > { %v5450_v34 = vadd.f32 %v5445_v54, %v5440_v58  ;;  %v5925_v36 = vrot.slane %v5923_v50, 1  ;;  %v5928_v61 = vrot.slane %v5926_v52, 2  ;;  %v5916_v62 = vrot.slane %v5914_v57, 1 }
0x1267   : > { %v5451_v59 = vadd.f32 %v5449_v3, %v5441_v51  ;;  %v5903_v54 = vsel %vm1159_vm3, %v11865_v33, %v5902_v56  ;;  %v5919_v10 = vrot.slane %v5917_v5, 2  ;;  %v6170_v57 = vshrl.u32 %v10824_v46, 16 }
0x1268   : > { %v5452_v15 = vadd.f32 3.0, %v5450_v34  ;;  %5958 = vmatpush1.bf16.msra.mxu0 %v5903_v54  ;;  %v5929_v3 = vor.u32 %v5928_v61, %v5925_v36  ;;  %v6173_v5 = vshll.u32 %v10824_v46, 16  ;;  %v10825_v36 = vld [vmem:[#allocation2 + $0x798] ss:$8 sps:$4 sm:$0xff]  }
0x1269   : > { %v5453_v0 = vadd.f32 3.0, %v5451_v59  ;;  %v5920_v58 = vor.u32 %v5919_v10, %v5916_v62  ;;  %v10826_v62 = vld [vmem:[#allocation2 + $0x7a8] ss:$8 sps:$4 sm:$0xff]   ;;  %v6172_v10 = vrot.slane %v6170_v57, 1 }
0x126a   : > { %v5454_v18 = vmax.f32 %v5452_v15, 0.0  ;;  %v5930_v51 = vsel %vm1159_vm3, %v11870_v19, %v5929_v3  ;;  %v10820_v15 = vld [vmem:[#allocation2 + $0x748] ss:$8 sps:$4 sm:$0xff]   ;;  %v6175_v3 = vrot.slane %v6173_v5, 2 }
0x126b   : > { %v5455_v2 = vmax.f32 %v5453_v0, 0.0  ;;  %5959 = vmatprep.subr.bf16.mxu0 %v5930_v51  ;;  %v6137_v33 = vshll.u32 %v10820_v15, 16  ;;  %v6182_v51 = vshll.u32 %v10825_v36, 16 }
0x126c   : > { %v5456_v16 = vmin.f32 %v5454_v18, 6.0 }
0x126d   : > { %v5457_v47 = vmin.f32 %v5455_v2, 6.0  ;;  %v6134_v2 = vshrl.u32 %v10820_v15, 16  ;;  %v10827_v15 = vld [vmem:[#allocation2 + $0x7b8] ss:$8 sps:$4 sm:$0xff]  }
0x126e   : > { %v5458_v44 = vmul.f32 %v5456_v16, %v5450_v34  ;;  %v5921_v34 = vsel %vm1159_vm3, %v5902_v56, %v5920_v58  ;;  %v10821_v16 = vld [vmem:[#allocation2 + $0x758] ss:$8 sps:$4 sm:$0xff]   ;;  %v6179_v58 = vshrl.u32 %v10825_v36, 16 }
0x126f   : > { %v5459_v29 = vmul.f32 %v5457_v47, %v5451_v59  ;;  %5960 = vmatpush1.bf16.msra.mxu0 %v5921_v34  ;;  %v10819_v59 = vld [vmem:[#allocation2 + $0x738] ss:$8 sps:$4 sm:$0xfe]   ;;  %v6146_v19 = vshll.u32 %v10821_v16, 16  ;;  %v6188_v34 = vshrl.u32 %v10826_v62, 16 }
0x1270   : > { %v11896_v8 = vmul.f32 0.16666667, %v5458_v44  ;;  %6286 = vmatprep.subr.bf16.mxu0 %v11044_v22  ;;  %v6126_v0 = vshrl.u32 %v10819_v59, 16  ;;  %v6129_v18 = vshll.u32 %v10819_v59, 16  ;;  %v6191_v59 = vshll.u32 %v10826_v62, 16 }
0x1271   : > { %v11898_v9 = vmul.f32 0.16666667, %v5459_v29  ;;  %v10822_v29 = vld [vmem:[#allocation2 + $0x768] ss:$8 sps:$4 sm:$0xff]  }
0x1272   : > { %v5462_v31 = vsel %vm2543_vm6, %v11896_v8, 0.0  ;;  %v6128_v47 = vrot.slane %v6126_v0, 1  ;;  %v6131_v44 = vrot.slane %v6129_v18, 2  ;;  %v6176_v18 = vor.u32 %v6175_v3, %v6172_v10  ;;  %v10832_v62 = vld [vmem:[#allocation2 + $0x808] ss:$8 sps:$4 sm:$0xff]  }
0x1273   : > { %v5463_v32 = vrot.slane %v5462_v31, 4  ;;  %v5470_v42 = vsel %vm5469_vm2, %v11898_v9, 0.0  ;;  %v6242_v3 = vshrl.u32 %v10832_v62, 16 }
0x1274   : > { %v5471_v60 = vrot.slane %v5470_v42, 4 }
0x1275   : > { %v5464_v6 = vadd.f32 %v5463_v32, %v5462_v31  ;;  %v6136_v31 = vrot.slane %v6134_v2, 1  ;;  %v6139_v32 = vrot.slane %v6137_v33, 2  ;;  %v6181_v2 = vrot.slane %v6179_v58, 1 }
0x1276   : > { %v5472_v55 = vadd.f32 %v5471_v60, %v5470_v42  ;;  %v6143_v42 = vshrl.u32 %v10821_v16, 16  ;;  %v5512_v60 = vld [vmem:[#allocation4 + $0xb5] ss:$0 sm:$0xff]  ;;  %v6184_v33 = vrot.slane %v6182_v51, 2  ;;  %v6190_v16 = vrot.slane %v6188_v34, 1 }
0x1277   : > { %v5465_v11 = vrot.slane %v5464_v6, 2  ;;  %v6245_v58 = vshll.u32 %v10832_v62, 16  ;;  %v6244_v34 = vrot.slane %v6242_v3, 1 }
0x1278   : > { %v5473_v23 = vrot.slane %v5472_v55, 2 }
0x1279   : > { %v5466_v25 = vadd.f32 %v5465_v11, %v5464_v6  ;;  %v6152_v11 = vshrl.u32 %v10822_v29, 16 }
0x127a   : > { %v5474_v26 = vadd.f32 %v5473_v23, %v5472_v55  ;;  %v6132_v55 = vor.u32 %v6131_v44, %v6128_v47  ;;  %v6155_v23 = vshll.u32 %v10822_v29, 16  ;;  %v6193_v47 = vrot.slane %v6191_v59, 2 }
0x127b   : > { %v5467_v41 = vrot.slane %v5466_v25, 1  ;;  %v6197_v44 = vshrl.u32 %v10827_v15, 16  ;;  %v6200_v29 = vshll.u32 %v10827_v15, 16  ;;  %v6247_v59 = vrot.slane %v6245_v58, 2  ;;  %v10833_v15 = vld [vmem:[#allocation2 + $0x818] ss:$8 sps:$4 sm:$0xff]  }
0x127c   : > { %v5475_v28 = vrot.slane %v5474_v26, 1  ;;  %v6157_v30 = vrot.slane %v6155_v23, 2 }
0x127d   : > { %v5468_v37 = vadd.f32 %v5467_v41, %v5466_v25  ;;  %v10823_v25 = vld [vmem:[#allocation2 + $0x778] ss:$8 sps:$4 sm:$0xff]  }
0x127e   : > { %v5476_v17 = vadd.f32 %v5475_v28, %v5474_v26  ;;  %v6140_v28 = vor.u32 %v6139_v32, %v6136_v31  ;;  %v6161_v48 = vshrl.u32 %v10823_v25, 16  ;;  %v6164_v13 = vshll.u32 %v10823_v25, 16  ;;  %v10829_v25 = vld [vmem:[#allocation2 + $0x7d8] ss:$8 sps:$4 sm:$0xff]  }
0x127f   : > { %v5477_v24 = vmul.f32 0.25, %v5468_v37  ;;  %v6145_v37 = vrot.slane %v6143_v42, 1  ;;  %v6185_v32 = vor.u32 %v6184_v33, %v6181_v2  ;;  %v10828_v42 = vld [vmem:[#allocation2 + $0x7c8] ss:$8 sps:$4 sm:$0xff]   ;;  %v6254_v2 = vshll.u32 %v10833_v15, 16 }
0x1280   : > { %v5478_v21 = vmul.f32 0.25, %v5476_v17  ;;  %v6148_v17 = vrot.slane %v6146_v19, 2  ;;  %v6141_v20 = vsel %vm1159_vm3, %v6132_v55, %v6140_v28  ;;  %v6163_v50 = vrot.slane %v6161_v48, 1 }
0x1281   : > { %v5479_v7 = vpack.c.bf16 %v5477_v24, %v5477_v24  ;;  %v6166_v52 = vrot.slane %v6164_v13, 2  ;;  %v6194_v19 = vor.u32 %v6193_v47, %v6190_v16  ;;  %v6186_v55 = vsel %vm1159_vm3, %v6176_v18, %v6185_v32 }
0x1282   : > { %v5480_v63 = vpack.c.bf16 %v5478_v21, %v5478_v21  ;;  %v6149_v43 = vor.u32 %v6148_v17, %v6145_v37  ;;  %v6209_v23 = vshll.u32 %v10828_v42, 16  ;;  %v6215_v17 = vshrl.u32 %v10829_v25, 16 }
0x1283   : > { %v6167_v54 = vor.u32 %v6166_v52, %v6163_v50  ;;  %v10831_v52 = vld [vmem:[#allocation2 + $0x7f8] ss:$8 sps:$4 sm:$0xff]   ;;  %v6256_v47 = vrot.slane %v6254_v2, 2 }
0x1284   : > { %9909 = vmatprep.mubr.msk.bf16.mxu1 %vm5749_vm7, %v5480_v63  ;;  %v6150_v56 = vsel %vm1159_vm3, %v6140_v28, %v6149_v43  ;;  %v6211_v37 = vrot.slane %v6209_v23, 2  ;;  %v6233_v57 = vshrl.u32 %v10831_v52, 16  ;;  %v6236_v5 = vshll.u32 %v10831_v52, 16  ;;  %v10837_v23 = vld [vmem:[#allocation2 + $0x85c] ss:$8 sps:$4 sm:$0xff]  }
0x1285   : > { %5786 = vmatmul.mubr.bf16.vlgmr.msra.gmra.mrb[196].mxu1 %v5479_v7  ;;  %v6154_v7 = vrot.slane %v6152_v11, 1  ;;  %v6177_v31 = vsel %vm1159_vm3, %v6167_v54, %v6176_v18  ;;  %v6206_v11 = vshrl.u32 %v10828_v42, 16  ;;  %v6251_v18 = vshrl.u32 %v10833_v15, 16 }
0x1286   : > { %6467 = vmatprep.mubr.bf16.mxu1 %v11044_v22 }
0x1287   : > { %v6158_v45 = vor.u32 %v6157_v30, %v6154_v7  ;;  %v6208_v28 = vrot.slane %v6206_v11, 1  ;;  %v6217_v7 = vrot.slane %v6215_v17, 1  ;;  %v6253_v16 = vrot.slane %v6251_v18, 1  ;;  %v10835_v11 = vld [vmem:[#allocation2 + $0x84c] ss:$8 sps:$4 sm:$0xf8]  }
0x1288   : > { %v6399_v17 = vshll.u32 %v10837_v23, 16 }
0x1289   : > { %v6159_v61 = vsel %vm1159_vm3, %v6149_v43, %v6158_v45  ;;  %v6168_v0 = vsel %vm1159_vm3, %v6158_v45, %v6167_v54  ;;  %v6238_v54 = vrot.slane %v6236_v5, 2 }
0x1358   : > { %v5787_v6 = vpop.f32.mrb[196].mxu1 }
0x1359   : > { %v5788_v26 = vadd.f32 %v5787_v6, %v5512_v60  ;;  %v5789_v41 = vpop.f32.mrb[197].mxu1  ;;  %v6199_v60 = vrot.slane %v6197_v44, 1  ;;  %v6202_v6 = vrot.slane %v6200_v29, 2  ;;  %v10834_v44 = vld [vmem:[#allocation2 + $0x828] ss:$0 sps:$4 sm:$0x33]   ;;  %v6257_v29 = vor.u32 %v6256_v47, %v6253_v16 }
0x135a   : > { %v5790_v24 = vpop.f32.mrb[198].mxu1 }
0x135b   : > { %v5793_v21 = vmax.f32 %v5788_v26, 0.0  ;;  %v5791_v63 = vpop.f32.mrb[199].mxu1  ;;  %v6195_v26 = vsel %vm1159_vm3, %v6185_v32, %v6194_v19  ;;  %v6203_v41 = vor.u32 %v6202_v6, %v6199_v60  ;;  %v6218_v24 = vshll.u32 %v10829_v25, 16  ;;  %v10839_v25 = vld [vmem:[#allocation2 + $0x848] ss:$8 sps:$4 sm:$0xf8]  }
0x135c   : > { %v6212_v63 = vor.u32 %v6211_v37, %v6208_v28  ;;  %v6263_v32 = vshll.u32 %v10834_v44, 16  ;;  %v6391_v28 = vshll.u32 %v10835_v11, 16  ;;  %v6396_v37 = vshrl.u32 %v10837_v23, 16 }
0x135d   : > { %v5794_v39 = vpack.c.bf16 %v5793_v21, %v5793_v21  ;;  %v6204_v21 = vsel %vm1159_vm3, %v6194_v19, %v6203_v41  ;;  %v6220_v30 = vrot.slane %v6218_v24, 2  ;;  %v6371_v24 = vshrl.u32 %v10839_v25, 16 }
0x135e   : > { %v6213_v48 = vsel %vm1159_vm3, %v6203_v41, %v6212_v63  ;;  %v6265_v60 = vrot.slane %v6263_v32, 2  ;;  %v6388_v41 = vshrl.u32 %v10835_v11, 16 }
0x135f   : > { %9920 = vmatmul.mubr.msk.bf16.vlgmr.msra.gmra.mrb[148].mxu0 %vm3042_vm8, %v5794_v39  ;;  %v6221_v13 = vor.u32 %v6220_v30, %v6217_v7 }
0x1360   : > { %6287 = vmatpush1.bf16.msra.mxu0 %v6141_v20  ;;  %v10830_v20 = vld [vmem:[#allocation2 + $0x7e8] ss:$8 sps:$4 sm:$0xff]   ;;  %v6390_v30 = vrot.slane %v6388_v41, 3 }
0x1361   : > { %6288 = vmatprep.subr.bf16.mxu0 %v11044_v22  ;;  %v6222_v39 = vsel %vm1159_vm3, %v6212_v63, %v6221_v13  ;;  %v6224_v43 = vshrl.u32 %v10830_v20, 16  ;;  %v6227_v46 = vshll.u32 %v10830_v20, 16  ;;  %v6373_v20 = vrot.slane %v6371_v24, 3 }
0x1363   : > { %v6226_v45 = vrot.slane %v6224_v43, 1  ;;  %v6229_v50 = vrot.slane %v6227_v46, 2 }
0x1364   : > { %6289 = vmatpush1.bf16.msra.mxu0 %v6150_v56 }
0x1365   : > { %6290 = vmatprep.subr.bf16.mxu0 %v11044_v22  ;;  %v6230_v56 = vor.u32 %v6229_v50, %v6226_v45 }
0x1367   : > { %v6231_v36 = vsel %vm1159_vm3, %v6221_v13, %v6230_v56  ;;  %v6398_v13 = vrot.slane %v6396_v37, 3 }
0x1368   : > { %6291 = vmatpush1.bf16.msra.mxu0 %v6159_v61  ;;  %v6235_v61 = vrot.slane %v6233_v57, 1 }
0x1369   : > { %6292 = vmatprep.subr.bf16.mxu0 %v11044_v22 }
0x136a   : > { %v6239_v10 = vor.u32 %v6238_v54, %v6235_v61  ;;  %v5805_v61 = vld [vmem:[#allocation4 + $0xb6] ss:$8 sm:$0x3] }
0x136b   : > { %v5943_v54 = vrot.slane %v5805_v61, %v11199_v38  ;;  %v5947_v62 = vrot.slane %v5805_v61, %v11202_v40 }
0x136c   : > { %6293 = vmatpush1.bf16.msra.mxu0 %v6168_v0  ;;  %v6240_v51 = vsel %vm1159_vm3, %v6230_v56, %v6239_v10  ;;  %v6248_v0 = vor.u32 %v6247_v59, %v6244_v34 }
0x136d   : > { %6294 = vmatprep.subr.bf16.mxu0 %v11044_v22 }
0x136e   : > { %v6249_v33 = vsel %vm1159_vm3, %v6239_v10, %v6248_v0  ;;  %v6258_v42 = vsel %vm1159_vm3, %v6248_v0, %v6257_v29 }
0x1370   : > { %6295 = vmatpush1.bf16.msra.mxu0 %v6177_v31  ;;  %v6260_v31 = vshrl.u32 %v10834_v44, 16 }
0x1371   : > { %6296 = vmatprep.subr.bf16.mxu0 %v11044_v22 }
0x1372   : > { %v6262_v19 = vrot.slane %v6260_v31, 1 }
0x1374   : > { %6297 = vmatpush1.bf16.msra.mxu0 %v6186_v55  ;;  %v6266_v6 = vor.u32 %v6265_v60, %v6262_v19 }
0x1375   : > { %6298 = vmatprep.subr.bf16.mxu0 %v11044_v22 }
0x1376   : > { %v6267_v55 = vsel %vm1159_vm3, %v6257_v29, %v6266_v6  ;;  %v10841_v6 = vld [vmem:[#allocation2 + $0x86c] ss:$8 sps:$4 sm:$0xff]  }
0x1377   : > { %v6414_v11 = vshrl.u32 %v10841_v6, 16  ;;  %v6417_v23 = vshll.u32 %v10841_v6, 16 }
0x1378   : > { %6299 = vmatpush1.bf16.msra.mxu0 %v6195_v26  ;;  %v10840_v26 = vld [vmem:[#allocation2 + $0x858] ss:$8 sps:$4 sm:$0xff]  }
0x1379   : > { %6300 = vmatprep.subr.bf16.mxu0 %v11044_v22  ;;  %v6379_v63 = vshrl.u32 %v10840_v26, 16  ;;  %v6382_v7 = vshll.u32 %v10840_v26, 16  ;;  %v6416_v41 = vrot.slane %v6414_v11, 3 }
0x137b   : > { %v6381_v46 = vrot.slane %v6379_v63, 3  ;;  %v6384_v45 = vrot.slane %v6382_v7, 4  ;;  %v6012_v7 = vld [vmem:[#allocation4 + $0xb0] sm:$0x80] }
0x137c   : > { %6301 = vmatpush1.bf16.msra.mxu0 %v6204_v21  ;;  %v6374_v21 = vshll.u32 %v10839_v25, 16 }
0x137d   : > { %6302 = vmatprep.subr.bf16.mxu0 %v11044_v22  ;;  %v6385_v57 = vor.u32 %v6384_v45, %v6381_v46 }
0x137e   : > { %v6376_v43 = vrot.slane %v6374_v21, 4 }
0x1380   : > { %6303 = vmatpush1.bf16.msra.mxu0 %v6213_v48  ;;  %v6393_v48 = vrot.slane %v6391_v28, 4  ;;  %v6377_v56 = vor.u32 %v6376_v43, %v6373_v20  ;;  %v6419_v28 = vrot.slane %v6417_v23, 4  ;;  %v10844_v23 = vld [vmem:[#allocation2 + $0x828] ss:$8 sps:$4 sm:$0xfe]  }
0x1381   : > { %6304 = vmatprep.subr.bf16.mxu0 %v11044_v22 }
0x1382   : > { %v6394_v50 = vor.u32 %v6393_v48, %v6390_v30  ;;  %v6420_v24 = vor.u32 %v6419_v28, %v6416_v41  ;;  %v6329_v30 = vrot.slane %v6012_v7, %v11445_v53  ;;  %v9938_v48 = vld [vmem:[#allocation4 + $0xc0] ss:$0 sm:$0xff]  ;;  %v10845_v41 = vld [vmem:[#allocation2 + $0x838] ss:$8 sps:$4 sm:$0xff]  }
0x1384   : > { %6305 = vmatpush1.bf16.msra.mxu0 %v6222_v39  ;;  %v6401_v39 = vrot.slane %v6399_v17, 4 }
0x1385   : > { %6306 = vmatprep.subr.bf16.mxu0 %v11044_v22 }
0x1386   : > { %v6402_v52 = vor.u32 %v6401_v39, %v6398_v13 }
0x1388   : > { %6307 = vmatpush1.bf16.msra.mxu0 %v6231_v36  ;;  %v6403_v5 = vsel %vm4060_vm12, %v6394_v50, %v6402_v52  ;;  %v6386_v36 = vsel %vm4060_vm12, %v6377_v56, %v6385_v57  ;;  %v10847_v56 = vld [vmem:[#allocation2 + $0x870] ss:$8 sps:$4 sm:$0xf8]  }
0x1389   : > { %6308 = vmatprep.subr.bf16.mxu0 %v11044_v22  ;;  %6435 = vmatprep.subr.bf16.mxu1 %v6403_v5  ;;  %v10849_v5 = vld [vmem:[#allocation2 + $0x890] ss:$8 sps:$4 sm:$0xff]   ;;  %v6926_v61 = vshll.u32 %v10847_v56, 16 }
0x138a   : > { %6436 = vmatpush1.bf16.msra.mxu1 %v6386_v36  ;;  %v6923_v36 = vshrl.u32 %v10847_v56, 16 }
0x138c   : > { %6309 = vmatpush1.bf16.msra.mxu0 %v6240_v51 }
0x138d   : > { %6310 = vmatprep.subr.bf16.mxu0 %v11044_v22 }
0x1390   : > { %6311 = vmatpush1.bf16.msra.mxu0 %v6249_v33 }
0x1391   : > { %6312 = vmatprep.subr.bf16.mxu0 %v11044_v22 }
0x1394   : > { %6313 = vmatpush1.bf16.msra.mxu0 %v6258_v42 }
0x1395   : > { %6314 = vmatprep.subr.bf16.mxu0 %v11044_v22 }
0x1398   : > { %6315 = vmatpush1.bf16.msra.mxu0 %v6267_v55  ;;  %v10843_v55 = vld [vmem:[#allocation2 + $0x868] ss:$8 sps:$4 sm:$0xff]  }
0x1399   : > { %7083 = vmatprep.subr.bf16.mxu0 %v11044_v22  ;;  %v6405_v25 = vshrl.u32 %v10843_v55, 16  ;;  %v6408_v26 = vshll.u32 %v10843_v55, 16 }
0x139b   : > { %v6407_v37 = vrot.slane %v6405_v25, 3  ;;  %v6410_v17 = vrot.slane %v6408_v26, 4 }
0x139d   : > { %v6411_v21 = vor.u32 %v6410_v17, %v6407_v37 }
0x139f   : > { %v6430_v63 = vsel %vm2543_vm6, %v6411_v21, 0 }
0x1432   : > { %v5987_v10 = vpop.f32.mrb[148].mxu0 }
0x1433   : > { %v5988_v3 = vadd.f32 %v5987_v10, %v5943_v54  ;;  %v5989_v58 = vpop.f32.mrb[149].mxu0  ;;  %v6940_v10 = vshrl.u32 %v10849_v5, 16 }
0x1434   : > { %v5990_v51 = vadd.f32 %v5989_v58, %v5947_v62  ;;  %v5991_v34 = vpop.f32.mrb[150].mxu0  ;;  %v6925_v58 = vrot.slane %v6923_v36, 3 }
0x1435   : > { %v5994_v59 = vadd.f32 3.0, %v5988_v3  ;;  %v5992_v15 = vpop.f32.mrb[151].mxu0  ;;  %v6943_v3 = vshll.u32 %v10849_v5, 16 }
0x1436   : > { %v5995_v0 = vadd.f32 3.0, %v5990_v51  ;;  %v6928_v51 = vrot.slane %v6926_v61, 4 }
0x1437   : > { %v5996_v18 = vmax.f32 %v5994_v59, 0.0  ;;  %v6942_v59 = vrot.slane %v6940_v10, 3  ;;  %v6945_v15 = vrot.slane %v6943_v3, 4 }
0x1438   : > { %v5997_v2 = vmax.f32 %v5995_v0, 0.0  ;;  %v6929_v0 = vor.u32 %v6928_v51, %v6925_v58 }
0x1439   : > { %v5998_v33 = vmin.f32 %v5996_v18, 6.0 }
0x143a   : > { %v5999_v16 = vmin.f32 %v5997_v2, 6.0  ;;  %v11964_v2 = vor.u32 %v6945_v15, %v6942_v59  ;;  %v10850_v15 = vld [vmem:[#allocation2 + $0x8a0] ss:$8 sps:$4 sm:$0xff]  }
0x143b   : > { %v6000_v47 = vmul.f32 0.16666667, %v5998_v33 }
0x143c   : > { %v6001_v44 = vmul.f32 0.16666667, %v5999_v16 }
0x143d   : > { %v6005_v29 = vrot.slane %v6000_v47, %v11199_v38  ;;  %v6337_v47 = vld [vmem:[#allocation4 + $0xc0] sm:$0x6] }
0x143e   : > { %v6009_v31 = vrot.slane %v6001_v44, %v11199_v38  ;;  %v6338_v44 = vld [vmem:[#allocation4 + $0xc8] sm:$0x6] }
0x143f   : > { %v6010_v32 = vmul.f32 %v6005_v29, %v11896_v8  ;;  %v6421_v8 = vsel %vm4060_vm12, %v6402_v52, %v6420_v24  ;;  %v6479_v29 = vrot.slane %v6337_v47, %v11202_v40 }
0x1440   : > { %v6011_v42 = vmul.f32 %v6009_v31, %v11898_v9  ;;  %6437 = vmatprep.subr.bf16.mxu1 %v6421_v8  ;;  %v6412_v9 = vsel %vm4060_vm12, %v6385_v57, %v6411_v21  ;;  %v10848_v57 = vld [vmem:[#allocation2 + $0x880] ss:$8 sps:$4 sm:$0xff]   ;;  %v6483_v31 = vrot.slane %v6338_v44, %v11202_v40  ;;  %v6530_v21 = vshll.u32 %v10844_v23, 16 }
0x1441   : > { %v6014_v60 = vpack.c.bf16 %v6010_v32, %v6010_v32  ;;  %6438 = vmatpush1.bf16.msra.mxu1 %v6412_v9  ;;  %v6931_v54 = vshrl.u32 %v10848_v57, 16  ;;  %v6934_v62 = vshll.u32 %v10848_v57, 16  ;;  %v6489_v32 = vrot.slane %v6337_v47, %v11365_v1  ;;  %v10851_v47 = vld [vmem:[#allocation2 + $0x8b0] ss:$8 sps:$4 sm:$0xff]  }
0x1442   : > { %v6015_v19 = vpack.c.bf16 %v6011_v42, %v6011_v42  ;;  %9945 = vmatprep.subr.msk.bf16.mxu1 %vm2543_vm6, %v6420_v24  ;;  %v6527_v24 = vshrl.u32 %v10844_v23, 16  ;;  %v6535_v9 = vshrl.u32 %v10845_v41, 16 }
0x1443   : > { %v6936_v34 = vrot.slane %v6934_v62, 4 }
0x1444   : > { %9937 = vmatprep.mubr.msk.bf16.mxu0 %vm5749_vm7, %v6015_v19  ;;  %v6493_v19 = vrot.slane %v6338_v44, %v11365_v1 }
0x1445   : > { %6319 = vmatmul.mubr.bf16.vlgmr.msra.gmra.mrb[152].mxu0 %v6014_v60  ;;  %6440 = vmatpush1.bf16.msra.mxu1 %v6430_v63  ;;  %v6538_v63 = vshll.u32 %v10845_v41, 16 }
0x1518   : > { %v6320_v13 = vpop.f32.mrb[152].mxu0 }
0x1519   : > { %v6330_v39 = vmul.f32 %v6329_v30, %v6320_v13  ;;  %v6322_v20 = vpop.f32.mrb[153].mxu0  ;;  %v6529_v13 = vrot.slane %v6527_v24, 1 }
0x151a   : > { %v6323_v43 = vpop.f32.mrb[154].mxu0 }
0x151b   : > { %v6335_v46 = vadd.f32 %v9938_v48, %v6330_v39  ;;  %v6324_v45 = vpop.f32.mrb[155].mxu0  ;;  %v6532_v39 = vrot.slane %v6530_v21, 2  ;;  %v6537_v43 = vrot.slane %v6535_v9, 1  ;;  %v10854_v21 = vld [vmem:[#allocation2 + $0x8e0] ss:$8 sps:$4 sm:$0xff]  }
0x151c   : > { %v10846_v45 = vld [vmem:[#allocation2 + $0x848] ss:$0 sps:$4 sm:$0xff]   ;;  %v6985_v9 = vshrl.u32 %v10854_v21, 16 }
0x151d   : > { %v11958_v50 = vadd.f32 %v6335_v46, %v11814_v27  ;;  %v6933_v27 = vrot.slane %v6931_v54, 3  ;;  %v6540_v46 = vrot.slane %v6538_v63, 2  ;;  %v6533_v5 = vor.u32 %v6532_v39, %v6529_v13  ;;  %v10855_v13 = vld [vmem:[#allocation2 + $0x8f0] ss:$8 sps:$4 sm:$0xff]  }
0x151e   : > { %v6544_v54 = vshrl.u32 %v10846_v45, 16  ;;  %v6547_v62 = vshll.u32 %v10846_v45, 16  ;;  %v6988_v63 = vshll.u32 %v10854_v21, 16 }
0x151f   : > { %v6339_v52 = vpack.c.bf16 %v11958_v50, %v11958_v50  ;;  %v6937_v18 = vor.u32 %v6936_v34, %v6933_v27  ;;  %v6541_v61 = vor.u32 %v6540_v46, %v6537_v43  ;;  %v6994_v43 = vshrl.u32 %v10855_v13, 16 }
0x1520   : > { %v6546_v51 = vrot.slane %v6544_v54, 1  ;;  %v6549_v27 = vrot.slane %v6547_v62, 2  ;;  %v6997_v46 = vshll.u32 %v10855_v13, 16 }
0x1521   : > { %9946 = vmatmul.mubr.msk.bf16.vlgmr.msra.gmra.mrb[200].mxu1 %vm5088_vm15, %v6339_v52  ;;  %v6938_v33 = vsel %vm4060_vm12, %v6929_v0, %v6937_v18  ;;  %v6947_v16 = vsel %vm4060_vm12, %v6937_v18, %v11964_v2  ;;  %v6542_v58 = vsel %vm1159_vm3, %v6533_v5, %v6541_v61  ;;  %v6949_v0 = vshrl.u32 %v10850_v15, 16 }
0x1522   : > { %6599 = vmatprep.mubr.bf16.mxu1 %v11044_v22  ;;  %7084 = vmatpush1.bf16.msra.mxu0 %v6938_v33  ;;  %v6550_v34 = vor.u32 %v6549_v27, %v6546_v51  ;;  %v6952_v18 = vshll.u32 %v10850_v15, 16  ;;  %v10858_v15 = vld [vmem:[#allocation2 + $0x920] ss:$8 sps:$4 sm:$0xff]  }
0x1523   : > { %7085 = vmatprep.subr.bf16.mxu0 %v11044_v22  ;;  %v6951_v33 = vrot.slane %v6949_v0, 3 }
0x1524   : > { %v6551_v59 = vsel %vm1159_vm3, %v6541_v61, %v6550_v34 }
0x1526   : > { %7086 = vmatpush1.bf16.msra.mxu0 %v6947_v16  ;;  %v6954_v16 = vrot.slane %v6952_v18, 4 }
0x1527   : > { %7087 = vmatprep.subr.bf16.mxu0 %v11044_v22 }
0x1528   : > { %v6955_v44 = vor.u32 %v6954_v16, %v6951_v33  ;;  %v7021_v33 = vshrl.u32 %v10858_v15, 16  ;;  %v7024_v16 = vshll.u32 %v10858_v15, 16 }
0x15f4   : > { %v6469_v42 = vpop.f32.mrb[200].mxu1 }
0x15f5   : > { %v6484_v60 = vmul.f32 %v6479_v29, %v6469_v42  ;;  %v6471_v6 = vpop.f32.mrb[201].mxu1  ;;  %v6958_v29 = vshrl.u32 %v10851_v47, 16 }
0x15f6   : > { %v6485_v55 = vmul.f32 %v6483_v31, %v6471_v6  ;;  %v6473_v11 = vpop.f32.mrb[202].mxu1  ;;  %v6961_v31 = vshll.u32 %v10851_v47, 16 }
0x15f7   : > { %v6494_v25 = vadd.f32 %v6489_v32, %v6484_v60  ;;  %v6474_v26 = vpop.f32.mrb[203].mxu1  ;;  %v6956_v32 = vsel %vm4060_vm12, %v11964_v2, %v6955_v44  ;;  %v6960_v42 = vrot.slane %v6958_v29, 3  ;;  %v7026_v29 = vrot.slane %v7024_v16, 4 }
0x15f8   : > { %v6495_v28 = vadd.f32 %v6493_v19, %v6485_v55  ;;  %v10852_v19 = vld [vmem:[#allocation2 + $0x8c0] ss:$8 sps:$4 sm:$0xff]   ;;  %7088 = vmatpush1.bf16.msra.mxu0 %v6956_v32  ;;  %v6963_v60 = vrot.slane %v6961_v31, 4  ;;  %v10853_v26 = vld [vmem:[#allocation2 + $0x8d0] ss:$8 sps:$4 sm:$0xff]  }
0x15f9   : > { %v6496_v37 = vadd.f32 3.0, %v6494_v25  ;;  %7089 = vmatprep.subr.bf16.mxu0 %v11044_v22  ;;  %v6967_v6 = vshrl.u32 %v10852_v19, 16  ;;  %v6970_v55 = vshll.u32 %v10852_v19, 16  ;;  %v6979_v2 = vshll.u32 %v10853_v26, 16  ;;  %v10859_v31 = vld [vmem:[#allocation2 + $0x930] ss:$8 sps:$4 sm:$0xff]  }
0x15fa   : > { %v6497_v17 = vadd.f32 3.0, %v6495_v28  ;;  %v6964_v11 = vor.u32 %v6963_v60, %v6960_v42  ;;  %v7030_v42 = vshrl.u32 %v10859_v31, 16  ;;  %v7033_v19 = vshll.u32 %v10859_v31, 16 }
0x15fb   : > { %v6498_v8 = vmax.f32 %v6496_v37, 0.0  ;;  %v6969_v23 = vrot.slane %v6967_v6, 3  ;;  %v6976_v37 = vshrl.u32 %v10853_v26, 16 }
0x15fc   : > { %v6499_v7 = vmax.f32 %v6497_v17, 0.0  ;;  %v6965_v41 = vsel %vm4060_vm12, %v6955_v44, %v6964_v11  ;;  %v7023_v44 = vrot.slane %v7021_v33, 3  ;;  %v7032_v6 = vrot.slane %v7030_v42, 3 }
0x15fd   : > { %v6500_v30 = vmin.f32 %v6498_v8, 6.0  ;;  %7090 = vmatpush1.bf16.msra.mxu0 %v6965_v41  ;;  %v6978_v24 = vrot.slane %v6976_v37, 3  ;;  %v6981_v8 = vrot.slane %v6979_v2, 4  ;;  %v10861_v2 = vld [vmem:[#allocation2 + $0x950] ss:$8 sps:$4 sm:$0xff]  }
0x15fe   : > { %v6501_v48 = vmin.f32 %v6499_v7, 6.0  ;;  %7091 = vmatprep.subr.bf16.mxu0 %v11044_v22  ;;  %v7027_v32 = vor.u32 %v7026_v29, %v7023_v44  ;;  %v7048_v21 = vshrl.u32 %v10861_v2, 16 }
0x15ff   : > { %v6502_v20 = vmul.f32 %v6500_v30, %v6494_v25  ;;  %v6972_v25 = vrot.slane %v6970_v55, 4  ;;  %v6982_v7 = vor.u32 %v6981_v8, %v6978_v24  ;;  %v6987_v30 = vrot.slane %v6985_v9, 3 }
0x1600   : > { %v6503_v52 = vmul.f32 %v6501_v48, %v6495_v28  ;;  %v6990_v48 = vrot.slane %v6988_v63, 4  ;;  %v7035_v55 = vrot.slane %v7033_v19, 4  ;;  %v7051_v8 = vshll.u32 %v10861_v2, 16 }
0x1601   : > { %v6504_v56 = vmul.f32 0.16666667, %v6502_v20  ;;  %v6973_v28 = vor.u32 %v6972_v25, %v6969_v23 }
0x1602   : > { %v6505_v57 = vmul.f32 0.16666667, %v6503_v52  ;;  %v6991_v20 = vor.u32 %v6990_v48, %v6987_v30  ;;  %v6996_v52 = vrot.slane %v6994_v43, 3  ;;  %v7036_v23 = vor.u32 %v7035_v55, %v7032_v6  ;;  %v6630_v6 = vld [vmem:[#allocation4 + $0xd0] sm:$0xf] }
0x1603   : > { %v6511_v36 = vpack.c.bf16 %v6504_v56, %v6504_v56  ;;  %v6974_v17 = vsel %vm4060_vm12, %v6964_v11, %v6973_v28  ;;  %v6983_v39 = vsel %vm4060_vm12, %v6973_v28, %v6982_v7  ;;  %v6999_v56 = vrot.slane %v6997_v46, 4  ;;  %v10860_v11 = vld [vmem:[#allocation2 + $0x940] ss:$8 sps:$4 sm:$0xff]  }
0x1604   : > { %v6512_v10 = vpack.c.bf16 %v6505_v57, %v6505_v57  ;;  %7092 = vmatpush1.bf16.msra.mxu0 %v6974_v17  ;;  %v6992_v45 = vsel %vm4060_vm12, %v6982_v7, %v6991_v20  ;;  %v10856_v57 = vld [vmem:[#allocation2 + $0x900] ss:$8 sps:$4 sm:$0xff]   ;;  %v7039_v25 = vshrl.u32 %v10860_v11, 16  ;;  %v7042_v26 = vshll.u32 %v10860_v11, 16 }
0x1605   : > { %v6562_v3 = vsel %vm5228_vm0, %v6511_v36, 0  ;;  %7093 = vmatprep.subr.bf16.mxu0 %v11044_v22  ;;  %v7000_v5 = vor.u32 %v6999_v56, %v6996_v52  ;;  %v7003_v36 = vshrl.u32 %v10856_v57, 16  ;;  %v7006_v61 = vshll.u32 %v10856_v57, 16  ;;  %v10862_v17 = vld [vmem:[#allocation2 + $0x960] ss:$0 sps:$4 sm:$0xff]  }
0x1606   : > { %9950 = vmatprep.subr.msk.bf16.mxu1 %vm5228_vm0, %v6512_v10  ;;  %v10857_v10 = vld [vmem:[#allocation2 + $0x910] ss:$8 sps:$4 sm:$0xff]   ;;  %v7037_v41 = vsel %vm4060_vm12, %v7027_v32, %v7036_v23  ;;  %v7041_v28 = vrot.slane %v7039_v25, 3  ;;  %v7044_v37 = vrot.slane %v7042_v26, 4  ;;  %v7057_v9 = vshrl.u32 %v10862_v17, 16 }
0x1607   : > { %6568 = vmatpush1.bf16.msra.mxu1 %v6562_v3  ;;  %v7001_v54 = vsel %vm4060_vm12, %v6991_v20, %v7000_v5  ;;  %v7005_v62 = vrot.slane %v7003_v36, 3  ;;  %v7008_v3 = vrot.slane %v7006_v61, 4  ;;  %v7015_v51 = vshll.u32 %v10857_v10, 16  ;;  %v10863_v52 = vld [vmem:[#allocation2 + $0x964] ss:$8 sps:$4 sm:$0xf8]  }
0x1608   : > { %7615 = vmatprep.subr.bf16.mxu1 %v11044_v22  ;;  %7094 = vmatpush1.bf16.msra.mxu0 %v6983_v39  ;;  %v7045_v24 = vor.u32 %v7044_v37, %v7041_v28  ;;  %v7060_v63 = vshll.u32 %v10862_v17, 16  ;;  %v7050_v30 = vrot.slane %v7048_v21, 3  ;;  %v7053_v48 = vrot.slane %v7051_v8, 4  ;;  %v10865_v56 = vld [vmem:[#allocation2 + $0x974] ss:$8 sps:$4 sm:$0xff]  }
0x1609   : > { %7095 = vmatprep.subr.bf16.mxu0 %v11044_v22  ;;  %v7009_v27 = vor.u32 %v7008_v3, %v7005_v62  ;;  %v7059_v13 = vrot.slane %v7057_v9, 3  ;;  %v7191_v57 = vshrl.u32 %v10863_v52, 16  ;;  %v7199_v36 = vshrl.u32 %v10865_v56, 16  ;;  %v6631_v26 = vld [vmem:[#allocation4 + $0xd8] sm:$0xf] }
0x160a   : > { %9951 = vmatmul.mubr.msk.bf16.vlgmr.msra.gmra.mrb[204].mxu1 %vm5218_vm1, %v6542_v58  ;;  %v7012_v58 = vshrl.u32 %v10857_v10, 16  ;;  %v7046_v7 = vsel %vm4060_vm12, %v7036_v23, %v7045_v24  ;;  %v7062_v39 = vrot.slane %v7060_v63, 4  ;;  %v7054_v20 = vor.u32 %v7053_v48, %v7050_v30 }
0x160b   : > { %6609 = vmatprep.mubr.bf16.mxu1 %v11044_v22  ;;  %v7010_v0 = vsel %vm4060_vm12, %v7000_v5, %v7009_v27  ;;  %v7194_v5 = vshll.u32 %v10863_v52, 16  ;;  %v7202_v61 = vshll.u32 %v10865_v56, 16  ;;  %v7201_v10 = vrot.slane %v7199_v36, 3 }
0x160c   : > { %7096 = vmatpush1.bf16.msra.mxu0 %v6992_v45  ;;  %v7063_v43 = vor.u32 %v7062_v39, %v7059_v13  ;;  %v7055_v46 = vsel %vm4060_vm12, %v7045_v24, %v7054_v20  ;;  %v6705_v21 = vrot.slane %v6630_v6, %v11199_v38  ;;  %v6735_v13 = vrot.slane %v6630_v6, %v11365_v1 }
0x160d   : > { %7097 = vmatprep.subr.bf16.mxu0 %v11044_v22  ;;  %v7196_v62 = vrot.slane %v7194_v5, 4  ;;  %v7204_v3 = vrot.slane %v7202_v61, 4  ;;  %v6723_v5 = vrot.slane %v6630_v6, %v11202_v40 }
0x160e   : > { %v7064_v45 = vsel %vm4060_vm12, %v7054_v20, %v7063_v43 }
0x1610   : > { %7098 = vmatpush1.bf16.msra.mxu0 %v7001_v54  ;;  %v7193_v54 = vrot.slane %v7191_v57, 3 }
0x1611   : > { %7099 = vmatprep.subr.bf16.mxu0 %v11044_v22 }
0x1612   : > { %9952 = vmatmul.mubr.msk.bf16.gmra.mrb[208].mxu1 %vm5218_vm1, %v6551_v59  ;;  %v7017_v59 = vrot.slane %v7015_v51, 4  ;;  %v12011_v51 = vor.u32 %v7204_v3, %v7201_v10  ;;  %v6727_v10 = vrot.slane %v6631_v26, %v11202_v40 }
0x1613   : > { %6619 = vmatprep.mubr.bf16.mxu1 %v11044_v22 }
0x1614   : > { %7100 = vmatpush1.bf16.msra.mxu0 %v7010_v0 }
0x1615   : > { %7101 = vmatprep.subr.bf16.mxu0 %v11044_v22 }
0x161a   : > { %9953 = vmatmul.mubr.msk.bf16.gmra.mrb[212].mxu1 %vm5218_vm1, %v6550_v34  ;;  %v7014_v34 = vrot.slane %v7012_v58, 3  ;;  %v7197_v58 = vor.u32 %v7196_v62, %v7193_v54 }
0x161c   : > { %v7018_v18 = vor.u32 %v7017_v59, %v7014_v34  ;;  %v6628_v34 = vld [vmem:[#allocation4 + $0xc0] sm:$0xf8]  ;;  %v6629_v59 = vld [vmem:[#allocation4 + $0xc8] sm:$0xf8] }
0x161d   : > { %v6645_v15 = vrot.slane %v6628_v34, %v11420_v49  ;;  %v6649_v0 = vrot.slane %v6629_v59, %v11420_v49  ;;  %v6675_v33 = vrot.slane %v6628_v34, %v11440_v14  ;;  %v6679_v44 = vrot.slane %v6629_v59, %v11440_v14 }
0x161e   : > { %v7019_v47 = vsel %vm4060_vm12, %v7009_v27, %v7018_v18  ;;  %v7028_v60 = vsel %vm4060_vm12, %v7018_v18, %v7027_v32  ;;  %v7206_v27 = vsel %vm4060_vm12, %v7197_v58, %v12011_v51  ;;  %v6635_v18 = vrot.slane %v6628_v34, %v11370_v4 }
0x161f   : > { %7102 = vmatpush1.bf16.msra.mxu0 %v7019_v47  ;;  %v6639_v47 = vrot.slane %v6629_v59, %v11370_v4  ;;  %v6663_v32 = vrot.slane %v6628_v34, %v11435_v35  ;;  %v6693_v24 = vrot.slane %v6628_v34, %v11445_v53  ;;  %v6697_v63 = vrot.slane %v6629_v59, %v11445_v53 }
0x1620   : > { %7103 = vmatprep.subr.bf16.mxu0 %v11044_v22 }
0x1623   : > { %7104 = vmatpush1.bf16.msra.mxu0 %v7028_v60  ;;  %v6667_v60 = vrot.slane %v6629_v59, %v11435_v35 }
0x1624   : > { %7105 = vmatprep.subr.bf16.mxu0 %v11044_v22 }
0x1627   : > { %7106 = vmatpush1.bf16.msra.mxu0 %v7037_v41 }
0x1628   : > { %7107 = vmatprep.subr.bf16.mxu0 %v11044_v22 }
0x162b   : > { %7108 = vmatpush1.bf16.msra.mxu0 %v7046_v7  ;;  %v6709_v7 = vrot.slane %v6631_v26, %v11199_v38 }
0x162c   : > { %7109 = vmatprep.subr.bf16.mxu0 %v11044_v22 }
0x162f   : > { %7110 = vmatpush1.bf16.msra.mxu0 %v7055_v46  ;;  %v6739_v46 = vrot.slane %v6631_v26, %v11365_v1 }
0x1630   : > { %7111 = vmatprep.subr.bf16.mxu0 %v11044_v22 }
0x1633   : > { %7112 = vmatpush1.bf16.msra.mxu0 %v7064_v45 }
0x1634   : > { %7283 = vmatprep.subr.bf16.mxu0 %v7206_v27 }
0x16dd   : > { %v6601_v16 = vpop.f32.mrb[204].mxu1 }
0x16de   : > { %v6650_v29 = vmul.f32 %v6645_v15, %v6601_v16  ;;  %v6603_v31 = vpop.f32.mrb[205].mxu1  ;;  %v6640_v55 = vmul.f32 %v6635_v18, %v6601_v16  ;;  %v6753_v16 = vrot.slane %v6630_v6, %v11370_v4 }
0x16df   : > { %v6651_v42 = vmul.f32 %v6649_v0, %v6603_v31  ;;  %v6605_v19 = vpop.f32.mrb[206].mxu1  ;;  %v6641_v41 = vmul.f32 %v6639_v47, %v6603_v31  ;;  %v6757_v31 = vrot.slane %v6631_v26, %v11370_v4 }
0x16e0   : > { %v6654_v11 = vrot.slane %v6650_v29, 4  ;;  %v6680_v23 = vmul.f32 %v6675_v33, %v6605_v19  ;;  %v6607_v25 = vpop.f32.mrb[207].mxu1  ;;  %v6668_v17 = vmul.f32 %v6663_v32, %v6605_v19  ;;  %v6762_v29 = vld [vmem:[#allocation4 + $0xd0] sm:$0x30]  ;;  %v6763_v19 = vld [vmem:[#allocation4 + $0xd8] sm:$0x30] }
0x16e1   : > { %v6655_v28 = vrot.slane %v6651_v42, 4  ;;  %v6681_v37 = vmul.f32 %v6679_v44, %v6607_v25  ;;  %v6669_v9 = vmul.f32 %v6667_v60, %v6607_v25  ;;  %v6771_v6 = vrot.slane %v6763_v19, %v11420_v49 }
0x16e2   : > { %v6658_v2 = vadd.f32 %v6654_v11, %v6640_v55  ;;  %v6684_v48 = vrot.slane %v6680_v23, 4 }
0x16e3   : > { %v6659_v8 = vadd.f32 %v6655_v28, %v6641_v41  ;;  %v6685_v20 = vrot.slane %v6681_v37, 4  ;;  %v6767_v41 = vrot.slane %v6762_v29, %v11420_v49 }
0x16e4   : > { %v6670_v30 = vadd.f32 %v6668_v17, %v6658_v2 }
0x16e5   : > { %v6671_v39 = vadd.f32 %v6669_v9, %v6659_v8  ;;  %v6611_v43 = vpop.f32.mrb[208].mxu1  ;;  %v6781_v9 = vrot.slane %v6763_v19, %v11435_v35 }
0x16e6   : > { %v6688_v45 = vadd.f32 %v6684_v48, %v6670_v30  ;;  %v6698_v52 = vmul.f32 %v6693_v24, %v6611_v43  ;;  %v6710_v56 = vmul.f32 %v6705_v21, %v6611_v43  ;;  %v6613_v57 = vpop.f32.mrb[209].mxu1  ;;  %v6777_v21 = vrot.slane %v6762_v29, %v11435_v35 }
0x16e7   : > { %v6689_v36 = vadd.f32 %v6685_v20, %v6671_v39  ;;  %v6699_v61 = vmul.f32 %v6697_v63, %v6613_v57  ;;  %v6711_v54 = vmul.f32 %v6709_v7, %v6613_v57  ;;  %v6615_v62 = vpop.f32.mrb[210].mxu1 }
0x16e8   : > { %v6700_v3 = vadd.f32 %v6698_v52, %v6688_v45  ;;  %v6714_v58 = vrot.slane %v6710_v56, 4  ;;  %v6740_v27 = vmul.f32 %v6735_v13, %v6615_v62  ;;  %v6617_v34 = vpop.f32.mrb[211].mxu1  ;;  %v6728_v33 = vmul.f32 %v6723_v5, %v6615_v62 }
0x16e9   : > { %v6701_v59 = vadd.f32 %v6699_v61, %v6689_v36  ;;  %v6715_v15 = vrot.slane %v6711_v54, 4  ;;  %v6741_v0 = vmul.f32 %v6739_v46, %v6617_v34  ;;  %v6729_v44 = vmul.f32 %v6727_v10, %v6617_v34  ;;  %v10867_v36 = vld [vmem:[#allocation2 + $0x960] ss:$8 sps:$4 sm:$0xf8]   ;;  %v10868_v54 = vld [vmem:[#allocation2 + $0x970] ss:$8 sps:$4 sm:$0xff]  }
0x16ea   : > { %v6718_v18 = vadd.f32 %v6714_v58, %v6700_v3  ;;  %v6744_v42 = vrot.slane %v6740_v27, 4  ;;  %v10869_v3 = vld [vmem:[#allocation2 + $0x984] ss:$8 sps:$4 sm:$0xff]   ;;  %v7174_v34 = vshrl.u32 %v10867_v36, 16 }
0x16eb   : > { %v6719_v47 = vadd.f32 %v6715_v15, %v6701_v59  ;;  %v6745_v55 = vrot.slane %v6741_v0, 4  ;;  %v7177_v15 = vshll.u32 %v10867_v36, 16  ;;  %v7182_v0 = vshrl.u32 %v10868_v54, 16 }
0x16ec   : > { %v6730_v32 = vadd.f32 %v6728_v33, %v6718_v18  ;;  %v7185_v18 = vshll.u32 %v10868_v54, 16  ;;  %v7220_v29 = vshll.u32 %v10869_v3, 16  ;;  %v10874_v54 = vld [vmem:[#allocation2 + $0x990] ss:$8 sps:$4 sm:$0xff]  }
0x16ed   : > { %v6731_v60 = vadd.f32 %v6729_v44, %v6719_v47  ;;  %v6621_v11 = vpop.f32.mrb[212].mxu1  ;;  %v10871_v47 = vld [vmem:[#allocation2 + $0x980] ss:$8 sps:$4 sm:$0xff]  }
0x16ee   : > { %v6748_v23 = vadd.f32 %v6744_v42, %v6730_v32  ;;  %v6758_v25 = vmul.f32 %v6753_v16, %v6621_v11  ;;  %v6623_v28 = vpop.f32.mrb[213].mxu1  ;;  %v7217_v16 = vshrl.u32 %v10869_v3, 16  ;;  %v7176_v42 = vrot.slane %v7174_v34, 3  ;;  %v7133_v3 = vld [vmem:[#allocation2 + $0x9a0] sm:$0xff] }
0x16ef   : > { %v6749_v37 = vadd.f32 %v6745_v55, %v6731_v60  ;;  %v6759_v2 = vmul.f32 %v6757_v31, %v6623_v28  ;;  %v6625_v17 = vpop.f32.mrb[214].mxu1  ;;  %v10872_v31 = vld [vmem:[#allocation2 + $0x994] ss:$8 sps:$4 sm:$0xff]   ;;  %v7179_v60 = vrot.slane %v7177_v15, 4  ;;  %v7184_v55 = vrot.slane %v7182_v0, 3 }
0x16f0   : > { %v6760_v24 = vadd.f32 %v6758_v25, %v6748_v23  ;;  %v6626_v26 = vpop.f32.mrb[215].mxu1  ;;  %v7187_v11 = vrot.slane %v7185_v18, 4  ;;  %v7219_v25 = vrot.slane %v7217_v16, 3  ;;  %v7211_v28 = vshll.u32 %v10871_v47, 16 }
0x16f1   : > { %v6761_v8 = vadd.f32 %v6759_v2, %v6749_v37  ;;  %v7222_v2 = vrot.slane %v7220_v29, 4  ;;  %v7238_v17 = vshll.u32 %v10872_v31, 16  ;;  %v7180_v26 = vor.u32 %v7179_v60, %v7176_v42 }
0x16f2   : > { %v6772_v63 = vmul.f32 %v6767_v41, %v6760_v24  ;;  %v7208_v41 = vshrl.u32 %v10871_v47, 16 }
0x16f3   : > { %v6773_v7 = vmul.f32 %v6771_v6, %v6761_v8  ;;  %v7235_v6 = vshrl.u32 %v10872_v31, 16 }
0x16f4   : > { %v6782_v30 = vadd.f32 %v6777_v21, %v6772_v63  ;;  %v7210_v63 = vrot.slane %v7208_v41, 3 }
0x16f5   : > { %v6783_v48 = vadd.f32 %v6781_v9, %v6773_v7  ;;  %v7188_v9 = vor.u32 %v7187_v11, %v7184_v55  ;;  %v7213_v7 = vrot.slane %v7211_v28, 4  ;;  %v10877_v55 = vld [vmem:[#allocation2 + $0x9a0] ss:$8 sps:$4 sm:$0xf8]   ;;  %v10878_v11 = vld [vmem:[#allocation2 + $0x9b0] ss:$8 sps:$4 sm:$0xff]  }
0x16f6   : > { %v6784_v13 = vadd.f32 3.0, %v6782_v30  ;;  %v7455_v41 = vshrl.u32 %v10877_v55, 16  ;;  %v7458_v28 = vshll.u32 %v10877_v55, 16  ;;  %v10886_v55 = vld [vmem:[#allocation2 + $0xa30] ss:$8 sps:$4 sm:$0xff]  }
0x16f7   : > { %v6785_v39 = vadd.f32 3.0, %v6783_v48 }
0x16f8   : > { %v6786_v20 = vmax.f32 %v6784_v13, 0.0  ;;  %v7237_v13 = vrot.slane %v7235_v6, 3  ;;  %v10881_v6 = vld [vmem:[#allocation2 + $0x9e0] ss:$8 sps:$4 sm:$0xff]  }
0x16f9   : > { %v6787_v43 = vmax.f32 %v6785_v39, 0.0  ;;  %v7240_v39 = vrot.slane %v7238_v17, 4 }
0x16fa   : > { %v6788_v46 = vmin.f32 %v6786_v20, 6.0 }
0x16fb   : > { %v6789_v45 = vmin.f32 %v6787_v43, 6.0 }
0x16fc   : > { %v6790_v52 = vmul.f32 %v6788_v46, %v6782_v30  ;;  %v7189_v46 = vsel %vm4060_vm12, %v7180_v26, %v7188_v9 }
0x16fd   : > { %v6791_v56 = vmul.f32 %v6789_v45, %v6783_v48  ;;  %v7223_v48 = vor.u32 %v7222_v2, %v7219_v25  ;;  %v7214_v45 = vor.u32 %v7213_v7, %v7210_v63  ;;  %v10880_v25 = vld [vmem:[#allocation2 + $0x9d0] ss:$8 sps:$4 sm:$0xff]   ;;  %v7466_v2 = vshll.u32 %v10878_v11, 16 }
0x16fe   : > { %v12037_v57 = vmul.f32 0.16666667, %v6790_v52  ;;  %v7484_v26 = vshll.u32 %v10880_v25, 16 }
0x16ff   : > { %v12039_v5 = vmul.f32 0.16666667, %v6791_v56  ;;  %v7224_v52 = vsel %vm4060_vm12, %v12011_v51, %v7223_v48  ;;  %v7241_v56 = vor.u32 %v7240_v39, %v7237_v13  ;;  %v7215_v36 = vsel %vm4060_vm12, %v7188_v9, %v7214_v45 }
0x1700   : > { %v6794_v61 = vsel %vm2543_vm6, %v12037_v57, 0.0  ;;  %v9979_v51 = vcombine.low %v7133_v3, %v7133_v3  ;;  %v7460_v9 = vrot.slane %v7458_v28, 4  ;;  %v7468_v7 = vrot.slane %v7466_v2, 4  ;;  %v10887_v2 = vld [vmem:[#allocation2 + $0xa40] ss:$8 sps:$4 sm:$0xff]  }
0x1701   : > { %v6795_v62 = vrot.slane %v6794_v61, 4  ;;  %v6801_v10 = vsel %vm5469_vm2, %v12039_v5, 0.0  ;;  %v7486_v39 = vrot.slane %v7484_v26, 4 }
0x1702   : > { %v6802_v58 = vrot.slane %v6801_v10, 4  ;;  %v7244_v18 = vshrl.u32 %v9979_v51, 16 }
0x1703   : > { %v6796_v27 = vadd.f32 %v6795_v62, %v6794_v61  ;;  %v7242_v61 = vsel %vm4060_vm12, %v7223_v48, %v7241_v56  ;;  %v7226_v62 = vshrl.u32 %v10874_v54, 16 }
0x1704   : > { %v6803_v59 = vadd.f32 %v6802_v58, %v6801_v10  ;;  %v7229_v10 = vshll.u32 %v10874_v54, 16  ;;  %v9980_v58 = vcombine.high %v7133_v3, %v7133_v3  ;;  %v7246_v29 = vrot.slane %v7244_v18, 3 }
0x1705   : > { %v6797_v33 = vrot.slane %v6796_v27, 2 }
0x1706   : > { %v6804_v44 = vrot.slane %v6803_v59, 2  ;;  %v7231_v34 = vrot.slane %v7229_v10, 4  ;;  %v7256_v15 = vshll.u32 %v9980_v58, 16 }
0x1707   : > { %v6798_v32 = vadd.f32 %v6797_v33, %v6796_v27  ;;  %v7228_v27 = vrot.slane %v7226_v62, 3  ;;  %v7247_v33 = vshll.u32 %v9979_v51, 16  ;;  %v10883_v62 = vld [vmem:[#allocation2 + $0xa00] ss:$8 sps:$4 sm:$0xff]  }
0x1708   : > { %v6805_v19 = vadd.f32 %v6804_v44, %v6803_v59  ;;  %v7253_v59 = vshrl.u32 %v9980_v58, 16  ;;  %v7258_v47 = vrot.slane %v7256_v15, 4  ;;  %v7508_v51 = vshrl.u32 %v10883_v62, 16 }
0x1709   : > { %v6799_v23 = vrot.slane %v6798_v32, 1  ;;  %v7232_v0 = vor.u32 %v7231_v34, %v7228_v27  ;;  %v7249_v31 = vrot.slane %v7247_v33, 4  ;;  %v7511_v33 = vshll.u32 %v10883_v62, 16 }
0x170a   : > { %v6806_v37 = vrot.slane %v6805_v19, 1  ;;  %v7255_v16 = vrot.slane %v7253_v59, 3  ;;  %v10884_v59 = vld [vmem:[#allocation2 + $0xa10] ss:$8 sps:$4 sm:$0xff]  }
0x170b   : > { %v6800_v24 = vadd.f32 %v6799_v23, %v6798_v32  ;;  %v7233_v44 = vsel %vm4060_vm12, %v7214_v45, %v7232_v0  ;;  %v7250_v42 = vor.u32 %v7249_v31, %v7246_v29  ;;  %v10879_v23 = vld [vmem:[#allocation2 + $0x9c0] ss:$8 sps:$4 sm:$0xff]   ;;  %v7490_v45 = vshrl.u32 %v10881_v6, 16 }
0x170c   : > { %v6807_v21 = vadd.f32 %v6806_v37, %v6805_v19  ;;  %v7259_v32 = vor.u32 %v7258_v47, %v7255_v16  ;;  %v7463_v37 = vshrl.u32 %v10878_v11, 16  ;;  %v7472_v17 = vshrl.u32 %v10879_v23, 16 }
0x170d   : > { %v6808_v8 = vmul.f32 0.25, %v6800_v24  ;;  %v7251_v60 = vsel %vm4060_vm12, %v7232_v0, %v7250_v42  ;;  %v7475_v24 = vshll.u32 %v10879_v23, 16  ;;  %v7492_v3 = vrot.slane %v7490_v45, 3 }
0x170e   : > { %v6809_v30 = vmul.f32 0.25, %v6807_v21  ;;  %v7260_v19 = vsel %vm4060_vm12, %v7241_v56, %v7259_v32  ;;  %v7481_v21 = vshrl.u32 %v10880_v25, 16  ;;  %v7465_v63 = vrot.slane %v7463_v37, 3 }
0x170f   : > { %v6810_v43 = vpack.c.bf16 %v6808_v8, %v6808_v8  ;;  %v7457_v8 = vrot.slane %v7455_v41, 3  ;;  %v7477_v48 = vrot.slane %v7475_v24, 4  ;;  %v7510_v16 = vrot.slane %v7508_v51, 3 }
0x1710   : > { %v6811_v20 = vpack.c.bf16 %v6809_v30, %v6809_v30  ;;  %v7474_v30 = vrot.slane %v7472_v17, 3  ;;  %v7483_v13 = vrot.slane %v7481_v21, 3  ;;  %v7517_v47 = vshrl.u32 %v10884_v59, 16 }
0x1711   : > { %v7513_v32 = vrot.slane %v7511_v33, 4  ;;  %v7520_v42 = vshll.u32 %v10884_v59, 16  ;;  %v7535_v37 = vshrl.u32 %v10886_v55, 16  ;;  %v7538_v21 = vshll.u32 %v10886_v55, 16 }
0x1712   : > { %9970 = vmatprep.mubr.msk.bf16.mxu0 %vm5749_vm7, %v6811_v20  ;;  %v10882_v20 = vld [vmem:[#allocation2 + $0x9f0] ss:$8 sps:$4 sm:$0xff]   ;;  %v7478_v56 = vor.u32 %v7477_v48, %v7474_v30  ;;  %v7519_v25 = vrot.slane %v7517_v47, 3  ;;  %v7547_v30 = vshll.u32 %v10887_v2, 16 }
0x1713   : > { %7116 = vmatmul.mubr.bf16.vlgmr.msra.gmra.mrb[156].mxu0 %v6810_v43  ;;  %v7461_v43 = vor.u32 %v7460_v9, %v7457_v8  ;;  %v7499_v54 = vshrl.u32 %v10882_v20, 16  ;;  %v7502_v27 = vshll.u32 %v10882_v20, 16  ;;  %v7514_v23 = vor.u32 %v7513_v32, %v7510_v16 }
0x1714   : > { %7284 = vmatpush1.bf16.msra.mxu0 %v7189_v46  ;;  %7315 = vmatprep.mubr.bf16.mxu0 %v11044_v22  ;;  %v7469_v46 = vor.u32 %v7468_v7, %v7465_v63  ;;  %v7522_v41 = vrot.slane %v7520_v42, 4  ;;  %v7537_v26 = vrot.slane %v7535_v37, 3  ;;  %v7544_v8 = vshrl.u32 %v10887_v2, 16 }
0x1715   : > { %7285 = vmatprep.subr.bf16.mxu0 %v7224_v52  ;;  %v7493_v52 = vshll.u32 %v10881_v6, 16  ;;  %v7501_v0 = vrot.slane %v7499_v54, 3  ;;  %v7504_v18 = vrot.slane %v7502_v27, 4  ;;  %v7540_v7 = vrot.slane %v7538_v21, 4 }
0x1716   : > { %v7479_v10 = vsel %vm4060_vm12, %v7469_v46, %v7478_v56  ;;  %v7523_v17 = vor.u32 %v7522_v41, %v7519_v25  ;;  %v7549_v20 = vrot.slane %v7547_v30, 4  ;;  %v10893_v30 = vld [vmem:[#allocation2 + $0xab8] ss:$8 sps:$4 sm:$0xfe]  }
0x1717   : > { %v7495_v58 = vrot.slane %v7493_v52, 4  ;;  %v7505_v31 = vor.u32 %v7504_v18, %v7501_v0  ;;  %v6843_v52 = vld [vmem:[#allocation4 + $0xd6] ss:$0 sm:$0xff] }
0x1718   : > { %7286 = vmatpush1.bf16.msra.mxu0 %v7215_v36  ;;  %v7470_v36 = vsel %vm4060_vm12, %v7461_v43, %v7469_v46  ;;  %v7524_v9 = vsel %vm4060_vm12, %v7514_v23, %v7523_v17 }
0x1719   : > { %7287 = vmatprep.subr.bf16.mxu0 %v7242_v61  ;;  %7616 = vmatpush1.bf16.msra.mxu1 %v7470_v36  ;;  %v7487_v61 = vor.u32 %v7486_v39, %v7483_v13  ;;  %v7496_v15 = vor.u32 %v7495_v58, %v7492_v3  ;;  %v7515_v6 = vsel %vm4060_vm12, %v7505_v31, %v7514_v23  ;;  %v7546_v39 = vrot.slane %v7544_v8, 3  ;;  %v10888_v58 = vld [vmem:[#allocation2 + $0xa50] ss:$8 sps:$4 sm:$0xff]  }
0x171a   : > { %7617 = vmatprep.subr.bf16.mxu1 %v11044_v22  ;;  %v7541_v13 = vor.u32 %v7540_v7, %v7537_v26  ;;  %v7553_v27 = vshrl.u32 %v10888_v58, 16 }
0x171b   : > { %v7488_v34 = vsel %vm4060_vm12, %v7478_v56, %v7487_v61  ;;  %v7497_v29 = vsel %vm4060_vm12, %v7487_v61, %v7496_v15  ;;  %v7506_v11 = vsel %vm4060_vm12, %v7496_v15, %v7505_v31  ;;  %v7550_v46 = vor.u32 %v7549_v20, %v7546_v39  ;;  %v10889_v15 = vld [vmem:[#allocation2 + $0xa60] ss:$8 sps:$4 sm:$0xff]  }
0x171c   : > { %7288 = vmatpush1.bf16.msra.mxu0 %v7233_v44  ;;  %v10885_v44 = vld [vmem:[#allocation2 + $0xa20] ss:$8 sps:$4 sm:$0xff]   ;;  %v7555_v51 = vrot.slane %v7553_v27, 3  ;;  %v7562_v18 = vshrl.u32 %v10889_v15, 16  ;;  %v7565_v33 = vshll.u32 %v10889_v15, 16  ;;  %v7693_v39 = vshll.u32 %v10893_v30, 16 }
0x171d   : > { %7289 = vmatprep.subr.bf16.mxu0 %v7260_v19  ;;  %7618 = vmatpush1.bf16.msra.mxu1 %v7479_v10  ;;  %v7526_v19 = vshrl.u32 %v10885_v44, 16  ;;  %v7551_v45 = vsel %vm4060_vm12, %v7541_v13, %v7550_v46 }
0x171e   : > { %7619 = vmatprep.subr.bf16.mxu1 %v11044_v22  ;;  %v7564_v47 = vrot.slane %v7562_v18, 3 }
0x171f   : > { %v7528_v28 = vrot.slane %v7526_v19, 3 }
0x1720   : > { %7290 = vmatpush1.bf16.msra.mxu0 %v7251_v60  ;;  %v7529_v60 = vshll.u32 %v10885_v44, 16  ;;  %v7567_v44 = vrot.slane %v7565_v33, 4 }
0x1721   : > { %10475 = vmatprep.subr.bf16.mxu0 %v11045_v12  ;;  %7620 = vmatpush1.bf16.msra.mxu1 %v7488_v34  ;;  %v7556_v34 = vshll.u32 %v10888_v58, 16 }
0x1722   : > { %7621 = vmatprep.subr.bf16.mxu1 %v11044_v22  ;;  %v7531_v24 = vrot.slane %v7529_v60, 4  ;;  %v7568_v31 = vor.u32 %v7567_v44, %v7564_v47 }
0x1723   : > { %v7558_v59 = vrot.slane %v7556_v34, 4 }
0x1724   : > { %v7532_v63 = vor.u32 %v7531_v24, %v7528_v28 }
0x1725   : > { %7622 = vmatpush1.bf16.msra.mxu1 %v7497_v29  ;;  %v7559_v0 = vor.u32 %v7558_v59, %v7555_v51  ;;  %v10890_v29 = vld [vmem:[#allocation2 + $0xa70] ss:$8 sps:$4 sm:$0xff]  }
0x1726   : > { %7623 = vmatprep.subr.bf16.mxu1 %v11044_v22  ;;  %v7533_v48 = vsel %vm4060_vm12, %v7523_v17, %v7532_v63  ;;  %v7542_v43 = vsel %vm4060_vm12, %v7532_v63, %v7541_v13  ;;  %v7571_v32 = vshrl.u32 %v10890_v29, 16  ;;  %v7574_v42 = vshll.u32 %v10890_v29, 16 }
0x1727   : > { %v7560_v16 = vsel %vm4060_vm12, %v7550_v46, %v7559_v0  ;;  %v7569_v19 = vsel %vm4060_vm12, %v7559_v0, %v7568_v31  ;;  %v7690_v13 = vshrl.u32 %v10893_v30, 16 }
0x1728   : > { %v7573_v60 = vrot.slane %v7571_v32, 3  ;;  %v7576_v55 = vrot.slane %v7574_v42, 4 }
0x1729   : > { %7624 = vmatpush1.bf16.msra.mxu1 %v7506_v11  ;;  %v10891_v11 = vld [vmem:[#allocation2 + $0xa80] ss:$8 sps:$4 sm:$0xff]   ;;  %v7692_v46 = vrot.slane %v7690_v13, 1  ;;  %v7666_v13 = vld [vmem:[#allocation4 + $0xe0] sm:$0xc] }
0x172a   : > { %7625 = vmatprep.subr.bf16.mxu1 %v11044_v22  ;;  %v7577_v23 = vor.u32 %v7576_v55, %v7573_v60  ;;  %v7580_v25 = vshrl.u32 %v10891_v11, 16  ;;  %v7583_v41 = vshll.u32 %v10891_v11, 16 }
0x172c   : > { %v7578_v28 = vsel %vm4060_vm12, %v7568_v31, %v7577_v23  ;;  %v7582_v37 = vrot.slane %v7580_v25, 3  ;;  %v7585_v2 = vrot.slane %v7583_v41, 4 }
0x172d   : > { %7626 = vmatpush1.bf16.msra.mxu1 %v7515_v6  ;;  %v10892_v6 = vld [vmem:[#allocation2 + $0xa90] ss:$0 sps:$4 sm:$0xff]  }
0x172e   : > { %7627 = vmatprep.subr.bf16.mxu1 %v11044_v22  ;;  %v7586_v17 = vor.u32 %v7585_v2, %v7582_v37  ;;  %v7589_v24 = vshrl.u32 %v10892_v6, 16  ;;  %v7592_v21 = vshll.u32 %v10892_v6, 16 }
0x1730   : > { %v7587_v26 = vsel %vm4060_vm12, %v7577_v23, %v7586_v17  ;;  %v7591_v8 = vrot.slane %v7589_v24, 3  ;;  %v10895_v23 = vld [vmem:[#allocation2 + $0xad8] ss:$8 sps:$4 sm:$0x3f]  }
0x1731   : > { %7628 = vmatpush1.bf16.msra.mxu1 %v7524_v9  ;;  %v7594_v9 = vrot.slane %v7592_v21, 4  ;;  %v7707_v25 = vshrl.u32 %v10895_v23, 16  ;;  %v7710_v41 = vshll.u32 %v10895_v23, 16 }
0x1732   : > { %7629 = vmatprep.subr.bf16.mxu1 %v11044_v22 }
0x1733   : > { %v7595_v63 = vor.u32 %v7594_v9, %v7591_v8  ;;  %v7712_v37 = vrot.slane %v7710_v41, 2  ;;  %v10900_v41 = vld [vmem:[#allocation2 + $0xaf0] ss:$8 sps:$4 sm:$0xff]  }
0x1735   : > { %7630 = vmatpush1.bf16.msra.mxu1 %v7533_v48  ;;  %v7596_v7 = vsel %vm4060_vm12, %v7586_v17, %v7595_v63  ;;  %v10894_v48 = vld [vmem:[#allocation2 + $0xac8] ss:$8 sps:$4 sm:$0xff]  }
0x1736   : > { %7631 = vmatprep.subr.bf16.mxu1 %v11044_v22  ;;  %v7698_v20 = vshrl.u32 %v10894_v48, 16 }
0x1739   : > { %7632 = vmatpush1.bf16.msra.mxu1 %v7542_v43  ;;  %v7701_v43 = vshll.u32 %v10894_v48, 16 }
0x173a   : > { %7633 = vmatprep.subr.bf16.mxu1 %v11044_v22 }
0x173d   : > { %7634 = vmatpush1.bf16.msra.mxu1 %v7551_v45  ;;  %v7695_v45 = vrot.slane %v7693_v39, 2  ;;  %v7766_v39 = vrot.slane %v7666_v13, %v11365_v1 }
0x173e   : > { %7635 = vmatprep.subr.bf16.mxu1 %v11044_v22 }
0x1741   : > { %7636 = vmatpush1.bf16.msra.mxu1 %v7560_v16 }
0x1742   : > { %7637 = vmatprep.subr.bf16.mxu1 %v11044_v22 }
0x1745   : > { %7638 = vmatpush1.bf16.msra.mxu1 %v7569_v19 }
0x1746   : > { %7639 = vmatprep.subr.bf16.mxu1 %v11044_v22 }
0x1749   : > { %7640 = vmatpush1.bf16.msra.mxu1 %v7578_v28  ;;  %v7709_v28 = vrot.slane %v7707_v25, 1  ;;  %v10899_v25 = vld [vmem:[#allocation2 + $0xae0] ss:$8 sps:$4 sm:$0xfe]  }
0x174a   : > { %7641 = vmatprep.subr.bf16.mxu1 %v11044_v22 }
0x174b   : > { %v7713_v2 = vor.u32 %v7712_v37, %v7709_v28  ;;  %v8045_v28 = vshrl.u32 %v10899_v25, 16  ;;  %v8048_v37 = vshll.u32 %v10899_v25, 16 }
0x174d   : > { %7642 = vmatpush1.bf16.msra.mxu1 %v7587_v26 }
0x174e   : > { %7643 = vmatprep.subr.bf16.mxu1 %v11044_v22 }
0x1751   : > { %7644 = vmatpush1.bf16.msra.mxu1 %v7596_v7 }
0x1752   : > { %10519 = vmatprep.subr.bf16.mxu1 %v11045_v12 }
0x17e6   : > { %v7117_v56 = vpop.f32.mrb[156].mxu0 }
0x17e7   : > { %v7118_v36 = vadd.f32 %v7117_v56, %v6843_v52  ;;  %v7119_v61 = vpop.f32.mrb[157].mxu0  ;;  %v7700_v52 = vrot.slane %v7698_v20, 1  ;;  %v7703_v56 = vrot.slane %v7701_v43, 2  ;;  %v7771_v20 = vrot.slane %v7666_v13, %v11370_v4  ;;  %v10902_v13 = vld [vmem:[#allocation2 + $0xb10] ss:$8 sps:$4 sm:$0xff]  }
0x17e8   : > { %v7120_v54 = vpop.f32.mrb[158].mxu0 }
0x17e9   : > { %v7123_v62 = vmax.f32 %v7118_v36, 0.0  ;;  %v7121_v10 = vpop.f32.mrb[159].mxu0  ;;  %v7696_v36 = vor.u32 %v7695_v45, %v7692_v46  ;;  %v7704_v61 = vor.u32 %v7703_v56, %v7700_v52  ;;  %v10896_v52 = vld [vmem:[#allocation2 + $0xa90] ss:$8 sps:$4 sm:$0xf8]  }
0x17eb   : > { %v7124_v3 = vpack.c.bf16 %v7123_v62, %v7123_v62  ;;  %v7705_v54 = vsel %vm1159_vm3, %v7696_v36, %v7704_v61  ;;  %v7135_v62 = vld [vmem:[#allocation4 + $0xd7] ss:$8 sm:$0x3]  ;;  %v7714_v6 = vsel %vm1159_vm3, %v7704_v61, %v7713_v2  ;;  %v10897_v36 = vld [vmem:[#allocation2 + $0xaa0] ss:$8 sps:$4 sm:$0xff]  }
0x17ec   : > { %v7273_v10 = vrot.slane %v7135_v62, %v11199_v38 }
0x17ed   : > { %9981 = vmatmul.mubr.msk.bf16.vlgmr.msra.gmra.mrb[160].mxu0 %vm3042_vm8, %v7124_v3  ;;  %v7277_v3 = vrot.slane %v7135_v62, %v11202_v40  ;;  %v7801_v62 = vshrl.u32 %v10896_v52, 16  ;;  %vm7977_vm8 = vcmask 977920  }
0x17ee   : > { %10481 = vmatprep.mubr.msk.bf16.mxu0 %vm11046_vm4, %v11045_v12  ;;  %10476 = vmatpush3.bf16.msra.mxu0 %v7705_v54 }
0x17ef   : > { %10477 = vmatprep.subr.bf16.mxu0 %v11045_v12 }
0x17f2   : > { %10478 = vmatpush3.bf16.msra.mxu0 %v7714_v6  ;;  %v8056_v6 = vshll.u32 %v10900_v41, 16 }
0x17f3   : > { %10479 = vmatprep.subr.bf16.mxu0 %v11045_v12 }
0x18c0   : > { %v7317_v58 = vpop.f32.mrb[160].mxu0 }
0x18c1   : > { %v7318_v27 = vadd.f32 %v7317_v58, %v7273_v10  ;;  %v7319_v34 = vpop.f32.mrb[161].mxu0  ;;  %v7804_v10 = vshll.u32 %v10896_v52, 16  ;;  %v7812_v58 = vshll.u32 %v10897_v36, 16 }
0x18c2   : > { %v7320_v51 = vadd.f32 %v7319_v34, %v7277_v3  ;;  %v7321_v59 = vpop.f32.mrb[162].mxu0  ;;  %v7809_v3 = vshrl.u32 %v10897_v36, 16 }
0x18c3   : > { %v7324_v15 = vadd.f32 3.0, %v7318_v27  ;;  %v7322_v0 = vpop.f32.mrb[163].mxu0  ;;  %v7806_v59 = vrot.slane %v7804_v10, 4 }
0x18c4   : > { %v7325_v18 = vadd.f32 3.0, %v7320_v51  ;;  %v7803_v51 = vrot.slane %v7801_v62, 3  ;;  %v7814_v0 = vrot.slane %v7812_v58, 4 }
0x18c5   : > { %v7326_v33 = vmax.f32 %v7324_v15, 0.0  ;;  %v7811_v15 = vrot.slane %v7809_v3, 3  ;;  %v10904_v3 = vld [vmem:[#allocation2 + $0xb30] ss:$8 sps:$4 sm:$0xff]  }
0x18c6   : > { %v7327_v16 = vmax.f32 %v7325_v18, 0.0  ;;  %v10898_v18 = vld [vmem:[#allocation2 + $0xab0] ss:$8 sps:$4 sm:$0x3f]  }
0x18c7   : > { %v7328_v47 = vmin.f32 %v7326_v33, 6.0 }
0x18c8   : > { %v7329_v44 = vmin.f32 %v7327_v16, 6.0 }
0x18c9   : > { %v7330_v29 = vmul.f32 0.16666667, %v7328_v47  ;;  %v7807_v47 = vor.u32 %v7806_v59, %v7803_v51 }
0x18ca   : > { %v7331_v31 = vmul.f32 0.16666667, %v7329_v44  ;;  %v7815_v44 = vor.u32 %v7814_v0, %v7811_v15  ;;  %v10905_v0 = vld [vmem:[#allocation2 + $0xb40] ss:$8 sps:$4 sm:$0xff]  }
0x18cb   : > { %v7335_v32 = vrot.slane %v7330_v29, %v11199_v38  ;;  %v7818_v29 = vshrl.u32 %v10898_v18, 16 }
0x18cc   : > { %v7339_v42 = vrot.slane %v7331_v31, %v11199_v38  ;;  %v7821_v31 = vshll.u32 %v10898_v18, 16 }
0x18cd   : > { %v7340_v19 = vmul.f32 %v7335_v32, %v12037_v57  ;;  %v7721_v57 = vsel %vm2543_vm6, %v7713_v2, 0  ;;  %v8053_v2 = vshrl.u32 %v10900_v41, 16 }
0x18ce   : > { %v7341_v60 = vmul.f32 %v7339_v42, %v12039_v5  ;;  %10480 = vmatpush3.bf16.msra.mxu0 %v7721_v57  ;;  %v7342_v5 = vld [vmem:[#allocation4 + $0xe0] sm:$0x3]  ;;  %v8047_v57 = vrot.slane %v8045_v28, 1  ;;  %v7894_v28 = vld [vmem:[#allocation4 + $0xe0] sm:$0xf0] }
0x18cf   : > { %v7343_v11 = vpack.c.bf16 %v7340_v19, %v7340_v19  ;;  %10485 = vmatprep.subr.bf16.mxu0 %v11045_v12  ;;  %v7658_v17 = vrot.slane %v7342_v5, %v11199_v38  ;;  %v7663_v24 = vrot.slane %v7342_v5, %v11202_v40  ;;  %v7816_v19 = vsel %vm4060_vm12, %v7807_v47, %v7815_v44 }
0x18d0   : > { %v7344_v55 = vpack.c.bf16 %v7341_v60, %v7341_v60  ;;  %v7820_v60 = vrot.slane %v7818_v29, 3  ;;  %v8050_v5 = vrot.slane %v8048_v37, 2  ;;  %v7904_v37 = vrot.slane %v7894_v28, %v11435_v35 }
0x18d2   : > { %9998 = vmatprep.mubr.msk.bf16.mxu1 %vm5749_vm7, %v7344_v55  ;;  %v7823_v55 = vrot.slane %v7821_v31, 4  ;;  %v10906_v31 = vld [vmem:[#allocation2 + $0xb50] ss:$8 sps:$4 sm:$0x3f]  }
0x18d3   : > { %7648 = vmatmul.mubr.bf16.vlgmr.msra.gmra.mrb[216].mxu1 %v7343_v11 }
0x18d4   : > { %10523 = vmatprep.mubr.msk.bf16.mxu1 %vm11046_vm4, %v11045_v12  ;;  %v7824_v11 = vor.u32 %v7823_v55, %v7820_v60 }
0x18d6   : > { %v7825_v23 = vsel %vm4060_vm12, %v7815_v44, %v7824_v11 }
0x19a6   : > { %v7649_v21 = vpop.f32.mrb[216].mxu1 }
0x19a7   : > { %v7659_v26 = vmul.f32 %v7658_v17, %v7649_v21  ;;  %v7651_v8 = vpop.f32.mrb[217].mxu1  ;;  %v8055_v17 = vrot.slane %v8053_v2, 1  ;;  %v10901_v21 = vld [vmem:[#allocation2 + $0xb00] ss:$8 sps:$4 sm:$0xff]   ;;  %v7899_v2 = vrot.slane %v7894_v28, %v11420_v49 }
0x19a8   : > { %v7652_v9 = vpop.f32.mrb[218].mxu1 }
0x19a9   : > { %v7664_v63 = vadd.f32 %v7663_v24, %v7659_v26  ;;  %v7653_v7 = vpop.f32.mrb[219].mxu1  ;;  %v8058_v24 = vrot.slane %v8056_v6, 2  ;;  %v8051_v26 = vor.u32 %v8050_v5, %v8047_v57  ;;  %v8062_v9 = vshrl.u32 %v10901_v21, 16 }
0x19aa   : > { %v7919_v6 = vrot.slane %v7894_v28, %v11445_v53 }
0x19ab   : > { %v7665_v30 = vadd.f32 %v7664_v63, %v11958_v50  ;;  %v8059_v8 = vor.u32 %v8058_v24, %v8055_v17  ;;  %v8065_v63 = vshll.u32 %v10901_v21, 16  ;;  %v7913_v24 = vrot.slane %v7894_v28, %v11440_v14 }
0x19ad   : > { %v7667_v48 = vpack.c.bf16 %v7665_v30, %v7665_v30  ;;  %v8060_v7 = vsel %vm1159_vm3, %v8051_v26, %v8059_v8  ;;  %v8064_v30 = vrot.slane %v8062_v9, 1  ;;  %v7895_v26 = vld [vmem:[#allocation4 + $0xf0] sm:$0x1f] }
0x19af   : > { %10482 = vmatmul.mubr.msk.bf16.vlgmr.msra.gmra.mrb[164].mxu0 %vm5088_vm15, %v7667_v48  ;;  %v8067_v48 = vrot.slane %v8065_v63, 2 }
0x19b0   : > { %10487 = vmatprep.mubr.msk.bf16.mxu0 %vm11046_vm4, %v11045_v12 }
0x1a82   : > { %v7757_v43 = vpop.f32.mrb[164].mxu0 }
0x1a83   : > { %v7767_v46 = vmul.f32 %v7766_v39, %v7757_v43  ;;  %v10483_v45 = vpop.f32.mrb[165].mxu0  ;;  %v8068_v39 = vor.u32 %v8067_v48, %v8064_v30  ;;  %v8074_v43 = vshll.u32 %v10902_v13, 16 }
0x1a84   : > { %v7760_v56 = vpop.f32.mrb[166].mxu0 }
0x1a85   : > { %v7772_v61 = vadd.f32 %v7771_v20, %v7767_v46  ;;  %v10484_v54 = vpop.f32.mrb[167].mxu0  ;;  %v8071_v20 = vshrl.u32 %v10902_v13, 16  ;;  %v8069_v46 = vsel %vm1159_vm3, %v8059_v8, %v8068_v39  ;;  %v8076_v52 = vrot.slane %v8074_v43, 2  ;;  %v10903_v56 = vld [vmem:[#allocation2 + $0xb20] ss:$8 sps:$4 sm:$0xff]  }
0x1a86   : > { %v8083_v54 = vshll.u32 %v10903_v56, 16  ;;  %v7928_v13 = vrot.slane %v7895_v26, %v11199_v38 }
0x1a87   : > { %v7773_v50 = vadd.f32 3.0, %v7772_v61  ;;  %v8073_v45 = vrot.slane %v8071_v20, 1 }
0x1a88   : > { %v8085_v10 = vrot.slane %v8083_v54, 2  ;;  %v7943_v54 = vrot.slane %v7895_v26, %v11365_v1 }
0x1a89   : > { %v7774_v27 = vmax.f32 %v7773_v50, 0.0  ;;  %v8077_v36 = vor.u32 %v8076_v52, %v8073_v45 }
0x1a8b   : > { %v7775_v34 = vmin.f32 %v7774_v27, 6.0  ;;  %v8078_v50 = vsel %vm1159_vm3, %v8068_v39, %v8077_v36  ;;  %v8089_v27 = vshrl.u32 %v10904_v3, 16  ;;  %v7934_v39 = vrot.slane %v7895_v26, %v11202_v40 }
0x1a8d   : > { %v7776_v33 = vmul.f32 %v7775_v34, %v7772_v61  ;;  %v8080_v61 = vshrl.u32 %v10903_v56, 16  ;;  %v8092_v34 = vshll.u32 %v10904_v3, 16  ;;  %v8091_v59 = vrot.slane %v8089_v27, 1 }
0x1a8f   : > { %v7777_v16 = vmul.f32 0.16666667, %v7776_v33  ;;  %v8082_v62 = vrot.slane %v8080_v61, 1  ;;  %v8094_v15 = vrot.slane %v8092_v34, 2  ;;  %v8098_v33 = vshrl.u32 %v10905_v0, 16 }
0x1a91   : > { %v7784_v32 = vpack.c.bf16 %v7777_v16, %v7777_v16  ;;  %v8086_v58 = vor.u32 %v8085_v10, %v8082_v62  ;;  %v8095_v18 = vor.u32 %v8094_v15, %v8091_v59  ;;  %v8101_v16 = vshll.u32 %v10905_v0, 16  ;;  %v7961_v59 = vld [vmem:[#allocation4 + $0xf0] sm:$0x60] }
0x1a92   : > { %v8100_v44 = vrot.slane %v8098_v33, 1 }
0x1a93   : > { %v7836_v42 = vsel %vm5228_vm0, %v7784_v32, 0  ;;  %v8087_v51 = vsel %vm1159_vm3, %v8077_v36, %v8086_v58  ;;  %v8096_v47 = vsel %vm1159_vm3, %v8086_v58, %v8095_v18  ;;  %v8103_v29 = vrot.slane %v8101_v16, 2 }
0x1a94   : > { %10486 = vmatpush3.bf16.msra.mxu0 %v7836_v42  ;;  %v8107_v42 = vshrl.u32 %v10906_v31, 16 }
0x1a95   : > { %10499 = vmatprep.subr.bf16.mxu0 %v11045_v12  ;;  %v8104_v32 = vor.u32 %v8103_v29, %v8100_v44 }
0x1a96   : > { %v8109_v55 = vrot.slane %v8107_v42, 1 }
0x1a97   : > { %10488 = vmatmul.mubr.msk.bf16.vlgmr.msra.gmra.mrb[168].mxu0 %vm5218_vm1, %v7816_v19  ;;  %v8110_v19 = vshll.u32 %v10906_v31, 16  ;;  %v8105_v60 = vsel %vm1159_vm3, %v8095_v18, %v8104_v32 }
0x1a98   : > { %10491 = vmatprep.mubr.msk.bf16.mxu0 %vm11046_vm4, %v11045_v12  ;;  %10500 = vmatpush3.bf16.msra.mxu0 %v8060_v7 }
0x1a99   : > { %10501 = vmatprep.subr.bf16.mxu0 %v11045_v12 }
0x1a9c   : > { %10502 = vmatpush3.bf16.msra.mxu0 %v8069_v46  ;;  %v7949_v46 = vrot.slane %v7895_v26, %v11370_v4 }
0x1a9d   : > { %10503 = vmatprep.subr.bf16.mxu0 %v11045_v12 }
0x1a9f   : > { %10492 = vmatmul.mubr.msk.bf16.gmra.mrb[172].mxu0 %vm5218_vm1, %v7825_v23 }
0x1aa0   : > { %10495 = vmatprep.mubr.msk.bf16.mxu0 %vm11046_vm4, %v11045_v12  ;;  %10504 = vmatpush3.bf16.msra.mxu0 %v8078_v50 }
0x1aa1   : > { %10505 = vmatprep.subr.bf16.mxu0 %v11045_v12 }
0x1aa4   : > { %10506 = vmatpush3.bf16.msra.mxu0 %v8087_v51  ;;  %v7958_v51 = vrot.slane %v7895_v26, %v11420_v49  ;;  %v10907_v26 = vld [vmem:[#allocation2 + $0xb58] ss:$8 sps:$4 sm:$0xfe]  }
0x1aa5   : > { %10507 = vmatprep.subr.bf16.mxu0 %v11045_v12 }
0x1aa7   : > { %10496 = vmatmul.mubr.msk.bf16.gmra.mrb[176].mxu0 %vm5218_vm1, %v7824_v11  ;;  %v8112_v11 = vrot.slane %v8110_v19, 2 }
0x1aa8   : > { %10515 = vmatprep.mubr.msk.bf16.mxu0 %vm11046_vm4, %v11045_v12  ;;  %10508 = vmatpush3.bf16.msra.mxu0 %v8096_v47  ;;  %v7965_v47 = vrot.slane %v7961_v59, %v11435_v35 }
0x1aa9   : > { %10509 = vmatprep.subr.bf16.mxu0 %v11045_v12  ;;  %v8113_v23 = vor.u32 %v8112_v11, %v8109_v55 }
0x1aab   : > { %v8114_v25 = vsel %vm1159_vm3, %v8104_v32, %v8113_v23  ;;  %v8127_v41 = vsel %vm2543_vm6, %v8113_v23, 0  ;;  %v7970_v32 = vrot.slane %v7961_v59, %v11440_v14  ;;  %v10912_v59 = vld [vmem:[#allocation2 + $0xb98] ss:$8 sps:$4 sm:$0xff]  }
0x1aac   : > { %10510 = vmatpush3.bf16.msra.mxu0 %v8105_v60 }
0x1aad   : > { %10511 = vmatprep.subr.bf16.mxu0 %v11045_v12 }
0x1ab0   : > { %10512 = vmatpush3.bf16.msra.mxu0 %v8114_v25 }
0x1ab1   : > { %10513 = vmatprep.subr.bf16.mxu0 %v11045_v12 }
0x1ab4   : > { %10514 = vmatpush3.bf16.msra.mxu0 %v8127_v41 }
0x1b6a   : > { %v7872_v57 = vpop.f32.mrb[168].mxu0 }
0x1b6b   : > { %v7905_v5 = vmul.f32 %v7904_v37, %v7872_v57  ;;  %v10489_v17 = vpop.f32.mrb[169].mxu0  ;;  %v7900_v8 = vmul.f32 %v7899_v2, %v7872_v57 }
0x1b6c   : > { %v7875_v21 = vpop.f32.mrb[170].mxu0 }
0x1b6d   : > { %v7907_v9 = vrot.slane %v7905_v5, 4  ;;  %v7920_v63 = vmul.f32 %v7919_v6, %v7875_v21  ;;  %v10490_v7 = vpop.f32.mrb[171].mxu0  ;;  %v7914_v48 = vmul.f32 %v7913_v24, %v7875_v21 }
0x1b6f   : > { %v7909_v30 = vadd.f32 %v7907_v9, %v7900_v8  ;;  %v7922_v43 = vrot.slane %v7920_v63, 4  ;;  %v10908_v8 = vld [vmem:[#allocation2 + $0xb68] ss:$8 sps:$4 sm:$0xff]   ;;  %v8191_v9 = vshrl.u32 %v10907_v26, 16  ;;  %v8194_v63 = vshll.u32 %v10907_v26, 16 }
0x1b70   : > { %v8199_v7 = vshrl.u32 %v10908_v8, 16 }
0x1b71   : > { %v7915_v20 = vadd.f32 %v7914_v48, %v7909_v30  ;;  %v8202_v30 = vshll.u32 %v10908_v8, 16  ;;  %v8193_v48 = vrot.slane %v8191_v9, 1 }
0x1b72   : > { %v7880_v45 = vpop.f32.mrb[172].mxu0 }
0x1b73   : > { %v7924_v52 = vadd.f32 %v7922_v43, %v7915_v20  ;;  %v7929_v56 = vmul.f32 %v7928_v13, %v7880_v45  ;;  %v7935_v36 = vmul.f32 %v7934_v39, %v7880_v45  ;;  %v10493_v61 = vpop.f32.mrb[173].mxu0  ;;  %v8196_v13 = vrot.slane %v8194_v63, 2  ;;  %v10909_v43 = vld [vmem:[#allocation2 + $0xb78] ss:$0 sps:$4 sm:$0x33]  }
0x1b74   : > { %v7883_v50 = vpop.f32.mrb[174].mxu0  ;;  %v8201_v39 = vrot.slane %v8199_v7, 1  ;;  %v8204_v20 = vrot.slane %v8202_v30, 2 }
0x1b75   : > { %v7930_v62 = vadd.f32 %v7929_v56, %v7924_v52  ;;  %v7937_v10 = vrot.slane %v7935_v36, 4  ;;  %v7950_v3 = vmul.f32 %v7949_v46, %v7883_v50  ;;  %v10494_v58 = vpop.f32.mrb[175].mxu0  ;;  %v7944_v34 = vmul.f32 %v7943_v54, %v7883_v50 }
0x1b76   : > { %v8197_v46 = vor.u32 %v8196_v13, %v8193_v48  ;;  %v8205_v45 = vor.u32 %v8204_v20, %v8201_v39  ;;  %v8208_v52 = vshrl.u32 %v10909_v43, 16  ;;  %v8211_v56 = vshll.u32 %v10909_v43, 16  ;;  %v10915_v20 = vld [vmem:[#allocation2 + $0xbc8] ss:$8 sps:$4 sm:$0xff]  }
0x1b77   : > { %v7939_v27 = vadd.f32 %v7937_v10, %v7930_v62  ;;  %v7952_v0 = vrot.slane %v7950_v3, 4  ;;  %v10910_v10 = vld [vmem:[#allocation2 + $0xb78] ss:$8 sps:$4 sm:$0xfe]   ;;  %v10911_v3 = vld [vmem:[#allocation2 + $0xb88] ss:$8 sps:$4 sm:$0xff]  }
0x1b78   : > { %v8206_v36 = vsel %vm1159_vm3, %v8197_v46, %v8205_v45  ;;  %v8210_v61 = vrot.slane %v8208_v52, 1  ;;  %v8213_v54 = vrot.slane %v8211_v56, 2  ;;  %v8330_v58 = vshrl.u32 %v10910_v10, 16  ;;  %v10916_v56 = vld [vmem:[#allocation2 + $0xbd8] ss:$8 sps:$4 sm:$0xff]  }
0x1b79   : > { %v7945_v15 = vadd.f32 %v7944_v34, %v7939_v27  ;;  %10520 = vmatpush3.bf16.msra.mxu1 %v8206_v36  ;;  %v8333_v27 = vshll.u32 %v10910_v10, 16  ;;  %v8338_v34 = vshrl.u32 %v10911_v3, 16  ;;  %v8374_v43 = vshrl.u32 %v10915_v20, 16 }
0x1b7a   : > { %v7888_v18 = vpop.f32.mrb[176].mxu0  ;;  %10521 = vmatprep.subr.bf16.mxu1 %v11045_v12  ;;  %v8214_v50 = vor.u32 %v8213_v54, %v8210_v61  ;;  %v8377_v46 = vshll.u32 %v10915_v20, 16  ;;  %v8383_v61 = vshrl.u32 %v10916_v56, 16  ;;  %v8386_v54 = vshll.u32 %v10916_v56, 16 }
0x1b7b   : > { %v7954_v33 = vadd.f32 %v7952_v0, %v7945_v15  ;;  %v7959_v16 = vmul.f32 %v7958_v51, %v7888_v18  ;;  %v10497_v44 = vpop.f32.mrb[177].mxu0  ;;  %v8341_v51 = vshll.u32 %v10911_v3, 16  ;;  %v8332_v15 = vrot.slane %v8330_v58, 1  ;;  %v10917_v3 = vld [vmem:[#allocation2 + $0xbe8] ss:$8 sps:$4 sm:$0x3f]  }
0x1b7c   : > { %v7891_v29 = vpop.f32.mrb[178].mxu0  ;;  %v8215_v62 = vsel %vm1159_vm3, %v8205_v45, %v8214_v50  ;;  %v8335_v0 = vrot.slane %v8333_v27, 2  ;;  %v8340_v18 = vrot.slane %v8338_v34, 1  ;;  %v10913_v44 = vld [vmem:[#allocation2 + $0xba8] ss:$8 sps:$4 sm:$0xff]   ;;  %v8376_v45 = vrot.slane %v8374_v43, 1 }
0x1b7d   : > { %v7960_v31 = vadd.f32 %v7959_v16, %v7954_v33  ;;  %v10498_v42 = vpop.f32.mrb[179].mxu0  ;;  %10522 = vmatpush3.bf16.msra.mxu1 %v8215_v62  ;;  %v8343_v33 = vrot.slane %v8341_v51, 2  ;;  %v8347_v16 = vshrl.u32 %v10912_v59, 16  ;;  %v8003_v29 = vld [vmem:[#allocation4 + $0xf7] ss:$0 sm:$0xff]  ;;  %v8379_v52 = vrot.slane %v8377_v46, 2 }
0x1b7e   : > { %10527 = vmatprep.subr.bf16.mxu1 %v11045_v12  ;;  %v8385_v62 = vrot.slane %v8383_v61, 1  ;;  %v8388_v10 = vrot.slane %v8386_v54, 2  ;;  %v8392_v27 = vshrl.u32 %v10917_v3, 16  ;;  %v8395_v34 = vshll.u32 %v10917_v3, 16  ;;  %v8176_v43 = vld [vmem:[#allocation4 + $0x100] ss:$0 sm:$0xff] }
0x1b7f   : > { %v7966_v19 = vmul.f32 %v7965_v47, %v7960_v31  ;;  %v8350_v47 = vshll.u32 %v10912_v59, 16  ;;  %v8336_v31 = vor.u32 %v8335_v0, %v8332_v15  ;;  %v8344_v42 = vor.u32 %v8343_v33, %v8340_v18 }
0x1b80   : > { %v8380_v36 = vor.u32 %v8379_v52, %v8376_v45  ;;  %v8389_v58 = vor.u32 %v8388_v10, %v8385_v62  ;;  %v8394_v59 = vrot.slane %v8392_v27, 1  ;;  %v8397_v15 = vrot.slane %v8395_v34, 2  ;;  %v10926_v27 = vld [vmem:[#allocation2 + $0xc30] ss:$8 sps:$4 sm:$0xff]  }
0x1b81   : > { %v7971_v60 = vadd.f32 %v7970_v32, %v7966_v19  ;;  %v8349_v19 = vrot.slane %v8347_v16, 1  ;;  %v10918_v16 = vld [vmem:[#allocation2 + $0xc14] ss:$8 sps:$4 sm:$0xf8]   ;;  %v8537_v34 = vshrl.u32 %v10926_v27, 16 }
0x1b82   : > { %v8390_v51 = vsel %vm1159_vm3, %v8380_v36, %v8389_v58  ;;  %v8398_v0 = vor.u32 %v8397_v15, %v8394_v59  ;;  %v8472_v59 = vld [vmem:[#allocation2 + $0xc40] sm:$0xff] }
0x1b83   : > { %v7972_v55 = vadd.f32 3.0, %v7971_v60  ;;  %v10038_v15 = vcombine.high %v8472_v59, %v8472_v59 }
0x1b84   : > { %v8399_v18 = vsel %vm1159_vm3, %v8389_v58, %v8398_v0  ;;  %v8411_v33 = vsel %vm2543_vm6, %v8398_v0, 0  ;;  %v8539_v0 = vrot.slane %v8537_v34, 3 }
0x1b85   : > { %v7973_v11 = vmax.f32 %v7972_v55, 0.0  ;;  %v8356_v55 = vshrl.u32 %v10913_v44, 16 }
0x1b87   : > { %v7974_v23 = vmin.f32 %v7973_v11, 6.0 }
0x1b89   : > { %v7975_v25 = vmul.f32 %v7974_v23, %v7971_v60  ;;  %v8352_v60 = vrot.slane %v8350_v47, 2  ;;  %v10920_v47 = vld [vmem:[#allocation2 + $0xc24] ss:$8 sps:$4 sm:$0xff]  }
0x1b8b   : > { %v12151_v41 = vmul.f32 0.16666667, %v7975_v25  ;;  %v8359_v25 = vshll.u32 %v10913_v44, 16  ;;  %v10922_v44 = vld [vmem:[#allocation2 + $0xc10] ss:$8 sps:$4 sm:$0xf8]  }
0x1b8d   : > { %v7978_v28 = vsel %vm7977_vm8, %v12151_v41, 0.0 }
0x1b8e   : > { %v7979_v37 = vrot.slane %v7978_v28, 4 }
0x1b90   : > { %v7980_v2 = vadd.f32 %v7979_v37, %v7978_v28  ;;  %v10914_v28 = vld [vmem:[#allocation2 + $0xbb8] ss:$8 sps:$4 sm:$0xff]  }
0x1b91   : > { %v8365_v26 = vshrl.u32 %v10914_v28, 16  ;;  %v8368_v8 = vshll.u32 %v10914_v28, 16 }
0x1b92   : > { %v7981_v6 = vrot.slane %v7980_v2, 2 }
0x1b93   : > { %v8367_v7 = vrot.slane %v8365_v26, 1  ;;  %v8370_v30 = vrot.slane %v8368_v8, 2 }
0x1b94   : > { %v7982_v57 = vadd.f32 %v7981_v6, %v7980_v2 }
0x1b95   : > { %v8371_v13 = vor.u32 %v8370_v30, %v8367_v7 }
0x1b96   : > { %v7983_v5 = vrot.slane %v7982_v57, 1 }
0x1b97   : > { %v8381_v50 = vsel %vm1159_vm3, %v8371_v13, %v8380_v36 }
0x1b98   : > { %v7984_v17 = vadd.f32 %v7983_v5, %v7982_v57  ;;  %v8345_v57 = vsel %vm1159_vm3, %v8336_v31, %v8344_v42  ;;  %v8353_v5 = vor.u32 %v8352_v60, %v8349_v19  ;;  %v8520_v31 = vshrl.u32 %v10918_v16, 16  ;;  %v10924_v60 = vld [vmem:[#allocation2 + $0xc34] ss:$8 sps:$4 sm:$0xff]  }
0x1b99   : > { %v8531_v19 = vshll.u32 %v10920_v47, 16  ;;  %v8546_v26 = vshrl.u32 %v10924_v60, 16  ;;  %v8549_v8 = vshll.u32 %v10924_v60, 16 }
0x1b9a   : > { %v7985_v24 = vmul.f32 0.25, %v7984_v17  ;;  %v8358_v17 = vrot.slane %v8356_v55, 1  ;;  %v8354_v9 = vsel %vm1159_vm3, %v8344_v42, %v8353_v5  ;;  %v8528_v42 = vshrl.u32 %v10920_v47, 16 }
0x1b9b   : > { %v8503_v55 = vshrl.u32 %v10922_v44, 16  ;;  %v8522_v28 = vrot.slane %v8520_v31, 3  ;;  %v8548_v30 = vrot.slane %v8546_v26, 3  ;;  %v8567_v47 = vshll.u32 %v10038_v15, 16  ;;  %v8463_v26 = vld [vmem:[#allocation4 + $0x100] sm:$0x18] }
0x1b9c   : > { %v7986_v21 = vpack.c.bf16 %v7985_v24, %v7985_v24 }
0x1b9e   : > { %10516 = vmatmul.mubr.msk.bf16.vlgmr.msra.gmra.mrb[180].mxu0 %vm8122_vm9, %v7986_v21  ;;  %v8361_v21 = vrot.slane %v8359_v25, 2 }
0x1b9f   : > { %8614 = vmatprep.mubr.bf16.mxu0 %v11044_v22 }
0x1ba0   : > { %v8362_v63 = vor.u32 %v8361_v21, %v8358_v17 }
0x1ba2   : > { %v8363_v48 = vsel %vm1159_vm3, %v8353_v5, %v8362_v63  ;;  %v8372_v39 = vsel %vm1159_vm3, %v8362_v63, %v8371_v13 }
0x1c71   : > { %v8163_v32 = vpop.f32.mrb[180].mxu0 }
0x1c72   : > { %v8164_v11 = vadd.f32 %v8163_v32, %v8003_v29  ;;  %v10517_v23 = vpop.f32.mrb[181].mxu0  ;;  %v10923_v29 = vld [vmem:[#allocation2 + $0xc20] ss:$8 sps:$4 sm:$0xff]   ;;  %v8523_v32 = vshll.u32 %v10918_v16, 16  ;;  %v8564_v16 = vshrl.u32 %v10038_v15, 16 }
0x1c73   : > { %v8166_v37 = vpop.f32.mrb[182].mxu0  ;;  %v8511_v23 = vshrl.u32 %v10923_v29, 16  ;;  %v8514_v25 = vshll.u32 %v10923_v29, 16 }
0x1c74   : > { %v8169_v2 = vmax.f32 %v8164_v11, 0.0  ;;  %v10518_v6 = vpop.f32.mrb[183].mxu0  ;;  %v8506_v11 = vshll.u32 %v10922_v44, 16  ;;  %v8530_v37 = vrot.slane %v8528_v42, 3  ;;  %v8569_v42 = vrot.slane %v8567_v47, 4 }
0x1c75   : > { %v8505_v6 = vrot.slane %v8503_v55, 3  ;;  %v8513_v5 = vrot.slane %v8511_v23, 3  ;;  %v8516_v17 = vrot.slane %v8514_v25, 4 }
0x1c76   : > { %v8170_v24 = vpack.c.bf16 %v8169_v2, %v8169_v2  ;;  %v8533_v2 = vrot.slane %v8531_v19, 4 }
0x1c77   : > { %v8517_v63 = vor.u32 %v8516_v17, %v8513_v5 }
0x1c78   : > { %10524 = vmatmul.mubr.msk.bf16.vlgmr.msra.gmra.mrb[220].mxu1 %vm8218_vm10, %v8170_v24  ;;  %v8534_v21 = vor.u32 %v8533_v2, %v8530_v37 }
0x1c79   : > { %10528 = vmatpush3.bf16.msra.mxu1 %v8345_v57  ;;  %10543 = vmatprep.mubr.msk.bf16.mxu1 %vm11046_vm4, %v11045_v12  ;;  %v8508_v57 = vrot.slane %v8506_v11, 4  ;;  %vm8578_vm4 = vcmask 392192  }
0x1c7a   : > { %10529 = vmatprep.subr.bf16.mxu1 %v11045_v12 }
0x1c7d   : > { %10530 = vmatpush3.bf16.msra.mxu1 %v8354_v9  ;;  %v8509_v9 = vor.u32 %v8508_v57, %v8505_v6 }
0x1c7e   : > { %10531 = vmatprep.subr.bf16.mxu1 %v11045_v12 }
0x1c7f   : > { %v8518_v13 = vsel %vm4060_vm12, %v8509_v9, %v8517_v63  ;;  %v8626_v9 = vrot.slane %v8463_v26, %v11370_v4 }
0x1c81   : > { %10532 = vmatpush3.bf16.msra.mxu1 %v8363_v48  ;;  %v8551_v48 = vrot.slane %v8549_v8, 4  ;;  %v8464_v8 = vld [vmem:[#allocation4 + $0x108] sm:$0x18] }
0x1c82   : > { %10533 = vmatprep.subr.bf16.mxu1 %v11045_v12 }
0x1c85   : > { %10534 = vmatpush3.bf16.msra.mxu1 %v8372_v39  ;;  %v8552_v39 = vor.u32 %v8551_v48, %v8548_v30  ;;  %v8640_v48 = vrot.slane %v8464_v8, %v11420_v49 }
0x1c86   : > { %10535 = vmatprep.subr.bf16.mxu1 %v11045_v12 }
0x1c87   : > { %v8553_v20 = vsel %vm4060_vm12, %v8534_v21, %v8552_v39 }
0x1c89   : > { %10536 = vmatpush3.bf16.msra.mxu1 %v8381_v50 }
0x1c8a   : > { %10537 = vmatprep.subr.bf16.mxu1 %v11045_v12 }
0x1c8d   : > { %10538 = vmatpush3.bf16.msra.mxu1 %v8390_v51  ;;  %v8540_v51 = vshll.u32 %v10926_v27, 16 }
0x1c8e   : > { %10539 = vmatprep.subr.bf16.mxu1 %v11045_v12 }
0x1c91   : > { %10540 = vmatpush3.bf16.msra.mxu1 %v8399_v18  ;;  %v8542_v18 = vrot.slane %v8540_v51, 4 }
0x1c92   : > { %10541 = vmatprep.subr.bf16.mxu1 %v11045_v12  ;;  %v8525_v12 = vrot.slane %v8523_v32, 4  ;;  %v8566_v32 = vrot.slane %v8564_v16, 3  ;;  %v10931_v16 = vld [vmem:[#allocation2 + $0xc10] ss:$0 sps:$4 sm:$0xff]  }
0x1c93   : > { %v8543_v44 = vor.u32 %v8542_v18, %v8539_v0 }
0x1c94   : > { %v8526_v24 = vor.u32 %v8525_v12, %v8522_v28  ;;  %v8570_v55 = vor.u32 %v8569_v42, %v8566_v32  ;;  %v8271_v28 = vld [vmem:[#allocation4 + $0x100] sm:$0x6] }
0x1c95   : > { %10542 = vmatpush3.bf16.msra.mxu1 %v8411_v33  ;;  %v10037_v33 = vcombine.low %v8472_v59, %v8472_v59  ;;  %v8456_v12 = vrot.slane %v8271_v28, %v11202_v40  ;;  %v8461_v37 = vrot.slane %v8271_v28, %v11365_v1 }
0x1c96   : > { %9129 = vmatprep.subr.bf16.mxu1 %v11044_v22  ;;  %v8535_v7 = vsel %vm4060_vm12, %v8526_v24, %v8534_v21  ;;  %v8571_v23 = vsel %vm4060_vm12, %v8552_v39, %v8570_v55 }
0x1c97   : > { %8582 = vmatprep.subr.bf16.mxu0 %v8535_v7  ;;  %v8555_v29 = vshrl.u32 %v10037_v33, 16  ;;  %v8558_v31 = vshll.u32 %v10037_v33, 16  ;;  %v8636_v7 = vrot.slane %v8463_v26, %v11420_v49 }
0x1c98   : > { %8583 = vmatpush1.bf16.msra.mxu0 %v8518_v13 }
0x1c99   : > { %8584 = vmatprep.subr.bf16.mxu0 %v8553_v20  ;;  %v8557_v19 = vrot.slane %v8555_v29, 3  ;;  %v8560_v60 = vrot.slane %v8558_v31, 4 }
0x1c9b   : > { %v8561_v11 = vor.u32 %v8560_v60, %v8557_v19  ;;  %v8694_v19 = vshll.u32 %v10931_v16, 16 }
0x1c9d   : > { %v8562_v25 = vsel %vm4060_vm12, %v8543_v44, %v8561_v11 }
0x1d4b   : > { %v8256_v46 = vpop.f32.mrb[220].mxu1 }
0x1d4c   : > { %v8257_v45 = vadd.f32 %v8256_v46, %v8176_v43  ;;  %v10525_v52 = vpop.f32.mrb[221].mxu1  ;;  %v10929_v46 = vld [vmem:[#allocation2 + $0xbf0] ss:$8 sps:$4 sm:$0xfe]  }
0x1d4d   : > { %v8259_v56 = vpop.f32.mrb[222].mxu1 }
0x1d4e   : > { %v8262_v36 = vadd.f32 3.0, %v8257_v45  ;;  %v10526_v61 = vpop.f32.mrb[223].mxu1  ;;  %v10930_v56 = vld [vmem:[#allocation2 + $0xc00] ss:$8 sps:$4 sm:$0xff]  }
0x1d50   : > { %v8263_v54 = vmax.f32 %v8262_v36, 0.0 }
0x1d52   : > { %v8264_v50 = vmin.f32 %v8263_v54, 6.0 }
0x1d54   : > { %v8265_v62 = vmul.f32 0.16666667, %v8264_v50  ;;  %v8674_v50 = vshrl.u32 %v10929_v46, 16 }
0x1d56   : > { %v8269_v10 = vrot.slane %v8265_v62, %v11199_v38  ;;  %v8677_v62 = vshll.u32 %v10929_v46, 16  ;;  %v8676_v59 = vrot.slane %v8674_v50, 1 }
0x1d58   : > { %v8270_v3 = vmul.f32 %v8269_v10, %v12151_v41  ;;  %v8544_v41 = vsel %vm4060_vm12, %v8517_v63, %v8543_v44  ;;  %v8630_v63 = vrot.slane %v8464_v8, %v11370_v4  ;;  %v8679_v15 = vrot.slane %v8677_v62, 2 }
0x1d59   : > { %8585 = vmatpush1.bf16.msra.mxu0 %v8544_v41  ;;  %v8691_v41 = vshrl.u32 %v10931_v16, 16 }
0x1d5a   : > { %v8272_v58 = vpack.c.bf16 %v8270_v3, %v8270_v3  ;;  %8586 = vmatprep.subr.bf16.mxu0 %v8571_v23  ;;  %v8682_v3 = vshrl.u32 %v10930_v56, 16  ;;  %v8680_v31 = vor.u32 %v8679_v15, %v8676_v59 }
0x1d5b   : > { %v8693_v23 = vrot.slane %v8691_v41, 1 }
0x1d5c   : > { %10544 = vmatmul.mubr.msk.bf16.vlgmr.msra.gmra.mrb[224].mxu1 %vm8122_vm9, %v8272_v58  ;;  %v8685_v58 = vshll.u32 %v10930_v56, 16  ;;  %v8684_v18 = vrot.slane %v8682_v3, 1 }
0x1d5d   : > { %8587 = vmatpush1.bf16.msra.mxu0 %v8562_v25  ;;  %v8696_v25 = vrot.slane %v8694_v19, 2  ;;  %v10939_v19 = vld [vmem:[#allocation2 + $0xcb0] ss:$8 sps:$4 sm:$0xff]  }
0x1d5e   : > { %v8687_v33 = vrot.slane %v8685_v58, 2 }
0x1d5f   : > { %v8697_v28 = vor.u32 %v8696_v25, %v8693_v23 }
0x1d60   : > { %v8688_v42 = vor.u32 %v8687_v33, %v8684_v18 }
0x1d62   : > { %v8689_v11 = vsel %vm1159_vm3, %v8680_v31, %v8688_v42 }
0x1e2f   : > { %v8447_v2 = vpop.f32.mrb[224].mxu1 }
0x1e30   : > { %v8457_v6 = vmul.f32 %v8456_v12, %v8447_v2  ;;  %v10545_v57 = vpop.f32.mrb[225].mxu1  ;;  %v8698_v12 = vsel %vm1159_vm3, %v8688_v42, %v8697_v28  ;;  %v10933_v2 = vld [vmem:[#allocation2 + $0xc50] ss:$8 sps:$4 sm:$0xff]   ;;  %vm8948_vm3 = vcmask 125952  }
0x1e31   : > { %v8450_v5 = vpop.f32.mrb[226].mxu1 }
0x1e32   : > { %v12189_v17 = vadd.f32 %v8461_v37, %v8457_v6  ;;  %v10546_v24 = vpop.f32.mrb[227].mxu1  ;;  %v10932_v37 = vld [vmem:[#allocation2 + $0xc40] ss:$8 sps:$4 sm:$0xf8]   ;;  %v9037_v5 = vshrl.u32 %v10933_v2, 16 }
0x1e33   : > { %v9029_v6 = vshrl.u32 %v10932_v37, 16  ;;  %v9032_v57 = vshll.u32 %v10932_v37, 16  ;;  %v9040_v24 = vshll.u32 %v10933_v2, 16  ;;  %v10941_v37 = vld [vmem:[#allocation2 + $0xcd0] ss:$0 sps:$4 sm:$0xff]  }
0x1e34   : > { %v8465_v21 = vpack.c.bf16 %v12189_v17, %v12189_v17  ;;  %v9039_v8 = vrot.slane %v9037_v5, 3  ;;  %v9109_v5 = vshrl.u32 %v10941_v37, 16 }
0x1e35   : > { %v9034_v26 = vrot.slane %v9032_v57, 4 }
0x1e36   : > { %10039 = vmatmul.mubr.msk.bf16.vlgmr.msra.gmra.mrb[184].mxu0 %vm8578_vm4, %v8465_v21  ;;  %v9031_v21 = vrot.slane %v9029_v6, 3 }
0x1e37   : > { %8746 = vmatprep.mubr.bf16.mxu0 %v11044_v22 }
0x1f09   : > { %v8616_v30 = vpop.f32.mrb[184].mxu0 }
0x1f0a   : > { %v8631_v13 = vmul.f32 %v8626_v9, %v8616_v30  ;;  %v8618_v39 = vpop.f32.mrb[185].mxu0  ;;  %v9042_v9 = vrot.slane %v9040_v24, 4  ;;  %v9112_v24 = vshll.u32 %v10941_v37, 16 }
0x1f0b   : > { %v8632_v20 = vmul.f32 %v8630_v63, %v8618_v39  ;;  %v8620_v43 = vpop.f32.mrb[186].mxu0  ;;  %v10934_v63 = vld [vmem:[#allocation2 + $0xc60] ss:$8 sps:$4 sm:$0xff]  }
0x1f0c   : > { %v8641_v45 = vadd.f32 %v8636_v7, %v8631_v13  ;;  %v8621_v52 = vpop.f32.mrb[187].mxu0  ;;  %v9035_v7 = vor.u32 %v9034_v26, %v9031_v21  ;;  %v9043_v30 = vor.u32 %v9042_v9, %v9039_v8  ;;  %v9049_v13 = vshll.u32 %v10934_v63, 16  ;;  %v10935_v43 = vld [vmem:[#allocation2 + $0xc70] ss:$8 sps:$4 sm:$0xff]  }
0x1f0d   : > { %v8642_v36 = vadd.f32 %v8640_v48, %v8632_v20  ;;  %v9046_v48 = vshrl.u32 %v10934_v63, 16  ;;  %v9058_v52 = vshll.u32 %v10935_v43, 16  ;;  %v9111_v9 = vrot.slane %v9109_v5, 3 }
0x1f0e   : > { %v8643_v61 = vadd.f32 3.0, %v8641_v45  ;;  %v9044_v39 = vsel %vm4060_vm12, %v9035_v7, %v9043_v30  ;;  %v9051_v46 = vrot.slane %v9049_v13, 4  ;;  %v9114_v63 = vrot.slane %v9112_v24, 4  ;;  %v12236_v24 = vld [vmem:[#allocation4 + $0x118] sm:$0x3f] }
0x1f0f   : > { %v8644_v54 = vadd.f32 3.0, %v8642_v36  ;;  %v9048_v20 = vrot.slane %v9046_v48, 3  ;;  %9130 = vmatpush1.bf16.msra.mxu1 %v9044_v39  ;;  %v10942_v39 = vld [vmem:[#allocation2 + $0xcd4] ss:$8 sps:$4 sm:$0xf8]  }
0x1f10   : > { %v8645_v10 = vmax.f32 %v8643_v61, 0.0  ;;  %9131 = vmatprep.subr.bf16.mxu1 %v11044_v22  ;;  %v9060_v61 = vrot.slane %v9058_v52, 4  ;;  %v9224_v52 = vshll.u32 %v10942_v39, 16 }
0x1f11   : > { %v8646_v27 = vmax.f32 %v8644_v54, 0.0  ;;  %v9052_v56 = vor.u32 %v9051_v46, %v9048_v20  ;;  %v10936_v54 = vld [vmem:[#allocation2 + $0xc80] ss:$8 sps:$4 sm:$0xff]   ;;  %v10944_v20 = vld [vmem:[#allocation2 + $0xce4] ss:$8 sps:$4 sm:$0xff]  }
0x1f12   : > { %v8647_v34 = vmin.f32 %v8645_v10, 6.0  ;;  %v9064_v10 = vshrl.u32 %v10936_v54, 16  ;;  %v9067_v3 = vshll.u32 %v10936_v54, 16  ;;  %v10947_v46 = vld [vmem:[#allocation2 + $0xce0] ss:$8 sps:$4 sm:$0xff]  }
0x1f13   : > { %v8648_v51 = vmin.f32 %v8646_v27, 6.0  ;;  %v9053_v50 = vsel %vm4060_vm12, %v9043_v30, %v9052_v56  ;;  %v9115_v30 = vor.u32 %v9114_v63, %v9111_v9 }
0x1f14   : > { %v8649_v0 = vmul.f32 %v8647_v34, %v8641_v45  ;;  %v9055_v45 = vshrl.u32 %v10935_v43, 16  ;;  %9132 = vmatpush1.bf16.msra.mxu1 %v9053_v50  ;;  %v9066_v27 = vrot.slane %v9064_v10, 3  ;;  %v9069_v34 = vrot.slane %v9067_v3, 4  ;;  %v10946_v43 = vld [vmem:[#allocation2 + $0xcd0] ss:$8 sps:$4 sm:$0xf8]  }
0x1f15   : > { %v8650_v47 = vmul.f32 %v8648_v51, %v8642_v36  ;;  %9133 = vmatprep.subr.bf16.mxu1 %v11044_v22  ;;  %v10937_v51 = vld [vmem:[#allocation2 + $0xc90] ss:$8 sps:$4 sm:$0xff]   ;;  %v9204_v54 = vshrl.u32 %v10946_v43, 16  ;;  %v9207_v50 = vshll.u32 %v10946_v43, 16  ;;  %v9215_v10 = vshll.u32 %v10947_v46, 16 }
0x1f16   : > { %v8651_v44 = vmul.f32 0.16666667, %v8649_v0  ;;  %v9057_v36 = vrot.slane %v9055_v45, 3  ;;  %v9070_v59 = vor.u32 %v9069_v34, %v9066_v27  ;;  %v9073_v15 = vshrl.u32 %v10937_v51, 16  ;;  %v10950_v3 = vld [vmem:[#allocation2 + $0xcf0] ss:$8 sps:$4 sm:$0xff]  }
0x1f17   : > { %v8652_v29 = vmul.f32 0.16666667, %v8650_v47  ;;  %v9076_v0 = vshll.u32 %v10937_v51, 16  ;;  %v10938_v47 = vld [vmem:[#allocation2 + $0xca0] ss:$8 sps:$4 sm:$0xff]   ;;  %v9221_v45 = vshrl.u32 %v10942_v39, 16 }
0x1f18   : > { %v8658_v32 = vpack.c.bf16 %v8651_v44, %v8651_v44  ;;  %v9061_v62 = vor.u32 %v9060_v61, %v9057_v36  ;;  %v9075_v33 = vrot.slane %v9073_v15, 3  ;;  %v9085_v31 = vshll.u32 %v10938_v47, 16  ;;  %v10948_v61 = vld [vmem:[#allocation2 + $0xcf4] ss:$8 sps:$4 sm:$0xff]  }
0x1f19   : > { %v8659_v60 = vpack.c.bf16 %v8652_v29, %v8652_v29  ;;  %v9078_v16 = vrot.slane %v9076_v0, 4  ;;  %v9082_v29 = vshrl.u32 %v10938_v47, 16  ;;  %v9232_v36 = vshll.u32 %v10944_v20, 16 }
0x1f1a   : > { %v8709_v55 = vsel %vm5228_vm0, %v8658_v32, 0  ;;  %v9062_v58 = vsel %vm4060_vm12, %v9052_v56, %v9061_v62  ;;  %v9071_v18 = vsel %vm4060_vm12, %v9061_v62, %v9070_v59  ;;  %v9087_v41 = vrot.slane %v9085_v31, 4 }
0x1f1b   : > { %10043 = vmatprep.subr.msk.bf16.mxu0 %vm5228_vm0, %v8659_v60  ;;  %9134 = vmatpush1.bf16.msra.mxu1 %v9062_v58  ;;  %v9079_v44 = vor.u32 %v9078_v16, %v9075_v33  ;;  %v9084_v42 = vrot.slane %v9082_v29, 3  ;;  %v9229_v56 = vshrl.u32 %v10944_v20, 16  ;;  %v9212_v62 = vshrl.u32 %v10947_v46, 16 }
0x1f1c   : > { %8715 = vmatpush1.bf16.msra.mxu0 %v8709_v55  ;;  %9135 = vmatprep.subr.bf16.mxu1 %v11044_v22  ;;  %v9091_v55 = vshrl.u32 %v10939_v19, 16  ;;  %v9223_v58 = vrot.slane %v9221_v45, 3  ;;  %v9226_v27 = vrot.slane %v9224_v52, 4  ;;  %v9234_v51 = vrot.slane %v9232_v36, 4 }
0x1f1d   : > { %v9080_v32 = vsel %vm4060_vm12, %v9070_v59, %v9079_v44  ;;  %v9088_v60 = vor.u32 %v9087_v41, %v9084_v42  ;;  %v9231_v34 = vrot.slane %v9229_v56, 3  ;;  %v9206_v59 = vrot.slane %v9204_v54, 3 }
0x1f1e   : > { %v9093_v25 = vrot.slane %v9091_v55, 3  ;;  %v9209_v15 = vrot.slane %v9207_v50, 4  ;;  %v9214_v0 = vrot.slane %v9212_v62, 3  ;;  %v9227_v33 = vor.u32 %v9226_v27, %v9223_v58 }
0x1f1f   : > { %10044 = vmatmul.mubr.msk.bf16.vlgmr.msra.gmra.mrb[188].mxu0 %vm5218_vm1, %v8689_v11  ;;  %9136 = vmatpush1.bf16.msra.mxu1 %v9071_v18  ;;  %v9094_v11 = vshll.u32 %v10939_v19, 16  ;;  %v9089_v23 = vsel %vm4060_vm12, %v9079_v44, %v9088_v60  ;;  %v9217_v18 = vrot.slane %v9215_v10, 4  ;;  %v9235_v16 = vor.u32 %v9234_v51, %v9231_v34 }
0x1f20   : > { %8756 = vmatprep.mubr.bf16.mxu0 %v11044_v22  ;;  %9137 = vmatprep.subr.bf16.mxu1 %v11044_v22  ;;  %v9247_v47 = vshrl.u32 %v10948_v61, 16  ;;  %v9250_v44 = vshll.u32 %v10948_v61, 16  ;;  %v9210_v29 = vor.u32 %v9209_v15, %v9206_v59  ;;  %v9241_v42 = vshll.u32 %v10950_v3, 16 }
0x1f21   : > { %v9218_v31 = vor.u32 %v9217_v18, %v9214_v0  ;;  %v9236_v41 = vsel %vm4060_vm12, %v9227_v33, %v9235_v16  ;;  %v8844_v34 = vrot.slane %v12236_v24, %v11202_v40  ;;  %v8856_v51 = vrot.slane %v12236_v24, %v11365_v1 }
0x1f22   : > { %v9249_v19 = vrot.slane %v9247_v47, 3  ;;  %9279 = vmatprep.subr.bf16.mxu0 %v9236_v41  ;;  %v8886_v47 = vrot.slane %v12236_v24, %v11420_v49 }
0x1f23   : > { %9138 = vmatpush1.bf16.msra.mxu1 %v9080_v32  ;;  %v9238_v32 = vshrl.u32 %v10950_v3, 16  ;;  %v9219_v55 = vsel %vm4060_vm12, %v9210_v29, %v9218_v31 }
0x1f24   : > { %9139 = vmatprep.subr.bf16.mxu1 %v11044_v22  ;;  %9280 = vmatpush1.bf16.msra.mxu0 %v9219_v55 }
0x1f27   : > { %10045 = vmatmul.mubr.msk.bf16.gmra.mrb[192].mxu0 %vm5218_vm1, %v8698_v12  ;;  %v10940_v12 = vld [vmem:[#allocation2 + $0xcc0] ss:$8 sps:$4 sm:$0xff]   ;;  %9140 = vmatpush1.bf16.msra.mxu1 %v9089_v23  ;;  %v9243_v23 = vrot.slane %v9241_v42, 4 }
0x1f28   : > { %8766 = vmatprep.mubr.bf16.mxu0 %v11044_v22  ;;  %v9100_v6 = vshrl.u32 %v10940_v12, 16  ;;  %v9103_v57 = vshll.u32 %v10940_v12, 16  ;;  %9141 = vmatprep.subr.bf16.mxu1 %v11044_v22 }
0x1f2a   : > { %v9102_v26 = vrot.slane %v9100_v6, 3  ;;  %v9105_v8 = vrot.slane %v9103_v57, 4  ;;  %v8776_v6 = vld [vmem:[#allocation4 + $0x108] sm:$0xe0]  ;;  %v12233_v57 = vld [vmem:[#allocation4 + $0x110] sm:$0x3f] }
0x1f2b   : > { %v8786_v63 = vrot.slane %v8776_v6, %v11435_v35  ;;  %v8814_v43 = vrot.slane %v8776_v6, %v11445_v53  ;;  %v8840_v10 = vrot.slane %v12233_v57, %v11202_v40  ;;  %v8852_v3 = vrot.slane %v12233_v57, %v11365_v1 }
0x1f2c   : > { %v9106_v7 = vor.u32 %v9105_v8, %v9102_v26  ;;  %v8822_v8 = vrot.slane %v12233_v57, %v11199_v38  ;;  %v8882_v0 = vrot.slane %v12233_v57, %v11420_v49  ;;  %v8870_v42 = vrot.slane %v12233_v57, %v11370_v4 }
0x1f2e   : > { %v9116_v13 = vsel %vm4060_vm12, %v9106_v7, %v9115_v30 }
0x1f2f   : > { %10046 = vmatmul.mubr.msk.bf16.gmra.mrb[196].mxu0 %vm5218_vm1, %v8697_v28  ;;  %v9096_v28 = vrot.slane %v9094_v11, 4  ;;  %v9240_v11 = vrot.slane %v9238_v32, 3 }
0x1f30   : > { %9311 = vmatprep.mubr.bf16.mxu0 %v11044_v22 }
0x1f31   : > { %v9097_v2 = vor.u32 %v9096_v28, %v9093_v25  ;;  %v12227_v28 = vor.u32 %v9243_v23, %v9240_v11  ;;  %v8874_v11 = vrot.slane %v12236_v24, %v11370_v4 }
0x1f33   : > { %v9098_v21 = vsel %vm4060_vm12, %v9088_v60, %v9097_v2  ;;  %v9107_v48 = vsel %vm4060_vm12, %v9097_v2, %v9106_v7  ;;  %v9252_v60 = vrot.slane %v9250_v44, 4  ;;  %v9245_v37 = vsel %vm4060_vm12, %v9218_v31, %v12227_v28  ;;  %v8775_v2 = vld [vmem:[#allocation4 + $0x100] sm:$0xe0] }
0x1f34   : > { %9142 = vmatpush1.bf16.msra.mxu1 %v9098_v21  ;;  %v8792_v5 = vrot.slane %v8775_v2, %v11440_v14  ;;  %v8796_v21 = vrot.slane %v8776_v6, %v11440_v14  ;;  %v8782_v26 = vrot.slane %v8775_v2, %v11435_v35  ;;  %v8826_v7 = vrot.slane %v12236_v24, %v11199_v38 }
0x1f35   : > { %9143 = vmatprep.subr.bf16.mxu1 %v11044_v22  ;;  %v9253_v25 = vor.u32 %v9252_v60, %v9249_v19 }
0x1f37   : > { %v9254_v12 = vsel %vm4060_vm12, %v9235_v16, %v9253_v25 }
0x1f38   : > { %9144 = vmatpush1.bf16.msra.mxu1 %v9107_v48  ;;  %9281 = vmatprep.subr.bf16.mxu0 %v9254_v12 }
0x1f39   : > { %9145 = vmatprep.subr.bf16.mxu1 %v11044_v22  ;;  %9282 = vmatpush1.bf16.msra.mxu0 %v9245_v37 }
0x1f3a   : > { %10064 = vmatprep.subr.msk.bf16.mxu0 %vm2543_vm6, %v9253_v25 }
0x1f3c   : > { %9146 = vmatpush1.bf16.msra.mxu1 %v9116_v13  ;;  %v8810_v13 = vrot.slane %v8775_v2, %v11445_v53 }
0x1ff2   : > { %v8748_v9 = vpop.f32.mrb[188].mxu0 }
0x1ff3   : > { %v8797_v30 = vmul.f32 %v8792_v5, %v8748_v9  ;;  %v8750_v48 = vpop.f32.mrb[189].mxu0  ;;  %v8787_v46 = vmul.f32 %v8782_v26, %v8748_v9  ;;  %v8900_v26 = vrot.slane %v12233_v57, %v11435_v35 }
0x1ff4   : > { %v8798_v39 = vmul.f32 %v8796_v21, %v8750_v48  ;;  %v8752_v20 = vpop.f32.mrb[190].mxu0  ;;  %v8788_v36 = vmul.f32 %v8786_v63, %v8750_v48  ;;  %v8909_v63 = vld [vmem:[#allocation4 + $0x110] sm:$0xc0] }
0x1ff5   : > { %v8801_v45 = vrot.slane %v8797_v30, 4  ;;  %v8827_v52 = vmul.f32 %v8822_v8, %v8752_v20  ;;  %v8754_v56 = vpop.f32.mrb[191].mxu0  ;;  %v8815_v62 = vmul.f32 %v8810_v13, %v8752_v20  ;;  %v8910_v13 = vld [vmem:[#allocation4 + $0x118] sm:$0xc0] }
0x1ff6   : > { %v8802_v61 = vrot.slane %v8798_v39, 4  ;;  %v8828_v54 = vmul.f32 %v8826_v7, %v8754_v56  ;;  %v8816_v27 = vmul.f32 %v8814_v43, %v8754_v56  ;;  %v8904_v7 = vrot.slane %v12236_v24, %v11435_v35 }
0x1ff7   : > { %v8805_v50 = vadd.f32 %v8801_v45, %v8787_v46  ;;  %v8831_v15 = vrot.slane %v8827_v52, 4  ;;  %v8914_v52 = vrot.slane %v8909_v63, %v11440_v14  ;;  %v8918_v57 = vrot.slane %v8910_v13, %v11440_v14 }
0x1ff8   : > { %v8806_v58 = vadd.f32 %v8802_v61, %v8788_v36  ;;  %v8832_v33 = vrot.slane %v8828_v54, 4 }
0x1ff9   : > { %v8817_v59 = vadd.f32 %v8815_v62, %v8805_v50  ;;  %v8924_v62 = vrot.slane %v8909_v63, %v11445_v53 }
0x1ffa   : > { %v8818_v18 = vadd.f32 %v8816_v27, %v8806_v58  ;;  %v8758_v16 = vpop.f32.mrb[192].mxu0 }
0x1ffb   : > { %v8835_v44 = vadd.f32 %v8831_v15, %v8817_v59  ;;  %v8845_v29 = vmul.f32 %v8840_v10, %v8758_v16  ;;  %v8857_v31 = vmul.f32 %v8852_v3, %v8758_v16  ;;  %v8760_v32 = vpop.f32.mrb[193].mxu0  ;;  %v8928_v10 = vrot.slane %v8910_v13, %v11445_v53 }
0x1ffc   : > { %v8836_v41 = vadd.f32 %v8832_v33, %v8818_v18  ;;  %v8846_v19 = vmul.f32 %v8844_v34, %v8760_v32  ;;  %v8858_v60 = vmul.f32 %v8856_v51, %v8760_v32  ;;  %v8762_v55 = vpop.f32.mrb[194].mxu0 }
0x1ffd   : > { %v8847_v23 = vadd.f32 %v8845_v29, %v8835_v44  ;;  %v8861_v25 = vrot.slane %v8857_v31, 4  ;;  %v8887_v12 = vmul.f32 %v8882_v0, %v8762_v55  ;;  %v8764_v37 = vpop.f32.mrb[195].mxu0  ;;  %v8875_v21 = vmul.f32 %v8870_v42, %v8762_v55 }
0x1ffe   : > { %v8848_v2 = vadd.f32 %v8846_v19, %v8836_v41  ;;  %v8862_v49 = vrot.slane %v8858_v60, 4  ;;  %v8888_v6 = vmul.f32 %v8886_v47, %v8764_v37  ;;  %v8876_v9 = vmul.f32 %v8874_v11, %v8764_v37 }
0x1fff   : > { %v8865_v5 = vadd.f32 %v8861_v25, %v8847_v23  ;;  %v8891_v48 = vrot.slane %v8887_v12, 4 }
0x2000   : > { %v8866_v8 = vadd.f32 %v8862_v49, %v8848_v2  ;;  %v8892_v20 = vrot.slane %v8888_v6, 4 }
0x2001   : > { %v8877_v30 = vadd.f32 %v8875_v21, %v8865_v5  ;;  %v9274_v21 = vsel %vm2543_vm6, %v12227_v28, 0 }
0x2002   : > { %v8878_v39 = vadd.f32 %v8876_v9, %v8866_v8  ;;  %v8768_v43 = vpop.f32.mrb[196].mxu0  ;;  %9284 = vmatpush1.bf16.msra.mxu0 %v9274_v21  ;;  %v10952_v8 = vld [vmem:[#allocation2 + $0xd08] ss:$8 sps:$4 sm:$0xff]  }
0x2003   : > { %v8895_v46 = vadd.f32 %v8891_v48, %v8877_v30  ;;  %v8905_v45 = vmul.f32 %v8900_v26, %v8768_v43  ;;  %v8770_v56 = vpop.f32.mrb[197].mxu0  ;;  %9509 = vmatprep.subr.bf16.mxu0 %v11044_v22  ;;  %v10951_v26 = vld [vmem:[#allocation2 + $0xcf8] ss:$8 sps:$4 sm:$0xf8]   ;;  %v9420_v30 = vshll.u32 %v10952_v8, 16 }
0x2004   : > { %v8896_v36 = vadd.f32 %v8892_v20, %v8878_v39  ;;  %v8906_v61 = vmul.f32 %v8904_v7, %v8770_v56  ;;  %v8772_v54 = vpop.f32.mrb[198].mxu0  ;;  %v9409_v9 = vshrl.u32 %v10951_v26, 16  ;;  %v9412_v63 = vshll.u32 %v10951_v26, 16  ;;  %v10953_v48 = vld [vmem:[#allocation2 + $0xd18] ss:$8 sps:$4 sm:$0xff]  }
0x2005   : > { %v8907_v50 = vadd.f32 %v8905_v45, %v8895_v46  ;;  %v8773_v35 = vpop.f32.mrb[199].mxu0  ;;  %v9417_v7 = vshrl.u32 %v10952_v8, 16  ;;  %v9422_v43 = vrot.slane %v9420_v30, 4  ;;  %v9426_v46 = vshrl.u32 %v10953_v48, 16  ;;  %v8979_v56 = vld [vmem:[#allocation4 + $0x120] ss:$0 sm:$0xff] }
0x2006   : > { %v8908_v24 = vadd.f32 %v8906_v61, %v8896_v36  ;;  %v9411_v13 = vrot.slane %v9409_v9, 3  ;;  %v9414_v39 = vrot.slane %v9412_v63, 4  ;;  %v9429_v45 = vshll.u32 %v10953_v48, 16  ;;  %v10959_v30 = vld [vmem:[#allocation2 + $0xd78] ss:$8 sps:$4 sm:$0xff]  }
0x2007   : > { %v8919_v3 = vmul.f32 %v8914_v52, %v8907_v50  ;;  %v9419_v20 = vrot.slane %v9417_v7, 3  ;;  %v10954_v52 = vld [vmem:[#allocation2 + $0xd28] ss:$8 sps:$4 sm:$0xff]  }
0x2008   : > { %v8920_v58 = vmul.f32 %v8918_v57, %v8908_v24  ;;  %v9415_v36 = vor.u32 %v9414_v39, %v9411_v13  ;;  %v9428_v57 = vrot.slane %v9426_v46, 3  ;;  %v9431_v54 = vrot.slane %v9429_v45, 4  ;;  %v10960_v45 = vld [vmem:[#allocation2 + $0xd88] ss:$0 sps:$4 sm:$0xff]  }
0x2009   : > { %v8929_v27 = vadd.f32 %v8924_v62, %v8919_v3  ;;  %v9423_v61 = vor.u32 %v9422_v43, %v9419_v20  ;;  %v9435_v50 = vshrl.u32 %v10954_v52, 16  ;;  %v9438_v24 = vshll.u32 %v10954_v52, 16 }
0x200a   : > { %v8930_v34 = vadd.f32 %v8928_v10, %v8920_v58  ;;  %v10955_v10 = vld [vmem:[#allocation2 + $0xd38] ss:$8 sps:$4 sm:$0xff]   ;;  %v9480_v13 = vshrl.u32 %v10959_v30, 16  ;;  %v9483_v39 = vshll.u32 %v10959_v30, 16 }
0x200b   : > { %v8931_v51 = vadd.f32 3.0, %v8929_v27 }
0x200c   : > { %v8932_v59 = vadd.f32 3.0, %v8930_v34  ;;  %v9482_v43 = vrot.slane %v9480_v13, 3  ;;  %v9485_v46 = vrot.slane %v9483_v39, 4 }
0x200d   : > { %v8933_v15 = vmax.f32 %v8931_v51, 0.0  ;;  %v9432_v51 = vor.u32 %v9431_v54, %v9428_v57 }
0x200e   : > { %v8934_v0 = vmax.f32 %v8932_v59, 0.0  ;;  %v9437_v59 = vrot.slane %v9435_v50, 3  ;;  %v9486_v52 = vor.u32 %v9485_v46, %v9482_v43 }
0x200f   : > { %v8935_v18 = vmin.f32 %v8933_v15, 6.0 }
0x2010   : > { %v8936_v33 = vmin.f32 %v8934_v0, 6.0  ;;  %v9440_v0 = vrot.slane %v9438_v24, 4 }
0x2011   : > { %v8937_v16 = vmul.f32 %v8935_v18, %v8929_v27  ;;  %v9444_v18 = vshrl.u32 %v10955_v10, 16 }
0x2012   : > { %v8938_v14 = vmul.f32 %v8936_v33, %v8930_v34  ;;  %v9424_v34 = vsel %vm4060_vm12, %v9415_v36, %v9423_v61  ;;  %v9447_v33 = vshll.u32 %v10955_v10, 16  ;;  %v9492_v36 = vshll.u32 %v10960_v45, 16 }
0x2013   : > { %v12271_v47 = vmul.f32 0.16666667, %v8937_v16  ;;  %v9433_v16 = vsel %vm4060_vm12, %v9423_v61, %v9432_v51 }
0x2014   : > { %v12273_v44 = vmul.f32 0.16666667, %v8938_v14  ;;  %v9441_v14 = vor.u32 %v9440_v0, %v9437_v59  ;;  %v9494_v57 = vrot.slane %v9492_v36, 4 }
0x2015   : > { %v8941_v53 = vsel %vm2543_vm6, %v12271_v47, 0.0  ;;  %vm9562_vm6 = vcmask 388096  }
0x2016   : > { %v8942_v29 = vrot.slane %v8941_v53, 4  ;;  %v8949_v31 = vsel %vm8948_vm3, %v12273_v44, 0.0 }
0x2017   : > { %v8950_v32 = vrot.slane %v8949_v31, 4 }
0x2018   : > { %v8943_v42 = vadd.f32 %v8942_v29, %v8941_v53  ;;  %v9446_v53 = vrot.slane %v9444_v18, 3  ;;  %v9449_v29 = vrot.slane %v9447_v33, 4 }
0x2019   : > { %v8951_v41 = vadd.f32 %v8950_v32, %v8949_v31  ;;  %v9442_v31 = vsel %vm4060_vm12, %v9432_v51, %v9441_v14 }
0x201a   : > { %v8944_v19 = vrot.slane %v8943_v42, 2  ;;  %v9450_v32 = vor.u32 %v9449_v29, %v9446_v53 }
0x201b   : > { %v8952_v60 = vrot.slane %v8951_v41, 2 }
0x201c   : > { %v8945_v55 = vadd.f32 %v8944_v19, %v8943_v42  ;;  %v9451_v42 = vsel %vm4060_vm12, %v9441_v14, %v9450_v32 }
0x201d   : > { %v8953_v11 = vadd.f32 %v8952_v60, %v8951_v41  ;;  %v10956_v41 = vld [vmem:[#allocation2 + $0xd48] ss:$8 sps:$4 sm:$0xff]  }
0x201e   : > { %v8946_v23 = vrot.slane %v8945_v55, 1  ;;  %v9453_v19 = vshrl.u32 %v10956_v41, 16  ;;  %v9456_v60 = vshll.u32 %v10956_v41, 16  ;;  %v9338_v41 = vld [vmem:[#allocation4 + $0x120] sm:$0xc] }
0x201f   : > { %v8954_v25 = vrot.slane %v8953_v11, 1 }
0x2020   : > { %v8947_v12 = vadd.f32 %v8946_v23, %v8945_v55  ;;  %v9455_v55 = vrot.slane %v9453_v19, 3  ;;  %v10957_v23 = vld [vmem:[#allocation2 + $0xd58] ss:$8 sps:$4 sm:$0xff]   ;;  %v9552_v19 = vrot.slane %v9338_v41, %v11365_v1 }
0x2021   : > { %v8955_v37 = vadd.f32 %v8954_v25, %v8953_v11  ;;  %v9458_v11 = vrot.slane %v9456_v60, 4  ;;  %v9557_v60 = vrot.slane %v9338_v41, %v11370_v4 }
0x2022   : > { %v8956_v2 = vmul.f32 0.25, %v8947_v12  ;;  %v9462_v12 = vshrl.u32 %v10957_v23, 16 }
0x2023   : > { %v8957_v49 = vmul.f32 0.25, %v8955_v37  ;;  %v9459_v25 = vor.u32 %v9458_v11, %v9455_v55  ;;  %v9465_v37 = vshll.u32 %v10957_v23, 16 }
0x2024   : > { %v8958_v5 = vpack.c.bf16 %v8956_v2, %v8956_v2 }
0x2025   : > { %v8959_v6 = vpack.c.bf16 %v8957_v49, %v8957_v49  ;;  %v9460_v2 = vsel %vm4060_vm12, %v9450_v32, %v9459_v25  ;;  %v9464_v49 = vrot.slane %v9462_v12, 3 }
0x2027   : > { %10057 = vmatprep.mubr.msk.bf16.mxu1 %vm2424_vm5, %v8959_v6  ;;  %v9467_v6 = vrot.slane %v9465_v37, 4 }
0x2028   : > { %9162 = vmatmul.mubr.bf16.vlgmr.msra.gmra.mrb[228].mxu1 %v8958_v5  ;;  %v10958_v5 = vld [vmem:[#allocation2 + $0xd68] ss:$8 sps:$4 sm:$0xff]  }
0x2029   : > { %v9468_v21 = vor.u32 %v9467_v6, %v9464_v49  ;;  %v9471_v26 = vshrl.u32 %v10958_v5, 16  ;;  %v9474_v8 = vshll.u32 %v10958_v5, 16 }
0x202b   : > { %v9469_v9 = vsel %vm4060_vm12, %v9459_v25, %v9468_v21  ;;  %v9473_v63 = vrot.slane %v9471_v26, 3  ;;  %v9476_v7 = vrot.slane %v9474_v8, 4 }
0x202d   : > { %v9477_v48 = vor.u32 %v9476_v7, %v9473_v63 }
0x202f   : > { %v9478_v20 = vsel %vm4060_vm12, %v9468_v21, %v9477_v48 }
0x20fb   : > { %v9163_v28 = vpop.f32.mrb[228].mxu1 }
0x20fc   : > { %v9164_v62 = vadd.f32 %v9163_v28, %v8979_v56  ;;  %v9165_v35 = vpop.f32.mrb[229].mxu1  ;;  %v9489_v56 = vshrl.u32 %v10960_v45, 16  ;;  %v9487_v28 = vsel %vm4060_vm12, %v9477_v48, %v9486_v52 }
0x20fd   : > { %v9166_v3 = vpop.f32.mrb[230].mxu1 }
0x20fe   : > { %v9169_v58 = vmax.f32 %v9164_v62, 0.0  ;;  %v9167_v27 = vpop.f32.mrb[231].mxu1  ;;  %v9491_v61 = vrot.slane %v9489_v56, 3  ;;  %v9178_v62 = vld [vmem:[#allocation4 + $0x121] ss:$8 sm:$0x3] }
0x20ff   : > { %v9263_v35 = vrot.slane %v9178_v62, %v11199_v38  ;;  %v9267_v24 = vrot.slane %v9178_v62, %v11202_v40 }
0x2100   : > { %v9170_v15 = vpack.c.bf16 %v9169_v58, %v9169_v58  ;;  %v9495_v54 = vor.u32 %v9494_v57, %v9491_v61 }
0x2102   : > { %10065 = vmatmul.mubr.msk.bf16.vlgmr.msra.gmra.mrb[200].mxu0 %vm5088_vm15, %v9170_v15  ;;  %v9496_v50 = vsel %vm4060_vm12, %v9486_v52, %v9495_v54 }
0x2103   : > { %9510 = vmatpush1.bf16.msra.mxu0 %v9424_v34 }
0x2104   : > { %9511 = vmatprep.subr.bf16.mxu0 %v11044_v22 }
0x2107   : > { %9512 = vmatpush1.bf16.msra.mxu0 %v9433_v16 }
0x2108   : > { %9513 = vmatprep.subr.bf16.mxu0 %v11044_v22 }
0x210b   : > { %9514 = vmatpush1.bf16.msra.mxu0 %v9442_v31 }
0x210c   : > { %9515 = vmatprep.subr.bf16.mxu0 %v11044_v22 }
0x210f   : > { %9516 = vmatpush1.bf16.msra.mxu0 %v9451_v42 }
0x2110   : > { %9517 = vmatprep.subr.bf16.mxu0 %v11044_v22 }
0x2113   : > { %9518 = vmatpush1.bf16.msra.mxu0 %v9460_v2 }
0x2114   : > { %9519 = vmatprep.subr.bf16.mxu0 %v11044_v22 }
0x2117   : > { %9520 = vmatpush1.bf16.msra.mxu0 %v9469_v9 }
0x2118   : > { %9521 = vmatprep.subr.bf16.mxu0 %v11044_v22 }
0x211b   : > { %9522 = vmatpush1.bf16.msra.mxu0 %v9478_v20 }
0x211c   : > { %9523 = vmatprep.subr.bf16.mxu0 %v11044_v22 }
0x211f   : > { %9524 = vmatpush1.bf16.msra.mxu0 %v9487_v28 }
0x2120   : > { %9525 = vmatprep.subr.bf16.mxu0 %v11044_v22 }
0x2123   : > { %9526 = vmatpush1.bf16.msra.mxu0 %v9496_v50 }
0x21d5   : > { %v9313_v10 = vpop.f32.mrb[200].mxu0 }
0x21d6   : > { %v9314_v3 = vadd.f32 %v9313_v10, %v9263_v35  ;;  %v9315_v58 = vpop.f32.mrb[201].mxu0 }
0x21d7   : > { %v9316_v27 = vadd.f32 %v9315_v58, %v9267_v24  ;;  %v9317_v34 = vpop.f32.mrb[202].mxu0 }
0x21d8   : > { %v9320_v51 = vadd.f32 3.0, %v9314_v3  ;;  %v9318_v59 = vpop.f32.mrb[203].mxu0 }
0x21d9   : > { %v9321_v15 = vadd.f32 3.0, %v9316_v27 }
0x21da   : > { %v9322_v0 = vmax.f32 %v9320_v51, 0.0 }
0x21db   : > { %v9323_v18 = vmax.f32 %v9321_v15, 0.0 }
0x21dc   : > { %v9324_v22 = vmin.f32 %v9322_v0, 6.0 }
0x21dd   : > { %v9325_v33 = vmin.f32 %v9323_v18, 6.0 }
0x21de   : > { %v9326_v16 = vmul.f32 0.16666667, %v9324_v22 }
0x21df   : > { %v9327_v14 = vmul.f32 0.16666667, %v9325_v33 }
0x21e0   : > { %v9331_v53 = vrot.slane %v9326_v16, %v11199_v38 }
0x21e1   : > { %v9335_v29 = vrot.slane %v9327_v14, %v11199_v38 }
0x21e2   : > { %v9336_v40 = vmul.f32 %v9331_v53, %v12271_v47  ;;  %v9560_v47 = vld [vmem:[#allocation4 + $0x124] ss:$0 sm:$0xff] }
0x21e3   : > { %v9337_v31 = vmul.f32 %v9335_v29, %v12273_v44 }
0x21e4   : > { %v9339_v42 = vpack.c.bf16 %v9336_v40, %v9336_v40 }
0x21e5   : > { %v9340_v32 = vpack.c.bf16 %v9337_v31, %v9337_v31 }
0x21e7   : > { %10076 = vmatprep.mubr.msk.bf16.mxu0 %vm2424_vm5, %v9340_v32  ;;  %vm9572_vm5 = vcmask 3072  }
0x21e8   : > { %9542 = vmatmul.mubr.bf16.vlgmr.msra.gmra.mrb[204].mxu0 %v9339_v42 }
0x22bb   : > { %v9543_v55 = vpop.f32.mrb[204].mxu0 }
0x22bc   : > { %v9553_v11 = vmul.f32 %v9552_v19, %v9543_v55  ;;  %v9545_v23 = vpop.f32.mrb[205].mxu0 }
0x22bd   : > { %v9546_v25 = vpop.f32.mrb[206].mxu0 }
0x22be   : > { %v9558_v38 = vadd.f32 %v9557_v60, %v9553_v11  ;;  %v9547_v12 = vpop.f32.mrb[207].mxu0 }
0x22c0   : > { %v9559_v44 = vadd.f32 %v9558_v38, %v12189_v17 }
0x22c2   : > { %v9561_v37 = vmul.f32 %v9560_v47, %v9559_v44 }
0x22c4   : > { %v9563_v2 = vsel %vm9562_vm6, %v9561_v37, 0.0 }
0x22c5   : > { %9564 = vadd.xlane.f32.xlu0 %v9563_v2 }
0x2352   : > { %v9565_v49 = vpop.xlane.xlu0 %9564 }
0x2353   : > { %v10077_v6 = vmul.f32 -1.442695, %v9565_v49 }
0x2355   : > { %10961 = vpow2.f32 %v10077_v6 }
0x235f   : > { %v10962_v1 = vpop.eup %10961 }
0x2360   : > { %v9569_v5 = vadd.f32 1.0, %v10962_v1 }
0x2362   : > { %10963 = vrcp.f32 %v9569_v5 }
0x236c   : > { %v10964_v4 = vpop.eup %10963 }
0x236d   : > { %9573 = vst.msk [vmem:[%s198_s26] sm:$0xf] %vm9572_vm5, %v10964_v4 }
0x236e PF: > { %s15_s12 = sadd.s32 1, %s11035_s12  }
0x236f   : > { %p12_p5 = scmp.ge.s32.totalorder %s15_s12, 4  }
0x2371   :  { %14 = sbr.rel (!%p12_p5) target bundleno = 2 (0x2), region = 74 }
0x2378   :  { %9593 = vsyncpa [#allocation3], 1 }
0x2379   :  { %9595 = vsyncpa [#allocation3 + $0x1], 1 }
0x237a   :  { %9596 = vsyncpa [#allocation5], 1 }

</bundles_post_ra>
